<compile_context>
chip_gen: v7x
topology: tpu7x:2x2x1
jax: 0.10.0
libtpu: 0.0.40
codegen_flags: <defaults>
</compile_context>

<pallas_src>
import functools

import jax
import jax.numpy as jnp
from jax.experimental import pallas as pl
from jax.experimental.pallas import tpu as pltpu


# ----------------------------- in-kernel helpers -----------------------------
def _reflect_pad1(x):
    """ReflectionPad2d(1) on a (H, W, C) channels-last value."""
    x = jnp.concatenate([x[:, 1:2, :], x, x[:, -2:-1, :]], axis=1)
    x = jnp.concatenate([x[1:2, :, :], x, x[-2:-1, :, :]], axis=0)
    return x


def _upsample2x_nearest(x):
    """UpsamplingNearest2d(scale_factor=2) on a (H, W, C) value (stays in VMEM)."""
    H, W, C = x.shape
    x = jnp.broadcast_to(x[:, None, :, :], (H, 2, W, C)).reshape(2 * H, W, C)
    x = jnp.broadcast_to(x[:, :, None, :], (2 * H, W, 2, C)).reshape(2 * H, 2 * W, C)
    return x


def _conv3x3(xp, w_ref, b_ref, *, relu):
    """3x3 valid conv on a padded (H+2, W+2, Cin) f32 value.

    w_ref: (9, Cin, Cout) bf16 (tap index t = ky*3 + kx), b_ref: (1, Cout) f32.
    Returns (H*W, Cout) f32.
    """
    Hp, Wp, cin = xp.shape
    H, W = Hp - 2, Wp - 2
    cout = w_ref.shape[-1]
    # Seed the accumulator with the (broadcast) bias: no zeros init, no final add.
    acc = jnp.broadcast_to(b_ref[...], (H * W, cout))
    for kx in range(3):
        # One sublane-shifted, bf16-cast slab per kx (hoisted out of the ky
        # loop: 3 shifts/casts per conv instead of 9).
        xs = xp[:, kx:kx + W, :].astype(jnp.bfloat16)
        for ky in range(3):
            # Leading-dim slice (free) + layout-preserving reshape (W % 8 == 0).
            patch = xs[ky:ky + H].reshape(H * W, cin)
            acc = acc + jnp.dot(patch, w_ref[ky * 3 + kx],
                                preferred_element_type=jnp.float32)
    if relu:
        acc = jnp.maximum(acc, 0.0)
    return acc


# ------------------------------- fused kernel --------------------------------
def _decoder_kernel(x_ref, w1_ref, b1_ref, w2_ref, b2_ref, w3_ref, b3_ref,
                    o_ref, *, H, W):
    """Whole depth-2 decoder for one batch element, all intermediates in VMEM.

    x_ref : (1, 128, H*W)  f32  (NCHW, spatial flattened)
    w*_ref: (9, Cin, Cout) bf16 ; b*_ref: (1, Cout) f32
    o_ref : (1, 3, (2H)*(2W)) f32  (NCHW, lane-dense spatial)
    """
    c_in = x_ref.shape[1]
    c_mid = w1_ref.shape[-1]

    # NCHW (C, H*W) -> channels-last (H, W, C). Single in-kernel transpose.
    x = x_ref[0].T.reshape(H, W, c_in)

    # conv1: 128 -> 64, reflect pad + 3x3 + ReLU
    y = _conv3x3(_reflect_pad1(x), w1_ref, b1_ref, relu=True)
    y = y.reshape(H, W, c_mid)

    # nearest-neighbour 2x upsample (never leaves VMEM)
    y = _upsample2x_nearest(y)
    H2, W2 = 2 * H, 2 * W

    # conv2: 64 -> 64, reflect pad + 3x3 + ReLU
    y = _conv3x3(_reflect_pad1(y), w2_ref, b2_ref, relu=True)
    y = y.reshape(H2, W2, w2_ref.shape[-1])

    # conv3: 64 -> 3 (Cout zero-padded to 8), reflect pad + 3x3, no ReLU
    y = _conv3x3(_reflect_pad1(y), w3_ref, b3_ref, relu=False)   # (H2*W2, 8)

    # Lane-dense NCHW store: (Cout, H2*W2); keep only the 3 real channels.
    o_ref[0] = y.T[:o_ref.shape[1], :].astype(o_ref.dtype)


# ------------------------------- host wrappers --------------------------------
def _prep_conv_params(w_hwio, b, cout_pad=None):
    """(3,3,Cin,Cout) HWIO -> (9,Cin,Cout) bf16; bias -> (1,Cout) f32."""
    kh, kw, cin, cout = w_hwio.shape
    w = w_hwio.reshape(kh * kw, cin, cout)
    b = b.reshape(1, cout).astype(jnp.float32)
    if cout_pad is not None and cout_pad > cout:
        w = jnp.pad(w, ((0, 0), (0, 0), (0, cout_pad - cout)))
        b = jnp.pad(b, ((0, 0), (0, cout_pad - cout)))
    return w.astype(jnp.bfloat16), b


def decoder_forward(params, x_nchw):
    """Forward of Decoder(depth=2). Input/output are NCHW (PyTorch convention)."""
    N, C, H, W = x_nchw.shape
    (w1, b1), (w2, b2), (w3, b3) = params
    w1p, b1p = _prep_conv_params(w1, b1)
    w2p, b2p = _prep_conv_params(w2, b2)
    w3p, b3p = _prep_conv_params(w3, b3, cout_pad=8)   # pad 3 -> 8 output ch.
    c_out = w3.shape[-1]                               # 3 real output channels
    H2, W2 = 2 * H, 2 * W

    x_flat = x_nchw.reshape(N, C, H * W)               # free reshape, no copy

    kernel = functools.partial(_decoder_kernel, H=H, W=W)
    out = pl.pallas_call(
        kernel,
        out_shape=jax.ShapeDtypeStruct((N, c_out, H2 * W2), jnp.float32),
        grid_spec=pltpu.PrefetchScalarGridSpec(
            num_scalar_prefetch=0,
            grid=(N,),
            in_specs=[
                pl.BlockSpec((1, C, H * W), lambda b: (b, 0, 0)),
                pl.BlockSpec(w1p.shape, lambda b: (0, 0, 0)),
                pl.BlockSpec(b1p.shape, lambda b: (0, 0)),
                pl.BlockSpec(w2p.shape, lambda b: (0, 0, 0)),
                pl.BlockSpec(b2p.shape, lambda b: (0, 0)),
                pl.BlockSpec(w3p.shape, lambda b: (0, 0, 0)),
                pl.BlockSpec(b3p.shape, lambda b: (0, 0)),
            ],
            out_specs=pl.BlockSpec((1, c_out, H2 * W2), lambda b: (b, 0, 0)),
        ),
        compiler_params=pltpu.CompilerParams(
            dimension_semantics=("parallel",)),
    )(x_flat, w1p, b1p, w2p, b2p, w3p, b3p)

    return out.reshape(N, c_out, H2, W2)               # free reshape


def _reference_decoder(params, x_nchw):
    """Pure-JAX f32 reference (ReflectionPad + conv + ReLU + nearest 2x)."""
    (w1, b1), (w2, b2), (w3, b3) = params
    x = jnp.transpose(x_nchw, (0, 2, 3, 1))            # NHWC

    def conv(x, w, b, relu):
        xp = jnp.pad(x, ((0, 0), (1, 1), (1, 1), (0, 0)), mode="reflect")
        y = jax.lax.conv_general_dilated(
            xp, w, (1, 1), "VALID",
            dimension_numbers=("NHWC", "HWIO", "NHWC"),
            precision=jax.lax.Precision.HIGHEST) + b
        return jnp.maximum(y, 0.0) if relu else y

    y = conv(x, w1, b1, True)
    y = jnp.repeat(jnp.repeat(y, 2, axis=1), 2, axis=2)
    y = conv(y, w2, b2, True)
    y = conv(y, w3, b3, False)
    return jnp.transpose(y, (0, 3, 1, 2))              # NCHW


def init_decoder_params(key, depth=2, dtype=jnp.float32):
    """Deterministic synthetic weights (HWIO) matching feature_invertor_conv2_1."""
    assert depth == 2, "This script implements the depth=2 decoder."
    # TODO(synk): depths 1/3/4/5 follow the same conv+relu+upsample pattern with
    # different channel ladders; only depth=2 is instantiated here.
    layer_dims = [(128, 64), (64, 64), (64, 3)]  # (Cin, Cout) per conv
    params = []
    for i, (cin, cout) in enumerate(layer_dims):
        kw, kb = jax.random.split(jax.random.fold_in(key, i))
        w = jax.random.normal(kw, (3, 3, cin, cout), dtype) * 0.05
        b = jax.random.normal(kb, (cout,), dtype) * 0.01
        params.append((w, b))
    return params


if __name__ == "__main__":
    key = jax.random.PRNGKey(0)
    k_params, k_x = jax.random.split(key)

    params = init_decoder_params(k_params, depth=2)

    # Depth-2 decoder consumes relu2_1-style features: 128 channels.
    N, C, H, W = 2, 128, 16, 16
    x = jax.random.normal(k_x, (N, C, H, W), jnp.float32)

    out = jax.jit(decoder_forward)(params, x)
    out = jax.block_until_ready(out)

    assert out.shape == (N, 3, 2 * H, 2 * W), out.shape
    assert out.dtype == jnp.float32
    assert bool(jnp.isfinite(out).all())

    # Correctness vs. a pure-JAX f32 reference (kernel matmuls are bf16-in /
    # f32-accumulate, so allow a small absolute tolerance).
    ref = jax.block_until_ready(jax.jit(_reference_decoder)(params, x))
    max_err = float(jnp.max(jnp.abs(out - ref)))
    assert max_err < 0.1, f"max abs error vs reference: {max_err}"

    print("KERNEL_OK")
</pallas_src>

<mosaic_0001>
module attributes {stable_mosaic.version = 11 : i64} {
  func.func @_decoder_kernel(%arg0: i32, %arg1: memref<1x128x256xf32, #tpu.memory_space<vmem>>, %arg2: memref<9x128x64xbf16, #tpu.memory_space<vmem>>, %arg3: memref<1x64xf32, #tpu.memory_space<vmem>>, %arg4: memref<9x64x64xbf16, #tpu.memory_space<vmem>>, %arg5: memref<1x64xf32, #tpu.memory_space<vmem>>, %arg6: memref<9x64x8xbf16, #tpu.memory_space<vmem>>, %arg7: memref<1x8xf32, #tpu.memory_space<vmem>>, %arg8: memref<1x3x1024xf32, #tpu.memory_space<vmem>>) attributes {dimension_semantics = [#tpu.dimension_semantics<parallel>], iteration_bounds = array<i64: 2>, scalar_prefetch = 0 : i64, scratch_operands = 0 : i64, tpu.core_type = #tpu.core_type<tc>, window_params = [{transform_indices = @transform_0, window_bounds = array<i64: 1, 128, 256>}, {pipeline_mode = #tpu.pipeline_mode<synchronous>, transform_indices = @transform_1, window_bounds = array<i64: 9, 128, 64>}, {pipeline_mode = #tpu.pipeline_mode<synchronous>, transform_indices = @transform_2, window_bounds = array<i64: 1, 64>}, {pipeline_mode = #tpu.pipeline_mode<synchronous>, transform_indices = @transform_3, window_bounds = array<i64: 9, 64, 64>}, {pipeline_mode = #tpu.pipeline_mode<synchronous>, transform_indices = @transform_4, window_bounds = array<i64: 1, 64>}, {pipeline_mode = #tpu.pipeline_mode<synchronous>, transform_indices = @transform_5, window_bounds = array<i64: 9, 64, 8>}, {pipeline_mode = #tpu.pipeline_mode<synchronous>, transform_indices = @transform_6, window_bounds = array<i64: 1, 8>}, {transform_indices = @transform_7, window_bounds = array<i64: 1, 3, 1024>}]} {
    %c0 = arith.constant 0 : index
    %c0_0 = arith.constant 0 : index
    %c0_1 = arith.constant 0 : index
    %0 = vector.load %arg1[%c0, %c0_0, %c0_1] : memref<1x128x256xf32, #tpu.memory_space<vmem>>, vector<1x128x256xf32>
    %1 = vector.shape_cast %0 : vector<1x128x256xf32> to vector<128x256xf32>
    %2 = tpu.transpose %1, [1, 0] : vector<128x256xf32> -> vector<256x128xf32>
    %3 = vector.shape_cast %2 : vector<256x128xf32> to vector<16x16x128xf32>
    %4 = vector.extract_strided_slice %3 {offsets = [0, 1, 0], sizes = [16, 1, 128], strides = [1, 1, 1]} : vector<16x16x128xf32> to vector<16x1x128xf32>
    %5 = vector.extract_strided_slice %3 {offsets = [0, 14, 0], sizes = [16, 1, 128], strides = [1, 1, 1]} : vector<16x16x128xf32> to vector<16x1x128xf32>
    %6 = tpu.concatenate %4, %3, %5 in 1 : vector<16x1x128xf32>, vector<16x16x128xf32>, vector<16x1x128xf32> -> vector<16x18x128xf32>
    %7 = vector.extract_strided_slice %6 {offsets = [1, 0, 0], sizes = [1, 18, 128], strides = [1, 1, 1]} : vector<16x18x128xf32> to vector<1x18x128xf32>
    %8 = vector.extract_strided_slice %6 {offsets = [14, 0, 0], sizes = [1, 18, 128], strides = [1, 1, 1]} : vector<16x18x128xf32> to vector<1x18x128xf32>
    %9 = tpu.concatenate %7, %6, %8 in 0 : vector<1x18x128xf32>, vector<16x18x128xf32>, vector<1x18x128xf32> -> vector<18x18x128xf32>
    %c0_2 = arith.constant 0 : index
    %c0_3 = arith.constant 0 : index
    %10 = vector.load %arg3[%c0_2, %c0_3] : memref<1x64xf32, #tpu.memory_space<vmem>>, vector<1x64xf32>
    %11 = vector.shape_cast %10 : vector<1x64xf32> to vector<1x64xf32>
    %12 = vector.broadcast %11 : vector<1x64xf32> to vector<256x64xf32>
    %13 = vector.extract_strided_slice %9 {offsets = [0, 0, 0], sizes = [18, 16, 128], strides = [1, 1, 1]} : vector<18x18x128xf32> to vector<18x16x128xf32>
    %14 = arith.truncf %13 : vector<18x16x128xf32> to vector<18x16x128xbf16>
    %15 = vector.extract_strided_slice %14 {offsets = [0, 0, 0], sizes = [16, 16, 128], strides = [1, 1, 1]} : vector<18x16x128xbf16> to vector<16x16x128xbf16>
    %16 = vector.shape_cast %15 : vector<16x16x128xbf16> to vector<256x128xbf16>
    %c0_4 = arith.constant 0 : index
    %c0_5 = arith.constant 0 : index
    %c0_6 = arith.constant 0 : index
    %17 = vector.load %arg2[%c0_4, %c0_5, %c0_6] : memref<9x128x64xbf16, #tpu.memory_space<vmem>>, vector<1x128x64xbf16>
    %18 = vector.shape_cast %17 : vector<1x128x64xbf16> to vector<128x64xbf16>
    %cst = arith.constant dense<0.000000e+00> : vector<256x64xf32>
    %19 = tpu.matmul %16, %18, %cst {dimension_numbers = #tpu.dot_dimension_numbers<[1], [0], [0], [1], [0, 0, 1, 1], [], []>} : vector<256x128xbf16>, vector<128x64xbf16>, vector<256x64xf32> -> vector<256x64xf32>
    %20 = arith.addf %12, %19 : vector<256x64xf32>
    %21 = vector.extract_strided_slice %14 {offsets = [1, 0, 0], sizes = [16, 16, 128], strides = [1, 1, 1]} : vector<18x16x128xbf16> to vector<16x16x128xbf16>
    %22 = vector.shape_cast %21 : vector<16x16x128xbf16> to vector<256x128xbf16>
    %c3 = arith.constant 3 : index
    %c0_7 = arith.constant 0 : index
    %c0_8 = arith.constant 0 : index
    %23 = vector.load %arg2[%c3, %c0_7, %c0_8] : memref<9x128x64xbf16, #tpu.memory_space<vmem>>, vector<1x128x64xbf16>
    %24 = vector.shape_cast %23 : vector<1x128x64xbf16> to vector<128x64xbf16>
    %cst_9 = arith.constant dense<0.000000e+00> : vector<256x64xf32>
    %25 = tpu.matmul %22, %24, %cst_9 {dimension_numbers = #tpu.dot_dimension_numbers<[1], [0], [0], [1], [0, 0, 1, 1], [], []>} : vector<256x128xbf16>, vector<128x64xbf16>, vector<256x64xf32> -> vector<256x64xf32>
    %26 = arith.addf %20, %25 : vector<256x64xf32>
    %27 = vector.extract_strided_slice %14 {offsets = [2, 0, 0], sizes = [16, 16, 128], strides = [1, 1, 1]} : vector<18x16x128xbf16> to vector<16x16x128xbf16>
    %28 = vector.shape_cast %27 : vector<16x16x128xbf16> to vector<256x128xbf16>
    %c6 = arith.constant 6 : index
    %c0_10 = arith.constant 0 : index
    %c0_11 = arith.constant 0 : index
    %29 = vector.load %arg2[%c6, %c0_10, %c0_11] : memref<9x128x64xbf16, #tpu.memory_space<vmem>>, vector<1x128x64xbf16>
    %30 = vector.shape_cast %29 : vector<1x128x64xbf16> to vector<128x64xbf16>
    %cst_12 = arith.constant dense<0.000000e+00> : vector<256x64xf32>
    %31 = tpu.matmul %28, %30, %cst_12 {dimension_numbers = #tpu.dot_dimension_numbers<[1], [0], [0], [1], [0, 0, 1, 1], [], []>} : vector<256x128xbf16>, vector<128x64xbf16>, vector<256x64xf32> -> vector<256x64xf32>
    %32 = arith.addf %26, %31 : vector<256x64xf32>
    %33 = vector.extract_strided_slice %9 {offsets = [0, 1, 0], sizes = [18, 16, 128], strides = [1, 1, 1]} : vector<18x18x128xf32> to vector<18x16x128xf32>
    %34 = arith.truncf %33 : vector<18x16x128xf32> to vector<18x16x128xbf16>
    %35 = vector.extract_strided_slice %34 {offsets = [0, 0, 0], sizes = [16, 16, 128], strides = [1, 1, 1]} : vector<18x16x128xbf16> to vector<16x16x128xbf16>
    %36 = vector.shape_cast %35 : vector<16x16x128xbf16> to vector<256x128xbf16>
    %c1 = arith.constant 1 : index
    %c0_13 = arith.constant 0 : index
    %c0_14 = arith.constant 0 : index
    %37 = vector.load %arg2[%c1, %c0_13, %c0_14] : memref<9x128x64xbf16, #tpu.memory_space<vmem>>, vector<1x128x64xbf16>
    %38 = vector.shape_cast %37 : vector<1x128x64xbf16> to vector<128x64xbf16>
    %cst_15 = arith.constant dense<0.000000e+00> : vector<256x64xf32>
    %39 = tpu.matmul %36, %38, %cst_15 {dimension_numbers = #tpu.dot_dimension_numbers<[1], [0], [0], [1], [0, 0, 1, 1], [], []>} : vector<256x128xbf16>, vector<128x64xbf16>, vector<256x64xf32> -> vector<256x64xf32>
    %40 = arith.addf %32, %39 : vector<256x64xf32>
    %41 = vector.extract_strided_slice %34 {offsets = [1, 0, 0], sizes = [16, 16, 128], strides = [1, 1, 1]} : vector<18x16x128xbf16> to vector<16x16x128xbf16>
    %42 = vector.shape_cast %41 : vector<16x16x128xbf16> to vector<256x128xbf16>
    %c4 = arith.constant 4 : index
    %c0_16 = arith.constant 0 : index
    %c0_17 = arith.constant 0 : index
    %43 = vector.load %arg2[%c4, %c0_16, %c0_17] : memref<9x128x64xbf16, #tpu.memory_space<vmem>>, vector<1x128x64xbf16>
    %44 = vector.shape_cast %43 : vector<1x128x64xbf16> to vector<128x64xbf16>
    %cst_18 = arith.constant dense<0.000000e+00> : vector<256x64xf32>
    %45 = tpu.matmul %42, %44, %cst_18 {dimension_numbers = #tpu.dot_dimension_numbers<[1], [0], [0], [1], [0, 0, 1, 1], [], []>} : vector<256x128xbf16>, vector<128x64xbf16>, vector<256x64xf32> -> vector<256x64xf32>
    %46 = arith.addf %40, %45 : vector<256x64xf32>
    %47 = vector.extract_strided_slice %34 {offsets = [2, 0, 0], sizes = [16, 16, 128], strides = [1, 1, 1]} : vector<18x16x128xbf16> to vector<16x16x128xbf16>
    %48 = vector.shape_cast %47 : vector<16x16x128xbf16> to vector<256x128xbf16>
    %c7 = arith.constant 7 : index
    %c0_19 = arith.constant 0 : index
    %c0_20 = arith.constant 0 : index
    %49 = vector.load %arg2[%c7, %c0_19, %c0_20] : memref<9x128x64xbf16, #tpu.memory_space<vmem>>, vector<1x128x64xbf16>
    %50 = vector.shape_cast %49 : vector<1x128x64xbf16> to vector<128x64xbf16>
    %cst_21 = arith.constant dense<0.000000e+00> : vector<256x64xf32>
    %51 = tpu.matmul %48, %50, %cst_21 {dimension_numbers = #tpu.dot_dimension_numbers<[1], [0], [0], [1], [0, 0, 1, 1], [], []>} : vector<256x128xbf16>, vector<128x64xbf16>, vector<256x64xf32> -> vector<256x64xf32>
    %52 = arith.addf %46, %51 : vector<256x64xf32>
    %53 = vector.extract_strided_slice %9 {offsets = [0, 2, 0], sizes = [18, 16, 128], strides = [1, 1, 1]} : vector<18x18x128xf32> to vector<18x16x128xf32>
    %54 = arith.truncf %53 : vector<18x16x128xf32> to vector<18x16x128xbf16>
    %55 = vector.extract_strided_slice %54 {offsets = [0, 0, 0], sizes = [16, 16, 128], strides = [1, 1, 1]} : vector<18x16x128xbf16> to vector<16x16x128xbf16>
    %56 = vector.shape_cast %55 : vector<16x16x128xbf16> to vector<256x128xbf16>
    %c2 = arith.constant 2 : index
    %c0_22 = arith.constant 0 : index
    %c0_23 = arith.constant 0 : index
    %57 = vector.load %arg2[%c2, %c0_22, %c0_23] : memref<9x128x64xbf16, #tpu.memory_space<vmem>>, vector<1x128x64xbf16>
    %58 = vector.shape_cast %57 : vector<1x128x64xbf16> to vector<128x64xbf16>
    %cst_24 = arith.constant dense<0.000000e+00> : vector<256x64xf32>
    %59 = tpu.matmul %56, %58, %cst_24 {dimension_numbers = #tpu.dot_dimension_numbers<[1], [0], [0], [1], [0, 0, 1, 1], [], []>} : vector<256x128xbf16>, vector<128x64xbf16>, vector<256x64xf32> -> vector<256x64xf32>
    %60 = arith.addf %52, %59 : vector<256x64xf32>
    %61 = vector.extract_strided_slice %54 {offsets = [1, 0, 0], sizes = [16, 16, 128], strides = [1, 1, 1]} : vector<18x16x128xbf16> to vector<16x16x128xbf16>
    %62 = vector.shape_cast %61 : vector<16x16x128xbf16> to vector<256x128xbf16>
    %c5 = arith.constant 5 : index
    %c0_25 = arith.constant 0 : index
    %c0_26 = arith.constant 0 : index
    %63 = vector.load %arg2[%c5, %c0_25, %c0_26] : memref<9x128x64xbf16, #tpu.memory_space<vmem>>, vector<1x128x64xbf16>
    %64 = vector.shape_cast %63 : vector<1x128x64xbf16> to vector<128x64xbf16>
    %cst_27 = arith.constant dense<0.000000e+00> : vector<256x64xf32>
    %65 = tpu.matmul %62, %64, %cst_27 {dimension_numbers = #tpu.dot_dimension_numbers<[1], [0], [0], [1], [0, 0, 1, 1], [], []>} : vector<256x128xbf16>, vector<128x64xbf16>, vector<256x64xf32> -> vector<256x64xf32>
    %66 = arith.addf %60, %65 : vector<256x64xf32>
    %67 = vector.extract_strided_slice %54 {offsets = [2, 0, 0], sizes = [16, 16, 128], strides = [1, 1, 1]} : vector<18x16x128xbf16> to vector<16x16x128xbf16>
    %68 = vector.shape_cast %67 : vector<16x16x128xbf16> to vector<256x128xbf16>
    %c8 = arith.constant 8 : index
    %c0_28 = arith.constant 0 : index
    %c0_29 = arith.constant 0 : index
    %69 = vector.load %arg2[%c8, %c0_28, %c0_29] : memref<9x128x64xbf16, #tpu.memory_space<vmem>>, vector<1x128x64xbf16>
    %70 = vector.shape_cast %69 : vector<1x128x64xbf16> to vector<128x64xbf16>
    %cst_30 = arith.constant dense<0.000000e+00> : vector<256x64xf32>
    %71 = tpu.matmul %68, %70, %cst_30 {dimension_numbers = #tpu.dot_dimension_numbers<[1], [0], [0], [1], [0, 0, 1, 1], [], []>} : vector<256x128xbf16>, vector<128x64xbf16>, vector<256x64xf32> -> vector<256x64xf32>
    %72 = arith.addf %66, %71 : vector<256x64xf32>
    %cst_31 = arith.constant 0.000000e+00 : f32
    %73 = vector.broadcast %cst_31 : f32 to vector<256x64xf32>
    %74 = arith.maximumf %72, %73 : vector<256x64xf32>
    %75 = vector.shape_cast %74 : vector<256x64xf32> to vector<16x16x64xf32>
    %76 = vector.shape_cast %75 : vector<16x16x64xf32> to vector<16x1x16x64xf32>
    %77 = vector.shape_cast %76 : vector<16x1x16x64xf32> to vector<16x1x16x64xf32>
    %78 = vector.broadcast %77 : vector<16x1x16x64xf32> to vector<16x2x16x64xf32>
    %79 = vector.shape_cast %78 : vector<16x2x16x64xf32> to vector<32x16x64xf32>
    %80 = vector.shape_cast %79 : vector<32x16x64xf32> to vector<32x16x1x64xf32>
    %81 = vector.shape_cast %80 : vector<32x16x1x64xf32> to vector<32x16x1x64xf32>
    %82 = vector.broadcast %81 : vector<32x16x1x64xf32> to vector<32x16x2x64xf32>
    %83 = vector.shape_cast %82 : vector<32x16x2x64xf32> to vector<32x32x64xf32>
    %84 = vector.extract_strided_slice %83 {offsets = [0, 1, 0], sizes = [32, 1, 64], strides = [1, 1, 1]} : vector<32x32x64xf32> to vector<32x1x64xf32>
    %85 = vector.extract_strided_slice %83 {offsets = [0, 30, 0], sizes = [32, 1, 64], strides = [1, 1, 1]} : vector<32x32x64xf32> to vector<32x1x64xf32>
    %86 = tpu.concatenate %84, %83, %85 in 1 : vector<32x1x64xf32>, vector<32x32x64xf32>, vector<32x1x64xf32> -> vector<32x34x64xf32>
    %87 = vector.extract_strided_slice %86 {offsets = [1, 0, 0], sizes = [1, 34, 64], strides = [1, 1, 1]} : vector<32x34x64xf32> to vector<1x34x64xf32>
    %88 = vector.extract_strided_slice %86 {offsets = [30, 0, 0], sizes = [1, 34, 64], strides = [1, 1, 1]} : vector<32x34x64xf32> to vector<1x34x64xf32>
    %89 = tpu.concatenate %87, %86, %88 in 0 : vector<1x34x64xf32>, vector<32x34x64xf32>, vector<1x34x64xf32> -> vector<34x34x64xf32>
    %c0_32 = arith.constant 0 : index
    %c0_33 = arith.constant 0 : index
    %90 = vector.load %arg5[%c0_32, %c0_33] : memref<1x64xf32, #tpu.memory_space<vmem>>, vector<1x64xf32>
    %91 = vector.shape_cast %90 : vector<1x64xf32> to vector<1x64xf32>
    %92 = vector.broadcast %91 : vector<1x64xf32> to vector<1024x64xf32>
    %93 = vector.extract_strided_slice %89 {offsets = [0, 0, 0], sizes = [34, 32, 64], strides = [1, 1, 1]} : vector<34x34x64xf32> to vector<34x32x64xf32>
    %94 = arith.truncf %93 : vector<34x32x64xf32> to vector<34x32x64xbf16>
    %95 = vector.extract_strided_slice %94 {offsets = [0, 0, 0], sizes = [32, 32, 64], strides = [1, 1, 1]} : vector<34x32x64xbf16> to vector<32x32x64xbf16>
    %96 = vector.shape_cast %95 : vector<32x32x64xbf16> to vector<1024x64xbf16>
    %c0_34 = arith.constant 0 : index
    %c0_35 = arith.constant 0 : index
    %c0_36 = arith.constant 0 : index
    %97 = vector.load %arg4[%c0_34, %c0_35, %c0_36] : memref<9x64x64xbf16, #tpu.memory_space<vmem>>, vector<1x64x64xbf16>
    %98 = vector.shape_cast %97 : vector<1x64x64xbf16> to vector<64x64xbf16>
    %cst_37 = arith.constant dense<0.000000e+00> : vector<1024x64xf32>
    %99 = tpu.matmul %96, %98, %cst_37 {dimension_numbers = #tpu.dot_dimension_numbers<[1], [0], [0], [1], [0, 0, 1, 1], [], []>} : vector<1024x64xbf16>, vector<64x64xbf16>, vector<1024x64xf32> -> vector<1024x64xf32>
    %100 = arith.addf %92, %99 : vector<1024x64xf32>
    %101 = vector.extract_strided_slice %94 {offsets = [1, 0, 0], sizes = [32, 32, 64], strides = [1, 1, 1]} : vector<34x32x64xbf16> to vector<32x32x64xbf16>
    %102 = vector.shape_cast %101 : vector<32x32x64xbf16> to vector<1024x64xbf16>
    %c3_38 = arith.constant 3 : index
    %c0_39 = arith.constant 0 : index
    %c0_40 = arith.constant 0 : index
    %103 = vector.load %arg4[%c3_38, %c0_39, %c0_40] : memref<9x64x64xbf16, #tpu.memory_space<vmem>>, vector<1x64x64xbf16>
    %104 = vector.shape_cast %103 : vector<1x64x64xbf16> to vector<64x64xbf16>
    %cst_41 = arith.constant dense<0.000000e+00> : vector<1024x64xf32>
    %105 = tpu.matmul %102, %104, %cst_41 {dimension_numbers = #tpu.dot_dimension_numbers<[1], [0], [0], [1], [0, 0, 1, 1], [], []>} : vector<1024x64xbf16>, vector<64x64xbf16>, vector<1024x64xf32> -> vector<1024x64xf32>
    %106 = arith.addf %100, %105 : vector<1024x64xf32>
    %107 = vector.extract_strided_slice %94 {offsets = [2, 0, 0], sizes = [32, 32, 64], strides = [1, 1, 1]} : vector<34x32x64xbf16> to vector<32x32x64xbf16>
    %108 = vector.shape_cast %107 : vector<32x32x64xbf16> to vector<1024x64xbf16>
    %c6_42 = arith.constant 6 : index
    %c0_43 = arith.constant 0 : index
    %c0_44 = arith.constant 0 : index
    %109 = vector.load %arg4[%c6_42, %c0_43, %c0_44] : memref<9x64x64xbf16, #tpu.memory_space<vmem>>, vector<1x64x64xbf16>
    %110 = vector.shape_cast %109 : vector<1x64x64xbf16> to vector<64x64xbf16>
    %cst_45 = arith.constant dense<0.000000e+00> : vector<1024x64xf32>
    %111 = tpu.matmul %108, %110, %cst_45 {dimension_numbers = #tpu.dot_dimension_numbers<[1], [0], [0], [1], [0, 0, 1, 1], [], []>} : vector<1024x64xbf16>, vector<64x64xbf16>, vector<1024x64xf32> -> vector<1024x64xf32>
    %112 = arith.addf %106, %111 : vector<1024x64xf32>
    %113 = vector.extract_strided_slice %89 {offsets = [0, 1, 0], sizes = [34, 32, 64], strides = [1, 1, 1]} : vector<34x34x64xf32> to vector<34x32x64xf32>
    %114 = arith.truncf %113 : vector<34x32x64xf32> to vector<34x32x64xbf16>
    %115 = vector.extract_strided_slice %114 {offsets = [0, 0, 0], sizes = [32, 32, 64], strides = [1, 1, 1]} : vector<34x32x64xbf16> to vector<32x32x64xbf16>
    %116 = vector.shape_cast %115 : vector<32x32x64xbf16> to vector<1024x64xbf16>
    %c1_46 = arith.constant 1 : index
    %c0_47 = arith.constant 0 : index
    %c0_48 = arith.constant 0 : index
    %117 = vector.load %arg4[%c1_46, %c0_47, %c0_48] : memref<9x64x64xbf16, #tpu.memory_space<vmem>>, vector<1x64x64xbf16>
    %118 = vector.shape_cast %117 : vector<1x64x64xbf16> to vector<64x64xbf16>
    %cst_49 = arith.constant dense<0.000000e+00> : vector<1024x64xf32>
    %119 = tpu.matmul %116, %118, %cst_49 {dimension_numbers = #tpu.dot_dimension_numbers<[1], [0], [0], [1], [0, 0, 1, 1], [], []>} : vector<1024x64xbf16>, vector<64x64xbf16>, vector<1024x64xf32> -> vector<1024x64xf32>
    %120 = arith.addf %112, %119 : vector<1024x64xf32>
    %121 = vector.extract_strided_slice %114 {offsets = [1, 0, 0], sizes = [32, 32, 64], strides = [1, 1, 1]} : vector<34x32x64xbf16> to vector<32x32x64xbf16>
    %122 = vector.shape_cast %121 : vector<32x32x64xbf16> to vector<1024x64xbf16>
    %c4_50 = arith.constant 4 : index
    %c0_51 = arith.constant 0 : index
    %c0_52 = arith.constant 0 : index
    %123 = vector.load %arg4[%c4_50, %c0_51, %c0_52] : memref<9x64x64xbf16, #tpu.memory_space<vmem>>, vector<1x64x64xbf16>
    %124 = vector.shape_cast %123 : vector<1x64x64xbf16> to vector<64x64xbf16>
    %cst_53 = arith.constant dense<0.000000e+00> : vector<1024x64xf32>
    %125 = tpu.matmul %122, %124, %cst_53 {dimension_numbers = #tpu.dot_dimension_numbers<[1], [0], [0], [1], [0, 0, 1, 1], [], []>} : vector<1024x64xbf16>, vector<64x64xbf16>, vector<1024x64xf32> -> vector<1024x64xf32>
    %126 = arith.addf %120, %125 : vector<1024x64xf32>
    %127 = vector.extract_strided_slice %114 {offsets = [2, 0, 0], sizes = [32, 32, 64], strides = [1, 1, 1]} : vector<34x32x64xbf16> to vector<32x32x64xbf16>
    %128 = vector.shape_cast %127 : vector<32x32x64xbf16> to vector<1024x64xbf16>
    %c7_54 = arith.constant 7 : index
    %c0_55 = arith.constant 0 : index
    %c0_56 = arith.constant 0 : index
    %129 = vector.load %arg4[%c7_54, %c0_55, %c0_56] : memref<9x64x64xbf16, #tpu.memory_space<vmem>>, vector<1x64x64xbf16>
    %130 = vector.shape_cast %129 : vector<1x64x64xbf16> to vector<64x64xbf16>
    %cst_57 = arith.constant dense<0.000000e+00> : vector<1024x64xf32>
    %131 = tpu.matmul %128, %130, %cst_57 {dimension_numbers = #tpu.dot_dimension_numbers<[1], [0], [0], [1], [0, 0, 1, 1], [], []>} : vector<1024x64xbf16>, vector<64x64xbf16>, vector<1024x64xf32> -> vector<1024x64xf32>
    %132 = arith.addf %126, %131 : vector<1024x64xf32>
    %133 = vector.extract_strided_slice %89 {offsets = [0, 2, 0], sizes = [34, 32, 64], strides = [1, 1, 1]} : vector<34x34x64xf32> to vector<34x32x64xf32>
    %134 = arith.truncf %133 : vector<34x32x64xf32> to vector<34x32x64xbf16>
    %135 = vector.extract_strided_slice %134 {offsets = [0, 0, 0], sizes = [32, 32, 64], strides = [1, 1, 1]} : vector<34x32x64xbf16> to vector<32x32x64xbf16>
    %136 = vector.shape_cast %135 : vector<32x32x64xbf16> to vector<1024x64xbf16>
    %c2_58 = arith.constant 2 : index
    %c0_59 = arith.constant 0 : index
    %c0_60 = arith.constant 0 : index
    %137 = vector.load %arg4[%c2_58, %c0_59, %c0_60] : memref<9x64x64xbf16, #tpu.memory_space<vmem>>, vector<1x64x64xbf16>
    %138 = vector.shape_cast %137 : vector<1x64x64xbf16> to vector<64x64xbf16>
    %cst_61 = arith.constant dense<0.000000e+00> : vector<1024x64xf32>
    %139 = tpu.matmul %136, %138, %cst_61 {dimension_numbers = #tpu.dot_dimension_numbers<[1], [0], [0], [1], [0, 0, 1, 1], [], []>} : vector<1024x64xbf16>, vector<64x64xbf16>, vector<1024x64xf32> -> vector<1024x64xf32>
    %140 = arith.addf %132, %139 : vector<1024x64xf32>
    %141 = vector.extract_strided_slice %134 {offsets = [1, 0, 0], sizes = [32, 32, 64], strides = [1, 1, 1]} : vector<34x32x64xbf16> to vector<32x32x64xbf16>
    %142 = vector.shape_cast %141 : vector<32x32x64xbf16> to vector<1024x64xbf16>
    %c5_62 = arith.constant 5 : index
    %c0_63 = arith.constant 0 : index
    %c0_64 = arith.constant 0 : index
    %143 = vector.load %arg4[%c5_62, %c0_63, %c0_64] : memref<9x64x64xbf16, #tpu.memory_space<vmem>>, vector<1x64x64xbf16>
    %144 = vector.shape_cast %143 : vector<1x64x64xbf16> to vector<64x64xbf16>
    %cst_65 = arith.constant dense<0.000000e+00> : vector<1024x64xf32>
    %145 = tpu.matmul %142, %144, %cst_65 {dimension_numbers = #tpu.dot_dimension_numbers<[1], [0], [0], [1], [0, 0, 1, 1], [], []>} : vector<1024x64xbf16>, vector<64x64xbf16>, vector<1024x64xf32> -> vector<1024x64xf32>
    %146 = arith.addf %140, %145 : vector<1024x64xf32>
    %147 = vector.extract_strided_slice %134 {offsets = [2, 0, 0], sizes = [32, 32, 64], strides = [1, 1, 1]} : vector<34x32x64xbf16> to vector<32x32x64xbf16>
    %148 = vector.shape_cast %147 : vector<32x32x64xbf16> to vector<1024x64xbf16>
    %c8_66 = arith.constant 8 : index
    %c0_67 = arith.constant 0 : index
    %c0_68 = arith.constant 0 : index
    %149 = vector.load %arg4[%c8_66, %c0_67, %c0_68] : memref<9x64x64xbf16, #tpu.memory_space<vmem>>, vector<1x64x64xbf16>
    %150 = vector.shape_cast %149 : vector<1x64x64xbf16> to vector<64x64xbf16>
    %cst_69 = arith.constant dense<0.000000e+00> : vector<1024x64xf32>
    %151 = tpu.matmul %148, %150, %cst_69 {dimension_numbers = #tpu.dot_dimension_numbers<[1], [0], [0], [1], [0, 0, 1, 1], [], []>} : vector<1024x64xbf16>, vector<64x64xbf16>, vector<1024x64xf32> -> vector<1024x64xf32>
    %152 = arith.addf %146, %151 : vector<1024x64xf32>
    %cst_70 = arith.constant 0.000000e+00 : f32
    %153 = vector.broadcast %cst_70 : f32 to vector<1024x64xf32>
    %154 = arith.maximumf %152, %153 : vector<1024x64xf32>
    %155 = vector.shape_cast %154 : vector<1024x64xf32> to vector<32x32x64xf32>
    %156 = vector.extract_strided_slice %155 {offsets = [0, 1, 0], sizes = [32, 1, 64], strides = [1, 1, 1]} : vector<32x32x64xf32> to vector<32x1x64xf32>
    %157 = vector.extract_strided_slice %155 {offsets = [0, 30, 0], sizes = [32, 1, 64], strides = [1, 1, 1]} : vector<32x32x64xf32> to vector<32x1x64xf32>
    %158 = tpu.concatenate %156, %155, %157 in 1 : vector<32x1x64xf32>, vector<32x32x64xf32>, vector<32x1x64xf32> -> vector<32x34x64xf32>
    %159 = vector.extract_strided_slice %158 {offsets = [1, 0, 0], sizes = [1, 34, 64], strides = [1, 1, 1]} : vector<32x34x64xf32> to vector<1x34x64xf32>
    %160 = vector.extract_strided_slice %158 {offsets = [30, 0, 0], sizes = [1, 34, 64], strides = [1, 1, 1]} : vector<32x34x64xf32> to vector<1x34x64xf32>
    %161 = tpu.concatenate %159, %158, %160 in 0 : vector<1x34x64xf32>, vector<32x34x64xf32>, vector<1x34x64xf32> -> vector<34x34x64xf32>
    %c0_71 = arith.constant 0 : index
    %c0_72 = arith.constant 0 : index
    %162 = vector.load %arg7[%c0_71, %c0_72] : memref<1x8xf32, #tpu.memory_space<vmem>>, vector<1x8xf32>
    %163 = vector.shape_cast %162 : vector<1x8xf32> to vector<1x8xf32>
    %164 = vector.broadcast %163 : vector<1x8xf32> to vector<1024x8xf32>
    %165 = vector.extract_strided_slice %161 {offsets = [0, 0, 0], sizes = [34, 32, 64], strides = [1, 1, 1]} : vector<34x34x64xf32> to vector<34x32x64xf32>
    %166 = arith.truncf %165 : vector<34x32x64xf32> to vector<34x32x64xbf16>
    %167 = vector.extract_strided_slice %166 {offsets = [0, 0, 0], sizes = [32, 32, 64], strides = [1, 1, 1]} : vector<34x32x64xbf16> to vector<32x32x64xbf16>
    %168 = vector.shape_cast %167 : vector<32x32x64xbf16> to vector<1024x64xbf16>
    %c0_73 = arith.constant 0 : index
    %c0_74 = arith.constant 0 : index
    %c0_75 = arith.constant 0 : index
    %169 = vector.load %arg6[%c0_73, %c0_74, %c0_75] : memref<9x64x8xbf16, #tpu.memory_space<vmem>>, vector<1x64x8xbf16>
    %170 = vector.shape_cast %169 : vector<1x64x8xbf16> to vector<64x8xbf16>
    %cst_76 = arith.constant dense<0.000000e+00> : vector<1024x8xf32>
    %171 = tpu.matmul %168, %170, %cst_76 {dimension_numbers = #tpu.dot_dimension_numbers<[1], [0], [0], [1], [0, 0, 1, 1], [], []>} : vector<1024x64xbf16>, vector<64x8xbf16>, vector<1024x8xf32> -> vector<1024x8xf32>
    %172 = arith.addf %164, %171 : vector<1024x8xf32>
    %173 = vector.extract_strided_slice %166 {offsets = [1, 0, 0], sizes = [32, 32, 64], strides = [1, 1, 1]} : vector<34x32x64xbf16> to vector<32x32x64xbf16>
    %174 = vector.shape_cast %173 : vector<32x32x64xbf16> to vector<1024x64xbf16>
    %c3_77 = arith.constant 3 : index
    %c0_78 = arith.constant 0 : index
    %c0_79 = arith.constant 0 : index
    %175 = vector.load %arg6[%c3_77, %c0_78, %c0_79] : memref<9x64x8xbf16, #tpu.memory_space<vmem>>, vector<1x64x8xbf16>
    %176 = vector.shape_cast %175 : vector<1x64x8xbf16> to vector<64x8xbf16>
    %cst_80 = arith.constant dense<0.000000e+00> : vector<1024x8xf32>
    %177 = tpu.matmul %174, %176, %cst_80 {dimension_numbers = #tpu.dot_dimension_numbers<[1], [0], [0], [1], [0, 0, 1, 1], [], []>} : vector<1024x64xbf16>, vector<64x8xbf16>, vector<1024x8xf32> -> vector<1024x8xf32>
    %178 = arith.addf %172, %177 : vector<1024x8xf32>
    %179 = vector.extract_strided_slice %166 {offsets = [2, 0, 0], sizes = [32, 32, 64], strides = [1, 1, 1]} : vector<34x32x64xbf16> to vector<32x32x64xbf16>
    %180 = vector.shape_cast %179 : vector<32x32x64xbf16> to vector<1024x64xbf16>
    %c6_81 = arith.constant 6 : index
    %c0_82 = arith.constant 0 : index
    %c0_83 = arith.constant 0 : index
    %181 = vector.load %arg6[%c6_81, %c0_82, %c0_83] : memref<9x64x8xbf16, #tpu.memory_space<vmem>>, vector<1x64x8xbf16>
    %182 = vector.shape_cast %181 : vector<1x64x8xbf16> to vector<64x8xbf16>
    %cst_84 = arith.constant dense<0.000000e+00> : vector<1024x8xf32>
    %183 = tpu.matmul %180, %182, %cst_84 {dimension_numbers = #tpu.dot_dimension_numbers<[1], [0], [0], [1], [0, 0, 1, 1], [], []>} : vector<1024x64xbf16>, vector<64x8xbf16>, vector<1024x8xf32> -> vector<1024x8xf32>
    %184 = arith.addf %178, %183 : vector<1024x8xf32>
    %185 = vector.extract_strided_slice %161 {offsets = [0, 1, 0], sizes = [34, 32, 64], strides = [1, 1, 1]} : vector<34x34x64xf32> to vector<34x32x64xf32>
    %186 = arith.truncf %185 : vector<34x32x64xf32> to vector<34x32x64xbf16>
    %187 = vector.extract_strided_slice %186 {offsets = [0, 0, 0], sizes = [32, 32, 64], strides = [1, 1, 1]} : vector<34x32x64xbf16> to vector<32x32x64xbf16>
    %188 = vector.shape_cast %187 : vector<32x32x64xbf16> to vector<1024x64xbf16>
    %c1_85 = arith.constant 1 : index
    %c0_86 = arith.constant 0 : index
    %c0_87 = arith.constant 0 : index
    %189 = vector.load %arg6[%c1_85, %c0_86, %c0_87] : memref<9x64x8xbf16, #tpu.memory_space<vmem>>, vector<1x64x8xbf16>
    %190 = vector.shape_cast %189 : vector<1x64x8xbf16> to vector<64x8xbf16>
    %cst_88 = arith.constant dense<0.000000e+00> : vector<1024x8xf32>
    %191 = tpu.matmul %188, %190, %cst_88 {dimension_numbers = #tpu.dot_dimension_numbers<[1], [0], [0], [1], [0, 0, 1, 1], [], []>} : vector<1024x64xbf16>, vector<64x8xbf16>, vector<1024x8xf32> -> vector<1024x8xf32>
    %192 = arith.addf %184, %191 : vector<1024x8xf32>
    %193 = vector.extract_strided_slice %186 {offsets = [1, 0, 0], sizes = [32, 32, 64], strides = [1, 1, 1]} : vector<34x32x64xbf16> to vector<32x32x64xbf16>
    %194 = vector.shape_cast %193 : vector<32x32x64xbf16> to vector<1024x64xbf16>
    %c4_89 = arith.constant 4 : index
    %c0_90 = arith.constant 0 : index
    %c0_91 = arith.constant 0 : index
    %195 = vector.load %arg6[%c4_89, %c0_90, %c0_91] : memref<9x64x8xbf16, #tpu.memory_space<vmem>>, vector<1x64x8xbf16>
    %196 = vector.shape_cast %195 : vector<1x64x8xbf16> to vector<64x8xbf16>
    %cst_92 = arith.constant dense<0.000000e+00> : vector<1024x8xf32>
    %197 = tpu.matmul %194, %196, %cst_92 {dimension_numbers = #tpu.dot_dimension_numbers<[1], [0], [0], [1], [0, 0, 1, 1], [], []>} : vector<1024x64xbf16>, vector<64x8xbf16>, vector<1024x8xf32> -> vector<1024x8xf32>
    %198 = arith.addf %192, %197 : vector<1024x8xf32>
    %199 = vector.extract_strided_slice %186 {offsets = [2, 0, 0], sizes = [32, 32, 64], strides = [1, 1, 1]} : vector<34x32x64xbf16> to vector<32x32x64xbf16>
    %200 = vector.shape_cast %199 : vector<32x32x64xbf16> to vector<1024x64xbf16>
    %c7_93 = arith.constant 7 : index
    %c0_94 = arith.constant 0 : index
    %c0_95 = arith.constant 0 : index
    %201 = vector.load %arg6[%c7_93, %c0_94, %c0_95] : memref<9x64x8xbf16, #tpu.memory_space<vmem>>, vector<1x64x8xbf16>
    %202 = vector.shape_cast %201 : vector<1x64x8xbf16> to vector<64x8xbf16>
    %cst_96 = arith.constant dense<0.000000e+00> : vector<1024x8xf32>
    %203 = tpu.matmul %200, %202, %cst_96 {dimension_numbers = #tpu.dot_dimension_numbers<[1], [0], [0], [1], [0, 0, 1, 1], [], []>} : vector<1024x64xbf16>, vector<64x8xbf16>, vector<1024x8xf32> -> vector<1024x8xf32>
    %204 = arith.addf %198, %203 : vector<1024x8xf32>
    %205 = vector.extract_strided_slice %161 {offsets = [0, 2, 0], sizes = [34, 32, 64], strides = [1, 1, 1]} : vector<34x34x64xf32> to vector<34x32x64xf32>
    %206 = arith.truncf %205 : vector<34x32x64xf32> to vector<34x32x64xbf16>
    %207 = vector.extract_strided_slice %206 {offsets = [0, 0, 0], sizes = [32, 32, 64], strides = [1, 1, 1]} : vector<34x32x64xbf16> to vector<32x32x64xbf16>
    %208 = vector.shape_cast %207 : vector<32x32x64xbf16> to vector<1024x64xbf16>
    %c2_97 = arith.constant 2 : index
    %c0_98 = arith.constant 0 : index
    %c0_99 = arith.constant 0 : index
    %209 = vector.load %arg6[%c2_97, %c0_98, %c0_99] : memref<9x64x8xbf16, #tpu.memory_space<vmem>>, vector<1x64x8xbf16>
    %210 = vector.shape_cast %209 : vector<1x64x8xbf16> to vector<64x8xbf16>
    %cst_100 = arith.constant dense<0.000000e+00> : vector<1024x8xf32>
    %211 = tpu.matmul %208, %210, %cst_100 {dimension_numbers = #tpu.dot_dimension_numbers<[1], [0], [0], [1], [0, 0, 1, 1], [], []>} : vector<1024x64xbf16>, vector<64x8xbf16>, vector<1024x8xf32> -> vector<1024x8xf32>
    %212 = arith.addf %204, %211 : vector<1024x8xf32>
    %213 = vector.extract_strided_slice %206 {offsets = [1, 0, 0], sizes = [32, 32, 64], strides = [1, 1, 1]} : vector<34x32x64xbf16> to vector<32x32x64xbf16>
    %214 = vector.shape_cast %213 : vector<32x32x64xbf16> to vector<1024x64xbf16>
    %c5_101 = arith.constant 5 : index
    %c0_102 = arith.constant 0 : index
    %c0_103 = arith.constant 0 : index
    %215 = vector.load %arg6[%c5_101, %c0_102, %c0_103] : memref<9x64x8xbf16, #tpu.memory_space<vmem>>, vector<1x64x8xbf16>
    %216 = vector.shape_cast %215 : vector<1x64x8xbf16> to vector<64x8xbf16>
    %cst_104 = arith.constant dense<0.000000e+00> : vector<1024x8xf32>
    %217 = tpu.matmul %214, %216, %cst_104 {dimension_numbers = #tpu.dot_dimension_numbers<[1], [0], [0], [1], [0, 0, 1, 1], [], []>} : vector<1024x64xbf16>, vector<64x8xbf16>, vector<1024x8xf32> -> vector<1024x8xf32>
    %218 = arith.addf %212, %217 : vector<1024x8xf32>
    %219 = vector.extract_strided_slice %206 {offsets = [2, 0, 0], sizes = [32, 32, 64], strides = [1, 1, 1]} : vector<34x32x64xbf16> to vector<32x32x64xbf16>
    %220 = vector.shape_cast %219 : vector<32x32x64xbf16> to vector<1024x64xbf16>
    %c8_105 = arith.constant 8 : index
    %c0_106 = arith.constant 0 : index
    %c0_107 = arith.constant 0 : index
    %221 = vector.load %arg6[%c8_105, %c0_106, %c0_107] : memref<9x64x8xbf16, #tpu.memory_space<vmem>>, vector<1x64x8xbf16>
    %222 = vector.shape_cast %221 : vector<1x64x8xbf16> to vector<64x8xbf16>
    %cst_108 = arith.constant dense<0.000000e+00> : vector<1024x8xf32>
    %223 = tpu.matmul %220, %222, %cst_108 {dimension_numbers = #tpu.dot_dimension_numbers<[1], [0], [0], [1], [0, 0, 1, 1], [], []>} : vector<1024x64xbf16>, vector<64x8xbf16>, vector<1024x8xf32> -> vector<1024x8xf32>
    %224 = arith.addf %218, %223 : vector<1024x8xf32>
    %225 = tpu.transpose %224, [1, 0] : vector<1024x8xf32> -> vector<8x1024xf32>
    %226 = vector.extract_strided_slice %225 {offsets = [0, 0], sizes = [3, 1024], strides = [1, 1]} : vector<8x1024xf32> to vector<3x1024xf32>
    %c0_109 = arith.constant 0 : index
    %c0_110 = arith.constant 0 : index
    %c0_111 = arith.constant 0 : index
    %227 = vector.load %arg8[%c0_109, %c0_110, %c0_111] : memref<1x3x1024xf32, #tpu.memory_space<vmem>>, vector<1x3x1024xf32>
    %228 = vector.shape_cast %227 : vector<1x3x1024xf32> to vector<3x1024xf32>
    %229 = vector.shape_cast %226 : vector<3x1024xf32> to vector<1x3x1024xf32>
    tpu.vector_store %arg8[%c0_109, %c0_110, %c0_111], %229 {strides = array<i32>} : memref<1x3x1024xf32, #tpu.memory_space<vmem>>, vector<1x3x1024xf32>,
    return
  }
  func.func @transform_0(%arg0: i32) -> (i32, i32, i32) {
    %c0_i32 = arith.constant 0 : i32
    %c0_i32_0 = arith.constant 0 : i32
    %c0_i32_1 = arith.constant 0 : i32
    return %arg0, %c0_i32, %c0_i32_0 : i32, i32, i32
  }
  func.func @transform_1(%arg0: i32) -> (i32, i32, i32) {
    %c0_i32 = arith.constant 0 : i32
    %c0_i32_0 = arith.constant 0 : i32
    %c0_i32_1 = arith.constant 0 : i32
    %c0_i32_2 = arith.constant 0 : i32
    return %c0_i32, %c0_i32_0, %c0_i32_1 : i32, i32, i32
  }
  func.func @transform_2(%arg0: i32) -> (i32, i32) {
    %c0_i32 = arith.constant 0 : i32
    %c0_i32_0 = arith.constant 0 : i32
    %c0_i32_1 = arith.constant 0 : i32
    return %c0_i32, %c0_i32_0 : i32, i32
  }
  func.func @transform_3(%arg0: i32) -> (i32, i32, i32) {
    %c0_i32 = arith.constant 0 : i32
    %c0_i32_0 = arith.constant 0 : i32
    %c0_i32_1 = arith.constant 0 : i32
    %c0_i32_2 = arith.constant 0 : i32
    return %c0_i32, %c0_i32_0, %c0_i32_1 : i32, i32, i32
  }
  func.func @transform_4(%arg0: i32) -> (i32, i32) {
    %c0_i32 = arith.constant 0 : i32
    %c0_i32_0 = arith.constant 0 : i32
    %c0_i32_1 = arith.constant 0 : i32
    return %c0_i32, %c0_i32_0 : i32, i32
  }
  func.func @transform_5(%arg0: i32) -> (i32, i32, i32) {
    %c0_i32 = arith.constant 0 : i32
    %c0_i32_0 = arith.constant 0 : i32
    %c0_i32_1 = arith.constant 0 : i32
    %c0_i32_2 = arith.constant 0 : i32
    return %c0_i32, %c0_i32_0, %c0_i32_1 : i32, i32, i32
  }
  func.func @transform_6(%arg0: i32) -> (i32, i32) {
    %c0_i32 = arith.constant 0 : i32
    %c0_i32_0 = arith.constant 0 : i32
    %c0_i32_1 = arith.constant 0 : i32
    return %c0_i32, %c0_i32_0 : i32, i32
  }
  func.func @transform_7(%arg0: i32) -> (i32, i32, i32) {
    %c0_i32 = arith.constant 0 : i32
    %c0_i32_0 = arith.constant 0 : i32
    %c0_i32_1 = arith.constant 0 : i32
    return %arg0, %c0_i32, %c0_i32_0 : i32, i32, i32
  }
}

</mosaic_0001>

<bundles_post_ra>
// kernel: decoder_forward.1
= control target key start
LH: loop header
LB: loop body
LE: loop exit
PB: predicated region body
PF: predicated region fallthrough
CT: control target
= control target key end

     0   :  { %s32231_s24 = smov 0   ;;  %s39360_s0 = inlined_call_operand.vmem [shape: f32[2,128,256], index: 0, kind: input, shape index: {}]   ;;  %s39361_s1 = inlined_call_operand.vmem [shape: bf16[9,128,64], index: 1, kind: input, shape index: {}]   ;;  %s39362_s2 = inlined_call_operand.vmem [shape: f32[1,64], index: 2, kind: input, shape index: {}]   ;;  %s39363_s3 = inlined_call_operand.vmem [shape: bf16[9,64,64], index: 3, kind: input, shape index: {}]   ;;  %s39364_s4 = inlined_call_operand.vmem [shape: f32[1,64], index: 4, kind: input, shape index: {}]   ;;  %s39365_s5 = inlined_call_operand.vmem [shape: bf16[9,64,8], index: 5, kind: input, shape index: {}]   ;;  %s39366_s6 = inlined_call_operand.vmem [shape: f32[1,8], index: 6, kind: input, shape index: {}]   ;;  %s39367_s7 = inlined_call_operand.vmem [shape: f32[2,3,1024], index: 7, kind: output, shape index: {}]  }
   0x1 LB: > { %s23535_s25 = sadd.s32 4294967295, %s32187_s24   ;;  %p23539_p0 = scmp.ge.s32.totalorder %s32187_s24, 1  ;;  %s32187_s24 = sphi %s32231_s24, %s17_s24  }
   0x2   : > { %p237_p1 = scmp.lt.s32.totalorder %s32187_s24, 3 }
   0x4   : > { %p238_p2 = pnand %p23539_p0, %p237_p1 }
   0x6   : > { %241 = sbr.rel (%p238_p2) target bundleno = 5619 (0x15f3), region = 48 }
   0xd   : > { %p269_p3 = scmp.lt.s32.totalorder %s23535_s25, 1  ;;  %v32033_v0 = vld [vmem:[%s39361_s1] sm:$0xff]   ;;  %v32034_v1 = vld [vmem:[%s39361_s1 + $0x8] sm:$0xff]   ;;  %v32035_v2 = vld [vmem:[%s39361_s1 + $0x10] sm:$0xff]   ;;  %vm440_vm0 = vcmask 1040384   ;;  %vm2426_vm2 = vcmask 1046528  }
   0xe   : > { %26543 = vmatprep.subr.bf16.mxu0 %v32033_v0  ;;  %v32036_v6 = vld [vmem:[%s39361_s1 + $0x18] sm:$0xff]   ;;  %v32037_v11 = vld [vmem:[%s39361_s1 + $0x20] sm:$0xff]   ;;  %v32038_v13 = vld [vmem:[%s39361_s1 + $0x28] sm:$0xff]   ;;  %vm1413_vm1 = vsmask.f32 7424  ;;  %vm7466_vm3 = vcmask 523264  }
   0xf   : > { %s40413_s25 = smov (!%p269_p3, %s23535_s25), 1  ;;  %26544 = vmatpush3.bf16.msra.mxu0 %v32033_v0  ;;  %v32039_v16 = vld [vmem:[%s39361_s1 + $0x30] sm:$0xff]   ;;  %v32040_v18 = vld [vmem:[%s39361_s1 + $0x38] sm:$0xff]   ;;  %v32295_v29 = vld [vmem:[%s39361_s1 + $0xc0] sm:$0xff]  }
  0x10   : > { %s25101_s30 = sshll.u32 %s40413_s25, 8  ;;  %26545 = vmatprep.subr.bf16.mxu0 %v32034_v1  ;;  %s25102_s13 = sshll.u32 %s40413_s25, 5 }
  0x11   : > { %s32254_s12 = scalar_lea.vmem %s39360_s0, %s25101_s30  ;;  %s39248_s16 = scalar_lea.vmem %s39367_s7, %s25102_s13 }
  0x12   : > { %v280_v3 = vld [vmem:[%s32254_s12] sm:$0xff]  ;;  %v282_v4 = vld [vmem:[%s32254_s12 + $0x10] sm:$0xff]  ;;  %v281_v5 = vld [vmem:[%s32254_s12 + $0x8] sm:$0xff] }
  0x13   : > { %312 = vxpose.xlu0.b32.start [1/16] %v280_v3, 128  ;;  %26546 = vmatpush3.bf16.msra.mxu0 %v32034_v1  ;;  %v283_v7 = vld [vmem:[%s32254_s12 + $0x18] sm:$0xff]  ;;  %v284_v8 = vld [vmem:[%s32254_s12 + $0x20] sm:$0xff]  ;;  %v285_v9 = vld [vmem:[%s32254_s12 + $0x28] sm:$0xff] }
  0x14   : > { %26547 = vmatprep.subr.bf16.mxu0 %v32035_v2  ;;  %344 = vxpose.xlu1.b32.start [1/16] %v281_v5, 128  ;;  %v286_v10 = vld [vmem:[%s32254_s12 + $0x30] sm:$0xff]  ;;  %v287_v12 = vld [vmem:[%s32254_s12 + $0x38] sm:$0xff]  ;;  %v288_v14 = vld [vmem:[%s32254_s12 + $0x40] sm:$0xff] }
  0x15   : > { %v289_v15 = vld [vmem:[%s32254_s12 + $0x48] sm:$0xff]  ;;  %v290_v17 = vld [vmem:[%s32254_s12 + $0x50] sm:$0xff]  ;;  %v291_v19 = vld [vmem:[%s32254_s12 + $0x58] sm:$0xff] }
  0x16   : > { %v292_v20 = vld [vmem:[%s32254_s12 + $0x60] sm:$0xff]  ;;  %v293_v21 = vld [vmem:[%s32254_s12 + $0x68] sm:$0xff]  ;;  %v294_v22 = vld [vmem:[%s32254_s12 + $0x70] sm:$0xff] }
  0x17   : > { %313 = vxpose.xlu0.b32.cont [2/16] %v282_v4, 128  ;;  %26548 = vmatpush3.bf16.msra.mxu0 %v32035_v2  ;;  %v295_v23 = vld [vmem:[%s32254_s12 + $0x78] sm:$0xff]  ;;  %v296_v24 = vld [vmem:[%s32254_s12 + $0x80] sm:$0xff]  ;;  %v297_v25 = vld [vmem:[%s32254_s12 + $0x88] sm:$0xff] }
  0x18   : > { %26549 = vmatprep.subr.bf16.mxu0 %v32036_v6  ;;  %345 = vxpose.xlu1.b32.cont [2/16] %v283_v7, 128  ;;  %v298_v26 = vld [vmem:[%s32254_s12 + $0x90] sm:$0xff]  ;;  %v299_v27 = vld [vmem:[%s32254_s12 + $0x98] sm:$0xff]  ;;  %v300_v28 = vld [vmem:[%s32254_s12 + $0xa0] sm:$0xff] }
  0x19   : > { %v301_v30 = vld [vmem:[%s32254_s12 + $0xa8] sm:$0xff]  ;;  %v302_v31 = vld [vmem:[%s32254_s12 + $0xb0] sm:$0xff]  ;;  %v304_v32 = vld [vmem:[%s32254_s12 + $0xc0] sm:$0xff] }
  0x1a   : > { %v303_v33 = vld [vmem:[%s32254_s12 + $0xb8] sm:$0xff]  ;;  %v305_v34 = vld [vmem:[%s32254_s12 + $0xc8] sm:$0xff]  ;;  %v306_v35 = vld [vmem:[%s32254_s12 + $0xd0] sm:$0xff] }
  0x1b   : > { %314 = vxpose.xlu0.b32.cont [3/16] %v284_v8, 128  ;;  %26550 = vmatpush3.bf16.msra.mxu0 %v32036_v6  ;;  %v308_v36 = vld [vmem:[%s32254_s12 + $0xe0] sm:$0xff]  ;;  %v307_v37 = vld [vmem:[%s32254_s12 + $0xd8] sm:$0xff]  ;;  %v309_v38 = vld [vmem:[%s32254_s12 + $0xe8] sm:$0xff] }
  0x1c   : > { %346 = vxpose.xlu1.b32.cont [3/16] %v285_v9, 128  ;;  %26551 = vmatprep.subr.bf16.mxu0 %v32037_v11  ;;  %v310_v39 = vld [vmem:[%s32254_s12 + $0xf0] sm:$0xff]  ;;  %v311_v40 = vld [vmem:[%s32254_s12 + $0xf8] sm:$0xff]  ;;  %v32042_v8 = vld [vmem:[%s39361_s1 + $0xc8] sm:$0xff]  }
  0x1f   : > { %315 = vxpose.xlu0.b32.cont [4/16] %v286_v10, 128  ;;  %26552 = vmatpush3.bf16.msra.mxu0 %v32037_v11 }
  0x20   : > { %26553 = vmatprep.subr.bf16.mxu0 %v32038_v13  ;;  %347 = vxpose.xlu1.b32.cont [4/16] %v287_v12, 128 }
  0x23   : > { %316 = vxpose.xlu0.b32.cont [5/16] %v288_v14, 128  ;;  %26554 = vmatpush3.bf16.msra.mxu0 %v32038_v13 }
  0x24   : > { %26555 = vmatprep.subr.bf16.mxu0 %v32039_v16  ;;  %348 = vxpose.xlu1.b32.cont [5/16] %v289_v15, 128  ;;  %v32043_v15 = vld [vmem:[%s39361_s1 + $0xd0] sm:$0xff]  }
  0x27   : > { %317 = vxpose.xlu0.b32.cont [6/16] %v290_v17, 128  ;;  %26556 = vmatpush3.bf16.msra.mxu0 %v32039_v16 }
  0x28   : > { %26557 = vmatprep.subr.bf16.mxu0 %v32040_v18  ;;  %349 = vxpose.xlu1.b32.cont [6/16] %v291_v19, 128 }
  0x2b   : > { %318 = vxpose.xlu0.b32.cont [7/16] %v292_v20, 128  ;;  %26558 = vmatpush3.bf16.msra.mxu0 %v32040_v18 }
  0x2c   : > { %350 = vxpose.xlu1.b32.cont [7/16] %v293_v21, 128  ;;  %26591 = vmatprep.subr.bf16.mxu0 %v32295_v29 }
  0x2f   : > { %319 = vxpose.xlu0.b32.cont [8/16] %v294_v22, 128 }
  0x30   : > { %351 = vxpose.xlu1.b32.cont [8/16] %v295_v23, 128 }
  0x33   : > { %320 = vxpose.xlu0.b32.cont [9/16] %v296_v24, 128 }
  0x34   : > { %352 = vxpose.xlu1.b32.cont [9/16] %v297_v25, 128  ;;  %v32044_v25 = vld [vmem:[%s39361_s1 + $0xd8] sm:$0xff]  }
  0x37   : > { %321 = vxpose.xlu0.b32.cont [10/16] %v298_v26, 128 }
  0x38   : > { %353 = vxpose.xlu1.b32.cont [10/16] %v299_v27, 128 }
  0x3b   : > { %322 = vxpose.xlu0.b32.cont [11/16] %v300_v28, 128 }
  0x3c   : > { %354 = vxpose.xlu1.b32.cont [11/16] %v301_v30, 128 }
  0x3f   : > { %323 = vxpose.xlu0.b32.cont [12/16] %v302_v31, 128 }
  0x40   : > { %355 = vxpose.xlu1.b32.cont [12/16] %v303_v33, 128 }
  0x43   : > { %324 = vxpose.xlu0.b32.cont [13/16] %v304_v32, 128  ;;  %v32045_v32 = vld [vmem:[%s39361_s1 + $0xe0] sm:$0xff]  }
  0x44   : > { %356 = vxpose.xlu1.b32.cont [13/16] %v305_v34, 128 }
  0x47   : > { %325 = vxpose.xlu0.b32.cont [14/16] %v306_v35, 128 }
  0x48   : > { %357 = vxpose.xlu1.b32.cont [14/16] %v307_v37, 128 }
  0x4b   : > { %326 = vxpose.xlu0.b32.cont [15/16] %v308_v36, 128 }
  0x4c   : > { %358 = vxpose.xlu1.b32.cont [15/16] %v309_v38, 128 }
  0x4f   : > { %327 = vxpose.xlu0.b32.end [16/16] %v310_v39, 128 }
  0x50   : > { %359 = vxpose.xlu1.b32.end [16/16] %v311_v40, 128 }
  0x93   : > { %v328_v41 = vpop.trf.xlu0 }
  0x94   : > { %v32309_v42 = vpop.trf.xlu1  ;;  %v392_v55 = vrot.slane %v328_v41, 1  ;;  %v441_v56 = vrot.slane %v328_v41, 7 }
  0x96   : > { %v569_v3 = vsel %vm440_vm0, %v392_v55, %v441_v56  ;;  %v32047_v55 = vld [vmem:[%s39361_s1 + $0xf0] sm:$0xff]  }
  0x97   : > { %v329_v43 = vpop.trf.xlu0 }
  0x98   : > { %v442_v44 = vrot.slane %v329_v43, 7  ;;  %v537_v45 = vrot.slane %v329_v43, 5  ;;  %v32311_v46 = vpop.trf.xlu1  ;;  %v32046_v43 = vld [vmem:[%s39361_s1 + $0xe8] sm:$0xff]  }
  0x99   : > { %v466_v48 = vrot.slane %v32311_v46, 7  ;;  %v545_v49 = vrot.slane %v32311_v46, 5 }
  0x9a   : > { %v32314_v47 = vsel %vm440_vm0, %v442_v44, %v537_v45  ;;  %v443_v60 = vsel %vm440_vm0, %v441_v56, %v442_v44 }
  0x9b   : > { %v330_v50 = vpop.trf.xlu0  ;;  %v32321_v51 = vsel %vm440_vm0, %v466_v48, %v545_v49  ;;  %v32338_v6 = vpack.c.bf16 %v443_v60, %v569_v3 }
  0x9c   : > { %v393_v52 = vrot.slane %v330_v50, 1  ;;  %v444_v53 = vrot.slane %v330_v50, 7  ;;  %v32323_v54 = vpop.trf.xlu1 }
  0x9e   : > { %v570_v61 = vsel %vm440_vm0, %v393_v52, %v444_v53 }
  0x9f   : > { %v331_v57 = vpop.trf.xlu0 }
  0xa0   : > { %v445_v58 = vrot.slane %v331_v57, 7  ;;  %v538_v59 = vrot.slane %v331_v57, 5  ;;  %v32327_v62 = vpop.trf.xlu1 }
  0xa1   : > { %v469_v1 = vrot.slane %v32327_v62, 7  ;;  %v546_v2 = vrot.slane %v32327_v62, 5 }
  0xa2   : > { %v446_v63 = vsel %vm440_vm0, %v444_v53, %v445_v58  ;;  %v32331_v0 = vsel %vm440_vm0, %v445_v58, %v538_v59 }
  0xa3   : > { %v32336_v4 = vpack.c.bf16 %v446_v63, %v570_v61  ;;  %v332_v5 = vpop.trf.xlu0  ;;  %v32343_v7 = vsel %vm440_vm0, %v469_v1, %v546_v2 }
  0xa4   : > { %v394_v9 = vrot.slane %v332_v5, 1  ;;  %v447_v10 = vrot.slane %v332_v5, 7  ;;  %v32349_v11 = vpop.trf.xlu1  ;;  %v32048_v5 = vld [vmem:[%s39361_s1 + $0xf8] sm:$0xff]  }
  0xa5   : > { %26559 = vmatprep.mubr.bf16.mxu0 %v32336_v4  ;;  %v402_v46 = vrot.slane %v32349_v11, 1 }
  0xa6   : > { %26560 = vmatmul.mubr.bf16.vlgmr.msra.gmra.mrb[0].mxu0 %v32338_v6  ;;  %v571_v16 = vsel %vm440_vm0, %v394_v9, %v447_v10 }
  0xa7   : > { %26563 = vmatprep.mubr.bf16.mxu0 %v32336_v4  ;;  %v333_v12 = vpop.trf.xlu0  ;;  %26592 = vmatpush3.bf16.msra.mxu0 %v32295_v29 }
  0xa8   : > { %v448_v13 = vrot.slane %v333_v12, 7  ;;  %v539_v14 = vrot.slane %v333_v12, 5  ;;  %26593 = vmatprep.subr.bf16.mxu0 %v32042_v8  ;;  %v32358_v17 = vpop.trf.xlu1 }
  0xa9   : > { %v472_v20 = vrot.slane %v32358_v17, 7  ;;  %v547_v21 = vrot.slane %v32358_v17, 5 }
  0xaa   : > { %v449_v18 = vsel %vm440_vm0, %v447_v10, %v448_v13  ;;  %v32362_v19 = vsel %vm440_vm0, %v448_v13, %v539_v14 }
  0xab   : > { %v32366_v22 = vpack.c.bf16 %v449_v18, %v571_v16  ;;  %v334_v23 = vpop.trf.xlu0  ;;  %26594 = vmatpush3.bf16.msra.mxu0 %v32042_v8  ;;  %v32371_v24 = vsel %vm440_vm0, %v472_v20, %v547_v21 }
  0xac   : > { %26595 = vmatprep.subr.bf16.mxu0 %v32043_v15  ;;  %v395_v26 = vrot.slane %v334_v23, 1  ;;  %v450_v27 = vrot.slane %v334_v23, 7  ;;  %v32376_v28 = vpop.trf.xlu1 }
  0xad   : > { %v403_v62 = vrot.slane %v32376_v28, 1 }
  0xae   : > { %26564 = vmatmul.mubr.bf16.gmra.mrb[4].mxu0 %v32366_v22  ;;  %v572_v33 = vsel %vm440_vm0, %v395_v26, %v450_v27 }
  0xaf   : > { %v335_v29 = vpop.trf.xlu0  ;;  %26596 = vmatpush3.bf16.msra.mxu0 %v32043_v15  ;;  %v32432_v15 = vld [vmem:[%s39361_s1 + $0x180] sm:$0xff]  }
  0xb0   : > { %v451_v30 = vrot.slane %v335_v29, 7  ;;  %v540_v31 = vrot.slane %v335_v29, 5  ;;  %26597 = vmatprep.subr.bf16.mxu0 %v32044_v25  ;;  %v32383_v34 = vpop.trf.xlu1 }
  0xb1   : > { %v475_v37 = vrot.slane %v32383_v34, 7  ;;  %v548_v38 = vrot.slane %v32383_v34, 5 }
  0xb2   : > { %v452_v35 = vsel %vm440_vm0, %v450_v27, %v451_v30  ;;  %v32387_v36 = vsel %vm440_vm0, %v451_v30, %v540_v31 }
  0xb3   : > { %v32391_v39 = vpack.c.bf16 %v452_v35, %v572_v33  ;;  %v336_v40 = vpop.trf.xlu0  ;;  %26598 = vmatpush3.bf16.msra.mxu0 %v32044_v25  ;;  %v32396_v41 = vsel %vm440_vm0, %v475_v37, %v548_v38 }
  0xb4   : > { %26599 = vmatprep.subr.bf16.mxu0 %v32045_v32  ;;  %v396_v44 = vrot.slane %v336_v40, 1  ;;  %v453_v45 = vrot.slane %v336_v40, 7  ;;  %v32402_v49 = vpop.trf.xlu1 }
  0xb5   : > { %26567 = vmatprep.mubr.bf16.mxu0 %v32391_v39 }
  0xb6   : > { %v573_v56 = vsel %vm440_vm0, %v396_v44, %v453_v45 }
  0xb7   : > { %v337_v50 = vpop.trf.xlu0  ;;  %26600 = vmatpush3.bf16.msra.mxu0 %v32045_v32 }
  0xb8   : > { %v454_v52 = vrot.slane %v337_v50, 7  ;;  %v541_v53 = vrot.slane %v337_v50, 5  ;;  %26601 = vmatprep.subr.bf16.mxu0 %v32046_v43  ;;  %v32408_v57 = vpop.trf.xlu1 }
  0xb9   : > { %v478_v60 = vrot.slane %v32408_v57, 7  ;;  %v549_v61 = vrot.slane %v32408_v57, 5 }
  0xba   : > { %v455_v58 = vsel %vm440_vm0, %v453_v45, %v454_v52  ;;  %v32412_v59 = vsel %vm440_vm0, %v454_v52, %v541_v53 }
  0xbb   : > { %v32416_v63 = vpack.c.bf16 %v455_v58, %v573_v56  ;;  %v338_v2 = vpop.trf.xlu0  ;;  %26602 = vmatpush3.bf16.msra.mxu0 %v32046_v43  ;;  %v32421_v3 = vsel %vm440_vm0, %v478_v60, %v549_v61  ;;  %v400_v61 = vrot.slane %v32309_v42, 1 }
  0xbc   : > { %26603 = vmatprep.subr.bf16.mxu0 %v32047_v55  ;;  %v397_v8 = vrot.slane %v338_v2, 1  ;;  %v456_v9 = vrot.slane %v338_v2, 7  ;;  %v32427_v10 = vpop.trf.xlu1  ;;  %v465_v2 = vrot.slane %v32309_v42, 7 }
  0xbd   : > { %26568 = vmatmul.mubr.bf16.gmra.mrb[8].mxu0 %v32416_v63  ;;  %v480_v17 = vrot.slane %v32427_v10, 7 }
  0xbe   : > { %v574_v16 = vsel %vm440_vm0, %v397_v8, %v456_v9  ;;  %v468_v8 = vrot.slane %v32323_v54, 7 }
  0xbf   : > { %v339_v12 = vpop.trf.xlu0  ;;  %26604 = vmatpush3.bf16.msra.mxu0 %v32047_v55 }
  0xc0   : > { %v457_v13 = vrot.slane %v339_v12, 7  ;;  %v542_v14 = vrot.slane %v339_v12, 5  ;;  %26605 = vmatprep.subr.bf16.mxu0 %v32048_v5  ;;  %v32435_v18 = vpop.trf.xlu1 }
  0xc1   : > { %v481_v25 = vrot.slane %v32435_v18, 7  ;;  %v550_v26 = vrot.slane %v32435_v18, 5  ;;  %v32050_v18 = vld [vmem:[%s39361_s1 + $0x188] sm:$0xff]  }
  0xc2   : > { %v458_v21 = vsel %vm440_vm0, %v456_v9, %v457_v13  ;;  %v32439_v23 = vsel %vm440_vm0, %v457_v13, %v542_v14 }
  0xc3   : > { %v32443_v27 = vpack.c.bf16 %v458_v21, %v574_v16  ;;  %v340_v29 = vpop.trf.xlu0  ;;  %26606 = vmatpush3.bf16.msra.mxu0 %v32048_v5  ;;  %v32448_v30 = vsel %vm440_vm0, %v481_v25, %v550_v26  ;;  %v401_v5 = vrot.slane %v32323_v54, 1  ;;  %v577_v16 = vsel %vm440_vm0, %v400_v61, %v465_v2 }
  0xc4   : > { %26639 = vmatprep.subr.bf16.mxu0 %v32432_v15  ;;  %v398_v31 = vrot.slane %v340_v29, 1  ;;  %v459_v32 = vrot.slane %v340_v29, 7  ;;  %v32452_v33 = vpop.trf.xlu1  ;;  %v467_v21 = vsel %vm440_vm0, %v465_v2, %v466_v48  ;;  %v470_v26 = vsel %vm440_vm0, %v468_v8, %v469_v1 }
  0xc5   : > { %26571 = vmatprep.mubr.bf16.mxu0 %v32443_v27  ;;  %v578_v42 = vsel %vm440_vm0, %v401_v5, %v468_v8  ;;  %v471_v48 = vrot.slane %v32349_v11, 7  ;;  %v474_v1 = vrot.slane %v32376_v28, 7  ;;  %v404_v28 = vrot.slane %v32402_v49, 1 }
  0xc6   : > { %v575_v43 = vsel %vm440_vm0, %v398_v31, %v459_v32  ;;  %v483_v5 = vrot.slane %v32452_v33, 7 }
  0xc7   : > { %v341_v35 = vpop.trf.xlu0  ;;  %v476_v11 = vsel %vm440_vm0, %v474_v1, %v475_v37 }
  0xc8   : > { %v460_v38 = vrot.slane %v341_v35, 7  ;;  %v543_v40 = vrot.slane %v341_v35, 5  ;;  %v373_v44 = vpop.trf.xlu1  ;;  %v32488_v35 = vpack.c.bf16 %v470_v26, %v578_v42 }
  0xc9   : > { %v484_v52 = vrot.slane %v373_v44, 7  ;;  %v551_v53 = vrot.slane %v373_v44, 5 }
  0xca   : > { %v461_v45 = vsel %vm440_vm0, %v459_v32, %v460_v38  ;;  %v32457_v50 = vsel %vm440_vm0, %v460_v38, %v543_v40  ;;  %v32486_v32 = vpack.c.bf16 %v467_v21, %v577_v16  ;;  %v579_v38 = vsel %vm440_vm0, %v402_v46, %v471_v48  ;;  %v32057_v16 = vld [vmem:[%s39361_s1 + $0x40] sm:$0xff]  }
  0xcb   : > { %v32459_v55 = vpack.c.bf16 %v461_v45, %v575_v43  ;;  %v342_v56 = vpop.trf.xlu0  ;;  %v32462_v58 = vsel %vm440_vm0, %v484_v52, %v551_v53  ;;  %v473_v40 = vsel %vm440_vm0, %v471_v48, %v472_v20  ;;  %v580_v43 = vsel %vm440_vm0, %v403_v62, %v474_v1  ;;  %v32058_v1 = vld [vmem:[%s39361_s1 + $0x48] sm:$0xff]  }
  0xcc   : > { %v399_v9 = vrot.slane %v342_v56, 1  ;;  %v462_v12 = vrot.slane %v342_v56, 7  ;;  %v32505_v44 = vpack.c.bf16 %v473_v40, %v579_v38  ;;  %v32507_v45 = vpack.c.bf16 %v476_v11, %v580_v43  ;;  %v374_v21 = vpop.trf.xlu1  ;;  %v32059_v38 = vld [vmem:[%s39361_s1 + $0x50] sm:$0xff]   ;;  %v32060_v40 = vld [vmem:[%s39361_s1 + $0x58] sm:$0xff]   ;;  %v32061_v43 = vld [vmem:[%s39361_s1 + $0x60] sm:$0xff]  }
  0xcd   : > { %26572 = vmatmul.mubr.bf16.gmra.mrb[12].mxu0 %v32459_v55  ;;  %v477_v53 = vrot.slane %v32402_v49, 7  ;;  %v405_v56 = vrot.slane %v32427_v10, 1  ;;  %v482_v49 = vsel %vm440_vm0, %v480_v17, %v481_v25  ;;  %v406_v10 = vrot.slane %v32452_v33, 1  ;;  %v32051_v25 = vld [vmem:[%s39361_s1 + $0x190] sm:$0xff]   ;;  %v32052_v33 = vld [vmem:[%s39361_s1 + $0x198] sm:$0xff]   ;;  %v32062_v11 = vld [vmem:[%s39361_s1 + $0x68] sm:$0xff]  }
  0xce   : > { %v576_v54 = vsel %vm440_vm0, %v399_v9, %v462_v12  ;;  %v32055_v9 = vld [vmem:[%s39361_s1 + $0x1b0] sm:$0xff]   ;;  %v407_v26 = vrot.slane %v374_v21, 1 }
  0xcf   : > { %v32469_v13 = vpop.trf.xlu0  ;;  %v581_v20 = vsel %vm440_vm0, %v404_v28, %v477_v53  ;;  %v479_v34 = vsel %vm440_vm0, %v477_v53, %v478_v60  ;;  %v582_v37 = vsel %vm440_vm0, %v405_v56, %v480_v17  ;;  %v583_v57 = vsel %vm440_vm0, %v406_v10, %v483_v5  ;;  %v32063_v28 = vld [vmem:[%s39361_s1 + $0x70] sm:$0xff]   ;;  %v32064_v53 = vld [vmem:[%s39361_s1 + $0x78] sm:$0xff]   ;;  %v32065_v56 = vld [vmem:[%s39361_s1 + $0x100] sm:$0xff]  }
  0xd0   : > { %v463_v14 = vrot.slane %v32469_v13, 7  ;;  %v32523_v61 = vpack.c.bf16 %v479_v34, %v581_v20  ;;  %v32525_v2 = vpack.c.bf16 %v482_v49, %v582_v37  ;;  %v485_v60 = vsel %vm440_vm0, %v483_v5, %v484_v52  ;;  %v32054_v52 = vld [vmem:[%s39361_s1 + $0x1a8] sm:$0xff]   ;;  %v32574_v42 = vpop.trf.xlu1 }
  0xd1   : > { %v32533_v8 = vpack.c.bf16 %v485_v60, %v583_v57  ;;  %v1417_v17 = vshll.u32 %v32336_v4, 16  ;;  %v32626_v20 = vpack.c.bf16 %v32331_v0, %v32331_v0  ;;  %v1415_v37 = vshrl.u32 %v32336_v4, 16 }
  0xd2   : > { %v464_v29 = vsel %vm440_vm0, %v462_v12, %v463_v14  ;;  %v32056_v12 = vld [vmem:[%s39361_s1 + $0x1b8] sm:$0xff]   ;;  %v1429_v10 = vshll.u32 %v32338_v6, 16  ;;  %v32635_v57 = vpack.c.bf16 %v32314_v47, %v32314_v47  ;;  %v1453_v47 = vshll.u32 %v32391_v39, 16 }
  0xd3   : > { %v32484_v31 = vpack.c.bf16 %v464_v29, %v576_v54  ;;  %v486_v54 = vrot.slane %v374_v21, 7  ;;  %v487_v29 = vrot.slane %v32574_v42, 7  ;;  %v1419_v34 = vrot.slane %v1417_v17, 1  ;;  %v32066_v21 = vld [vmem:[%s39361_s1 + $0x108] sm:$0xff]  }
  0xd4   : > { %v1422_v49 = vshll.u32 %v32626_v20, 16  ;;  %v1431_v0 = vrot.slane %v1429_v10, 1  ;;  %v32677_v17 = vpack.c.bf16 %v32439_v23, %v32439_v23  ;;  %v1463_v23 = vshrl.u32 %v32416_v63, 16 }
  0xd5   : > { %26575 = vmatprep.mubr.bf16.mxu0 %v32484_v31  ;;  %v584_v46 = vsel %vm440_vm0, %v407_v26, %v486_v54  ;;  %v488_v48 = vsel %vm440_vm0, %v486_v54, %v487_v29  ;;  %v1420_v5 = vor.u32 %v1419_v34, %v1415_v37  ;;  %v32068_v37 = vld [vmem:[%s39361_s1 + $0x118] sm:$0xff]  }
  0xd6   : > { %26576 = vmatmul.mubr.bf16.gmra.mrb[16].mxu0 %v32486_v32  ;;  %v32583_v62 = vpack.c.bf16 %v488_v48, %v584_v46  ;;  %v1424_v60 = vrot.slane %v1422_v49, 1  ;;  %v1455_v46 = vrot.slane %v1453_v47, 1  ;;  %v544_v49 = vrot.slane %v32469_v13, 5  ;;  %v32070_v13 = vld [vmem:[%s39361_s1 + $0x128] sm:$0xff]  }
  0xd7   : > { %26579 = vmatprep.mubr.bf16.mxu0 %v32488_v35 }
  0xde   : > { %26580 = vmatmul.mubr.bf16.gmra.mrb[20].mxu0 %v32505_v44 }
  0xdf   : > { %26583 = vmatprep.mubr.bf16.mxu0 %v32507_v45 }
  0xe6   : > { %26584 = vmatmul.mubr.bf16.gmra.mrb[24].mxu0 %v32523_v61 }
  0xe7   : > { %26587 = vmatprep.mubr.bf16.mxu0 %v32525_v2 }
  0xee   : > { %26588 = vmatmul.mubr.bf16.gmra.mrb[28].mxu0 %v32533_v8 }
  0xef   : > { %26607 = vmatprep.mubr.bf16.mxu0 %v32338_v6 }
  0xf6   : > { %26608 = vmatmul.mubr.bf16.vlgmr.msra.gmra.mrb[0].mxu0 %v32336_v4 }
  0xf7   : > { %26640 = vmatpush3.bf16.msra.mxu0 %v32432_v15  ;;  %26611 = vmatprep.mubr.bf16.mxu0 %v32366_v22  ;;  %v32053_v15 = vld [vmem:[%s39361_s1 + $0x1a0] sm:$0xff]  }
  0xf8   : > { %26641 = vmatprep.subr.bf16.mxu0 %v32050_v18 }
  0xfb   : > { %26642 = vmatpush3.bf16.msra.mxu0 %v32050_v18  ;;  %v32639_v18 = vsel %vm1413_vm1, %v1420_v5, %v1424_v60 }
  0xfc   : > { %26643 = vmatprep.subr.bf16.mxu0 %v32051_v25 }
  0xfe   : > { %26612 = vmatmul.mubr.bf16.gmra.mrb[4].mxu0 %v32391_v39 }
  0xff   : > { %26615 = vmatprep.mubr.bf16.mxu0 %v32416_v63  ;;  %26644 = vmatpush3.bf16.msra.mxu0 %v32051_v25  ;;  %v1434_v25 = vshll.u32 %v32635_v57, 16 }
 0x100   : > { %26645 = vmatprep.subr.bf16.mxu0 %v32052_v33 }
 0x103   : > { %26646 = vmatpush3.bf16.msra.mxu0 %v32052_v33  ;;  %v1427_v33 = vshrl.u32 %v32338_v6, 16 }
 0x104   : > { %26647 = vmatprep.subr.bf16.mxu0 %v32053_v15 }
 0x106   : > { %26616 = vmatmul.mubr.bf16.gmra.mrb[8].mxu0 %v32443_v27 }
 0x107   : > { %26619 = vmatprep.mubr.bf16.mxu0 %v32459_v55  ;;  %26648 = vmatpush3.bf16.msra.mxu0 %v32053_v15  ;;  %v1432_v15 = vor.u32 %v1431_v0, %v1427_v33  ;;  %v1482_v33 = vshll.u32 %v32677_v17, 16 }
 0x108   : > { %26649 = vmatprep.subr.bf16.mxu0 %v32054_v52 }
 0x10b   : > { %26650 = vmatpush3.bf16.msra.mxu0 %v32054_v52  ;;  %v1441_v52 = vshll.u32 %v32366_v22, 16 }
 0x10c   : > { %26651 = vmatprep.subr.bf16.mxu0 %v32055_v9 }
 0x10d   : > { %v1443_v54 = vrot.slane %v1441_v52, 1  ;;  %v592_v52 = vsel %vm440_vm0, %v463_v14, %v544_v49  ;;  %v1513_v49 = vshll.u32 %v32486_v32, 16 }
 0x10e   : > { %26620 = vmatmul.mubr.bf16.gmra.mrb[12].mxu0 %v32484_v31 }
 0x10f   : > { %26623 = vmatprep.mubr.bf16.mxu0 %v32486_v32  ;;  %26652 = vmatpush3.bf16.msra.mxu0 %v32055_v9  ;;  %v1436_v9 = vrot.slane %v1434_v25, 1  ;;  %v1475_v25 = vshrl.u32 %v32443_v27, 16 }
 0x110   : > { %26653 = vmatprep.subr.bf16.mxu0 %v32056_v12 }
 0x111   : > { %v32658_v26 = vsel %vm1413_vm1, %v1432_v15, %v1436_v9  ;;  %v32069_v15 = vld [vmem:[%s39361_s1 + $0x120] sm:$0xff]   ;;  %v1489_v9 = vshll.u32 %v32459_v55, 16 }
 0x113   : > { %26654 = vmatpush3.bf16.msra.mxu0 %v32056_v12  ;;  %v32648_v12 = vpack.c.bf16 %v32362_v19, %v32362_v19  ;;  %v1439_v19 = vshrl.u32 %v32366_v22, 16 }
 0x114   : > { %26687 = vmatprep.subr.bf16.mxu0 %v32057_v16 }
 0x115   : > { %v1446_v48 = vshll.u32 %v32648_v12, 16 }
 0x116   : > { %26624 = vmatmul.mubr.bf16.gmra.mrb[16].mxu0 %v32488_v35 }
 0x117   : > { %26627 = vmatprep.mubr.bf16.mxu0 %v32505_v44 }
 0x11e   : > { %26628 = vmatmul.mubr.bf16.gmra.mrb[20].mxu0 %v32507_v45 }
 0x11f   : > { %26631 = vmatprep.mubr.bf16.mxu0 %v32523_v61 }
 0x126   : > { %26632 = vmatmul.mubr.bf16.gmra.mrb[24].mxu0 %v32525_v2 }
 0x127   : > { %26635 = vmatprep.mubr.bf16.mxu0 %v32533_v8 }
 0x12e   : > { %26636 = vmatmul.mubr.bf16.gmra.mrb[28].mxu0 %v32583_v62 }
 0x12f   : > { %26655 = vmatprep.mubr.bf16.mxu0 %v32336_v4 }
 0x136   : > { %26656 = vmatmul.mubr.bf16.vlgmr.msra.gmra.mrb[0].mxu0 %v32366_v22 }
 0x137   : > { %26688 = vmatpush3.bf16.msra.mxu0 %v32057_v16  ;;  %26659 = vmatprep.mubr.bf16.mxu0 %v32391_v39  ;;  %v32652_v16 = vpack.c.bf16 %v32387_v36, %v32387_v36  ;;  %v1451_v36 = vshrl.u32 %v32391_v39, 16 }
 0x138   : > { %26689 = vmatprep.subr.bf16.mxu0 %v32058_v1 }
 0x13b   : > { %26690 = vmatpush3.bf16.msra.mxu0 %v32058_v1  ;;  %v1458_v1 = vshll.u32 %v32652_v16, 16 }
 0x13c   : > { %26691 = vmatprep.subr.bf16.mxu0 %v32059_v38 }
 0x13d   : > { %v1460_v34 = vrot.slane %v1458_v1, 1  ;;  %v1491_v1 = vrot.slane %v1489_v9, 1  ;;  %v1523_v9 = vshrl.u32 %v32488_v35, 16 }
 0x13e   : > { %26660 = vmatmul.mubr.bf16.gmra.mrb[4].mxu0 %v32416_v63 }
 0x13f   : > { %26663 = vmatprep.mubr.bf16.mxu0 %v32443_v27  ;;  %26692 = vmatpush3.bf16.msra.mxu0 %v32059_v38  ;;  %v32067_v38 = vld [vmem:[%s39361_s1 + $0x110] sm:$0xff]  }
 0x140   : > { %26693 = vmatprep.subr.bf16.mxu0 %v32060_v40 }
 0x143   : > { %26694 = vmatpush3.bf16.msra.mxu0 %v32060_v40  ;;  %v1444_v40 = vor.u32 %v1443_v54, %v1439_v19  ;;  %v1501_v54 = vshll.u32 %v32484_v31, 16 }
 0x144   : > { %26695 = vmatprep.subr.bf16.mxu0 %v32061_v43 }
 0x146   : > { %26664 = vmatmul.mubr.bf16.gmra.mrb[8].mxu0 %v32459_v55 }
 0x147   : > { %26667 = vmatprep.mubr.bf16.mxu0 %v32484_v31  ;;  %26696 = vmatpush3.bf16.msra.mxu0 %v32061_v43  ;;  %v1465_v43 = vshll.u32 %v32416_v63, 16 }
 0x148   : > { %26697 = vmatprep.subr.bf16.mxu0 %v32062_v11 }
 0x149   : > { %v1467_v5 = vrot.slane %v1465_v43, 1 }
 0x14b   : > { %26698 = vmatpush3.bf16.msra.mxu0 %v32062_v11  ;;  %v1456_v11 = vor.u32 %v1455_v46, %v1451_v36  ;;  %v1468_v47 = vor.u32 %v1467_v5, %v1463_v23  ;;  %v32705_v46 = vpack.c.bf16 %v32457_v50, %v32457_v50  ;;  %v1484_v36 = vrot.slane %v1482_v33, 1  ;;  %v32072_v33 = vld [vmem:[%s39361_s1 + $0x138] sm:$0xff]  }
 0x14c   : > { %26699 = vmatprep.subr.bf16.mxu0 %v32063_v28  ;;  %v1503_v50 = vrot.slane %v1501_v54, 1  ;;  %v32734_v5 = vpack.c.bf16 %v32343_v7, %v32343_v7  ;;  %v1525_v23 = vshll.u32 %v32488_v35, 16 }
 0x14d   : > { %v1494_v43 = vshll.u32 %v32705_v46, 16 }
 0x14e   : > { %26668 = vmatmul.mubr.bf16.gmra.mrb[12].mxu0 %v32486_v32  ;;  %v1530_v54 = vshll.u32 %v32734_v5, 16 }
 0x14f   : > { %26671 = vmatprep.mubr.bf16.mxu0 %v32488_v35  ;;  %26700 = vmatpush3.bf16.msra.mxu0 %v32063_v28  ;;  %v1477_v28 = vshll.u32 %v32443_v27, 16 }
 0x150   : > { %26701 = vmatprep.subr.bf16.mxu0 %v32064_v53 }
 0x151   : > { %v1479_v60 = vrot.slane %v1477_v28, 1 }
 0x153   : > { %26702 = vmatpush3.bf16.msra.mxu0 %v32064_v53  ;;  %v32673_v53 = vpack.c.bf16 %v32412_v59, %v32412_v59  ;;  %v32688_v59 = vsel %vm1413_vm1, %v1456_v11, %v1460_v34  ;;  %v1499_v11 = vshrl.u32 %v32484_v31, 16  ;;  %v32729_v34 = vpack.c.bf16 %v32321_v51, %v32321_v51 }
 0x154   : > { %26735 = vmatprep.subr.bf16.mxu0 %v32065_v56 }
 0x155   : > { %v1470_v0 = vshll.u32 %v32673_v53, 16  ;;  %v1518_v7 = vshll.u32 %v32729_v34, 16 }
 0x156   : > { %26672 = vmatmul.mubr.bf16.gmra.mrb[16].mxu0 %v32505_v44 }
 0x157   : > { %26675 = vmatprep.mubr.bf16.mxu0 %v32507_v45  ;;  %v1472_v19 = vrot.slane %v1470_v0, 1  ;;  %v1496_v0 = vrot.slane %v1494_v43, 1 }
 0x159   : > { %v32713_v14 = vsel %vm1413_vm1, %v1468_v47, %v1472_v19  ;;  %v32073_v19 = vld [vmem:[%s39361_s1 + $0x1c0] sm:$0xff]  }
 0x15e   : > { %26676 = vmatmul.mubr.bf16.gmra.mrb[20].mxu0 %v32523_v61 }
 0x15f   : > { %26679 = vmatprep.mubr.bf16.mxu0 %v32525_v2 }
 0x166   : > { %26680 = vmatmul.mubr.bf16.gmra.mrb[24].mxu0 %v32533_v8 }
 0x167   : > { %26683 = vmatprep.mubr.bf16.mxu0 %v32583_v62 }
 0x16e   : > { %26684 = vmatmul.mubr.bf16.gmra.mrb[28].mxu0 %v32533_v8 }
 0x16f   : > { %26703 = vmatprep.mubr.bf16.mxu0 %v32639_v18 }
 0x176   : > { %26704 = vmatmul.mubr.bf16.vlgmr.msra.gmra.mrb[0].mxu0 %v32658_v26 }
 0x177   : > { %26736 = vmatpush3.bf16.msra.mxu0 %v32065_v56  ;;  %26707 = vmatprep.mubr.bf16.mxu0 %v32639_v18  ;;  %v1448_v56 = vrot.slane %v1446_v48, 1  ;;  %v32707_v48 = vpack.c.bf16 %v592_v52, %v592_v52  ;;  %v1515_v52 = vrot.slane %v1513_v49, 1 }
 0x178   : > { %26737 = vmatprep.subr.bf16.mxu0 %v32066_v21 }
 0x179   : > { %v32684_v10 = vsel %vm1413_vm1, %v1444_v40, %v1448_v56  ;;  %v1487_v40 = vshrl.u32 %v32459_v55, 16  ;;  %v1506_v28 = vshll.u32 %v32707_v48, 16  ;;  %v32071_v56 = vld [vmem:[%s39361_s1 + $0x130] sm:$0xff]  }
 0x17b   : > { %26738 = vmatpush3.bf16.msra.mxu0 %v32066_v21  ;;  %v1480_v21 = vor.u32 %v1479_v60, %v1475_v25  ;;  %v1504_v60 = vor.u32 %v1503_v50, %v1499_v11  ;;  %v1508_v25 = vrot.slane %v1506_v28, 1  ;;  %v1537_v50 = vshll.u32 %v32505_v44, 16 }
 0x17c   : > { %26739 = vmatprep.subr.bf16.mxu0 %v32067_v38  ;;  %v1532_v11 = vrot.slane %v1530_v54, 1  ;;  %v1549_v28 = vshll.u32 %v32507_v45, 16  ;;  %v1573_v54 = vshll.u32 %v32525_v2, 16 }
 0x17d   : > { %v32747_v47 = vsel %vm1413_vm1, %v1504_v60, %v1508_v25  ;;  %v32779_v25 = vpack.c.bf16 %v32421_v3, %v32421_v3 }
 0x17e   : > { %26708 = vmatmul.mubr.bf16.gmra.mrb[4].mxu0 %v32684_v10 }
 0x17f   : > { %26711 = vmatprep.mubr.bf16.mxu0 %v32688_v59  ;;  %26740 = vmatpush3.bf16.msra.mxu0 %v32067_v38  ;;  %v32717_v38 = vsel %vm1413_vm1, %v1480_v21, %v1484_v36  ;;  %v1527_v21 = vrot.slane %v1525_v23, 1  ;;  %v32757_v36 = vpack.c.bf16 %v32371_v24, %v32371_v24  ;;  %v1535_v24 = vshrl.u32 %v32505_v44, 16 }
 0x180   : > { %26741 = vmatprep.subr.bf16.mxu0 %v32068_v37  ;;  %v1551_v23 = vrot.slane %v1549_v28, 1  ;;  %v1566_v3 = vshll.u32 %v32779_v25, 16 }
 0x181   : > { %v1528_v43 = vor.u32 %v1527_v21, %v1523_v9  ;;  %v1542_v49 = vshll.u32 %v32757_v36, 16 }
 0x183   : > { %26742 = vmatpush3.bf16.msra.mxu0 %v32068_v37  ;;  %v1492_v37 = vor.u32 %v1491_v1, %v1487_v40  ;;  %v1520_v1 = vrot.slane %v1518_v7, 1  ;;  %v32762_v40 = vpack.c.bf16 %v32396_v41, %v32396_v41  ;;  %v32772_v60 = vsel %vm1413_vm1, %v1528_v43, %v1532_v11 }
 0x184   : > { %26743 = vmatprep.subr.bf16.mxu0 %v32069_v15  ;;  %v1547_v41 = vshrl.u32 %v32507_v45, 16  ;;  %v32784_v7 = vpack.c.bf16 %v32448_v30, %v32448_v30  ;;  %v1571_v30 = vshrl.u32 %v32525_v2, 16  ;;  %v1575_v11 = vrot.slane %v1573_v54, 1 }
 0x185   : > { %v32741_v51 = vsel %vm1413_vm1, %v1492_v37, %v1496_v0  ;;  %v1539_v37 = vrot.slane %v1537_v50, 1  ;;  %v1554_v0 = vshll.u32 %v32762_v40, 16 }
 0x186   : > { %26712 = vmatmul.mubr.bf16.gmra.mrb[8].mxu0 %v32713_v14  ;;  %v1552_v9 = vor.u32 %v1551_v23, %v1547_v41  ;;  %v1578_v28 = vshll.u32 %v32784_v7, 16  ;;  %v1585_v41 = vshll.u32 %v32533_v8, 16  ;;  %v1576_v23 = vor.u32 %v1575_v11, %v1571_v30  ;;  %v32078_v30 = vld [vmem:[%s39361_s1 + $0x1e8] sm:$0xff]   ;;  %v32079_v11 = vld [vmem:[%s39361_s1 + $0x1f0] sm:$0xff]  }
 0x187   : > { %26715 = vmatprep.mubr.bf16.mxu0 %v32717_v38  ;;  %26744 = vmatpush3.bf16.msra.mxu0 %v32069_v15  ;;  %v1511_v15 = vshrl.u32 %v32486_v32, 16  ;;  %v1556_v21 = vrot.slane %v1554_v0, 1 }
 0x188   : > { %26745 = vmatprep.subr.bf16.mxu0 %v32070_v13  ;;  %v1580_v0 = vrot.slane %v1578_v28, 1  ;;  %v32080_v28 = vld [vmem:[%s39361_s1 + $0x1f8] sm:$0xff]  }
 0x189   : > { %v32794_v43 = vsel %vm1413_vm1, %v1552_v9, %v1556_v21 }
 0x18a   : > { %v32811_v21 = vsel %vm1413_vm1, %v1576_v23, %v1580_v0  ;;  %v1870_v0 = vshll.u32 %v32583_v62, 16 }
 0x18b   : > { %26746 = vmatpush3.bf16.msra.mxu0 %v32070_v13  ;;  %v1516_v13 = vor.u32 %v1515_v52, %v1511_v15  ;;  %v1544_v15 = vrot.slane %v1542_v49, 1  ;;  %v1561_v52 = vshll.u32 %v32523_v61, 16  ;;  %v1568_v49 = vrot.slane %v1566_v3, 1  ;;  %v32075_v3 = vld [vmem:[%s39361_s1 + $0x1d0] sm:$0xff]  }
 0x18c   : > { %26747 = vmatprep.subr.bf16.mxu0 %v32071_v56 }
 0x18d   : > { %v1563_v50 = vrot.slane %v1561_v52, 1  ;;  %v1587_v52 = vrot.slane %v1585_v41, 1 }
 0x18e   : > { %26716 = vmatmul.mubr.bf16.gmra.mrb[12].mxu0 %v32741_v51 }
 0x18f   : > { %26719 = vmatprep.mubr.bf16.mxu0 %v32747_v47  ;;  %26748 = vmatpush3.bf16.msra.mxu0 %v32071_v56  ;;  %v32766_v56 = vsel %vm1413_vm1, %v1516_v13, %v1520_v1  ;;  %v1559_v1 = vshrl.u32 %v32523_v61, 16 }
 0x190   : > { %26749 = vmatprep.subr.bf16.mxu0 %v32072_v33 }
 0x193   : > { %26750 = vmatpush3.bf16.msra.mxu0 %v32072_v33  ;;  %v1540_v33 = vor.u32 %v1539_v37, %v1535_v24  ;;  %v32801_v24 = vpack.c.bf16 %v32462_v58, %v32462_v58  ;;  %v1564_v37 = vor.u32 %v1563_v50, %v1559_v1  ;;  %v32074_v50 = vld [vmem:[%s39361_s1 + $0x1c8] sm:$0xff]  }
 0x194   : > { %26783 = vmatprep.subr.bf16.mxu0 %v32073_v19 }
 0x195   : > { %v32788_v13 = vsel %vm1413_vm1, %v1540_v33, %v1544_v15  ;;  %v32805_v33 = vsel %vm1413_vm1, %v1564_v37, %v1568_v49  ;;  %v1583_v15 = vshrl.u32 %v32533_v8, 16  ;;  %v1590_v9 = vshll.u32 %v32801_v24, 16  ;;  %v32081_v37 = vld [vmem:[%s39361_s1 + $0x80] sm:$0xff]  }
 0x196   : > { %26720 = vmatmul.mubr.bf16.gmra.mrb[16].mxu0 %v32766_v56  ;;  %v552_v49 = vrot.slane %v32574_v42, 5 }
 0x197   : > { %26723 = vmatprep.mubr.bf16.mxu0 %v32772_v60  ;;  %v1588_v58 = vor.u32 %v1587_v52, %v1583_v15  ;;  %v1592_v54 = vrot.slane %v1590_v9, 1  ;;  %v1868_v15 = vshrl.u32 %v32583_v62, 16  ;;  %v1872_v52 = vrot.slane %v1870_v0, 1 }
 0x198   : > { %v600_v41 = vsel %vm440_vm0, %v487_v29, %v552_v49  ;;  %v2449_v49 = vrot.slane %v32707_v48, 1  ;;  %v2454_v48 = vrot.slane %v32488_v35, 1  ;;  %v2460_v35 = vrot.slane %v32507_v45, 1 }
 0x199   : > { %v32815_v1 = vsel %vm1413_vm1, %v1588_v58, %v1592_v54  ;;  %v32859_v23 = vpack.c.bf16 %v600_v41, %v600_v41  ;;  %v1873_v42 = vor.u32 %v1872_v52, %v1868_v15  ;;  %v32082_v54 = vld [vmem:[%s39361_s1 + $0x88] sm:$0xff]   ;;  %v32096_v41 = vld [vmem:[%s39361_s1 + $0x178] sm:$0xff]   ;;  %v2455_v52 = vrot.slane %v32734_v5, 1 }
 0x19a   : > { %v2461_v5 = vrot.slane %v32762_v40, 1  ;;  %v2467_v45 = vrot.slane %v32784_v7, 1  ;;  %v32102_v7 = vld [vmem:[%s39361_s1 + $0x228] sm:$0xff]  }
 0x19b   : > { %v1875_v9 = vshll.u32 %v32859_v23, 16 }
 0x19d   : > { %v1877_v58 = vrot.slane %v1875_v9, 1 }
 0x19e   : > { %26724 = vmatmul.mubr.bf16.gmra.mrb[20].mxu0 %v32788_v13 }
 0x19f   : > { %26727 = vmatprep.mubr.bf16.mxu0 %v32794_v43  ;;  %v1878_v29 = vsel %vm1413_vm1, %v1873_v42, %v1877_v58  ;;  %v32988_v42 = vsel %vm2426_vm2, %v2454_v48, %v2455_v52  ;;  %v32190_v52 = vmov 1983009808  }
 0x1a6   : > { %26728 = vmatmul.mubr.bf16.gmra.mrb[24].mxu0 %v32805_v33 }
 0x1a7   : > { %26731 = vmatprep.mubr.bf16.mxu0 %v32811_v21 }
 0x1ae   : > { %26732 = vmatmul.mubr.bf16.gmra.mrb[28].mxu0 %v32815_v1 }
 0x1af   : > { %26751 = vmatprep.mubr.bf16.mxu0 %v32658_v26  ;;  %v32076_v26 = vld [vmem:[%s39361_s1 + $0x1d8] sm:$0xff]  }
 0x1b6   : > { %26752 = vmatmul.mubr.bf16.vlgmr.msra.gmra.mrb[0].mxu0 %v32639_v18 }
 0x1b7   : > { %26784 = vmatpush3.bf16.msra.mxu0 %v32073_v19  ;;  %26755 = vmatprep.mubr.bf16.mxu0 %v32684_v10  ;;  %v32077_v19 = vld [vmem:[%s39361_s1 + $0x1e0] sm:$0xff]  }
 0x1b8   : > { %26785 = vmatprep.subr.bf16.mxu0 %v32074_v50 }
 0x1bb   : > { %26786 = vmatpush3.bf16.msra.mxu0 %v32074_v50  ;;  %v32083_v50 = vld [vmem:[%s39361_s1 + $0x90] sm:$0xff]  }
 0x1bc   : > { %26787 = vmatprep.subr.bf16.mxu0 %v32075_v3 }
 0x1be   : > { %26756 = vmatmul.mubr.bf16.gmra.mrb[4].mxu0 %v32688_v59 }
 0x1bf   : > { %26759 = vmatprep.mubr.bf16.mxu0 %v32713_v14  ;;  %26788 = vmatpush3.bf16.msra.mxu0 %v32075_v3  ;;  %v32092_v3 = vld [vmem:[%s39361_s1 + $0x158] sm:$0xff]  }
 0x1c0   : > { %26789 = vmatprep.subr.bf16.mxu0 %v32076_v26 }
 0x1c3   : > { %26790 = vmatpush3.bf16.msra.mxu0 %v32076_v26 }
 0x1c4   : > { %26791 = vmatprep.subr.bf16.mxu0 %v32077_v19 }
 0x1c6   : > { %26760 = vmatmul.mubr.bf16.gmra.mrb[8].mxu0 %v32717_v38 }
 0x1c7   : > { %26763 = vmatprep.mubr.bf16.mxu0 %v32741_v51  ;;  %26792 = vmatpush3.bf16.msra.mxu0 %v32077_v19 }
 0x1c8   : > { %26793 = vmatprep.subr.bf16.mxu0 %v32078_v30 }
 0x1cb   : > { %26794 = vmatpush3.bf16.msra.mxu0 %v32078_v30  ;;  %v2443_v30 = vrot.slane %v32677_v17, 1  ;;  %v2448_v17 = vrot.slane %v32484_v31, 1  ;;  %v2451_v31 = vrot.slane %v32486_v32, 1  ;;  %v2457_v32 = vrot.slane %v32505_v44, 1 }
 0x1cc   : > { %26795 = vmatprep.subr.bf16.mxu0 %v32079_v11  ;;  %v2464_v44 = vrot.slane %v32779_v25, 1  ;;  %v32101_v25 = vld [vmem:[%s39361_s1 + $0x220] sm:$0xff]  }
 0x1cd   : > { %v32973_v15 = vsel %vm2426_vm2, %v2448_v17, %v2449_v49 }
 0x1ce   : > { %26764 = vmatmul.mubr.bf16.gmra.mrb[12].mxu0 %v32747_v47 }
 0x1cf   : > { %26767 = vmatprep.mubr.bf16.mxu0 %v32766_v56  ;;  %26796 = vmatpush3.bf16.msra.mxu0 %v32079_v11  ;;  %v32094_v11 = vld [vmem:[%s39361_s1 + $0x168] sm:$0xff]  }
 0x1d0   : > { %26797 = vmatprep.subr.bf16.mxu0 %v32080_v28 }
 0x1d3   : > { %26798 = vmatpush3.bf16.msra.mxu0 %v32080_v28 }
 0x1d4   : > { %26831 = vmatprep.subr.bf16.mxu0 %v32081_v37 }
 0x1d6   : > { %26768 = vmatmul.mubr.bf16.gmra.mrb[16].mxu0 %v32772_v60 }
 0x1d7   : > { %26771 = vmatprep.mubr.bf16.mxu0 %v32788_v13 }
 0x1de   : > { %26772 = vmatmul.mubr.bf16.gmra.mrb[20].mxu0 %v32794_v43 }
 0x1df   : > { %26775 = vmatprep.mubr.bf16.mxu0 %v32805_v33 }
 0x1e6   : > { %26776 = vmatmul.mubr.bf16.gmra.mrb[24].mxu0 %v32811_v21 }
 0x1e7   : > { %26779 = vmatprep.mubr.bf16.mxu0 %v32815_v1 }
 0x1ee   : > { %26780 = vmatmul.mubr.bf16.gmra.mrb[28].mxu0 %v1878_v29 }
 0x1ef   : > { %26799 = vmatprep.mubr.bf16.mxu0 %v32639_v18  ;;  %v32084_v18 = vld [vmem:[%s39361_s1 + $0x98] sm:$0xff]  }
 0x1f6   : > { %26800 = vmatmul.mubr.bf16.vlgmr.msra.gmra.mrb[0].mxu0 %v32684_v10  ;;  %v32085_v10 = vld [vmem:[%s39361_s1 + $0xa0] sm:$0xff]  }
 0x1f7   : > { %26832 = vmatpush3.bf16.msra.mxu0 %v32081_v37  ;;  %26803 = vmatprep.mubr.bf16.mxu0 %v32688_v59  ;;  %v32086_v59 = vld [vmem:[%s39361_s1 + $0xa8] sm:$0xff]  }
 0x1f8   : > { %26833 = vmatprep.subr.bf16.mxu0 %v32082_v54 }
 0x1fb   : > { %26834 = vmatpush3.bf16.msra.mxu0 %v32082_v54  ;;  %v2463_v54 = vrot.slane %v32523_v61, 1  ;;  %v32098_v61 = vld [vmem:[%s39361_s1 + $0x208] sm:$0xff]  }
 0x1fc   : > { %26835 = vmatprep.subr.bf16.mxu0 %v32083_v50 }
 0x1fd   : > { %v2465_v40 = vsel %vm2426_vm2, %v2463_v54, %v2464_v44 }
 0x1fe   : > { %26804 = vmatmul.mubr.bf16.gmra.mrb[4].mxu0 %v32713_v14  ;;  %v32087_v14 = vld [vmem:[%s39361_s1 + $0xb0] sm:$0xff]  }
 0x1ff   : > { %26807 = vmatprep.mubr.bf16.mxu0 %v32717_v38  ;;  %26836 = vmatpush3.bf16.msra.mxu0 %v32083_v50  ;;  %v32088_v38 = vld [vmem:[%s39361_s1 + $0xb8] sm:$0xff]  }
 0x200   : > { %26837 = vmatprep.subr.bf16.mxu0 %v32084_v18 }
 0x203   : > { %26838 = vmatpush3.bf16.msra.mxu0 %v32084_v18  ;;  %v2469_v18 = vrot.slane %v32533_v8, 1  ;;  %v32100_v8 = vld [vmem:[%s39361_s1 + $0x218] sm:$0xff]  }
 0x204   : > { %26839 = vmatprep.subr.bf16.mxu0 %v32085_v10 }
 0x206   : > { %26808 = vmatmul.mubr.bf16.gmra.mrb[8].mxu0 %v32741_v51  ;;  %v32089_v51 = vld [vmem:[%s39361_s1 + $0x140] sm:$0xff]  }
 0x207   : > { %26811 = vmatprep.mubr.bf16.mxu0 %v32747_v47  ;;  %26840 = vmatpush3.bf16.msra.mxu0 %v32085_v10  ;;  %v2427_v47 = vrot.slane %v32336_v4, 1  ;;  %v2470_v10 = vrot.slane %v32801_v24, 1  ;;  %v32103_v24 = vld [vmem:[%s39361_s1 + $0x230] sm:$0xff]  }
 0x208   : > { %26841 = vmatprep.subr.bf16.mxu0 %v32086_v59 }
 0x20b   : > { %26842 = vmatpush3.bf16.msra.mxu0 %v32086_v59  ;;  %v2471_v59 = vsel %vm2426_vm2, %v2469_v18, %v2470_v10 }
 0x20c   : > { %26843 = vmatprep.subr.bf16.mxu0 %v32087_v14 }
 0x20e   : > { %26812 = vmatmul.mubr.bf16.gmra.mrb[12].mxu0 %v32766_v56  ;;  %v2428_v56 = vrot.slane %v32626_v20, 1  ;;  %v32091_v20 = vld [vmem:[%s39361_s1 + $0x150] sm:$0xff]  }
 0x20f   : > { %26815 = vmatprep.mubr.bf16.mxu0 %v32772_v60  ;;  %26844 = vmatpush3.bf16.msra.mxu0 %v32087_v14  ;;  %v32104_v14 = vld [vmem:[%s39361_s1 + $0x238] sm:$0xff]  }
 0x210   : > { %26845 = vmatprep.subr.bf16.mxu0 %v32088_v38  ;;  %v32909_v60 = vsel %vm2426_vm2, %v2427_v47, %v2428_v56  ;;  %v32107_v56 = vld [vmem:[%s39363_s3 + $0x10] sm:$0xff]  }
 0x213   : > { %26846 = vmatpush3.bf16.msra.mxu0 %v32088_v38  ;;  %v2747_v38 = vrot.slane %v32583_v62, 1  ;;  %v32105_v62 = vld [vmem:[%s39363_s3] sm:$0xff]  }
 0x214   : > { %26879 = vmatprep.subr.bf16.mxu0 %v32089_v51  ;;  %26975 = vmatprep.subr.bf16.mxu1 %v32105_v62 }
 0x215   : > { %26976 = vmatpush3.bf16.msra.mxu1 %v32105_v62 }
 0x216   : > { %26816 = vmatmul.mubr.bf16.gmra.mrb[16].mxu0 %v32788_v13  ;;  %v2431_v13 = vrot.slane %v32635_v57, 1  ;;  %v2433_v57 = vrot.slane %v32366_v22, 1  ;;  %v32093_v22 = vld [vmem:[%s39361_s1 + $0x160] sm:$0xff]  }
 0x217   : > { %26819 = vmatprep.mubr.bf16.mxu0 %v32794_v43  ;;  %v2430_v43 = vrot.slane %v32338_v6, 1  ;;  %v2434_v6 = vrot.slane %v32648_v12, 1  ;;  %v2440_v12 = vrot.slane %v32673_v53, 1  ;;  %v2446_v53 = vrot.slane %v32705_v46, 1 }
 0x218   : > { %v2452_v46 = vrot.slane %v32729_v34, 1  ;;  %v2458_v34 = vrot.slane %v32757_v36, 1  ;;  %v2466_v36 = vrot.slane %v32525_v2, 1  ;;  %v32099_v2 = vld [vmem:[%s39361_s1 + $0x210] sm:$0xff]  }
 0x219   : > { %v32918_v4 = vsel %vm2426_vm2, %v2430_v43, %v2431_v13  ;;  %v32933_v26 = vsel %vm2426_vm2, %v2433_v57, %v2434_v6  ;;  %v3335_v43 = vlaneseq }
 0x21a   : > { %v32984_v9 = vsel %vm2426_vm2, %v2451_v31, %v2452_v46  ;;  %v32996_v58 = vsel %vm2426_vm2, %v2457_v32, %v2458_v34  ;;  %v2468_v50 = vsel %vm2426_vm2, %v2466_v36, %v2467_v45 }
 0x21b   : > { %v33074_v6 = vshrl.u32 %v3335_v43, 7 }
 0x21d   : > { %v33105_v48 = vsub.s32 0, %v33074_v6 }
 0x21e   : > { %26820 = vmatmul.mubr.bf16.gmra.mrb[20].mxu0 %v32805_v33  ;;  %v32090_v33 = vld [vmem:[%s39361_s1 + $0x148] sm:$0xff]  }
 0x21f   : > { %26823 = vmatprep.mubr.bf16.mxu0 %v32811_v21  ;;  %v2436_v21 = vrot.slane %v32391_v39, 1  ;;  %v2439_v39 = vrot.slane %v32416_v63, 1  ;;  %v32095_v63 = vld [vmem:[%s39361_s1 + $0x170] sm:$0xff]  }
 0x221   : > { %v32951_v28 = vsel %vm2426_vm2, %v2439_v39, %v2440_v12 }
 0x226   : > { %26824 = vmatmul.mubr.bf16.gmra.mrb[24].mxu0 %v32815_v1 }
 0x227   : > { %26827 = vmatprep.mubr.bf16.mxu0 %v1878_v29  ;;  %v33000_v29 = vsel %vm2426_vm2, %v2460_v35, %v2461_v5 }
 0x22e   : > { %26828 = vmatmul.mubr.bf16.gmra.mrb[28].mxu0 %v32815_v1  ;;  %v2437_v1 = vrot.slane %v32652_v16, 1  ;;  %v2442_v16 = vrot.slane %v32443_v27, 1  ;;  %v2445_v27 = vrot.slane %v32459_v55, 1  ;;  %v32097_v55 = vld [vmem:[%s39361_s1 + $0x200] sm:$0xff]  }
 0x22f   : > { %26847 = vmatprep.mubr.bf16.mxu0 %v32909_v60 }
 0x230   : > { %v32937_v19 = vsel %vm2426_vm2, %v2436_v21, %v2437_v1  ;;  %v32955_v37 = vsel %vm2426_vm2, %v2442_v16, %v2443_v30  ;;  %v32969_v0 = vsel %vm2426_vm2, %v2445_v27, %v2446_v53  ;;  %v32108_v16 = vld [vmem:[%s39363_s3 + $0x18] sm:$0xff]  }
 0x236   : > { %26848 = vmatmul.mubr.bf16.vlgmr.msra.gmra.mrb[0].mxu0 %v32918_v4 }
 0x237   : > { %26880 = vmatpush3.bf16.msra.mxu0 %v32089_v51  ;;  %26851 = vmatprep.mubr.bf16.mxu0 %v32909_v60  ;;  %v2748_v51 = vrot.slane %v32859_v23, 1  ;;  %v32106_v23 = vld [vmem:[%s39363_s3 + $0x8] sm:$0xff]  }
 0x238   : > { %26881 = vmatprep.subr.bf16.mxu0 %v32090_v33  ;;  %26977 = vmatprep.subr.bf16.mxu1 %v32106_v23 }
 0x239   : > { %v2749_v47 = vsel %vm2426_vm2, %v2747_v38, %v2748_v51  ;;  %26978 = vmatpush3.bf16.msra.mxu1 %v32106_v23 }
 0x23a   : > { %26979 = vmatprep.subr.bf16.mxu1 %v32107_v56 }
 0x23b   : > { %26882 = vmatpush3.bf16.msra.mxu0 %v32090_v33  ;;  %v33071_v33 = vld [vmem:[%s39362_s2] ss:$0 sm:$0xff] }
 0x23c   : > { %26883 = vmatprep.subr.bf16.mxu0 %v32091_v20 }
 0x23d   : > { %26980 = vmatpush3.bf16.msra.mxu1 %v32107_v56 }
 0x23e   : > { %26852 = vmatmul.mubr.bf16.gmra.mrb[4].mxu0 %v32933_v26  ;;  %26981 = vmatprep.subr.bf16.mxu1 %v32108_v16 }
 0x23f   : > { %26855 = vmatprep.mubr.bf16.mxu0 %v32937_v19  ;;  %26884 = vmatpush3.bf16.msra.mxu0 %v32091_v20 }
 0x240   : > { %26885 = vmatprep.subr.bf16.mxu0 %v32092_v3 }
 0x241   : > { %26982 = vmatpush3.bf16.msra.mxu1 %v32108_v16 }
 0x243   : > { %26886 = vmatpush3.bf16.msra.mxu0 %v32092_v3 }
 0x244   : > { %26887 = vmatprep.subr.bf16.mxu0 %v32093_v22 }
 0x246   : > { %26856 = vmatmul.mubr.bf16.gmra.mrb[8].mxu0 %v32951_v28 }
 0x247   : > { %26859 = vmatprep.mubr.bf16.mxu0 %v32955_v37  ;;  %26888 = vmatpush3.bf16.msra.mxu0 %v32093_v22 }
 0x248   : > { %26889 = vmatprep.subr.bf16.mxu0 %v32094_v11 }
 0x24b   : > { %26890 = vmatpush3.bf16.msra.mxu0 %v32094_v11 }
 0x24c   : > { %26891 = vmatprep.subr.bf16.mxu0 %v32095_v63 }
 0x24e   : > { %26860 = vmatmul.mubr.bf16.gmra.mrb[12].mxu0 %v32969_v0 }
 0x24f   : > { %26863 = vmatprep.mubr.bf16.mxu0 %v32973_v15  ;;  %26892 = vmatpush3.bf16.msra.mxu0 %v32095_v63 }
 0x250   : > { %26893 = vmatprep.subr.bf16.mxu0 %v32096_v41 }
 0x253   : > { %26894 = vmatpush3.bf16.msra.mxu0 %v32096_v41 }
 0x254   : > { %26927 = vmatprep.subr.bf16.mxu0 %v32097_v55 }
 0x256   : > { %26864 = vmatmul.mubr.bf16.gmra.mrb[16].mxu0 %v32984_v9 }
 0x257   : > { %26867 = vmatprep.mubr.bf16.mxu0 %v32988_v42 }
 0x25e   : > { %26868 = vmatmul.mubr.bf16.gmra.mrb[20].mxu0 %v32996_v58 }
 0x25f   : > { %26871 = vmatprep.mubr.bf16.mxu0 %v33000_v29 }
 0x266   : > { %26872 = vmatmul.mubr.bf16.gmra.mrb[24].mxu0 %v2465_v40 }
 0x267   : > { %26875 = vmatprep.mubr.bf16.mxu0 %v2468_v50 }
 0x26e   : > { %26876 = vmatmul.mubr.bf16.gmra.mrb[28].mxu0 %v2471_v59 }
 0x26f   : > { %26895 = vmatprep.mubr.bf16.mxu0 %v32918_v4 }
 0x276   : > { %26896 = vmatmul.mubr.bf16.vlgmr.msra.gmra.mrb[0].mxu0 %v32909_v60 }
 0x277   : > { %26928 = vmatpush3.bf16.msra.mxu0 %v32097_v55  ;;  %26899 = vmatprep.mubr.bf16.mxu0 %v32933_v26 }
 0x278   : > { %26929 = vmatprep.subr.bf16.mxu0 %v32098_v61 }
 0x27b   : > { %26930 = vmatpush3.bf16.msra.mxu0 %v32098_v61 }
 0x27c   : > { %26931 = vmatprep.subr.bf16.mxu0 %v32099_v2 }
 0x27e   : > { %26900 = vmatmul.mubr.bf16.gmra.mrb[4].mxu0 %v32937_v19 }
 0x27f   : > { %26903 = vmatprep.mubr.bf16.mxu0 %v32951_v28  ;;  %26932 = vmatpush3.bf16.msra.mxu0 %v32099_v2 }
 0x280   : > { %26933 = vmatprep.subr.bf16.mxu0 %v32100_v8 }
 0x283   : > { %26934 = vmatpush3.bf16.msra.mxu0 %v32100_v8 }
 0x284   : > { %26935 = vmatprep.subr.bf16.mxu0 %v32101_v25 }
 0x286   : > { %26904 = vmatmul.mubr.bf16.gmra.mrb[8].mxu0 %v32955_v37 }
 0x287   : > { %26907 = vmatprep.mubr.bf16.mxu0 %v32969_v0  ;;  %26936 = vmatpush3.bf16.msra.mxu0 %v32101_v25 }
 0x288   : > { %26937 = vmatprep.subr.bf16.mxu0 %v32102_v7 }
 0x28b   : > { %26938 = vmatpush3.bf16.msra.mxu0 %v32102_v7 }
 0x28c   : > { %26939 = vmatprep.subr.bf16.mxu0 %v32103_v24 }
 0x28e   : > { %26908 = vmatmul.mubr.bf16.gmra.mrb[12].mxu0 %v32973_v15 }
 0x28f   : > { %26911 = vmatprep.mubr.bf16.mxu0 %v32984_v9  ;;  %26940 = vmatpush3.bf16.msra.mxu0 %v32103_v24 }
 0x290   : > { %26941 = vmatprep.subr.bf16.mxu0 %v32104_v14 }
 0x293   : > { %26942 = vmatpush3.bf16.msra.mxu0 %v32104_v14 }
 0x296   : > { %26912 = vmatmul.mubr.bf16.gmra.mrb[16].mxu0 %v32988_v42 }
 0x297   : > { %26915 = vmatprep.mubr.bf16.mxu0 %v32996_v58 }
 0x29e   : > { %26916 = vmatmul.mubr.bf16.gmra.mrb[20].mxu0 %v33000_v29 }
 0x29f   : > { %26919 = vmatprep.mubr.bf16.mxu0 %v2465_v40 }
 0x2a6   : > { %26920 = vmatmul.mubr.bf16.gmra.mrb[24].mxu0 %v2468_v50 }
 0x2a7   : > { %26923 = vmatprep.mubr.bf16.mxu0 %v2471_v59 }
 0x2ae   : > { %26924 = vmatmul.mubr.bf16.gmra.mrb[28].mxu0 %v2749_v47 }
 0x2af   : > { %26943 = vmatprep.mubr.bf16.mxu0 %v32909_v60  ;;  %v32189_v60 = vmov 1966171168  }
 0x2b0   : > { %v3333_v13 = vunpack.c.l.s4 %v32189_v60 }
 0x2b2   : > { %v3334_v57 = vunpack.c.0.s8 %v3333_v13 }
 0x2b4   : > { %v33082_v39 = vsub.s32 %v3334_v57, %v33074_v6 }
 0x2b6   : > { %26944 = vmatmul.mubr.bf16.vlgmr.msra.gmra.mrb[0].mxu0 %v32933_v26 }
 0x2b7   : > { %26947 = vmatprep.mubr.bf16.mxu0 %v32937_v19 }
 0x2be   : > { %26948 = vmatmul.mubr.bf16.gmra.mrb[4].mxu0 %v32951_v28 }
 0x2bf   : > { %26951 = vmatprep.mubr.bf16.mxu0 %v32955_v37 }
 0x2c6   : > { %26952 = vmatmul.mubr.bf16.gmra.mrb[8].mxu0 %v32969_v0 }
 0x2c7   : > { %26955 = vmatprep.mubr.bf16.mxu0 %v32973_v15 }
 0x2ce   : > { %26956 = vmatmul.mubr.bf16.gmra.mrb[12].mxu0 %v32984_v9  ;;  %v6006_v9 = vunpack.c.l.s4 %v32190_v52 }
 0x2cf   : > { %26959 = vmatprep.mubr.bf16.mxu0 %v32988_v42 }
 0x2d0   : > { %v6007_v54 = vunpack.c.0.s8 %v6006_v9 }
 0x2d2   : > { %v33124_v2 = vsub.s32 %v6007_v54, %v33074_v6 }
 0x2d6   : > { %26960 = vmatmul.mubr.bf16.gmra.mrb[16].mxu0 %v32996_v58 }
 0x2d7   : > { %26963 = vmatprep.mubr.bf16.mxu0 %v33000_v29 }
 0x2de   : > { %26964 = vmatmul.mubr.bf16.gmra.mrb[20].mxu0 %v2465_v40 }
 0x2df   : > { %26967 = vmatprep.mubr.bf16.mxu0 %v2468_v50 }
 0x2e6   : > { %26968 = vmatmul.mubr.bf16.gmra.mrb[24].mxu0 %v2471_v59 }
 0x2e7   : > { %26971 = vmatprep.mubr.bf16.mxu0 %v2749_v47 }
 0x2ee   : > { %26972 = vmatmul.mubr.bf16.gmra.mrb[28].mxu0 %v2471_v59 }
 0x389   : > { %v26945_v4 = vpop.f32.mrb[0].mxu0 }
 0x38a   : > { %v29431_v20 = vadd.f32 %v26945_v4, %v33071_v33  ;;  %v3108_v21 = vpop.f32.mrb[1].mxu0 }
 0x38b   : > { %v29432_v1 = vadd.f32 %v33071_v33, %v3108_v21  ;;  %v26946_v3 = vpop.f32.mrb[2].mxu0 }
 0x38c   : > { %v33077_v26 = vmax.f32 %v29431_v20, 0.0  ;;  %v3111_v19 = vpop.f32.mrb[3].mxu0  ;;  %v29433_v37 = vadd.f32 %v26946_v3, %v33071_v33 }
 0x38d   : > { %v33079_v22 = vmax.f32 %v29432_v1, 0.0  ;;  %v29434_v38 = vadd.f32 %v33071_v33, %v3111_v19 }
 0x38e   : > { %v3429_v12 = vcombine.high %v33077_v26, %v33077_v26  ;;  %v3270_v55 = vmax.f32 %v29433_v37, 0.0 }
 0x38f   : > { %v3331_v30 = vcombine.high %v33079_v22, %v33079_v22 }
 0x390   : > { %v3443_v11 = vrot.slane %v3429_v12, %v33082_v39  ;;  %v3478_v35 = vcombine.high %v3270_v55, %v3270_v55  ;;  %v3485_v44 = vrot.slane %v3270_v55, %v33082_v39  ;;  %v3268_v12 = vmax.f32 %v29434_v38, 0.0 }
 0x391   : > { %v3345_v28 = vrot.slane %v3331_v30, %v33082_v39  ;;  %v33094_v63 = vpop.f32.mrb[4].mxu0 }
 0x392   : > { %v3445_v27 = vcombine.high %v3443_v11, %v3443_v11  ;;  %v3459_v53 = vrot.slane %v3443_v11, %v33082_v39  ;;  %v33097_v17 = vpop.f32.mrb[5].mxu0  ;;  %v3492_v61 = vrot.slane %v3478_v35, %v33082_v39  ;;  %v3493_v7 = vcombine.high %v3485_v44, %v3485_v44 }
 0x393   : > { %v3347_v49 = vcombine.high %v3345_v28, %v3345_v28  ;;  %v33099_v41 = vpop.f32.mrb[6].mxu0  ;;  %v3361_v34 = vrot.slane %v3345_v28, %v33082_v39  ;;  %v3501_v62 = vrot.slane %v3485_v44, %v33082_v39  ;;  %v3387_v35 = vrot.slane %v3268_v12, %v33082_v39 }
 0x394   : > { %v3473_v0 = vrot.slane %v3445_v27, %v33082_v39  ;;  %v33102_v15 = vpop.f32.mrb[7].mxu0  ;;  %v3475_v31 = vcombine.high %v3459_v53, %v3459_v53  ;;  %v4982_v50 = vrot.slane %v3459_v53, %v33105_v48  ;;  %v3494_v14 = vcombine.high %v3492_v61, %v3492_v61 }
 0x395   : > { %v3375_v42 = vrot.slane %v3347_v49, %v33082_v39  ;;  %v3377_v59 = vcombine.high %v3361_v34, %v3361_v34  ;;  %v4918_v47 = vrot.slane %v3361_v34, %v33105_v48  ;;  %v3508_v23 = vrot.slane %v3492_v61, %v33082_v39 }
 0x396   : > { %v3477_v46 = vcombine.high %v3473_v0, %v3473_v0  ;;  %v4986_v58 = vrot.slane %v3473_v0, %v33105_v48  ;;  %v4990_v29 = vrot.slane %v3475_v31, %v33105_v48  ;;  %v3515_v60 = vrot.slane %v3493_v7, %v33082_v39 }
 0x397   : > { %v3379_v45 = vcombine.high %v3375_v42, %v3375_v42  ;;  %v4922_v25 = vrot.slane %v3375_v42, %v33105_v48  ;;  %v4926_v56 = vrot.slane %v3377_v59, %v33105_v48  ;;  %v3522_v13 = vrot.slane %v3494_v14, %v33082_v39 }
 0x398   : > { %v4994_v32 = vrot.slane %v3477_v46, %v33105_v48  ;;  %v6088_v8 = vcombine.low %v4982_v50, %v4986_v58  ;;  %v3523_v57 = vcombine.high %v3501_v62, %v3501_v62  ;;  %v3524_v21 = vcombine.high %v3508_v23, %v3508_v23 }
 0x399   : > { %v33110_v5 = vpop.f32.mrb[8].mxu0  ;;  %v4930_v24 = vrot.slane %v3379_v45, %v33105_v48  ;;  %v6020_v20 = vcombine.low %v4918_v47, %v4922_v25  ;;  %v3525_v19 = vcombine.high %v3515_v60, %v3515_v60  ;;  %v3526_v11 = vcombine.high %v3522_v13, %v3522_v13 }
 0x39a   : > { %v33115_v36 = vpop.f32.mrb[9].mxu0  ;;  %v6089_v18 = vcombine.low %v4990_v29, %v4994_v32  ;;  %v6096_v4 = vrot.slane %v6088_v8, %v33124_v2  ;;  %v4998_v28 = vrot.slane %v3501_v62, %v33105_v48  ;;  %v5002_v37 = vrot.slane %v3515_v60, %v33105_v48 }
 0x39b   : > { %v33117_v40 = vpop.f32.mrb[10].mxu0  ;;  %v6021_v3 = vcombine.low %v4926_v56, %v4930_v24  ;;  %v5006_v53 = vrot.slane %v3523_v57, %v33105_v48  ;;  %v5010_v49 = vrot.slane %v3525_v19, %v33105_v48  ;;  %v5014_v0 = vrot.slane %v3508_v23, %v33105_v48 }
 0x39c   : > { %v33120_v10 = vpop.f32.mrb[11].mxu0  ;;  %v6103_v51 = vrot.slane %v6089_v18, %v33124_v2  ;;  %v5018_v55 = vrot.slane %v3522_v13, %v33105_v48  ;;  %v6028_v31 = vrot.slane %v6020_v20, %v33124_v2  ;;  %v5022_v46 = vrot.slane %v3524_v21, %v33105_v48 }
 0x39d   : > { %v33156_v52 = vrot.slane %v3526_v11, %v33105_v48  ;;  %v6105_v9 = vcombine.low %v4998_v28, %v5002_v37  ;;  %v6106_v42 = vcombine.low %v5006_v53, %v5010_v49  ;;  %v3380_v34 = vcombine.high %v3268_v12, %v3268_v12 }
 0x39e   : > { %v33143_v30 = vcombine.low %v6096_v4, %v6103_v51  ;;  %v6122_v32 = vcombine.low %v5014_v0, %v5018_v55  ;;  %v6035_v29 = vrot.slane %v6021_v3, %v33124_v2  ;;  %v29435_v44 = vadd.f32 %v33094_v63, %v33071_v33 }
 0x39f   : > { %39650 = vst [vmem:[#allocation2_spill] sm:$0xff] %v33156_v52  ;;  %v6123_v54 = vcombine.low %v5022_v46, %v33156_v52  ;;  %v6113_v45 = vrot.slane %v6105_v9, %v33124_v2  ;;  %v6120_v50 = vrot.slane %v6106_v42, %v33124_v2  ;;  %v3394_v18 = vrot.slane %v3380_v34, %v33082_v39  ;;  %v33204_v42 = vld [vmem:[%s39363_s3 + $0x60] sm:$0xff]  }
 0x3a0   : > { %v39374_v58 = vrot.slane %v33143_v30, 7  ;;  %v3395_v59 = vcombine.high %v3387_v35, %v3387_v35  ;;  %v6130_v8 = vrot.slane %v6122_v32, %v33124_v2  ;;  %v3403_v7 = vrot.slane %v3387_v35, %v33082_v39  ;;  %27111 = vmatprep.subr.bf16.mxu1 %v33204_v42 }
 0x3a1   : > { %v33136_v43 = vpop.f32.mrb[12].mxu0  ;;  %v6137_v25 = vrot.slane %v6123_v54, %v33124_v2  ;;  %v33172_v24 = vmax.f32 %v29435_v44, 0.0  ;;  %v6121_v63 = vcombine.low %v6113_v45, %v6120_v50  ;;  %v3396_v38 = vcombine.high %v3394_v18, %v3394_v18 }
 0x3a2   : > { %v33139_v1 = vpop.f32.mrb[13].mxu0  ;;  %v3410_v51 = vrot.slane %v3394_v18, %v33082_v39  ;;  %v3417_v47 = vrot.slane %v3395_v59, %v33082_v39  ;;  %v3425_v23 = vcombine.high %v3403_v7, %v3403_v7  ;;  %v4934_v56 = vrot.slane %v3403_v7, %v33105_v48 }
 0x3a3   : > { %v33141_v16 = vpop.f32.mrb[14].mxu0  ;;  %v33178_v62 = vcombine.low %v6130_v8, %v6137_v25  ;;  %v3625_v60 = vcombine.high %v33172_v24, %v33172_v24  ;;  %v7101_v13 = vrot.slane %v6121_v63, 7  ;;  %v3424_v4 = vrot.slane %v3396_v38, %v33082_v39 }
 0x3a4   : > { %v33147_v27 = vpop.f32.mrb[15].mxu0  ;;  %v3426_v20 = vcombine.high %v3410_v51, %v3410_v51  ;;  %v3427_v57 = vcombine.high %v3417_v47, %v3417_v47  ;;  %v4938_v3 = vrot.slane %v3417_v47, %v33105_v48  ;;  %v4942_v19 = vrot.slane %v3425_v23, %v33105_v48 }
 0x3a5   : > { %39651 = vst [vmem:[#allocation3_spill] sm:$0xff] %v33178_v62  ;;  %v39368_v21 = vrot.slane %v33178_v62, 7  ;;  %v4950_v12 = vrot.slane %v3410_v51, %v33105_v48  ;;  %v7102_v11 = vsel %vm440_vm0, %v39374_v58, %v7101_v13  ;;  %v3428_v28 = vcombine.high %v3424_v4, %v3424_v4 }
 0x3a6   : > { %v4946_v37 = vrot.slane %v3427_v57, %v33105_v48  ;;  %v4954_v53 = vrot.slane %v3424_v4, %v33105_v48  ;;  %v33195_v0 = vcombine.low %v6028_v31, %v6035_v29  ;;  %v4958_v46 = vrot.slane %v3426_v20, %v33105_v48 }
 0x3a7   : > { %v7104_v55 = vsel %vm440_vm0, %v7101_v13, %v39368_v21  ;;  %v6037_v9 = vcombine.low %v4934_v56, %v4938_v3  ;;  %v33209_v34 = vrot.slane %v3428_v28, %v33105_v48  ;;  %v3639_v29 = vrot.slane %v3625_v60, %v33082_v39 }
 0x3a8   : > { %v33206_v32 = vpack.c.bf16 %v7104_v55, %v7102_v11  ;;  %v6038_v35 = vcombine.low %v4942_v19, %v4946_v37  ;;  %v6054_v31 = vcombine.low %v4950_v12, %v4954_v53  ;;  %v29436_v54 = vadd.f32 %v33071_v33, %v33097_v17 }
 0x3a9   : > { %v33167_v61 = vpop.f32.mrb[16].mxu0  ;;  %39652 = vst [vmem:[#allocation4_spill] sm:$0xff] %v33209_v34  ;;  %v6045_v44 = vrot.slane %v6037_v9, %v33124_v2  ;;  %v6055_v50 = vcombine.low %v4958_v46, %v33209_v34  ;;  %v3436_v18 = vrot.slane %v33077_v26, %v33082_v39  ;;  %v3641_v59 = vcombine.high %v3639_v29, %v3639_v29 }
 0x3aa   : > { %v33174_v14 = vpop.f32.mrb[17].mxu0  ;;  %v6052_v45 = vrot.slane %v6038_v35, %v33124_v2  ;;  %v39370_v8 = vrot.slane %v33195_v0, 7  ;;  %v6062_v7 = vrot.slane %v6054_v31, %v33124_v2  ;;  %v33223_v17 = vmax.f32 %v29436_v54, 0.0 }
 0x3ab   : > { %v33193_v49 = vpop.f32.mrb[18].mxu0  ;;  %v6069_v63 = vrot.slane %v6055_v50, %v33124_v2  ;;  %v3669_v23 = vrot.slane %v3641_v59, %v33082_v39  ;;  %v3444_v56 = vcombine.high %v3436_v18, %v3436_v18  ;;  %v3655_v13 = vrot.slane %v3639_v29, %v33082_v39 }
 0x3ac   : > { %v6053_v25 = vcombine.low %v6045_v44, %v6052_v45  ;;  %v33225_v38 = vpop.f32.mrb[19].mxu0  ;;  %v3338_v4 = vrot.slane %v33079_v22, %v33082_v39  ;;  %v3527_v20 = vcombine.high %v33223_v17, %v33223_v17  ;;  %v29437_v19 = vadd.f32 %v33099_v41, %v33071_v33 }
 0x3ad   : > { %v33227_v51 = vcombine.low %v6062_v7, %v6069_v63  ;;  %v3673_v3 = vcombine.high %v3669_v23, %v3669_v23  ;;  %v3452_v12 = vrot.slane %v3436_v18, %v33082_v39  ;;  %v33246_v11 = vrot.slane %v3444_v56, %v33082_v39 }
 0x3ae   : > { %v7094_v47 = vrot.slane %v6053_v25, 7  ;;  %v3671_v37 = vcombine.high %v3655_v13, %v3655_v13  ;;  %v3541_v22 = vrot.slane %v3527_v20, %v33082_v39  ;;  %v3346_v53 = vcombine.high %v3338_v4, %v3338_v4 }
 0x3af   : > { %39653 = vst [vmem:[#allocation5_spill] sm:$0xff] %v33227_v51  ;;  %v39369_v60 = vrot.slane %v33227_v51, 7  ;;  %v3274_v55 = vmax.f32 %v29437_v19, 0.0  ;;  %v5122_v46 = vrot.slane %v3673_v3, %v33105_v48  ;;  %v3474_v31 = vcombine.high %v3452_v12, %v3452_v12 }
 0x3b0   : > { %v7095_v26 = vsel %vm440_vm0, %v39370_v8, %v7094_v47  ;;  %v3543_v9 = vcombine.high %v3541_v22, %v3541_v22  ;;  %v3557_v35 = vrot.slane %v3541_v22, %v33082_v39  ;;  %v3476_v41 = vcombine.high %v33246_v11, %v33246_v11 }
 0x3b1   : > { %v7097_v57 = vsel %vm440_vm0, %v7094_v47, %v39369_v60  ;;  %v33256_v29 = vsub.s32 1, %v33074_v6  ;;  %v5114_v54 = vrot.slane %v3669_v23, %v33105_v48  ;;  %v5118_v44 = vrot.slane %v3671_v37, %v33105_v48 }
 0x3b2   : > { %v33248_v28 = vpack.c.bf16 %v7097_v57, %v7095_v26  ;;  %v3571_v45 = vrot.slane %v3543_v9, %v33082_v39  ;;  %v3573_v50 = vcombine.high %v3557_v35, %v3557_v35  ;;  %v33262_v18 = vrot.slane %v3452_v12, %v33105_v48  ;;  %v33285_v12 = vpop.f32.mrb[20].mxu0 }
 0x3b3   : > { %v33265_v59 = vrot.slane %v3338_v4, %v33082_v39  ;;  %v33268_v25 = vrot.slane %v3346_v53, %v33082_v39  ;;  %v3674_v7 = vcombine.high %v3274_v55, %v3274_v55  ;;  %v5110_v6 = vrot.slane %v3655_v13, %v33105_v48 }
 0x3b4   : > { %39654 = vst [vmem:[#allocation6_spill] sm:$0xff] %v33248_v28  ;;  %v6225_v63 = vcombine.low %v5118_v44, %v5122_v46  ;;  %v3575_v47 = vcombine.high %v3571_v45, %v3571_v45  ;;  %v29438_v23 = vadd.f32 %v33071_v33, %v33102_v15  ;;  %v4970_v56 = vrot.slane %v33246_v11, %v33105_v48 }
 0x3b5   : > { %v33276_v26 = vrot.slane %v3474_v31, %v33105_v48  ;;  %v33279_v4 = vrot.slane %v3476_v41, %v33105_v48  ;;  %v3681_v20 = vrot.slane %v3274_v55, %v33082_v39  ;;  %v6224_v57 = vcombine.low %v5110_v6, %v5114_v54 }
 0x3b6   : > { %v5050_v3 = vrot.slane %v3571_v45, %v33105_v48  ;;  %v5054_v13 = vrot.slane %v3573_v50, %v33105_v48  ;;  %v5058_v19 = vrot.slane %v3575_v47, %v33105_v48  ;;  %v3378_v15 = vcombine.high %v33268_v25, %v33268_v25 }
 0x3b7   : > { %v3688_v37 = vrot.slane %v3674_v7, %v33082_v39  ;;  %v3689_v22 = vcombine.high %v3681_v20, %v3681_v20  ;;  %v3697_v53 = vrot.slane %v3681_v20, %v33082_v39  ;;  %v6239_v46 = vrot.slane %v6225_v63, %v33124_v2 }
 0x3b8   : > { %v5046_v55 = vrot.slane %v3557_v35, %v33105_v48  ;;  %v6157_v9 = vcombine.low %v5054_v13, %v5058_v19  ;;  %v3272_v31 = vmax.f32 %v29438_v23, 0.0  ;;  %v33297_v50 = vrot.slane %v33172_v24, %v33082_v39  ;;  %v33307_v24 = vpop.f32.mrb[21].mxu0 }
 0x3b9   : > { %v3690_v41 = vcombine.high %v3688_v37, %v3688_v37  ;;  %v3704_v54 = vrot.slane %v3688_v37, %v33082_v39  ;;  %v3711_v44 = vrot.slane %v3689_v22, %v33082_v39  ;;  %v3719_v45 = vcombine.high %v3697_v53, %v3697_v53 }
 0x3ba   : > { %v6232_v7 = vrot.slane %v6224_v57, %v33124_v2  ;;  %v6156_v6 = vcombine.low %v5046_v55, %v5050_v3  ;;  %v3576_v47 = vcombine.high %v3272_v31, %v3272_v31  ;;  %v6171_v19 = vrot.slane %v6157_v9, %v33124_v2 }
 0x3bb   : > { %v3718_v63 = vrot.slane %v3690_v41, %v33082_v39  ;;  %v3720_v20 = vcombine.high %v3704_v54, %v3704_v54  ;;  %v3721_v35 = vcombine.high %v3711_v44, %v3711_v44  ;;  %v5130_v23 = vrot.slane %v3711_v44, %v33105_v48 }
 0x3bc   : > { %v33302_v13 = vcombine.low %v6232_v7, %v6239_v46  ;;  %v5126_v37 = vrot.slane %v3697_v53, %v33105_v48  ;;  %v5134_v22 = vrot.slane %v3719_v45, %v33105_v48  ;;  %v5142_v3 = vrot.slane %v3704_v54, %v33105_v48 }
 0x3bd   : > { %v3722_v21 = vcombine.high %v3718_v63, %v3718_v63  ;;  %v5138_v57 = vrot.slane %v3721_v35, %v33105_v48  ;;  %v5146_v55 = vrot.slane %v3718_v63, %v33105_v48  ;;  %v6164_v41 = vrot.slane %v6156_v6, %v33124_v2 }
 0x3be   : > { %v5150_v46 = vrot.slane %v3720_v20, %v33105_v48  ;;  %v6241_v44 = vcombine.low %v5126_v37, %v5130_v23  ;;  %v3583_v9 = vrot.slane %v3272_v31, %v33082_v39  ;;  %v3590_v60 = vrot.slane %v3576_v47, %v33082_v39 }
 0x3bf   : > { %v33316_v53 = vrot.slane %v3722_v21, %v33105_v48  ;;  %v6242_v45 = vcombine.low %v5134_v22, %v5138_v57  ;;  %v6258_v7 = vcombine.low %v5142_v3, %v5146_v55  ;;  %v39373_v35 = vrot.slane %v33302_v13, 7 }
 0x3c0   : > { %v3591_v8 = vcombine.high %v3583_v9, %v3583_v9  ;;  %v3599_v54 = vrot.slane %v3583_v9, %v33082_v39  ;;  %v29439_v6 = vadd.f32 %v33110_v5, %v33071_v33  ;;  %v33323_v63 = vcombine.low %v6164_v41, %v6171_v19 }
 0x3c1   : > { %39655 = vst [vmem:[#allocation7_spill] sm:$0xff] %v33316_v53  ;;  %v6249_v20 = vrot.slane %v6241_v44, %v33124_v2  ;;  %v6256_v31 = vrot.slane %v6242_v45, %v33124_v2  ;;  %v6259_v21 = vcombine.low %v5150_v46, %v33316_v53  ;;  %v6266_v23 = vrot.slane %v6258_v7, %v33124_v2 }
 0x3c2   : > { %v3592_v37 = vcombine.high %v3590_v60, %v3590_v60  ;;  %v3606_v47 = vrot.slane %v3590_v60, %v33082_v39  ;;  %v3613_v22 = vrot.slane %v3591_v8, %v33082_v39  ;;  %v3621_v55 = vcombine.high %v3599_v54, %v3599_v54 }
 0x3c3   : > { %v6257_v57 = vcombine.low %v6249_v20, %v6256_v31  ;;  %v6273_v3 = vrot.slane %v6259_v21, %v33124_v2  ;;  %v5062_v5 = vrot.slane %v3599_v54, %v33105_v48  ;;  %v33342_v21 = vpop.f32.mrb[22].mxu0 }
 0x3c4   : > { %v3620_v19 = vrot.slane %v3592_v37, %v33082_v39  ;;  %v3622_v41 = vcombine.high %v3606_v47, %v3606_v47  ;;  %v3623_v44 = vcombine.high %v3613_v22, %v3613_v22  ;;  %v5066_v9 = vrot.slane %v3613_v22, %v33105_v48 }
 0x3c5   : > { %v33335_v46 = vcombine.low %v6266_v23, %v6273_v3  ;;  %v7115_v45 = vrot.slane %v6257_v57, 7  ;;  %v5070_v7 = vrot.slane %v3621_v55, %v33105_v48  ;;  %v5078_v60 = vrot.slane %v3606_v47, %v33105_v48 }
 0x3c6   : > { %v3624_v8 = vcombine.high %v3620_v19, %v3620_v19  ;;  %v5074_v20 = vrot.slane %v3623_v44, %v33105_v48  ;;  %v5082_v31 = vrot.slane %v3620_v19, %v33105_v48  ;;  %v5086_v54 = vrot.slane %v3622_v41, %v33105_v48 }
 0x3c7   : > { %39656 = vst [vmem:[#allocation8_spill] sm:$0xff] %v33335_v46  ;;  %v7116_v37 = vsel %vm440_vm0, %v39373_v35, %v7115_v45  ;;  %v39371_v23 = vrot.slane %v33335_v46, 7  ;;  %v6173_v22 = vcombine.low %v5062_v5, %v5066_v9  ;;  %v33348_v57 = vmax.f32 %v29439_v6, 0.0 }
 0x3c8   : > { %v33351_v47 = vrot.slane %v3624_v8, %v33105_v48  ;;  %v6174_v3 = vcombine.low %v5070_v7, %v5074_v20  ;;  %v6190_v55 = vcombine.low %v5078_v60, %v5082_v31  ;;  %v29440_v19 = vadd.f32 %v33071_v33, %v33115_v36 }
 0x3c9   : > { %v6072_v41 = vcombine.low %v33276_v26, %v33279_v4  ;;  %v3376_v44 = vcombine.high %v33265_v59, %v33265_v59  ;;  %v7118_v5 = vsel %vm440_vm0, %v7115_v45, %v39371_v23  ;;  %v3821_v6 = vcombine.high %v33348_v57, %v33348_v57 }
 0x3ca   : > { %39657 = vst [vmem:[#allocation9_spill] sm:$0xff] %v33351_v47  ;;  %v33364_v9 = vpack.c.bf16 %v7118_v5, %v7116_v37  ;;  %v6181_v7 = vrot.slane %v6173_v22, %v33124_v2  ;;  %v6188_v60 = vrot.slane %v6174_v3, %v33124_v2  ;;  %v6191_v36 = vcombine.low %v5086_v54, %v33351_v47 }
 0x3cb   : > { %v4914_v26 = vrot.slane %v3378_v15, %v33105_v48  ;;  %v3640_v4 = vcombine.high %v33297_v50, %v33297_v50  ;;  %v39372_v45 = vrot.slane %v33323_v63, 7  ;;  %v3835_v8 = vrot.slane %v3821_v6, %v33082_v39 }
 0x3cc   : > { %v6189_v20 = vcombine.low %v6181_v7, %v6188_v60  ;;  %v6198_v31 = vrot.slane %v6190_v55, %v33124_v2  ;;  %v6205_v37 = vrot.slane %v6191_v36, %v33124_v2  ;;  %v33379_v22 = vmax.f32 %v29440_v19, 0.0  ;;  %v33396_v60 = vpop.f32.mrb[23].mxu0 }
 0x3cd   : > { %v6071_v54 = vcombine.low %v33262_v18, %v4970_v56  ;;  %v4906_v15 = vrot.slane %v33268_v25, %v33105_v48  ;;  %v4910_v3 = vrot.slane %v3376_v44, %v33105_v48  ;;  %v3837_v5 = vcombine.high %v3835_v8, %v3835_v8 }
 0x3ce   : > { %v33390_v6 = vrot.slane %v33265_v59, %v33105_v48  ;;  %v3534_v55 = vrot.slane %v33223_v17, %v33082_v39  ;;  %v33394_v19 = vcombine.low %v6198_v31, %v6205_v37  ;;  %v7108_v7 = vrot.slane %v6189_v20, 7 }
 0x3cf   : > { %v6086_v11 = vrot.slane %v6072_v41, %v33124_v2  ;;  %v6004_v56 = vcombine.low %v4910_v3, %v4914_v26  ;;  %v3662_v25 = vrot.slane %v3640_v4, %v33082_v39  ;;  %v3865_v44 = vrot.slane %v3837_v5, %v33082_v39 }
 0x3d0   : > { %39658 = vst [vmem:[#allocation10_spill] sm:$0xff] %v33394_v19  ;;  %v7109_v59 = vsel %vm440_vm0, %v39372_v45, %v7108_v7  ;;  %v39375_v36 = vrot.slane %v33394_v19, 7  ;;  %v3851_v17 = vrot.slane %v3835_v8, %v33082_v39  ;;  %v3723_v20 = vcombine.high %v33379_v22, %v33379_v22 }
 0x3d1   : > { %v6079_v31 = vrot.slane %v6071_v54, %v33124_v2  ;;  %v6003_v41 = vcombine.low %v33390_v6, %v4906_v15  ;;  %v3648_v26 = vrot.slane %v33297_v50, %v33082_v39  ;;  %v29441_v4 = vadd.f32 %v33117_v40, %v33071_v33 }
 0x3d2   : > { %v3542_v37 = vcombine.high %v3534_v55, %v3534_v55  ;;  %v7111_v3 = vsel %vm440_vm0, %v7108_v7, %v39375_v36  ;;  %v3869_v5 = vcombine.high %v3865_v44, %v3865_v44  ;;  %v6018_v23 = vrot.slane %v6004_v56, %v33124_v2 }
 0x3d3   : > { %v33417_v8 = vcombine.low %v6079_v31, %v6086_v11  ;;  %v3672_v45 = vcombine.high %v3662_v25, %v3662_v25  ;;  %v33420_v54 = vpack.c.bf16 %v7111_v3, %v7109_v59  ;;  %v3867_v40 = vcombine.high %v3851_v17, %v3851_v17 }
 0x3d4   : > { %v3737_v35 = vrot.slane %v3723_v20, %v33082_v39  ;;  %v6011_v58 = vrot.slane %v6003_v41, %v33124_v2  ;;  %v3670_v7 = vcombine.high %v3648_v26, %v3648_v26  ;;  %v3550_v11 = vrot.slane %v3534_v55, %v33082_v39 }
 0x3d5   : > { %v3278_v31 = vmax.f32 %v29441_v4, 0.0  ;;  %v3564_v56 = vrot.slane %v3542_v37, %v33082_v39  ;;  %v5250_v59 = vrot.slane %v3869_v5, %v33105_v48  ;;  %v5098_v50 = vrot.slane %v3662_v25, %v33105_v48 }
 0x3d6   : > { %v3739_v3 = vcombine.high %v3737_v35, %v3737_v35  ;;  %v3753_v36 = vrot.slane %v3737_v35, %v33082_v39  ;;  %v33433_v46 = vcombine.low %v6011_v58, %v6018_v23  ;;  %v33437_v20 = vrot.slane %v3672_v45, %v33105_v48 }
 0x3d7   : > { %v5242_v41 = vrot.slane %v3865_v44, %v33105_v48  ;;  %v5246_v55 = vrot.slane %v3867_v40, %v33105_v48  ;;  %v33443_v5 = vrot.slane %v3648_v26, %v33105_v48  ;;  %v33446_v35 = vrot.slane %v3670_v7, %v33105_v48  ;;  %v33474_v7 = vpop.f32.mrb[24].mxu0 }
 0x3d8   : > { %v3767_v4 = vrot.slane %v3739_v3, %v33082_v39  ;;  %v3769_v37 = vcombine.high %v3753_v36, %v3753_v36  ;;  %v3572_v58 = vcombine.high %v3550_v11, %v3550_v11  ;;  %v3870_v23 = vcombine.high %v3278_v31, %v3278_v31  ;;  %39661 = vst [vmem:[#allocation11_spill] sm:$0xff] %v33474_v7 }
 0x3d9   : > { %v3574_v15 = vcombine.high %v3564_v56, %v3564_v56  ;;  %v5238_v25 = vrot.slane %v3851_v17, %v33105_v48  ;;  %v6361_v45 = vcombine.low %v5246_v55, %v5250_v59  ;;  %v39659_v44 = vrot.slane %v33143_v30, 7 }
 0x3da   : > { %v3771_v53 = vcombine.high %v3767_v4, %v3767_v4  ;;  %v39660_v40 = vrot.slane %v33417_v8, 7  ;;  %v33457_v26 = vcombine.low %v33443_v5, %v5098_v50  ;;  %v5034_v19 = vrot.slane %v3564_v56, %v33105_v48 }
 0x3db   : > { %v6360_v47 = vcombine.low %v5238_v25, %v5242_v41  ;;  %v5182_v17 = vrot.slane %v3769_v37, %v33105_v48  ;;  %v3877_v30 = vrot.slane %v3278_v31, %v33082_v39  ;;  %v33466_v55 = vrot.slane %v3550_v11, %v33105_v48 }
 0x3dc   : > { %v33454_v3 = vsel %vm440_vm0, %v39660_v40, %v39659_v44  ;;  %v5186_v59 = vrot.slane %v3771_v53, %v33105_v48  ;;  %v33469_v44 = vrot.slane %v3572_v58, %v33105_v48  ;;  %v3884_v50 = vrot.slane %v3870_v23, %v33082_v39 }
 0x3dd   : > { %v29442_v40 = vadd.f32 %v33071_v33, %v33120_v10  ;;  %v33477_v56 = vrot.slane %v3574_v15, %v33105_v48  ;;  %v6375_v53 = vrot.slane %v6361_v45, %v33124_v2  ;;  %v5178_v31 = vrot.slane %v3767_v4, %v33105_v48 }
 0x3de   : > { %v6293_v41 = vcombine.low %v5182_v17, %v5186_v59  ;;  %v3885_v11 = vcombine.high %v3877_v30, %v3877_v30  ;;  %v3886_v37 = vcombine.high %v3884_v50, %v3884_v50  ;;  %v3893_v58 = vrot.slane %v3877_v30, %v33082_v39 }
 0x3df   : > { %v3900_v25 = vrot.slane %v3884_v50, %v33082_v39  ;;  %v33484_v23 = vcombine.low %v33466_v55, %v5034_v19  ;;  %v6368_v10 = vrot.slane %v6360_v47, %v33124_v2  ;;  %v5174_v62 = vrot.slane %v3753_v36, %v33105_v48 }
 0x3e0   : > { %v3276_v15 = vmax.f32 %v29442_v40, 0.0  ;;  %v3907_v52 = vrot.slane %v3885_v11, %v33082_v39  ;;  %v3914_v45 = vrot.slane %v3886_v37, %v33082_v39  ;;  %v3915_v4 = vcombine.high %v3893_v58, %v3893_v58  ;;  %v33497_v40 = vpop.f32.mrb[25].mxu0 }
 0x3e1   : > { %v3916_v17 = vcombine.high %v3900_v25, %v3900_v25  ;;  %v33490_v59 = vcombine.low %v6368_v10, %v6375_v53  ;;  %v6292_v51 = vcombine.low %v5174_v62, %v5178_v31  ;;  %v6307_v30 = vrot.slane %v6293_v41, %v33124_v2  ;;  %39662 = vst [vmem:[#allocation12_spill] sm:$0xff] %v33497_v40 }
 0x3e2   : > { %v29443_v19 = vadd.f32 %v33136_v43, %v33071_v33  ;;  %v3917_v50 = vcombine.high %v3907_v52, %v3907_v52  ;;  %v3918_v34 = vcombine.high %v3914_v45, %v3914_v45  ;;  %v5254_v47 = vrot.slane %v3893_v58, %v33105_v48 }
 0x3e3   : > { %v5258_v36 = vrot.slane %v3907_v52, %v33105_v48  ;;  %v5262_v11 = vrot.slane %v3915_v4, %v33105_v48  ;;  %v5270_v37 = vrot.slane %v3900_v25, %v33105_v48  ;;  %v5274_v53 = vrot.slane %v3914_v45, %v33105_v48  ;;  %v33535_v45 = vpop.f32.mrb[26].mxu0 }
 0x3e4   : > { %v5278_v62 = vrot.slane %v3916_v17, %v33105_v48  ;;  %v5266_v31 = vrot.slane %v3917_v50, %v33105_v48  ;;  %v33505_v43 = vrot.slane %v3918_v34, %v33105_v48  ;;  %v3772_v10 = vcombine.high %v3276_v15, %v3276_v15  ;;  %39665 = vst [vmem:[#allocation15_spill] sm:$0xff] %v33535_v45 }
 0x3e5   : > { %v6377_v41 = vcombine.low %v5254_v47, %v5258_v36  ;;  %v6300_v58 = vrot.slane %v6292_v51, %v33124_v2  ;;  %v6394_v52 = vcombine.low %v5270_v37, %v5274_v53  ;;  %v3779_v40 = vrot.slane %v3276_v15, %v33082_v39 }
 0x3e6   : > { %39663 = vst [vmem:[#allocation13_spill] sm:$0xff] %v33505_v43  ;;  %v33509_v7 = vmax.f32 %v29443_v19, 0.0  ;;  %v6140_v25 = vcombine.low %v33469_v44, %v33477_v56  ;;  %v6378_v4 = vcombine.low %v5262_v11, %v5266_v31  ;;  %v6395_v17 = vcombine.low %v5278_v62, %v33505_v43 }
 0x3e7   : > { %v33515_v50 = vcombine.low %v6300_v58, %v6307_v30  ;;  %v6385_v34 = vrot.slane %v6377_v41, %v33124_v2  ;;  %v3786_v47 = vrot.slane %v3772_v10, %v33082_v39  ;;  %v3787_v51 = vcombine.high %v3779_v40, %v3779_v40 }
 0x3e8   : > { %v6392_v36 = vrot.slane %v6378_v4, %v33124_v2  ;;  %v6402_v15 = vrot.slane %v6394_v52, %v33124_v2  ;;  %v6409_v19 = vrot.slane %v6395_v17, %v33124_v2  ;;  %v3795_v44 = vrot.slane %v3779_v40, %v33082_v39 }
 0x3e9   : > { %v3788_v56 = vcombine.high %v3786_v47, %v3786_v47  ;;  %v3802_v11 = vrot.slane %v3786_v47, %v33082_v39  ;;  %v3809_v37 = vrot.slane %v3787_v51, %v33082_v39  ;;  %v4017_v30 = vcombine.high %v33509_v7, %v33509_v7 }
 0x3ea   : > { %v6393_v53 = vcombine.low %v6385_v34, %v6392_v36  ;;  %v33527_v62 = vcombine.low %v6402_v15, %v6409_v19  ;;  %v3817_v31 = vcombine.high %v3795_v44, %v3795_v44  ;;  %v5190_v41 = vrot.slane %v3795_v44, %v33105_v48 }
 0x3eb   : > { %v3816_v10 = vrot.slane %v3788_v56, %v33082_v39  ;;  %v3818_v58 = vcombine.high %v3802_v11, %v3802_v11  ;;  %v3819_v52 = vcombine.high %v3809_v37, %v3809_v37  ;;  %v5194_v40 = vrot.slane %v3809_v37, %v33105_v48 }
 0x3ec   : > { %39664 = vst [vmem:[#allocation14_spill] sm:$0xff] %v33527_v62  ;;  %v7129_v4 = vrot.slane %v6393_v53, 7  ;;  %v39386_v17 = vrot.slane %v33527_v62, 7  ;;  %v5198_v47 = vrot.slane %v3817_v31, %v33105_v48  ;;  %v5206_v51 = vrot.slane %v3802_v11, %v33105_v48 }
 0x3ed   : > { %v3820_v34 = vcombine.high %v3816_v10, %v3816_v10  ;;  %v5202_v36 = vrot.slane %v3819_v52, %v33105_v48  ;;  %v5210_v15 = vrot.slane %v3816_v10, %v33105_v48  ;;  %v5214_v19 = vrot.slane %v3818_v58, %v33105_v48 }
 0x3ee   : > { %v39666_v44 = vrot.slane %v33490_v59, 7  ;;  %v7132_v37 = vsel %vm440_vm0, %v7129_v4, %v39386_v17  ;;  %v6309_v53 = vcombine.low %v5190_v41, %v5194_v40  ;;  %v4031_v11 = vrot.slane %v4017_v30, %v33082_v39 }
 0x3ef   : > { %v33550_v43 = vrot.slane %v3820_v34, %v33105_v48  ;;  %v6310_v52 = vcombine.low %v5198_v47, %v5202_v36  ;;  %v6326_v10 = vcombine.low %v5206_v51, %v5210_v15  ;;  %v7091_v58 = vrot.slane %v33433_v46, 7 }
 0x3f0   : > { %v7130_v56 = vsel %vm440_vm0, %v39666_v44, %v7129_v4  ;;  %v39669_v44 = vcombine.low %v33446_v35, %v33437_v20  ;;  %v6154_v62 = vrot.slane %v6140_v25, %v33124_v2  ;;  %v4033_v4 = vcombine.high %v4031_v11, %v4031_v11 }
 0x3f1   : > { %v33547_v31 = vpack.c.bf16 %v7132_v37, %v7130_v56  ;;  %39668 = vst [vmem:[#allocation17_spill] sm:$0xff] %v33550_v43  ;;  %v3730_v30 = vrot.slane %v33379_v22, %v33082_v39  ;;  %v6317_v41 = vrot.slane %v6309_v53, %v33124_v2  ;;  %v6324_v40 = vrot.slane %v6310_v52, %v33124_v2 }
 0x3f2   : > { %v6222_v45 = vrot.slane %v39669_v44, %v33124_v2  ;;  %v6327_v47 = vcombine.low %v5214_v19, %v33550_v43  ;;  %v6215_v46 = vrot.slane %v33457_v26, %v33124_v2  ;;  %v6147_v51 = vrot.slane %v33484_v23, %v33124_v2 }
 0x3f3   : > { %39667 = vst [vmem:[#allocation16_spill] sm:$0xff] %v33547_v31  ;;  %v3828_v20 = vrot.slane %v33348_v57, %v33082_v39  ;;  %v4061_v35 = vrot.slane %v4033_v4, %v33082_v39  ;;  %v39388_v25 = vrot.slane %v33515_v50, 7  ;;  %v6325_v22 = vcombine.low %v6317_v41, %v6324_v40 }
 0x3f4   : > { %v6334_v34 = vrot.slane %v6326_v10, %v33124_v2  ;;  %v6341_v36 = vrot.slane %v6327_v47, %v33124_v2  ;;  %v39670_v15 = vrot.slane %v33195_v0, 7  ;;  %v33576_v26 = vcombine.low %v6215_v46, %v6222_v45 }
 0x3f5   : > { %v4047_v23 = vrot.slane %v4031_v11, %v33082_v39  ;;  %v29444_v57 = vadd.f32 %v33071_v33, %v33139_v1  ;;  %v6155_v56 = vcombine.low %v6147_v51, %v6154_v62  ;;  %v3738_v37 = vcombine.high %v3730_v30, %v3730_v30  ;;  %v33593_v1 = vpop.f32.mrb[27].mxu0 }
 0x3f6   : > { %v7093_v19 = vsel %vm440_vm0, %v7091_v58, %v39670_v15  ;;  %v33581_v53 = vcombine.low %v6334_v34, %v6341_v36  ;;  %v7122_v52 = vrot.slane %v6325_v22, 7  ;;  %v39672_v10 = vrot.slane %v33417_v8, 7 }
 0x3f7   : > { %v39673_v44 = vrot.slane %v33262_v18, %v33256_v29  ;;  %v39674_v45 = vrot.slane %v33390_v6, %v33256_v29  ;;  %v3836_v4 = vcombine.high %v3828_v20, %v3828_v20  ;;  %v4065_v41 = vcombine.high %v4061_v35, %v4061_v35 }
 0x3f8   : > { %39671 = vst [vmem:[#allocation18_spill] sm:$0xff] %v33581_v53  ;;  %v7123_v18 = vsel %vm440_vm0, %v39388_v25, %v7122_v52  ;;  %v39387_v8 = vrot.slane %v33581_v53, 7  ;;  %v4063_v47 = vcombine.high %v4047_v23, %v4047_v23  ;;  %v33607_v46 = vmax.f32 %v29444_v57, 0.0 }
 0x3f9   : > { %v7364_v0 = vsel %vm440_vm0, %v39673_v44, %v39672_v10  ;;  %v7363_v11 = vsel %vm440_vm0, %v39674_v45, %v7091_v58  ;;  %v39389_v58 = vrot.slane %v33576_v26, 7  ;;  %v7105_v51 = vrot.slane %v6155_v56, 7 }
 0x3fa   : > { %v33596_v62 = vpack.c.bf16 %v33454_v3, %v7364_v0  ;;  %v33598_v40 = vpack.c.bf16 %v7093_v19, %v7363_v11  ;;  %v3760_v3 = vrot.slane %v3738_v37, %v33082_v39  ;;  %v7125_v22 = vsel %vm440_vm0, %v7122_v52, %v39387_v8 }
 0x3fb   : > { %v29445_v34 = vadd.f32 %v33141_v16, %v33071_v33  ;;  %v3844_v36 = vrot.slane %v3828_v20, %v33082_v39  ;;  %v33617_v15 = vrot.slane %v3836_v4, %v33082_v39  ;;  %v33619_v19 = vpack.c.bf16 %v7125_v22, %v7123_v18 }
 0x3fc   : > { %39675 = vst [vmem:[#allocation19_spill] sm:$0xff] %v33598_v40  ;;  %v5378_v57 = vrot.slane %v4065_v41, %v33105_v48  ;;  %v3746_v56 = vrot.slane %v3730_v30, %v33082_v39  ;;  %v5370_v37 = vrot.slane %v4061_v35, %v33105_v48  ;;  %v3919_v10 = vcombine.high %v33607_v46, %v33607_v46 }
 0x3fd   : > { %v3282_v52 = vmax.f32 %v29445_v34, 0.0  ;;  %v39676_v44 = vrot.slane %v33302_v13, 7  ;;  %v5934_v20 = vrot.slane %v33466_v55, %v33256_v29  ;;  %v5374_v0 = vrot.slane %v4063_v47, %v33105_v48  ;;  %26983 = vmatprep.mubr.msk.bf16.mxu1 %vm7466_vm3, %v33598_v40 }
 0x3fe   : > { %v3770_v30 = vcombine.high %v3760_v3, %v3760_v3  ;;  %v5366_v35 = vrot.slane %v4047_v23, %v33105_v48  ;;  %v3933_v45 = vrot.slane %v3919_v10, %v33082_v39  ;;  %v3866_v4 = vcombine.high %v3844_v36, %v3844_v36  ;;  %26984 = vmatmul.mubr.msk.bf16.vlgmr.msra.gmra.mrb[0].mxu1 %vm7466_vm3, %v33248_v28 }
 0x3ff   : > { %v33631_v16 = vsel %vm440_vm0, %v39389_v58, %v39676_v44  ;;  %v4066_v11 = vcombine.high %v3282_v52, %v3282_v52  ;;  %v33641_v13 = vsel %vm440_vm0, %v5934_v20, %v7105_v51  ;;  %v3868_v41 = vcombine.high %v33617_v15, %v33617_v15  ;;  %27112 = vmatpush3.bf16.msra.mxu1 %v33204_v42 }
 0x400   : > { %v6497_v55 = vcombine.low %v5374_v0, %v5378_v57  ;;  %v3768_v18 = vcombine.high %v3746_v56, %v3746_v56  ;;  %v6496_v47 = vcombine.low %v5366_v35, %v5370_v37  ;;  %v3935_v23 = vcombine.high %v3933_v45, %v3933_v45  ;;  %26987 = vmatprep.mubr.msk.bf16.mxu1 %vm7466_vm3, %v33598_v40 }
 0x401   : > { %v29446_v22 = vadd.f32 %v33071_v33, %v33147_v27  ;;  %v39677_v34 = vrot.slane %v33323_v63, 7  ;;  %v33656_v44 = vrot.slane %v3844_v36, %v33105_v48  ;;  %v4073_v57 = vrot.slane %v3282_v52, %v33082_v39 }
 0x402   : > { %v4080_v20 = vrot.slane %v4066_v11, %v33082_v39  ;;  %v5162_v37 = vrot.slane %v3760_v3, %v33105_v48  ;;  %v33664_v33 = vrot.slane %v3770_v30, %v33105_v48  ;;  %v3949_v27 = vrot.slane %v3933_v45, %v33082_v39  ;;  %v33684_v45 = vpop.f32.mrb[28].mxu0 }
 0x403   : > { %v33653_v10 = vsel %vm440_vm0, %v7105_v51, %v39677_v34  ;;  %v3963_v42 = vrot.slane %v3935_v23, %v33082_v39  ;;  %v33671_v51 = vrot.slane %v3866_v4, %v33105_v48  ;;  %v33674_v36 = vrot.slane %v3868_v41, %v33105_v48  ;;  %39678 = vst [vmem:[#allocation20_spill] sm:$0xff] %v33684_v45  ;;  %v33715_v43 = vpop.f32.mrb[29].mxu0 }
 0x404   : > { %v6511_v52 = vrot.slane %v6497_v55, %v33124_v2  ;;  %v33678_v3 = vrot.slane %v3746_v56, %v33105_v48  ;;  %v33681_v0 = vrot.slane %v3768_v18, %v33105_v48  ;;  %v6504_v30 = vrot.slane %v6496_v47, %v33124_v2 }
 0x405   : > { %v3280_v35 = vmax.f32 %v29446_v22, 0.0  ;;  %v3967_v11 = vcombine.high %v3963_v42, %v3963_v42  ;;  %v4081_v23 = vcombine.high %v4073_v57, %v4073_v57  ;;  %v4082_v4 = vcombine.high %v4080_v20, %v4080_v20 }
 0x406   : > { %v4089_v34 = vrot.slane %v4073_v57, %v33082_v39  ;;  %v33688_v41 = vcombine.low %v33678_v3, %v5162_v37  ;;  %v3965_v55 = vcombine.high %v3949_v27, %v3949_v27  ;;  %v4096_v18 = vrot.slane %v4080_v20, %v33082_v39  ;;  %26988 = vmatmul.mubr.msk.bf16.gmra.mrb[4].mxu1 %vm7466_vm3, %v33248_v28 }
 0x407   : > { %v33693_v17 = vcombine.low %v6504_v30, %v6511_v52  ;;  %v4103_v47 = vrot.slane %v4081_v23, %v33082_v39  ;;  %v4110_v22 = vrot.slane %v4082_v4, %v33082_v39  ;;  %v5302_v57 = vrot.slane %v3949_v27, %v33105_v48  ;;  %26991 = vmatprep.mubr.msk.bf16.mxu1 %vm7466_vm3, %v33598_v40 }
 0x408   : > { %v4111_v8 = vcombine.high %v4089_v34, %v4089_v34  ;;  %v5306_v37 = vrot.slane %v3963_v42, %v33105_v48  ;;  %v4112_v25 = vcombine.high %v4096_v18, %v4096_v18  ;;  %v3968_v6 = vcombine.high %v3280_v35, %v3280_v35 }
 0x409   : > { %v5314_v20 = vrot.slane %v3967_v11, %v33105_v48  ;;  %v4113_v52 = vcombine.high %v4103_v47, %v4103_v47  ;;  %v4114_v30 = vcombine.high %v4110_v22, %v4110_v22  ;;  %v5386_v23 = vrot.slane %v4103_v47, %v33105_v48 }
 0x40a   : > { %v5310_v4 = vrot.slane %v3965_v55, %v33105_v48  ;;  %v5382_v58 = vrot.slane %v4089_v34, %v33105_v48  ;;  %v5390_v56 = vrot.slane %v4111_v8, %v33105_v48  ;;  %v5398_v27 = vrot.slane %v4096_v18, %v33105_v48 }
 0x40b   : > { %v5394_v42 = vrot.slane %v4113_v52, %v33105_v48  ;;  %v5402_v63 = vrot.slane %v4110_v22, %v33105_v48  ;;  %v5406_v53 = vrot.slane %v4112_v25, %v33105_v48  ;;  %v33713_v11 = vrot.slane %v4114_v30, %v33105_v48 }
 0x40c   : > { %v33719_v55 = vrot.slane %v33509_v7, %v33082_v39  ;;  %v6428_v34 = vcombine.low %v5302_v57, %v5306_v37  ;;  %v6513_v47 = vcombine.low %v5382_v58, %v5386_v23  ;;  %v3975_v8 = vrot.slane %v3280_v35, %v33082_v39  ;;  %v33729_v7 = vld [vmem:[%s39362_s2] ss:$0 sm:$0xff] }
 0x40d   : > { %39679 = vst [vmem:[#allocation21_spill] sm:$0xff] %v33713_v11  ;;  %v6429_v18 = vcombine.low %v5310_v4, %v5314_v20  ;;  %v6514_v40 = vcombine.low %v5390_v56, %v5394_v42  ;;  %v6530_v52 = vcombine.low %v5398_v27, %v5402_v63  ;;  %v6531_v22 = vcombine.low %v5406_v53, %v33713_v11 }
 0x40e   : > { %v6521_v30 = vrot.slane %v6513_v47, %v33124_v2  ;;  %v3982_v45 = vrot.slane %v3968_v6, %v33082_v39  ;;  %v29447_v58 = vadd.f32 %v33729_v7, %v33167_v61  ;;  %v3983_v56 = vcombine.high %v3975_v8, %v3975_v8  ;;  %26992 = vmatmul.mubr.msk.bf16.gmra.mrb[8].mxu1 %vm7466_vm3, %v33248_v28 }
 0x40f   : > { %v6528_v35 = vrot.slane %v6514_v40, %v33124_v2  ;;  %v6538_v63 = vrot.slane %v6530_v52, %v33124_v2  ;;  %v6545_v53 = vrot.slane %v6531_v22, %v33124_v2  ;;  %v6436_v6 = vrot.slane %v6428_v34, %v33124_v2  ;;  %26995 = vmatprep.mubr.msk.bf16.mxu1 %vm7466_vm3, %v33596_v62 }
 0x410   : > { %v3984_v57 = vcombine.high %v3982_v45, %v3982_v45  ;;  %v3991_v37 = vrot.slane %v3975_v8, %v33082_v39  ;;  %v3998_v20 = vrot.slane %v3982_v45, %v33082_v39  ;;  %v6443_v61 = vrot.slane %v6429_v18, %v33124_v2 }
 0x411   : > { %v6529_v40 = vcombine.low %v6521_v30, %v6528_v35  ;;  %v33744_v23 = vcombine.low %v6538_v63, %v6545_v53  ;;  %v4005_v4 = vrot.slane %v3983_v56, %v33082_v39  ;;  %v39681_v63 = vrot.slane %v33693_v17, 7 }
 0x412   : > { %v4012_v27 = vrot.slane %v3984_v57, %v33082_v39  ;;  %v4013_v42 = vcombine.high %v3991_v37, %v3991_v37  ;;  %v4014_v47 = vcombine.high %v3998_v20, %v3998_v20  ;;  %v5318_v34 = vrot.slane %v3991_v37, %v33105_v48 }
 0x413   : > { %39680 = vst [vmem:[#allocation22_spill] sm:$0xff] %v33744_v23  ;;  %v7143_v52 = vrot.slane %v6529_v40, 7  ;;  %v39397_v8 = vrot.slane %v33744_v23, 7  ;;  %v4015_v45 = vcombine.high %v4005_v4, %v4005_v4  ;;  %v5322_v22 = vrot.slane %v4005_v4, %v33105_v48  ;;  %v33762_v40 = vpop.f32.mrb[30].mxu0 }
 0x414   : > { %v4016_v25 = vcombine.high %v4012_v27, %v4012_v27  ;;  %v5326_v18 = vrot.slane %v4013_v42, %v33105_v48  ;;  %v5334_v30 = vrot.slane %v3998_v20, %v33105_v48  ;;  %v5338_v35 = vrot.slane %v4012_v27, %v33105_v48 }
 0x415   : > { %v7144_v53 = vsel %vm440_vm0, %v39681_v63, %v7143_v52  ;;  %v7146_v56 = vsel %vm440_vm0, %v7143_v52, %v39397_v8  ;;  %v5330_v57 = vrot.slane %v4015_v45, %v33105_v48  ;;  %v5342_v37 = vrot.slane %v4014_v47, %v33105_v48 }
 0x416   : > { %v33764_v4 = vpack.c.bf16 %v7146_v56, %v7144_v53  ;;  %v33767_v20 = vrot.slane %v4016_v25, %v33105_v48  ;;  %v6445_v27 = vcombine.low %v5318_v34, %v5322_v22  ;;  %v6462_v42 = vcombine.low %v5334_v30, %v5338_v35  ;;  %26996 = vmatmul.mubr.msk.bf16.gmra.mrb[12].mxu1 %vm7466_vm3, %v33206_v32 }
 0x417   : > { %v33769_v11 = vcombine.low %v6436_v6, %v6443_v61  ;;  %v6446_v63 = vcombine.low %v5326_v18, %v5330_v57  ;;  %v33771_v28 = vmax.f32 %v29447_v58, 0.0  ;;  %v29448_v52 = vadd.f32 %v33729_v7, %v33174_v14  ;;  %26999 = vmatprep.mubr.msk.bf16.mxu1 %vm7466_vm3, %v33596_v62 }
 0x418   : > { %39682 = vst [vmem:[#allocation23_spill] sm:$0xff] %v33764_v4  ;;  %39683 = vst [vmem:[#allocation24_spill] sm:$0xff] %v33767_v20  ;;  %v39684_v47 = vrot.slane %v33617_v15, %v33105_v48  ;;  %v6344_v25 = vcombine.low %v33671_v51, %v33674_v36  ;;  %v39685_v6 = vcombine.low %v33681_v0, %v33664_v33 }
 0x419   : > { %v6463_v61 = vcombine.low %v5342_v37, %v33767_v20  ;;  %v6453_v14 = vrot.slane %v6445_v27, %v33124_v2  ;;  %v6460_v34 = vrot.slane %v6446_v63, %v33124_v2  ;;  %v4213_v15 = vcombine.high %v33771_v28, %v33771_v28 }
 0x41a   : > { %v6343_v45 = vcombine.low %v33656_v44, %v39684_v47  ;;  %v6290_v58 = vrot.slane %v39685_v6, %v33124_v2  ;;  %v33794_v22 = vmax.f32 %v29448_v52, 0.0  ;;  %v6283_v51 = vrot.slane %v33688_v41, %v33124_v2  ;;  %v33816_v52 = vpop.f32.mrb[31].mxu0 }
 0x41b   : > { %v4032_v33 = vcombine.high %v33719_v55, %v33719_v55  ;;  %v6470_v36 = vrot.slane %v6462_v42, %v33124_v2  ;;  %v6477_v0 = vrot.slane %v6463_v61, %v33124_v2  ;;  %v3926_v18 = vrot.slane %v33607_v46, %v33082_v39 }
 0x41c   : > { %v39399_v30 = vrot.slane %v33769_v11, 7  ;;  %v6461_v35 = vcombine.low %v6453_v14, %v6460_v34  ;;  %v4227_v53 = vrot.slane %v4213_v15, %v33082_v39  ;;  %v33808_v56 = vpack.c.bf16 %v33653_v10, %v33641_v13 }
 0x41d   : > { %v6358_v41 = vrot.slane %v6344_v25, %v33124_v2  ;;  %v33811_v57 = vcombine.low %v6470_v36, %v6477_v0  ;;  %v4115_v37 = vcombine.high %v33794_v22, %v33794_v22  ;;  %v6351_v27 = vrot.slane %v6343_v45, %v33124_v2 }
 0x41e   : > { %v6291_v42 = vcombine.low %v6283_v51, %v6290_v58  ;;  %v7136_v46 = vrot.slane %v6461_v35, 7  ;;  %v4229_v63 = vcombine.high %v4227_v53, %v4227_v53  ;;  %v4040_v47 = vrot.slane %v33719_v55, %v33082_v39  ;;  %27000 = vmatmul.mubr.msk.bf16.gmra.mrb[16].mxu1 %vm7466_vm3, %v33206_v32 }
 0x41f   : > { %39686 = vst [vmem:[#allocation25_spill] sm:$0xff] %v33811_v57  ;;  %v4054_v13 = vrot.slane %v4032_v33, %v33082_v39  ;;  %v39398_v10 = vrot.slane %v33811_v57, 7  ;;  %v4243_v25 = vrot.slane %v4227_v53, %v33082_v39  ;;  %v3934_v6 = vcombine.high %v3926_v18, %v3926_v18  ;;  %27003 = vmatprep.mubr.msk.bf16.mxu1 %vm7466_vm3, %v33808_v56 }
 0x420   : > { %v7137_v61 = vsel %vm440_vm0, %v39399_v30, %v7136_v46  ;;  %v4257_v45 = vrot.slane %v4229_v63, %v33082_v39  ;;  %v4129_v58 = vrot.slane %v4115_v37, %v33082_v39  ;;  %v39687_v55 = vrot.slane %v33576_v26, 7 }
 0x421   : > { %v39688_v14 = vrot.slane %v33443_v5, %v33256_v29  ;;  %v6359_v15 = vcombine.low %v6351_v27, %v6358_v41  ;;  %v7139_v51 = vsel %vm440_vm0, %v7136_v46, %v39398_v10  ;;  %v29449_v33 = vadd.f32 %v33729_v7, %v33193_v49 }
 0x422   : > { %v7119_v26 = vrot.slane %v6291_v42, 7  ;;  %v33846_v0 = vpack.c.bf16 %v7139_v51, %v7137_v61  ;;  %v4261_v5 = vcombine.high %v4257_v45, %v4257_v45  ;;  %v5946_v35 = vrot.slane %v33656_v44, %v33256_v29 }
 0x423   : > { %v7366_v34 = vsel %vm440_vm0, %v39688_v14, %v39687_v55  ;;  %v5942_v53 = vrot.slane %v33678_v3, %v33256_v29  ;;  %v4064_v41 = vcombine.high %v4054_v13, %v4054_v13  ;;  %v4259_v37 = vcombine.high %v4243_v25, %v4243_v25 }
 0x424   : > { %v33844_v36 = vpack.c.bf16 %v33631_v16, %v7366_v34  ;;  %39689 = vst [vmem:[#allocation26_spill] sm:$0xff] %v33846_v0  ;;  %v4062_v27 = vcombine.high %v4040_v47, %v4040_v47  ;;  %v3942_v49 = vrot.slane %v3926_v18, %v33082_v39  ;;  %v33854_v46 = vrot.slane %v3934_v6, %v33082_v39 }
 0x425   : > { %v4131_v16 = vcombine.high %v4129_v58, %v4129_v58  ;;  %v7126_v63 = vrot.slane %v6359_v15, 7  ;;  %v5506_v42 = vrot.slane %v4261_v5, %v33105_v48  ;;  %v4145_v61 = vrot.slane %v4129_v58, %v33082_v39 }
 0x426   : > { %v3286_v55 = vmax.f32 %v29449_v33, 0.0  ;;  %v39690_v44 = vrot.slane %v33515_v50, 7  ;;  %v7367_v3 = vsel %vm440_vm0, %v5942_v53, %v7119_v26  ;;  %v5354_v34 = vrot.slane %v4054_v13, %v33105_v48  ;;  %27004 = vmatmul.mubr.msk.bf16.gmra.mrb[20].mxu1 %vm7466_vm3, %v33420_v54 }
 0x427   : > { %v4159_v18 = vrot.slane %v4131_v16, %v33082_v39  ;;  %v33865_v6 = vrot.slane %v4040_v47, %v33105_v48  ;;  %v33868_v15 = vrot.slane %v4064_v41, %v33105_v48  ;;  %v5498_v51 = vrot.slane %v4257_v45, %v33105_v48  ;;  %27007 = vmatprep.mubr.msk.bf16.mxu1 %vm7466_vm3, %v33808_v56 }
 0x428   : > { %v7121_v14 = vsel %vm440_vm0, %v7119_v26, %v39690_v44  ;;  %v5502_v58 = vrot.slane %v4259_v37, %v33105_v48  ;;  %v33873_v50 = vrot.slane %v4062_v27, %v33105_v48  ;;  %v3964_v33 = vcombine.high %v3942_v49, %v3942_v49 }
 0x429   : > { %v3966_v26 = vcombine.high %v33854_v46, %v33854_v46  ;;  %v4163_v13 = vcombine.high %v4159_v18, %v4159_v18  ;;  %v5494_v47 = vrot.slane %v4243_v25, %v33105_v48  ;;  %v4161_v53 = vcombine.high %v4145_v61, %v4145_v61 }
 0x42a   : > { %v6633_v5 = vcombine.low %v5502_v58, %v5506_v42  ;;  %v4262_v41 = vcombine.high %v3286_v55, %v3286_v55  ;;  %v39691_v45 = vrot.slane %v33490_v59, 7  ;;  %v33888_v27 = vsel %vm440_vm0, %v5946_v35, %v7126_v63 }
 0x42b   : > { %v33890_v16 = vpack.c.bf16 %v7121_v14, %v7367_v3  ;;  %v33893_v44 = vcombine.low %v33865_v6, %v5354_v34  ;;  %v33898_v42 = vrot.slane %v3942_v49, %v33105_v48  ;;  %v6632_v58 = vcombine.low %v5494_v47, %v5498_v51 }
 0x42c   : > { %v33885_v37 = vsel %vm440_vm0, %v7126_v63, %v39691_v45  ;;  %v5442_v59 = vrot.slane %v4163_v13, %v33105_v48  ;;  %v33904_v35 = vrot.slane %v3964_v33, %v33105_v48  ;;  %v33907_v63 = vrot.slane %v3966_v26, %v33105_v48 }
 0x42d   : > { %v4269_v14 = vrot.slane %v3286_v55, %v33082_v39  ;;  %v33912_v3 = vrot.slane %v33771_v28, %v33082_v39  ;;  %v6647_v49 = vrot.slane %v6633_v5, %v33124_v2  ;;  %v5438_v34 = vrot.slane %v4161_v53, %v33105_v48 }
 0x42e   : > { %v4276_v51 = vrot.slane %v4262_v41, %v33082_v39  ;;  %v5434_v13 = vrot.slane %v4159_v18, %v33105_v48  ;;  %v29450_v26 = vadd.f32 %v33729_v7, %v33225_v38  ;;  %v6640_v55 = vrot.slane %v6632_v58, %v33124_v2  ;;  %27008 = vmatmul.mubr.msk.bf16.gmra.mrb[24].mxu1 %vm7466_vm3, %v33420_v54 }
 0x42f   : > { %v4277_v47 = vcombine.high %v4269_v14, %v4269_v14  ;;  %v4285_v33 = vrot.slane %v4269_v14, %v33082_v39  ;;  %v6565_v8 = vcombine.low %v5438_v34, %v5442_v59  ;;  %v5430_v5 = vrot.slane %v4145_v61, %v33105_v48  ;;  %27011 = vmatprep.mubr.msk.bf16.mxu1 %vm7466_vm3, %v33844_v36 }
 0x430   : > { %v4278_v10 = vcombine.high %v4276_v51, %v4276_v51  ;;  %v4292_v28 = vrot.slane %v4276_v51, %v33082_v39  ;;  %v29451_v18 = vadd.f32 %v33729_v7, %v33285_v12  ;;  %v4228_v38 = vcombine.high %v33912_v3, %v33912_v3 }
 0x431   : > { %v4299_v53 = vrot.slane %v4277_v47, %v33082_v39  ;;  %v4307_v30 = vcombine.high %v4285_v33, %v4285_v33  ;;  %v33931_v41 = vcombine.low %v6640_v55, %v6647_v49  ;;  %v6564_v61 = vcombine.low %v5430_v5, %v5434_v13 }
 0x432   : > { %v4306_v58 = vrot.slane %v4278_v10, %v33082_v39  ;;  %v4308_v59 = vcombine.high %v4292_v28, %v4292_v28  ;;  %v5510_v34 = vrot.slane %v4285_v33, %v33105_v48  ;;  %v6579_v51 = vrot.slane %v6565_v8, %v33124_v2 }
 0x433   : > { %v4309_v14 = vcombine.high %v4299_v53, %v4299_v53  ;;  %v5514_v12 = vrot.slane %v4299_v53, %v33105_v48  ;;  %v5526_v45 = vrot.slane %v4292_v28, %v33105_v48  ;;  %v5518_v55 = vrot.slane %v4307_v30, %v33105_v48 }
 0x434   : > { %v4310_v47 = vcombine.high %v4306_v58, %v4306_v58  ;;  %v5530_v49 = vrot.slane %v4306_v58, %v33105_v48  ;;  %v3284_v23 = vmax.f32 %v29450_v26, 0.0  ;;  %v5534_v13 = vrot.slane %v4308_v59, %v33105_v48 }
 0x435   : > { %v5522_v10 = vrot.slane %v4309_v14, %v33105_v48  ;;  %v6649_v25 = vcombine.low %v5510_v34, %v5514_v12  ;;  %v33947_v53 = vmax.f32 %v29451_v18, 0.0  ;;  %v33950_v8 = vrot.slane %v4228_v38, %v33082_v39 }
 0x436   : > { %v33945_v5 = vrot.slane %v4310_v47, %v33105_v48  ;;  %v6666_v33 = vcombine.low %v5526_v45, %v5530_v49  ;;  %v4164_v57 = vcombine.high %v3284_v23, %v3284_v23  ;;  %v4171_v58 = vrot.slane %v3284_v23, %v33082_v39  ;;  %27012 = vmatmul.mubr.msk.bf16.gmra.mrb[28].mxu1 %vm7466_vm3, %v33364_v9 }
 0x437   : > { %v6650_v28 = vcombine.low %v5518_v55, %v5522_v10  ;;  %v6572_v30 = vrot.slane %v6564_v61, %v33124_v2  ;;  %v6657_v14 = vrot.slane %v6649_v25, %v33124_v2  ;;  %v4409_v59 = vcombine.high %v33947_v53, %v33947_v53  ;;  %27015 = vmatprep.mubr.msk.bf16.mxu1 %vm7466_vm3, %v33844_v36 }
 0x438   : > { %39692 = vst [vmem:[#allocation27_spill] sm:$0xff] %v33945_v5  ;;  %v6667_v26 = vcombine.low %v5534_v13, %v33945_v5  ;;  %v4178_v18 = vrot.slane %v4164_v57, %v33082_v39  ;;  %v4179_v34 = vcombine.high %v4171_v58, %v4171_v58  ;;  %v4187_v38 = vrot.slane %v4171_v58, %v33082_v39  ;;  %v32111_v5 = vld [vmem:[%s39363_s3 + $0x70] sm:$0xff]  }
 0x439   : > { %v6664_v45 = vrot.slane %v6650_v28, %v33124_v2  ;;  %v33964_v61 = vcombine.low %v6572_v30, %v6579_v51  ;;  %v6674_v25 = vrot.slane %v6666_v33, %v33124_v2  ;;  %v4423_v51 = vrot.slane %v4409_v59, %v33082_v39 }
 0x43a   : > { %v6681_v12 = vrot.slane %v6667_v26, %v33124_v2  ;;  %v4180_v49 = vcombine.high %v4178_v18, %v4178_v18  ;;  %v4194_v57 = vrot.slane %v4178_v18, %v33082_v39  ;;  %v4201_v55 = vrot.slane %v4179_v34, %v33082_v39  ;;  %v32110_v34 = vld [vmem:[%s39363_s3 + $0x68] sm:$0xff]  }
 0x43b   : > { %v6665_v47 = vcombine.low %v6657_v14, %v6664_v45  ;;  %v4209_v13 = vcombine.high %v4187_v38, %v4187_v38  ;;  %v5446_v28 = vrot.slane %v4187_v38, %v33105_v48  ;;  %v39694_v38 = vrot.slane %v33931_v41, 7  ;;  %27113 = vmatprep.subr.bf16.mxu1 %v32110_v34 }
 0x43c   : > { %v33972_v10 = vcombine.low %v6674_v25, %v6681_v12  ;;  %v4208_v33 = vrot.slane %v4180_v49, %v33082_v39  ;;  %v4210_v30 = vcombine.high %v4194_v57, %v4194_v57  ;;  %v4211_v26 = vcombine.high %v4201_v55, %v4201_v55  ;;  %27114 = vmatpush3.bf16.msra.mxu1 %v32110_v34 }
 0x43d   : > { %v7157_v58 = vrot.slane %v6665_v47, 7  ;;  %v5450_v14 = vrot.slane %v4201_v55, %v33105_v48  ;;  %v5454_v45 = vrot.slane %v4209_v13, %v33105_v48  ;;  %v5462_v18 = vrot.slane %v4194_v57, %v33105_v48  ;;  %27115 = vmatprep.subr.bf16.mxu1 %v32111_v5 }
 0x43e   : > { %39693 = vst [vmem:[#allocation28_spill] sm:$0xff] %v33972_v10  ;;  %v39404_v23 = vrot.slane %v33972_v10, 7  ;;  %v4212_v25 = vcombine.high %v4208_v33, %v4208_v33  ;;  %v5458_v12 = vrot.slane %v4211_v26, %v33105_v48  ;;  %v5466_v47 = vrot.slane %v4208_v33, %v33105_v48  ;;  %27016 = vmatmul.mubr.msk.bf16.gmra.mrb[32].mxu1 %vm7466_vm3, %v33364_v9 }
 0x43f   : > { %v7158_v59 = vsel %vm440_vm0, %v39694_v38, %v7157_v58  ;;  %v5470_v55 = vrot.slane %v4210_v30, %v33105_v48  ;;  %v6581_v57 = vcombine.low %v5446_v28, %v5450_v14  ;;  %v4425_v13 = vcombine.high %v4423_v51, %v4423_v51  ;;  %27019 = vmatprep.mubr.msk.bf16.mxu1 %vm7466_vm3, %v33890_v16 }
 0x440   : > { %v7160_v49 = vsel %vm440_vm0, %v7157_v58, %v39404_v23  ;;  %v33999_v38 = vrot.slane %v4212_v25, %v33105_v48  ;;  %v6582_v26 = vcombine.low %v5454_v45, %v5458_v12  ;;  %v6598_v33 = vcombine.low %v5462_v18, %v5466_v47  ;;  %27116 = vmatpush3.bf16.msra.mxu1 %v32111_v5 }
 0x441   : > { %v33996_v20 = vpack.c.bf16 %v7160_v49, %v7158_v59  ;;  %v39697_v28 = vcombine.low %v33873_v50, %v33868_v15  ;;  %v39698_v30 = vrot.slane %v33854_v46, %v33105_v48  ;;  %v6412_v59 = vcombine.low %v33904_v35, %v33907_v63  ;;  %v32112_v46 = vld [vmem:[%s39363_s3 + $0x78] sm:$0xff]  }
 0x442   : > { %39696 = vst [vmem:[#allocation30_spill] sm:$0xff] %v33999_v38  ;;  %v4236_v45 = vrot.slane %v33912_v3, %v33082_v39  ;;  %v4122_v18 = vrot.slane %v33794_v22, %v33082_v39  ;;  %v6589_v25 = vrot.slane %v6581_v57, %v33124_v2  ;;  %v6596_v15 = vrot.slane %v6582_v26, %v33124_v2 }
 0x443   : > { %39695 = vst [vmem:[#allocation29_spill] sm:$0xff] %v33996_v20  ;;  %v6494_v58 = vrot.slane %v39697_v28, %v33124_v2  ;;  %v6411_v14 = vcombine.low %v33898_v42, %v39698_v30  ;;  %v6599_v50 = vcombine.low %v5470_v55, %v33999_v38  ;;  %v4260_v35 = vcombine.high %v33950_v8, %v33950_v8 }
 0x444   : > { %v39406_v63 = vrot.slane %v33964_v61, 7  ;;  %v4453_v22 = vrot.slane %v4425_v13, %v33082_v39  ;;  %v29452_v3 = vadd.f32 %v33729_v7, %v33307_v24  ;;  %v6597_v34 = vcombine.low %v6589_v25, %v6596_v15  ;;  %27117 = vmatprep.subr.bf16.mxu1 %v32112_v46 }
 0x445   : > { %v6606_v12 = vrot.slane %v6598_v33, %v33124_v2  ;;  %v6613_v47 = vrot.slane %v6599_v50, %v33124_v2  ;;  %v4439_v49 = vrot.slane %v4423_v51, %v33082_v39  ;;  %v34036_v55 = vpack.c.bf16 %v33885_v37, %v33888_v27  ;;  %27118 = vmatpush3.bf16.msra.mxu1 %v32112_v46 }
 0x446   : > { %v6487_v57 = vrot.slane %v33893_v44, %v33124_v2  ;;  %v6426_v13 = vrot.slane %v6412_v59, %v33124_v2  ;;  %v4258_v26 = vcombine.high %v4236_v45, %v4236_v45  ;;  %v5954_v24 = vrot.slane %v33865_v6, %v33256_v29  ;;  %27020 = vmatmul.mubr.msk.bf16.gmra.mrb[36].mxu1 %vm7466_vm3, %v33619_v19 }
 0x447   : > { %39699 = vst [vmem:[#allocation31_spill] sm:$0xff] %v34036_v55  ;;  %v34043_v28 = vcombine.low %v6606_v12, %v6613_v47  ;;  %v7150_v33 = vrot.slane %v6597_v34, 7  ;;  %v4457_v30 = vcombine.high %v4453_v22, %v4453_v22  ;;  %v6419_v25 = vrot.slane %v6411_v14, %v33124_v2  ;;  %27023 = vmatprep.mubr.msk.bf16.mxu1 %vm7466_vm3, %v33890_v16 }
 0x448   : > { %v6495_v51 = vcombine.low %v6487_v57, %v6494_v58  ;;  %v5490_v37 = vrot.slane %v4260_v35, %v33105_v48  ;;  %v4130_v27 = vcombine.high %v4122_v18, %v4122_v18  ;;  %v4455_v59 = vcombine.high %v4439_v49, %v4439_v49 }
 0x449   : > { %39700 = vst [vmem:[#allocation32_spill] sm:$0xff] %v34043_v28  ;;  %v7151_v44 = vsel %vm440_vm0, %v39406_v63, %v7150_v33  ;;  %v39405_v5 = vrot.slane %v34043_v28, 7  ;;  %v34051_v15 = vmax.f32 %v29452_v3, 0.0  ;;  %v6427_v6 = vcombine.low %v6419_v25, %v6426_v13  ;;  %v39706_v63 = vld [vmem:[#allocation11_spill] sm:$0xff] }
 0x44a   : > { %v5482_v58 = vrot.slane %v33950_v8, %v33105_v48  ;;  %v5486_v14 = vrot.slane %v4258_v26, %v33105_v48  ;;  %v29453_v50 = vadd.f32 %v33729_v7, %v33342_v21  ;;  %v34063_v35 = vrot.slane %v4236_v45, %v33105_v48 }
 0x44b   : > { %v7153_v3 = vsel %vm440_vm0, %v7150_v33, %v39405_v5  ;;  %v5634_v34 = vrot.slane %v4457_v30, %v33105_v48  ;;  %v4311_v8 = vcombine.high %v34051_v15, %v34051_v15  ;;  %v4138_v47 = vrot.slane %v4122_v18, %v33082_v39 }
 0x44c   : > { %v6616_v12 = vcombine.low %v5486_v14, %v5490_v37  ;;  %v34072_v21 = vpack.c.bf16 %v7153_v3, %v7151_v44  ;;  %v3290_v57 = vmax.f32 %v29453_v50, 0.0  ;;  %v4152_v13 = vrot.slane %v4130_v27, %v33082_v39 }
 0x44d   : > { %v5626_v45 = vrot.slane %v4453_v22, %v33105_v48  ;;  %v5630_v26 = vrot.slane %v4455_v59, %v33105_v48  ;;  %v4325_v33 = vrot.slane %v4311_v8, %v33082_v39  ;;  %v7140_v25 = vrot.slane %v6495_v51, 7 }
 0x44e   : > { %39701 = vst [vmem:[#allocation33_spill] sm:$0xff] %v34072_v21  ;;  %v7133_v30 = vrot.slane %v6427_v6, 7  ;;  %v6615_v23 = vcombine.low %v34063_v35, %v5482_v58  ;;  %v4458_v5 = vcombine.high %v3290_v57, %v3290_v57  ;;  %v5950_v46 = vrot.slane %v33898_v42, %v33256_v29  ;;  %27024 = vmatmul.mubr.msk.bf16.gmra.mrb[40].mxu1 %vm7466_vm3, %v33619_v19 }
 0x44f   : > { %v5622_v18 = vrot.slane %v4439_v49, %v33105_v48  ;;  %v6769_v37 = vcombine.low %v5630_v26, %v5634_v34  ;;  %v4327_v44 = vcombine.high %v4325_v33, %v4325_v33  ;;  %v39702_v27 = vrot.slane %v33769_v11, 7  ;;  %27027 = vmatprep.mubr.msk.bf16.mxu1 %vm7466_vm3, %v34036_v55 }
 0x450   : > { %v6630_v59 = vrot.slane %v6616_v12, %v33124_v2  ;;  %v4465_v14 = vrot.slane %v3290_v57, %v33082_v39  ;;  %v4472_v51 = vrot.slane %v4458_v5, %v33082_v39  ;;  %v39703_v6 = vrot.slane %v33693_v17, 7 }
 0x451   : > { %v7135_v22 = vsel %vm440_vm0, %v7133_v30, %v39702_v27  ;;  %v4160_v42 = vcombine.high %v4138_v47, %v4138_v47  ;;  %v4162_v50 = vcombine.high %v4152_v13, %v4152_v13  ;;  %v6768_v49 = vcombine.low %v5622_v18, %v5626_v45 }
 0x452   : > { %v34091_v58 = vsel %vm440_vm0, %v7140_v25, %v39703_v6  ;;  %v34096_v11 = vsel %vm440_vm0, %v5954_v24, %v7140_v25  ;;  %v7369_v3 = vsel %vm440_vm0, %v5950_v46, %v7133_v30  ;;  %v6623_v34 = vrot.slane %v6615_v23, %v33124_v2 }
 0x453   : > { %v5418_v5 = vrot.slane %v4152_v13, %v33105_v48  ;;  %v34103_v17 = vpack.c.bf16 %v7135_v22, %v7369_v3  ;;  %v34106_v8 = vrot.slane %v4138_v47, %v33105_v48  ;;  %v6783_v12 = vrot.slane %v6769_v37, %v33124_v2 }
 0x454   : > { %v4355_v57 = vrot.slane %v4327_v44, %v33082_v39  ;;  %v34110_v24 = vcombine.low %v6623_v34, %v6630_v59  ;;  %v4341_v45 = vrot.slane %v4325_v33, %v33082_v39  ;;  %v4473_v26 = vcombine.high %v4465_v14, %v4465_v14 }
 0x455   : > { %39704 = vst [vmem:[#allocation34_spill] sm:$0xff] %v34103_v17  ;;  %v4474_v23 = vcombine.high %v4472_v51, %v4472_v51  ;;  %v34114_v13 = vrot.slane %v4160_v42, %v33105_v48  ;;  %v34117_v25 = vrot.slane %v4162_v50, %v33105_v48  ;;  %v6776_v30 = vrot.slane %v6768_v49, %v33124_v2 }
 0x456   : > { %v4481_v47 = vrot.slane %v4465_v14, %v33082_v39  ;;  %v34122_v46 = vcombine.low %v34106_v8, %v5418_v5  ;;  %v4488_v18 = vrot.slane %v4472_v51, %v33082_v39  ;;  %v4495_v37 = vrot.slane %v4473_v26, %v33082_v39  ;;  %27028 = vmatmul.mubr.msk.bf16.gmra.mrb[44].mxu1 %vm7466_vm3, %v33547_v31 }
 0x457   : > { %v4502_v33 = vrot.slane %v4474_v23, %v33082_v39  ;;  %v34127_v44 = vcombine.low %v6776_v30, %v6783_v12  ;;  %v4359_v27 = vcombine.high %v4355_v57, %v4355_v57  ;;  %v29454_v59 = vadd.f32 %v33729_v7, %v33396_v60  ;;  %27031 = vmatprep.mubr.msk.bf16.mxu1 %vm7466_vm3, %v34036_v55 }
 0x458   : > { %v4503_v22 = vcombine.high %v4481_v47, %v4481_v47  ;;  %v4357_v6 = vcombine.high %v4341_v45, %v4341_v45  ;;  %v4504_v42 = vcombine.high %v4488_v18, %v4488_v18  ;;  %v4505_v50 = vcombine.high %v4495_v37, %v4495_v37 }
 0x459   : > { %v4506_v14 = vcombine.high %v4502_v33, %v4502_v33  ;;  %v5558_v49 = vrot.slane %v4341_v45, %v33105_v48  ;;  %v5562_v3 = vrot.slane %v4355_v57, %v33105_v48  ;;  %v5638_v51 = vrot.slane %v4481_v47, %v33105_v48 }
 0x45a   : > { %v5642_v34 = vrot.slane %v4495_v37, %v33105_v48  ;;  %v5646_v5 = vrot.slane %v4503_v22, %v33105_v48  ;;  %v5650_v12 = vrot.slane %v4505_v50, %v33105_v48  ;;  %v5654_v60 = vrot.slane %v4488_v18, %v33105_v48 }
 0x45b   : > { %v5658_v26 = vrot.slane %v4502_v33, %v33105_v48  ;;  %v5570_v57 = vrot.slane %v4359_v27, %v33105_v48  ;;  %v5662_v45 = vrot.slane %v4504_v42, %v33105_v48  ;;  %v34146_v23 = vrot.slane %v4506_v14, %v33105_v48 }
 0x45c   : > { %v6785_v30 = vcombine.low %v5638_v51, %v5642_v34  ;;  %v6786_v47 = vcombine.low %v5646_v5, %v5650_v12  ;;  %v3288_v22 = vmax.f32 %v29454_v59, 0.0  ;;  %v29455_v50 = vadd.f32 %v33729_v7, %v39706_v63 }
 0x45d   : > { %39705 = vst [vmem:[#allocation35_spill] sm:$0xff] %v34146_v23  ;;  %v6802_v37 = vcombine.low %v5654_v60, %v5658_v26  ;;  %v6548_v18 = vcombine.low %v34114_v13, %v34117_v25  ;;  %v4416_v33 = vrot.slane %v33947_v53, %v33082_v39  ;;  %v5566_v27 = vrot.slane %v4357_v6, %v33105_v48 }
 0x45e   : > { %v6803_v42 = vcombine.low %v5662_v45, %v34146_v23  ;;  %v6700_v10 = vcombine.low %v5558_v49, %v5562_v3  ;;  %v6793_v14 = vrot.slane %v6785_v30, %v33124_v2  ;;  %v6800_v51 = vrot.slane %v6786_v47, %v33124_v2  ;;  %27032 = vmatmul.mubr.msk.bf16.gmra.mrb[48].mxu1 %vm7466_vm3, %v33547_v31 }
 0x45f   : > { %v4360_v34 = vcombine.high %v3288_v22, %v3288_v22  ;;  %v6810_v59 = vrot.slane %v6802_v37, %v33124_v2  ;;  %v4367_v5 = vrot.slane %v3288_v22, %v33082_v39  ;;  %v34161_v13 = vmax.f32 %v29455_v50, 0.0  ;;  %27035 = vmatprep.mubr.msk.bf16.mxu1 %vm7466_vm3, %v34103_v17 }
 0x460   : > { %v6817_v63 = vrot.slane %v6803_v42, %v33124_v2  ;;  %v39408_v53 = vrot.slane %v34127_v44, 7  ;;  %v6701_v25 = vcombine.low %v5566_v27, %v5570_v57  ;;  %v6801_v6 = vcombine.low %v6793_v14, %v6800_v51 }
 0x461   : > { %v4374_v12 = vrot.slane %v4360_v34, %v33082_v39  ;;  %v4424_v49 = vcombine.high %v4416_v33, %v4416_v33  ;;  %v4375_v60 = vcombine.high %v4367_v5, %v4367_v5  ;;  %v4383_v26 = vrot.slane %v4367_v5, %v33082_v39 }
 0x462   : > { %v34165_v3 = vcombine.low %v6810_v59, %v6817_v63  ;;  %v6708_v45 = vrot.slane %v6700_v10, %v33124_v2  ;;  %v7171_v30 = vrot.slane %v6801_v6, 7  ;;  %v4605_v27 = vcombine.high %v34161_v13, %v34161_v13 }
 0x463   : > { %v4376_v47 = vcombine.high %v4374_v12, %v4374_v12  ;;  %v4390_v37 = vrot.slane %v4374_v12, %v33082_v39  ;;  %v4397_v22 = vrot.slane %v4375_v60, %v33082_v39  ;;  %v4405_v50 = vcombine.high %v4383_v26, %v4383_v26 }
 0x464   : > { %39707 = vst [vmem:[#allocation11_spill] sm:$0xff] %v34165_v3  ;;  %v39411_v57 = vrot.slane %v34165_v3, 7  ;;  %v6715_v42 = vrot.slane %v6701_v25, %v33124_v2  ;;  %v7172_v10 = vsel %vm440_vm0, %v39408_v53, %v7171_v30  ;;  %v5574_v63 = vrot.slane %v4383_v26, %v33105_v48 }
 0x465   : > { %v4404_v14 = vrot.slane %v4376_v47, %v33082_v39  ;;  %v4406_v51 = vcombine.high %v4390_v37, %v4390_v37  ;;  %v4407_v59 = vcombine.high %v4397_v22, %v4397_v22  ;;  %v5578_v5 = vrot.slane %v4397_v22, %v33105_v48 }
 0x466   : > { %v7174_v34 = vsel %vm440_vm0, %v7171_v30, %v39411_v57  ;;  %v5590_v25 = vrot.slane %v4390_v37, %v33105_v48  ;;  %v5582_v53 = vrot.slane %v4405_v50, %v33105_v48  ;;  %v4619_v3 = vrot.slane %v4605_v27, %v33082_v39  ;;  %27036 = vmatmul.mubr.msk.bf16.gmra.mrb[52].mxu1 %vm7466_vm3, %v33846_v0 }
 0x467   : > { %v34188_v6 = vpack.c.bf16 %v7174_v34, %v7172_v10  ;;  %v4408_v12 = vcombine.high %v4404_v14, %v4404_v14  ;;  %v5594_v60 = vrot.slane %v4404_v14, %v33105_v48  ;;  %v5586_v47 = vrot.slane %v4407_v59, %v33105_v48  ;;  %v39709_v10 = vld [vmem:[#allocation12_spill] sm:$0xff]  ;;  %27039 = vmatprep.mubr.msk.bf16.mxu1 %vm7466_vm3, %v34103_v17 }
 0x468   : > { %v6717_v23 = vcombine.low %v5574_v63, %v5578_v5  ;;  %v5598_v30 = vrot.slane %v4406_v51, %v33105_v48  ;;  %v29456_v34 = vadd.f32 %v33729_v7, %v39709_v10  ;;  %v34202_v37 = vrot.slane %v4424_v49, %v33082_v39 }
 0x469   : > { %v34197_v26 = vrot.slane %v4408_v12, %v33105_v48  ;;  %v6734_v22 = vcombine.low %v5590_v25, %v5594_v60  ;;  %v34204_v14 = vcombine.low %v6708_v45, %v6715_v42  ;;  %v6718_v50 = vcombine.low %v5582_v53, %v5586_v47 }
 0x46a   : > { %v4621_v57 = vcombine.high %v4619_v3, %v4619_v3  ;;  %v6562_v27 = vrot.slane %v6548_v18, %v33124_v2  ;;  %v4432_v51 = vrot.slane %v4416_v33, %v33082_v39  ;;  %v4635_v63 = vrot.slane %v4619_v3, %v33082_v39 }
 0x46b   : > { %39708 = vst [vmem:[#allocation36_spill] sm:$0xff] %v34197_v26  ;;  %v6735_v59 = vcombine.low %v5598_v30, %v34197_v26  ;;  %v4318_v49 = vrot.slane %v34051_v15, %v33082_v39  ;;  %v6725_v53 = vrot.slane %v6717_v23, %v33124_v2  ;;  %v6732_v45 = vrot.slane %v6718_v50, %v33124_v2 }
 0x46c   : > { %v4649_v42 = vrot.slane %v4621_v57, %v33082_v39  ;;  %v6555_v18 = vrot.slane %v34122_v46, %v33124_v2  ;;  %v6742_v33 = vrot.slane %v6734_v22, %v33124_v2  ;;  %v34223_v3 = vmax.f32 %v29456_v34, 0.0 }
 0x46d   : > { %v6749_v5 = vrot.slane %v6735_v59, %v33124_v2  ;;  %v4456_v12 = vcombine.high %v34202_v37, %v34202_v37  ;;  %v39413_v15 = vrot.slane %v34204_v14, 7  ;;  %v6733_v25 = vcombine.low %v6725_v53, %v6732_v45 }
 0x46e   : > { %v4653_v23 = vcombine.high %v4649_v42, %v4649_v42  ;;  %v34230_v60 = vpack.c.bf16 %v34091_v58, %v34096_v11  ;;  %v4651_v46 = vcombine.high %v4635_v63, %v4635_v63  ;;  %v6563_v47 = vcombine.low %v6555_v18, %v6562_v27  ;;  %27040 = vmatmul.mubr.msk.bf16.gmra.mrb[56].mxu1 %vm7466_vm3, %v33846_v0 }
 0x46f   : > { %v34232_v57 = vcombine.low %v6742_v33, %v6749_v5  ;;  %v4454_v30 = vcombine.high %v4432_v51, %v4432_v51  ;;  %v4326_v22 = vcombine.high %v4318_v49, %v4318_v49  ;;  %v7164_v10 = vrot.slane %v6733_v25, 7 }
 0x470   : > { %39710 = vst [vmem:[#allocation12_spill] sm:$0xff] %v34230_v60  ;;  %v5962_v34 = vrot.slane %v34063_v35, %v33256_v29  ;;  %v5762_v59 = vrot.slane %v4653_v23, %v33105_v48  ;;  %v4507_v53 = vcombine.high %v34223_v3, %v34223_v3  ;;  %v7154_v58 = vrot.slane %v34110_v24, 7  ;;  %27043 = vmatprep.mubr.msk.bf16.mxu1 %vm7466_vm3, %v34230_v60 }
 0x471   : > { %39711 = vst [vmem:[#allocation37_spill] sm:$0xff] %v34232_v57  ;;  %v39412_v50 = vrot.slane %v34232_v57, 7  ;;  %v5958_v11 = vrot.slane %v34106_v8, %v33256_v29  ;;  %v5618_v27 = vrot.slane %v4456_v12, %v33105_v48  ;;  %v7165_v45 = vsel %vm440_vm0, %v39413_v15, %v7164_v10 }
 0x472   : > { %v5754_v18 = vrot.slane %v4649_v42, %v33105_v48  ;;  %v5758_v24 = vrot.slane %v4651_v46, %v33105_v48  ;;  %v4521_v33 = vrot.slane %v4507_v53, %v33082_v39  ;;  %v7147_v8 = vrot.slane %v6563_v47, 7 }
 0x473   : > { %v7167_v35 = vsel %vm440_vm0, %v7164_v10, %v39412_v50  ;;  %v5614_v5 = vrot.slane %v4454_v30, %v33105_v48  ;;  %v4348_v12 = vrot.slane %v4326_v22, %v33082_v39  ;;  %v4334_v23 = vrot.slane %v4318_v49, %v33082_v39 }
 0x474   : > { %v34259_v25 = vpack.c.bf16 %v7167_v35, %v7165_v45  ;;  %v5750_v10 = vrot.slane %v4635_v63, %v33105_v48  ;;  %v6905_v50 = vcombine.low %v5758_v24, %v5762_v59  ;;  %v4523_v42 = vcombine.high %v4521_v33, %v4521_v33  ;;  %v39715_v63 = vld [vmem:[#allocation15_spill] sm:$0xff] }
 0x475   : > { %v39713_v46 = vrot.slane %v33931_v41, 7  ;;  %v39714_v15 = vrot.slane %v33964_v61, 7  ;;  %v5610_v30 = vrot.slane %v34202_v37, %v33105_v48  ;;  %v4537_v22 = vrot.slane %v4521_v33, %v33082_v39 }
 0x476   : > { %39712 = vst [vmem:[#allocation38_spill] sm:$0xff] %v34259_v25  ;;  %v6752_v45 = vcombine.low %v5614_v5, %v5618_v27  ;;  %v6904_v35 = vcombine.low %v5750_v10, %v5754_v18  ;;  %v4551_v49 = vrot.slane %v4523_v42, %v33082_v39  ;;  %v29457_v59 = vadd.f32 %v33729_v7, %v39715_v63 }
 0x477   : > { %v7156_v53 = vsel %vm440_vm0, %v7154_v58, %v39713_v46  ;;  %v7149_v47 = vsel %vm440_vm0, %v7147_v8, %v39714_v15  ;;  %v7372_v41 = vsel %vm440_vm0, %v5962_v34, %v7154_v58  ;;  %v34277_v24 = vrot.slane %v4432_v51, %v33105_v48  ;;  %27044 = vmatmul.mubr.msk.bf16.gmra.mrb[60].mxu1 %vm7466_vm3, %v33764_v4 }
 0x478   : > { %v4358_v61 = vcombine.high %v4348_v12, %v4348_v12  ;;  %v7371_v15 = vsel %vm440_vm0, %v5958_v11, %v7147_v8  ;;  %v4356_v46 = vcombine.high %v4334_v23, %v4334_v23  ;;  %v6919_v37 = vrot.slane %v6905_v50, %v33124_v2  ;;  %27047 = vmatprep.mubr.msk.bf16.mxu1 %vm7466_vm3, %v34230_v60  ;;  %v34300_v11 = vld [vmem:[%s39363_s3 + $0xc0] sm:$0xff]  }
 0x479   : > { %v4555_v57 = vcombine.high %v4551_v49, %v4551_v49  ;;  %v34281_v33 = vpack.c.bf16 %v7156_v53, %v7372_v41  ;;  %v34283_v27 = vpack.c.bf16 %v7149_v47, %v7371_v15  ;;  %v34286_v18 = vcombine.low %v34277_v24, %v5610_v30  ;;  %27247 = vmatprep.subr.bf16.mxu1 %v34300_v11 }
 0x47a   : > { %v4553_v5 = vcombine.high %v4537_v22, %v4537_v22  ;;  %v34291_v51 = vrot.slane %v6752_v45, %v33124_v2  ;;  %v5546_v34 = vrot.slane %v4348_v12, %v33105_v48  ;;  %v6912_v58 = vrot.slane %v6904_v35, %v33124_v2 }
 0x47b   : > { %39716 = vst [vmem:[#allocation15_spill] sm:$0xff] %v34281_v33  ;;  %39717 = vst [vmem:[#allocation39_spill] sm:$0xff] %v34283_v27  ;;  %v3294_v50 = vmax.f32 %v29457_v59, 0.0  ;;  %v34303_v8 = vrot.slane %v4334_v23, %v33105_v48  ;;  %v34306_v10 = vrot.slane %v4358_v61, %v33105_v48  ;;  %v5698_v42 = vrot.slane %v4555_v57, %v33105_v48  ;;  %v39718_v59 = vld [vmem:[#allocation20_spill] sm:$0xff] }
 0x47c   : > { %v29458_v12 = vadd.f32 %v33729_v7, %v33593_v1  ;;  %v34312_v53 = vrot.slane %v4356_v46, %v33105_v48  ;;  %v34314_v47 = vcombine.low %v6912_v58, %v6919_v37  ;;  %v5690_v23 = vrot.slane %v4551_v49, %v33105_v48 }
 0x47d   : > { %v4654_v30 = vcombine.high %v3294_v50, %v3294_v50  ;;  %v4661_v45 = vrot.slane %v3294_v50, %v33082_v39  ;;  %v5694_v35 = vrot.slane %v4553_v5, %v33105_v48  ;;  %v29459_v57 = vadd.f32 %v33729_v7, %v39718_v59 }
 0x47e   : > { %v3292_v63 = vmax.f32 %v29458_v12, 0.0  ;;  %v34323_v1 = vcombine.low %v34303_v8, %v5546_v34  ;;  %v5686_v37 = vrot.slane %v4537_v22, %v33105_v48 }
 0x47f   : > { %v4668_v41 = vrot.slane %v4654_v30, %v33082_v39  ;;  %v4669_v61 = vcombine.high %v4661_v45, %v4661_v45  ;;  %v4677_v15 = vrot.slane %v4661_v45, %v33082_v39  ;;  %v6837_v49 = vcombine.low %v5694_v35, %v5698_v42  ;;  %27048 = vmatmul.mubr.msk.bf16.gmra.mrb[64].mxu1 %vm7466_vm3, %v33764_v4 }
 0x480   : > { %v4556_v58 = vcombine.high %v3292_v63, %v3292_v63  ;;  %v6836_v12 = vcombine.low %v5686_v37, %v5690_v23  ;;  %v4563_v30 = vrot.slane %v3292_v63, %v33082_v39  ;;  %v34334_v26 = vmax.f32 %v29459_v57, 0.0  ;;  %27051 = vmatprep.mubr.msk.bf16.mxu1 %vm7466_vm3, %v34283_v27 }
 0x481   : > { %v4670_v50 = vcombine.high %v4668_v41, %v4668_v41  ;;  %v4684_v7 = vrot.slane %v4668_v41, %v33082_v39  ;;  %v4691_v34 = vrot.slane %v4669_v61, %v33082_v39  ;;  %v4699_v59 = vcombine.high %v4677_v15, %v4677_v15 }
 0x482   : > { %v4570_v35 = vrot.slane %v4556_v58, %v33082_v39  ;;  %v6851_v41 = vrot.slane %v6837_v49, %v33124_v2  ;;  %v5766_v23 = vrot.slane %v4677_v15, %v33105_v48  ;;  %v6844_v58 = vrot.slane %v6836_v12, %v33124_v2 }
 0x483   : > { %v4698_v22 = vrot.slane %v4670_v50, %v33082_v39  ;;  %v4700_v42 = vcombine.high %v4684_v7, %v4684_v7  ;;  %v4701_v45 = vcombine.high %v4691_v34, %v4691_v34  ;;  %v5770_v63 = vrot.slane %v4691_v34, %v33105_v48 }
 0x484   : > { %v5774_v57 = vrot.slane %v4699_v59, %v33105_v48  ;;  %v5782_v50 = vrot.slane %v4684_v7, %v33105_v48  ;;  %v4571_v38 = vcombine.high %v4563_v30, %v4563_v30  ;;  %v4572_v4 = vcombine.high %v4570_v35, %v4570_v35 }
 0x485   : > { %v4702_v61 = vcombine.high %v4698_v22, %v4698_v22  ;;  %v5778_v37 = vrot.slane %v4701_v45, %v33105_v48  ;;  %v5786_v46 = vrot.slane %v4698_v22, %v33105_v48  ;;  %v5790_v5 = vrot.slane %v4700_v42, %v33105_v48 }
 0x486   : > { %v6921_v28 = vcombine.low %v5766_v23, %v5770_v63  ;;  %v4579_v59 = vrot.slane %v4563_v30, %v33082_v39  ;;  %v4586_v45 = vrot.slane %v4570_v35, %v33082_v39  ;;  %v4593_v7 = vrot.slane %v4571_v38, %v33082_v39 }
 0x487   : > { %v34352_v49 = vrot.slane %v4702_v61, %v33105_v48  ;;  %v6922_v15 = vcombine.low %v5774_v57, %v5778_v37  ;;  %v6938_v34 = vcombine.low %v5782_v50, %v5786_v46  ;;  %v4801_v22 = vcombine.high %v34334_v26, %v34334_v26  ;;  %27052 = vmatmul.mubr.msk.bf16.gmra.mrb[68].mxu1 %vm7466_vm3, %v34072_v21 }
 0x488   : > { %v34359_v12 = vcombine.low %v6844_v58, %v6851_v41  ;;  %v6929_v42 = vrot.slane %v6921_v28, %v33124_v2  ;;  %v4600_v46 = vrot.slane %v4572_v4, %v33082_v39  ;;  %v4601_v57 = vcombine.high %v4579_v59, %v4579_v59  ;;  %27055 = vmatprep.mubr.msk.bf16.mxu1 %vm7466_vm3, %v34283_v27 }
 0x489   : > { %39719 = vst [vmem:[#allocation20_spill] sm:$0xff] %v34352_v49  ;;  %v6936_v23 = vrot.slane %v6922_v15, %v33124_v2  ;;  %v6939_v63 = vcombine.low %v5790_v5, %v34352_v49  ;;  %v4602_v61 = vcombine.high %v4586_v45, %v4586_v45  ;;  %v4603_v30 = vcombine.high %v4593_v7, %v4593_v7 }
 0x48a   : > { %v6946_v35 = vrot.slane %v6938_v34, %v33124_v2  ;;  %v5706_v37 = vrot.slane %v4593_v7, %v33105_v48  ;;  %v4604_v28 = vcombine.high %v4600_v46, %v4600_v46  ;;  %v5702_v5 = vrot.slane %v4579_v59, %v33105_v48 }
 0x48b   : > { %v6937_v38 = vcombine.low %v6929_v42, %v6936_v23  ;;  %v6953_v41 = vrot.slane %v6939_v63, %v33124_v2  ;;  %v5710_v4 = vrot.slane %v4601_v57, %v33105_v48  ;;  %v5714_v50 = vrot.slane %v4603_v30, %v33105_v48 }
 0x48c   : > { %v5718_v42 = vrot.slane %v4586_v45, %v33105_v48  ;;  %v5722_v34 = vrot.slane %v4600_v46, %v33105_v48  ;;  %v5726_v23 = vrot.slane %v4602_v61, %v33105_v48  ;;  %v34381_v7 = vrot.slane %v4604_v28, %v33105_v48 }
 0x48d   : > { %v34375_v58 = vcombine.low %v6946_v35, %v6953_v41  ;;  %v7185_v15 = vrot.slane %v6937_v38, 7  ;;  %v6853_v63 = vcombine.low %v5702_v5, %v5706_v37  ;;  %v6854_v49 = vcombine.low %v5710_v4, %v5714_v50  ;;  %v32178_v41 = vld [vmem:[%s39362_s2] ss:$0 sm:$0xff] }
 0x48e   : > { %v39721_v59 = vrot.slane %v34314_v47, 7  ;;  %v6870_v35 = vcombine.low %v5718_v42, %v5722_v34  ;;  %v4815_v38 = vrot.slane %v4801_v22, %v33082_v39  ;;  %v6871_v61 = vcombine.low %v5726_v23, %v34381_v7 }
 0x48f   : > { %39720 = vst [vmem:[#allocation40_spill] sm:$0xff] %v34375_v58  ;;  %v39421_v30 = vrot.slane %v34375_v58, 7  ;;  %v6861_v45 = vrot.slane %v6853_v63, %v33124_v2  ;;  %v6868_v46 = vrot.slane %v6854_v49, %v33124_v2  ;;  %v29460_v37 = vadd.f32 %v32178_v41, %v33715_v43  ;;  %27056 = vmatmul.mubr.msk.bf16.gmra.mrb[72].mxu1 %vm7466_vm3, %v34072_v21 }
 0x490   : > { %v7186_v57 = vsel %vm440_vm0, %v39721_v59, %v7185_v15  ;;  %v39722_v28 = vcombine.low %v34312_v53, %v34306_v10  ;;  %v39423_v4 = vrot.slane %v34359_v12, 7  ;;  %v4817_v49 = vcombine.high %v4815_v38, %v4815_v38  ;;  %27059 = vmatprep.mubr.msk.bf16.mxu1 %vm7466_vm3, %v34281_v33 }
 0x491   : > { %v7188_v22 = vsel %vm440_vm0, %v7185_v15, %v39421_v30  ;;  %v6869_v42 = vcombine.low %v6861_v45, %v6868_v46  ;;  %v6878_v34 = vrot.slane %v6870_v35, %v33124_v2  ;;  %v6885_v23 = vrot.slane %v6871_v61, %v33124_v2 }
 0x492   : > { %v6698_v5 = vrot.slane %v39722_v28, %v33124_v2  ;;  %v34403_v50 = vpack.c.bf16 %v7188_v22, %v7186_v57  ;;  %v6759_v43 = vrot.slane %v34286_v18, %v33124_v2  ;;  %v6691_v10 = vrot.slane %v34323_v1, %v33124_v2 }
 0x493   : > { %v4514_v53 = vrot.slane %v34223_v3, %v33082_v39  ;;  %v34417_v15 = vcombine.low %v6878_v34, %v6885_v23  ;;  %v7178_v63 = vrot.slane %v6869_v42, 7  ;;  %v4845_v59 = vrot.slane %v4817_v49, %v33082_v39 }
 0x494   : > { %v34420_v57 = vmax.f32 %v29460_v37, 0.0  ;;  %v6699_v35 = vcombine.low %v6691_v10, %v6698_v5  ;;  %v6767_v45 = vcombine.low %v6759_v43, %v34291_v51  ;;  %v4831_v3 = vrot.slane %v4815_v38, %v33082_v39 }
 0x495   : > { %39723 = vst [vmem:[#allocation41_spill] sm:$0xff] %v34417_v15  ;;  %v7179_v18 = vsel %vm440_vm0, %v39423_v4, %v7178_v63  ;;  %v39422_v1 = vrot.slane %v34417_v15, 7  ;;  %v4522_v46 = vcombine.high %v4514_v53, %v4514_v53  ;;  %v4849_v28 = vcombine.high %v4845_v59, %v4845_v59 }
 0x496   : > { %v4703_v37 = vcombine.high %v34420_v57, %v34420_v57  ;;  %v7161_v5 = vrot.slane %v6699_v35, 7  ;;  %v7168_v51 = vrot.slane %v6767_v45, 7  ;;  %v34437_v49 = vrot.slane %v34161_v13, %v33082_v39 }
 0x497   : > { %v7181_v61 = vsel %vm440_vm0, %v7178_v63, %v39422_v1  ;;  %v4847_v42 = vcombine.high %v4831_v3, %v4831_v3  ;;  %27060 = vmatmul.mubr.msk.bf16.gmra.mrb[76].mxu1 %vm7466_vm3, %v33996_v20  ;;  %v5966_v34 = vrot.slane %v34303_v8, %v33256_v29  ;;  %v4530_v23 = vrot.slane %v4514_v53, %v33082_v39 }
 0x498   : > { %v34433_v22 = vpack.c.bf16 %v7181_v61, %v7179_v18  ;;  %v4717_v38 = vrot.slane %v4703_v37, %v33082_v39  ;;  %v4544_v43 = vrot.slane %v4522_v46, %v33082_v39  ;;  %v29461_v10 = vadd.f32 %v32178_v41, %v33762_v40  ;;  %27063 = vmatprep.mubr.msk.bf16.mxu1 %vm7466_vm3, %v34281_v33 }
 0x499   : > { %v5890_v13 = vrot.slane %v4849_v28, %v33105_v48  ;;  %v29462_v45 = vadd.f32 %v32178_v41, %v33816_v52  ;;  %v5970_v18 = vrot.slane %v34277_v24, %v33256_v29  ;;  %v39725_v8 = vrot.slane %v34127_v44, 7 }
 0x49a   : > { %39724 = vst [vmem:[#allocation42_spill] sm:$0xff] %v34433_v22  ;;  %v4719_v63 = vcombine.high %v4717_v38, %v4717_v38  ;;  %v4733_v35 = vrot.slane %v4717_v38, %v33082_v39  ;;  %v7373_v46 = vsel %vm440_vm0, %v5966_v34, %v7161_v5  ;;  %v5882_v40 = vrot.slane %v4845_v59, %v33105_v48 }
 0x49b   : > { %v7170_v53 = vsel %vm440_vm0, %v7168_v51, %v39725_v8  ;;  %v39726_v61 = vrot.slane %v34204_v14, 7  ;;  %v4620_v37 = vcombine.high %v34437_v49, %v34437_v49  ;;  %v5886_v52 = vrot.slane %v4847_v42, %v33105_v48 }
 0x49c   : > { %v4747_v41 = vrot.slane %v4719_v63, %v33082_v39  ;;  %v4552_v24 = vcombine.high %v4530_v23, %v4530_v23  ;;  %v4554_v38 = vcombine.high %v4544_v43, %v4544_v43  ;;  %v5878_v44 = vrot.slane %v4831_v3, %v33105_v48 }
 0x49d   : > { %v7163_v28 = vsel %vm440_vm0, %v7161_v5, %v39726_v61  ;;  %v3298_v8 = vmax.f32 %v29461_v10, 0.0  ;;  %v7041_v30 = vcombine.low %v5886_v52, %v5890_v13  ;;  %v4749_v34 = vcombine.high %v4733_v35, %v4733_v35 }
 0x49e   : > { %v4751_v1 = vcombine.high %v4747_v41, %v4747_v41  ;;  %v3296_v59 = vmax.f32 %v29462_v45, 0.0  ;;  %v7374_v14 = vsel %vm440_vm0, %v5970_v18, %v7168_v51  ;;  %v34468_v4 = vpack.c.bf16 %v7163_v28, %v7373_v46 }
 0x49f   : > { %v5674_v5 = vrot.slane %v4544_v43, %v33105_v48  ;;  %v7040_v61 = vcombine.low %v5878_v44, %v5882_v40  ;;  %v34471_v58 = vpack.c.bf16 %v7170_v53, %v7374_v14  ;;  %v34474_v42 = vrot.slane %v4620_v37, %v33082_v39  ;;  %27064 = vmatmul.mubr.msk.bf16.gmra.mrb[80].mxu1 %vm7466_vm3, %v33996_v20 }
 0x4a0   : > { %39727 = vst [vmem:[#allocation43_spill] sm:$0xff] %v34468_v4  ;;  %v34477_v63 = vrot.slane %v4530_v23, %v33105_v48  ;;  %v5826_v3 = vrot.slane %v4751_v1, %v33105_v48  ;;  %v5678_v51 = vrot.slane %v4552_v24, %v33105_v48  ;;  %v5682_v10 = vrot.slane %v4554_v38, %v33105_v48 }
 0x4a1   : > { %39728 = vst [vmem:[#allocation44_spill] sm:$0xff] %v34471_v58  ;;  %v4850_v13 = vcombine.high %v3298_v8, %v3298_v8  ;;  %v4857_v43 = vrot.slane %v3298_v8, %v33082_v39  ;;  %27067 = vmatprep.mubr.msk.bf16.mxu1 %vm7466_vm3, %v34468_v4  ;;  %v7055_v45 = vrot.slane %v7041_v30, %v33124_v2 }
 0x4a2   : > { %v5818_v23 = vrot.slane %v4747_v41, %v33105_v48  ;;  %v5822_v18 = vrot.slane %v4749_v34, %v33105_v48  ;;  %v4752_v1 = vcombine.high %v3296_v59, %v3296_v59  ;;  %v34491_v53 = vcombine.low %v34477_v63, %v5674_v5 }
 0x4a3   : > { %v7048_v46 = vrot.slane %v7040_v61, %v33124_v2  ;;  %v4864_v40 = vrot.slane %v4850_v13, %v33082_v39  ;;  %v4865_v28 = vcombine.high %v4857_v43, %v4857_v43  ;;  %v5814_v37 = vrot.slane %v4733_v35, %v33105_v48 }
 0x4a4   : > { %v6973_v52 = vcombine.low %v5822_v18, %v5826_v3  ;;  %v4873_v24 = vrot.slane %v4857_v43, %v33082_v39  ;;  %v4759_v30 = vrot.slane %v3296_v59, %v33082_v39  ;;  %v6820_v38 = vcombine.low %v5678_v51, %v5682_v10 }
 0x4a5   : > { %v4866_v41 = vcombine.high %v4864_v40, %v4864_v40  ;;  %v4880_v44 = vrot.slane %v4864_v40, %v33082_v39  ;;  %v4887_v8 = vrot.slane %v4865_v28, %v33082_v39  ;;  %v34500_v34 = vcombine.low %v7048_v46, %v7055_v45 }
 0x4a6   : > { %v6972_v14 = vcombine.low %v5814_v37, %v5818_v23  ;;  %v4895_v5 = vcombine.high %v4873_v24, %v4873_v24  ;;  %v4766_v61 = vrot.slane %v4752_v1, %v33082_v39  ;;  %v6987_v59 = vrot.slane %v6973_v52, %v33124_v2 }
 0x4a7   : > { %v4894_v13 = vrot.slane %v4866_v41, %v33082_v39  ;;  %v4896_v35 = vcombine.high %v4880_v44, %v4880_v44  ;;  %v4897_v3 = vcombine.high %v4887_v8, %v4887_v8  ;;  %v5898_v43 = vrot.slane %v4887_v8, %v33105_v48  ;;  %27068 = vmatmul.mubr.msk.bf16.gmra.mrb[84].mxu1 %vm7466_vm3, %v34259_v25 }
 0x4a8   : > { %v5894_v51 = vrot.slane %v4873_v24, %v33105_v48  ;;  %v5902_v10 = vrot.slane %v4895_v5, %v33105_v48  ;;  %v4767_v18 = vcombine.high %v4759_v30, %v4759_v30  ;;  %v5910_v1 = vrot.slane %v4880_v44, %v33105_v48  ;;  %27071 = vmatprep.mubr.msk.bf16.mxu1 %vm7466_vm3, %v34468_v4 }
 0x4a9   : > { %v4898_v45 = vcombine.high %v4894_v13, %v4894_v13  ;;  %v5906_v23 = vrot.slane %v4897_v3, %v33105_v48  ;;  %v5914_v46 = vrot.slane %v4894_v13, %v33105_v48  ;;  %v6834_v40 = vrot.slane %v6820_v38, %v33124_v2 }
 0x4aa   : > { %v6980_v28 = vrot.slane %v6972_v14, %v33124_v2  ;;  %v7057_v37 = vcombine.low %v5894_v51, %v5898_v43  ;;  %v4768_v52 = vcombine.high %v4766_v61, %v4766_v61  ;;  %v5918_v24 = vrot.slane %v4896_v35, %v33105_v48 }
 0x4ab   : > { %v34519_v41 = vrot.slane %v4898_v45, %v33105_v48  ;;  %v7058_v8 = vcombine.low %v5902_v10, %v5906_v23  ;;  %v7074_v5 = vcombine.low %v5910_v1, %v5914_v46  ;;  %v7197_v44 = vrot.slane %v34500_v34, 7  ;;  %v39734_v34 = vld [vmem:[#allocation6_spill] sm:$0xff] }
 0x4ac   : > { %v4775_v13 = vrot.slane %v4759_v30, %v33082_v39  ;;  %v4782_v3 = vrot.slane %v4766_v61, %v33082_v39  ;;  %v4789_v15 = vrot.slane %v4767_v18, %v33082_v39  ;;  %v34525_v38 = vcombine.low %v6980_v28, %v6987_v59 }
 0x4ad   : > { %v7065_v14 = vrot.slane %v7057_v37, %v33124_v2  ;;  %v7072_v43 = vrot.slane %v7058_v8, %v33124_v2  ;;  %v7075_v35 = vcombine.low %v5918_v24, %v34519_v41  ;;  %v4796_v51 = vrot.slane %v4768_v52, %v33082_v39 }
 0x4ae   : > { %v4797_v10 = vcombine.high %v4775_v13, %v4775_v13  ;;  %v4798_v45 = vcombine.high %v4782_v3, %v4782_v3  ;;  %v4799_v23 = vcombine.high %v4789_v15, %v4789_v15  ;;  %v7082_v30 = vrot.slane %v7074_v5, %v33124_v2 }
 0x4af   : > { %v7073_v1 = vcombine.low %v7065_v14, %v7072_v43  ;;  %v7089_v61 = vrot.slane %v7075_v35, %v33124_v2  ;;  %v5834_v18 = vrot.slane %v4789_v15, %v33105_v48  ;;  %v4800_v59 = vcombine.high %v4796_v51, %v4796_v51  ;;  %27072 = vmatmul.mubr.msk.bf16.gmra.mrb[88].mxu1 %vm7466_vm3, %v34259_v25 }
 0x4b0   : > { %v5830_v46 = vrot.slane %v4775_v13, %v33105_v48  ;;  %v5838_v28 = vrot.slane %v4797_v10, %v33105_v48  ;;  %v5842_v37 = vrot.slane %v4799_v23, %v33105_v48  ;;  %v5846_v8 = vrot.slane %v4782_v3, %v33105_v48  ;;  %27075 = vmatprep.mubr.msk.bf16.mxu1 %vm7466_vm3, %v34471_v58 }
 0x4b1   : > { %v34539_v52 = vcombine.low %v7082_v30, %v7089_v61  ;;  %v7199_v24 = vrot.slane %v7073_v1, 7  ;;  %v5850_v5 = vrot.slane %v4796_v51, %v33105_v48  ;;  %v5854_v15 = vrot.slane %v4798_v45, %v33105_v48 }
 0x4b2   : > { %v34547_v13 = vrot.slane %v4800_v59, %v33105_v48  ;;  %v6989_v14 = vcombine.low %v5830_v46, %v5834_v18  ;;  %v6990_v43 = vcombine.low %v5838_v28, %v5842_v37  ;;  %v6827_v35 = vrot.slane %v34491_v53, %v33124_v2 }
 0x4b3   : > { %v7200_v10 = vsel %vm440_vm0, %v7197_v44, %v7199_v24  ;;  %v7201_v3 = vrot.slane %v34539_v52, 7  ;;  %v7006_v51 = vcombine.low %v5846_v8, %v5850_v5  ;;  %v4628_v23 = vrot.slane %v34437_v49, %v33082_v39  ;;  %v39735_v52 = vld [vmem:[#allocation23_spill] sm:$0xff] }
 0x4b4   : > { %v6997_v45 = vrot.slane %v6989_v14, %v33124_v2  ;;  %v7004_v1 = vrot.slane %v6990_v43, %v33124_v2  ;;  %v7007_v30 = vcombine.low %v5854_v15, %v34547_v13  ;;  %v4652_v61 = vcombine.high %v34474_v42, %v34474_v42 }
 0x4b5   : > { %v6835_v53 = vcombine.low %v6827_v35, %v6834_v40  ;;  %v7190_v18 = vrot.slane %v34525_v38, 7  ;;  %v7202_v59 = vsel %vm440_vm0, %v7199_v24, %v7201_v3  ;;  %v7014_v49 = vrot.slane %v7006_v51, %v33124_v2 }
 0x4b6   : > { %v34566_v46 = vpack.c.bf16 %v7202_v59, %v7200_v10  ;;  %v7005_v28 = vcombine.low %v6997_v45, %v7004_v1  ;;  %v7021_v37 = vrot.slane %v7007_v30, %v33124_v2  ;;  %v4650_v8 = vcombine.high %v4628_v23, %v4628_v23 }
 0x4b7   : > { %27076 = vmatmul.mubr.msk.bf16.gmra.mrb[92].mxu1 %vm7466_vm3, %v34188_v6  ;;  %v5746_v40 = vrot.slane %v4652_v61, %v33105_v48  ;;  %v7175_v24 = vrot.slane %v6835_v53, 7  ;;  %v4710_v14 = vrot.slane %v34420_v57, %v33082_v39  ;;  %v5738_v10 = vrot.slane %v34474_v42, %v33105_v48 }
 0x4b8   : > { %v34570_v5 = vcombine.low %v7014_v49, %v7021_v37  ;;  %v7192_v15 = vrot.slane %v7005_v28, 7  ;;  %27079 = vmatprep.mubr.msk.bf16.mxu1 %vm7466_vm3, %v34471_v58  ;;  %v5742_v51 = vrot.slane %v4650_v8, %v33105_v48  ;;  %v5974_v45 = vrot.slane %v34477_v63, %v33256_v29 }
 0x4b9   : > { %v39729_v1 = vrot.slane %v34359_v12, 7  ;;  %v5734_v53 = vrot.slane %v4628_v23, %v33105_v48  ;;  %v4718_v28 = vcombine.high %v4710_v14, %v4710_v14  ;;  %v4726_v23 = vrot.slane %v4710_v14, %v33082_v39 }
 0x4ba   : > { %v7193_v43 = vsel %vm440_vm0, %v7190_v18, %v7192_v15  ;;  %v7194_v35 = vrot.slane %v34570_v5, 7  ;;  %v6888_v59 = vcombine.low %v5742_v51, %v5746_v40  ;;  %v7375_v42 = vsel %vm440_vm0, %v5974_v45, %v7175_v24 }
 0x4bb   : > { %v7177_v30 = vsel %vm440_vm0, %v7175_v24, %v39729_v1  ;;  %v6887_v37 = vcombine.low %v5734_v53, %v5738_v10  ;;  %v4740_v63 = vrot.slane %v4718_v28, %v33082_v39  ;;  %v4748_v24 = vcombine.high %v4726_v23, %v4726_v23 }
 0x4bc   : > { %v7195_v57 = vsel %vm440_vm0, %v7192_v15, %v7194_v35  ;;  %v34598_v49 = vpack.c.bf16 %v7177_v30, %v7375_v42  ;;  %v6902_v12 = vrot.slane %v6888_v59, %v33124_v2  ;;  %v4808_v10 = vrot.slane %v34334_v26, %v33082_v39 }
 0x4bd   : > { %v34594_v61 = vpack.c.bf16 %v7195_v57, %v7193_v43  ;;  %v6895_v8 = vrot.slane %v6887_v37, %v33124_v2  ;;  %v4750_v40 = vcombine.high %v4740_v63, %v4740_v63  ;;  %v5978_v45 = vrot.slane %v5734_v53, %v33256_v29 }
 0x4be   : > { %39730 = vst [vmem:[#allocation45_spill] sm:$0xff] %v34598_v49  ;;  %v39731_v1 = vrot.slane %v34314_v47, 7  ;;  %v5802_v30 = vrot.slane %v4740_v63, %v33105_v48  ;;  %v5806_v57 = vrot.slane %v4748_v24, %v33105_v48  ;;  %v4816_v42 = vcombine.high %v4808_v10, %v4808_v10 }
 0x4bf   : > { %27080 = vmatmul.mubr.msk.bf16.gmra.mrb[96].mxu1 %vm7466_vm3, %v34188_v6  ;;  %v6903_v15 = vcombine.low %v6895_v8, %v6902_v12  ;;  %v5810_v51 = vrot.slane %v4750_v40, %v33105_v48  ;;  %v5798_v28 = vrot.slane %v4726_v23, %v33105_v48  ;;  %v4824_v63 = vrot.slane %v4808_v10, %v33082_v39 }
 0x4c0   : > { %27083 = vmatprep.mubr.msk.bf16.mxu1 %vm7466_vm3, %v34598_v49  ;;  %v4838_v47 = vrot.slane %v4816_v42, %v33082_v39 }
 0x4c1   : > { %v7182_v43 = vrot.slane %v6903_v15, 7  ;;  %v6956_v37 = vcombine.low %v5806_v57, %v5810_v51  ;;  %v6955_v26 = vcombine.low %v5798_v28, %v5802_v30  ;;  %v4846_v40 = vcombine.high %v4824_v63, %v4824_v63 }
 0x4c2   : > { %v4848_v15 = vcombine.high %v4838_v47, %v4838_v47  ;;  %v5866_v51 = vrot.slane %v4838_v47, %v33105_v48  ;;  %v5982_v39 = vrot.slane %v5798_v28, %v33256_v29 }
 0x4c3   : > { %v7184_v14 = vsel %vm440_vm0, %v7182_v43, %v39731_v1  ;;  %v7376_v59 = vsel %vm440_vm0, %v5978_v45, %v7182_v43  ;;  %v6970_v53 = vrot.slane %v6956_v37, %v33124_v2  ;;  %v6963_v8 = vrot.slane %v6955_v26, %v33124_v2 }
 0x4c4   : > { %v34623_v12 = vpack.c.bf16 %v7184_v14, %v7376_v59  ;;  %v5874_v24 = vrot.slane %v4848_v15, %v33105_v48  ;;  %v5870_v45 = vrot.slane %v4846_v40, %v33105_v48  ;;  %v5862_v1 = vrot.slane %v4824_v63, %v33105_v48  ;;  %v32118_v63 = vld [vmem:[%s39363_s3 + $0x28] sm:$0xff]   ;;  %v32120_v15 = vld [vmem:[%s39363_s3 + $0x38] sm:$0xff]  }
 0x4c5   : > { %v6971_v23 = vcombine.low %v6963_v8, %v6970_v53  ;;  %v7346_v26 = vrot.slane %v34519_v41, %v33105_v48  ;;  %v39733_v41 = vld [vmem:[#allocation19_spill] sm:$0xff]  ;;  %v32119_v8 = vld [vmem:[%s39363_s3 + $0x30] sm:$0xff]  }
 0x4c6   : > { %v7024_v14 = vcombine.low %v5870_v45, %v5874_v24  ;;  %v7023_v59 = vcombine.low %v5862_v1, %v5866_v51  ;;  %v9666_v40 = vshll.u32 %v39733_v41, 16  ;;  %v39736_v24 = vld [vmem:[#allocation4_spill] sm:$0xff]  ;;  %v9670_v45 = vshll.u32 %v39734_v34, 16 }
 0x4c7   : > { %27084 = vmatmul.mubr.msk.bf16.gmra.mrb[100].mxu1 %vm7466_vm3, %v34433_v22  ;;  %v7189_v43 = vrot.slane %v6971_v23, 7  ;;  %v32121_v23 = vld [vmem:[%s39363_s3 + $0x80] sm:$0xff]  }
 0x4c8   : > { %27087 = vmatprep.mubr.msk.bf16.mxu1 %vm7466_vm3, %v34598_v49  ;;  %v7038_v42 = vrot.slane %v7024_v14, %v33124_v2  ;;  %v7031_v38 = vrot.slane %v7023_v59, %v33124_v2  ;;  %v34670_v2 = vsel %vm440_vm0, %v7201_v3, %v7346_v26  ;;  %v32117_v3 = vld [vmem:[%s39363_s3 + $0x20] sm:$0xff]   ;;  %v9668_v51 = vrot.slane %v9666_v40, 1 }
 0x4c9   : > { %v7191_v10 = vsel %vm440_vm0, %v7189_v43, %v7190_v18  ;;  %v7377_v30 = vsel %vm440_vm0, %v5982_v39, %v7189_v43  ;;  %v7342_v18 = vrot.slane %v34547_v13, %v33105_v48  ;;  %v5986_v13 = vrot.slane %v5862_v1, %v33256_v29  ;;  %v32114_v29 = vld [vmem:[%s39363_s3 + $0xc8] sm:$0xff]  }
 0x4ca   : > { %v34646_v57 = vpack.c.bf16 %v7191_v10, %v7377_v30  ;;  %v7039_v28 = vcombine.low %v7031_v38, %v7038_v42  ;;  %v7286_v43 = vrot.slane %v39736_v24, %v33105_v48  ;;  %v9664_v39 = vshrl.u32 %v39733_v41, 16  ;;  %v39737_v10 = vld [vmem:[#allocation5_spill] sm:$0xff] }
 0x4cb   : > { %v34659_v37 = vsel %vm440_vm0, %v7194_v35, %v7342_v18  ;;  %v39738_v1 = vrot.slane %v39737_v10, 7  ;;  %v9672_v59 = vrot.slane %v9670_v45, 1  ;;  %v9674_v18 = vshrl.u32 %v39734_v34, 16 }
 0x4cc   : > { %39732 = vst [vmem:[#allocation46_spill] sm:$0xff] %v34646_v57  ;;  %v7196_v47 = vrot.slane %v7039_v28, 7  ;;  %v9669_v30 = vor.u32 %v9668_v51, %v9664_v39  ;;  %v9692_v39 = vshrl.u32 %v33206_v32, 16 }
 0x4cd   : > { %v7379_v14 = vsel %vm440_vm0, %v39738_v1, %v7286_v43  ;;  %v9676_v26 = vor.u32 %v9674_v18, %v9672_v59  ;;  %v39742_v18 = vld [vmem:[#allocation9_spill] sm:$0xff] }
 0x4ce   : > { %v7198_v5 = vsel %vm440_vm0, %v7196_v47, %v7197_v44  ;;  %v7378_v35 = vsel %vm440_vm0, %v5986_v13, %v7196_v47  ;;  %v32115_v44 = vld [vmem:[%s39363_s3 + $0xd0] sm:$0xff]   ;;  %v34972_v42 = vpack.c.bf16 %v7379_v14, %v7379_v14  ;;  %v34977_v38 = vsel %vm1413_vm1, %v9669_v30, %v9672_v59  ;;  %v32122_v13 = vld [vmem:[%s39363_s3 + $0x88] sm:$0xff]  }
 0x4cf   : > { %27088 = vmatmul.mubr.msk.bf16.gmra.mrb[104].mxu1 %vm7466_vm3, %v34433_v22  ;;  %v34677_v53 = vpack.c.bf16 %v7198_v5, %v7378_v35  ;;  %v32123_v35 = vld [vmem:[%s39363_s3 + $0x90] sm:$0xff]   ;;  %v9702_v14 = vshll.u32 %v33808_v56, 16 }
 0x4d0   : > { %27091 = vmatprep.mubr.msk.bf16.mxu1 %vm7466_vm3, %v34623_v12  ;;  %v9678_v28 = vshll.u32 %v34972_v42, 16 }
 0x4d2   : > { %v9680_v47 = vrot.slane %v9678_v28, 1  ;;  %v7294_v28 = vrot.slane %v39742_v18, %v33105_v48  ;;  %v9718_v18 = vshrl.u32 %v33844_v36, 16 }
 0x4d4   : > { %v34987_v5 = vsel %vm1413_vm1, %v9676_v26, %v9680_v47  ;;  %v9704_v26 = vrot.slane %v9702_v14, 1  ;;  %v9706_v47 = vshll.u32 %v33420_v54, 16 }
 0x4d7   : > { %27092 = vmatmul.mubr.msk.bf16.gmra.mrb[108].mxu1 %vm7466_vm3, %v34403_v50 }
 0x4d8   : > { %27095 = vmatprep.mubr.msk.bf16.mxu1 %vm7466_vm3, %v34623_v12 }
 0x4df   : > { %27096 = vmatmul.mubr.msk.bf16.gmra.mrb[112].mxu1 %vm7466_vm3, %v34403_v50 }
 0x4e0   : > { %27099 = vmatprep.mubr.msk.bf16.mxu1 %vm7466_vm3, %v34646_v57 }
 0x4e7   : > { %27100 = vmatmul.mubr.msk.bf16.gmra.mrb[116].mxu1 %vm7466_vm3, %v34594_v61 }
 0x4e8   : > { %27103 = vmatprep.mubr.msk.bf16.mxu1 %vm7466_vm3, %v34646_v57 }
 0x4ef   : > { %27104 = vmatmul.mubr.msk.bf16.gmra.mrb[120].mxu1 %vm7466_vm3, %v34594_v61 }
 0x4f0   : > { %27107 = vmatprep.mubr.msk.bf16.mxu1 %vm7466_vm3, %v34677_v53 }
 0x4f7   : > { %27108 = vmatmul.mubr.msk.bf16.gmra.mrb[124].mxu1 %vm7466_vm3, %v34566_v46 }
 0x4f8   : > { %27119 = vmatprep.mubr.msk.bf16.mxu1 %vm7466_vm3, %v39733_v41 }
 0x4ff   : > { %27120 = vmatmul.mubr.msk.bf16.vlgmr.msra.gmra.mrb[0].mxu1 %vm7466_vm3, %v39734_v34 }
 0x500   : > { %27248 = vmatpush3.bf16.msra.mxu1 %v34300_v11  ;;  %27123 = vmatprep.mubr.msk.bf16.mxu1 %vm7466_vm3, %v39733_v41  ;;  %v32116_v11 = vld [vmem:[%s39363_s3 + $0xd8] sm:$0xff]  }
 0x501   : > { %27249 = vmatprep.subr.bf16.mxu1 %v32114_v29 }
 0x504   : > { %27250 = vmatpush3.bf16.msra.mxu1 %v32114_v29  ;;  %v9684_v29 = vshll.u32 %v33596_v62, 16 }
 0x505   : > { %27251 = vmatprep.subr.bf16.mxu1 %v32115_v44 }
 0x507   : > { %27124 = vmatmul.mubr.msk.bf16.gmra.mrb[4].mxu1 %vm7466_vm3, %v39734_v34 }
 0x508   : > { %27127 = vmatprep.mubr.msk.bf16.mxu1 %vm7466_vm3, %v33596_v62  ;;  %27252 = vmatpush3.bf16.msra.mxu1 %v32115_v44  ;;  %v39739_v44 = vld [vmem:[#allocation2_spill] sm:$0xff] }
 0x509   : > { %27253 = vmatprep.subr.bf16.mxu1 %v32116_v11 }
 0x50c   : > { %27254 = vmatpush3.bf16.msra.mxu1 %v32116_v11  ;;  %v7290_v11 = vrot.slane %v39739_v44, %v33105_v48 }
 0x50d   : > { %27383 = vmatprep.subr.bf16.mxu1 %v32117_v3 }
 0x50f   : > { %27128 = vmatmul.mubr.msk.bf16.gmra.mrb[8].mxu1 %vm7466_vm3, %v33206_v32 }
 0x510   : > { %27131 = vmatprep.mubr.msk.bf16.mxu1 %vm7466_vm3, %v33596_v62 }
 0x517   : > { %27132 = vmatmul.mubr.msk.bf16.gmra.mrb[12].mxu1 %vm7466_vm3, %v33206_v32 }
 0x518   : > { %27135 = vmatprep.mubr.msk.bf16.mxu1 %vm7466_vm3, %v33808_v56 }
 0x51f   : > { %27136 = vmatmul.mubr.msk.bf16.gmra.mrb[16].mxu1 %vm7466_vm3, %v33420_v54 }
 0x520   : > { %27139 = vmatprep.mubr.msk.bf16.mxu1 %vm7466_vm3, %v33808_v56 }
 0x527   : > { %27140 = vmatmul.mubr.msk.bf16.gmra.mrb[20].mxu1 %vm7466_vm3, %v33420_v54 }
 0x528   : > { %27143 = vmatprep.mubr.msk.bf16.mxu1 %vm7466_vm3, %v33844_v36 }
 0x52f   : > { %27144 = vmatmul.mubr.msk.bf16.gmra.mrb[24].mxu1 %vm7466_vm3, %v33364_v9 }
 0x530   : > { %27147 = vmatprep.mubr.msk.bf16.mxu1 %vm7466_vm3, %v33844_v36 }
 0x537   : > { %27148 = vmatmul.mubr.msk.bf16.gmra.mrb[28].mxu1 %vm7466_vm3, %v33364_v9 }
 0x538   : > { %27151 = vmatprep.mubr.msk.bf16.mxu1 %vm7466_vm3, %v33890_v16 }
 0x53f   : > { %27152 = vmatmul.mubr.msk.bf16.gmra.mrb[32].mxu1 %vm7466_vm3, %v33619_v19 }
 0x540   : > { %27155 = vmatprep.mubr.msk.bf16.mxu1 %vm7466_vm3, %v33890_v16 }
 0x547   : > { %27156 = vmatmul.mubr.msk.bf16.gmra.mrb[36].mxu1 %vm7466_vm3, %v33619_v19 }
 0x548   : > { %27159 = vmatprep.mubr.msk.bf16.mxu1 %vm7466_vm3, %v34036_v55 }
 0x54f   : > { %27160 = vmatmul.mubr.msk.bf16.gmra.mrb[40].mxu1 %vm7466_vm3, %v33547_v31 }
 0x550   : > { %27163 = vmatprep.mubr.msk.bf16.mxu1 %vm7466_vm3, %v34036_v55 }
 0x557   : > { %27164 = vmatmul.mubr.msk.bf16.gmra.mrb[44].mxu1 %vm7466_vm3, %v33547_v31 }
 0x558   : > { %27167 = vmatprep.mubr.msk.bf16.mxu1 %vm7466_vm3, %v34103_v17 }
 0x55f   : > { %27168 = vmatmul.mubr.msk.bf16.gmra.mrb[48].mxu1 %vm7466_vm3, %v33846_v0 }
 0x560   : > { %27171 = vmatprep.mubr.msk.bf16.mxu1 %vm7466_vm3, %v34103_v17 }
 0x567   : > { %27172 = vmatmul.mubr.msk.bf16.gmra.mrb[52].mxu1 %vm7466_vm3, %v33846_v0 }
 0x568   : > { %27175 = vmatprep.mubr.msk.bf16.mxu1 %vm7466_vm3, %v34230_v60 }
 0x56f   : > { %27176 = vmatmul.mubr.msk.bf16.gmra.mrb[56].mxu1 %vm7466_vm3, %v39735_v52 }
 0x570   : > { %27179 = vmatprep.mubr.msk.bf16.mxu1 %vm7466_vm3, %v34230_v60 }
 0x577   : > { %27180 = vmatmul.mubr.msk.bf16.gmra.mrb[60].mxu1 %vm7466_vm3, %v39735_v52 }
 0x578   : > { %27183 = vmatprep.mubr.msk.bf16.mxu1 %vm7466_vm3, %v34283_v27 }
 0x57f   : > { %27184 = vmatmul.mubr.msk.bf16.gmra.mrb[64].mxu1 %vm7466_vm3, %v34072_v21 }
 0x580   : > { %27187 = vmatprep.mubr.msk.bf16.mxu1 %vm7466_vm3, %v34283_v27 }
 0x587   : > { %27188 = vmatmul.mubr.msk.bf16.gmra.mrb[68].mxu1 %vm7466_vm3, %v34072_v21 }
 0x588   : > { %27191 = vmatprep.mubr.msk.bf16.mxu1 %vm7466_vm3, %v34281_v33 }
 0x58f   : > { %27192 = vmatmul.mubr.msk.bf16.gmra.mrb[72].mxu1 %vm7466_vm3, %v33996_v20 }
 0x590   : > { %27195 = vmatprep.mubr.msk.bf16.mxu1 %vm7466_vm3, %v34281_v33 }
 0x597   : > { %27196 = vmatmul.mubr.msk.bf16.gmra.mrb[76].mxu1 %vm7466_vm3, %v33996_v20 }
 0x598   : > { %27199 = vmatprep.mubr.msk.bf16.mxu1 %vm7466_vm3, %v34468_v4 }
 0x59f   : > { %27200 = vmatmul.mubr.msk.bf16.gmra.mrb[80].mxu1 %vm7466_vm3, %v34259_v25 }
 0x5a0   : > { %27203 = vmatprep.mubr.msk.bf16.mxu1 %vm7466_vm3, %v34468_v4 }
 0x5a7   : > { %27204 = vmatmul.mubr.msk.bf16.gmra.mrb[84].mxu1 %vm7466_vm3, %v34259_v25 }
 0x5a8   : > { %27207 = vmatprep.mubr.msk.bf16.mxu1 %vm7466_vm3, %v34471_v58 }
 0x5af   : > { %27208 = vmatmul.mubr.msk.bf16.gmra.mrb[88].mxu1 %vm7466_vm3, %v34188_v6 }
 0x5b0   : > { %27211 = vmatprep.mubr.msk.bf16.mxu1 %vm7466_vm3, %v34471_v58 }
 0x5b7   : > { %27212 = vmatmul.mubr.msk.bf16.gmra.mrb[92].mxu1 %vm7466_vm3, %v34188_v6 }
 0x5b8   : > { %27215 = vmatprep.mubr.msk.bf16.mxu1 %vm7466_vm3, %v34598_v49 }
 0x5bf   : > { %27216 = vmatmul.mubr.msk.bf16.gmra.mrb[96].mxu1 %vm7466_vm3, %v34433_v22 }
 0x5c0   : > { %27219 = vmatprep.mubr.msk.bf16.mxu1 %vm7466_vm3, %v34598_v49 }
 0x5c7   : > { %27220 = vmatmul.mubr.msk.bf16.gmra.mrb[100].mxu1 %vm7466_vm3, %v34433_v22 }
 0x5c8   : > { %27223 = vmatprep.mubr.msk.bf16.mxu1 %vm7466_vm3, %v34623_v12 }
 0x5cf   : > { %27224 = vmatmul.mubr.msk.bf16.gmra.mrb[104].mxu1 %vm7466_vm3, %v34403_v50 }
 0x5d0   : > { %27227 = vmatprep.mubr.msk.bf16.mxu1 %vm7466_vm3, %v34623_v12 }
 0x5d7   : > { %27228 = vmatmul.mubr.msk.bf16.gmra.mrb[108].mxu1 %vm7466_vm3, %v34403_v50 }
 0x5d8   : > { %27231 = vmatprep.mubr.msk.bf16.mxu1 %vm7466_vm3, %v34646_v57 }
 0x5df   : > { %27232 = vmatmul.mubr.msk.bf16.gmra.mrb[112].mxu1 %vm7466_vm3, %v34594_v61 }
 0x5e0   : > { %27235 = vmatprep.mubr.msk.bf16.mxu1 %vm7466_vm3, %v34646_v57 }
 0x5e7   : > { %27236 = vmatmul.mubr.msk.bf16.gmra.mrb[116].mxu1 %vm7466_vm3, %v34594_v61 }
 0x5e8   : > { %27239 = vmatprep.mubr.msk.bf16.mxu1 %vm7466_vm3, %v34677_v53 }
 0x5ef   : > { %27240 = vmatmul.mubr.msk.bf16.gmra.mrb[120].mxu1 %vm7466_vm3, %v34566_v46 }
 0x5f0   : > { %27243 = vmatprep.mubr.msk.bf16.mxu1 %vm7466_vm3, %v34677_v53 }
 0x5f7   : > { %27244 = vmatmul.mubr.msk.bf16.gmra.mrb[124].mxu1 %vm7466_vm3, %v34566_v46 }
 0x5f8   : > { %27255 = vmatprep.mubr.msk.bf16.mxu1 %vm7466_vm3, %v39733_v41 }
 0x5ff   : > { %27256 = vmatmul.mubr.msk.bf16.vlgmr.msra.gmra.mrb[0].mxu1 %vm7466_vm3, %v39734_v34 }
 0x600   : > { %27384 = vmatpush3.bf16.msra.mxu1 %v32117_v3  ;;  %27259 = vmatprep.mubr.msk.bf16.mxu1 %vm7466_vm3, %v33596_v62  ;;  %v9686_v3 = vrot.slane %v9684_v29, 1 }
 0x601   : > { %27385 = vmatprep.subr.bf16.mxu1 %v32118_v63 }
 0x604   : > { %27386 = vmatpush3.bf16.msra.mxu1 %v32118_v63  ;;  %v9688_v63 = vshll.u32 %v33206_v32, 16 }
 0x605   : > { %27387 = vmatprep.subr.bf16.mxu1 %v32119_v8 }
 0x606   : > { %v9690_v43 = vrot.slane %v9688_v63, 1 }
 0x607   : > { %27260 = vmatmul.mubr.msk.bf16.gmra.mrb[4].mxu1 %vm7466_vm3, %v33206_v32 }
 0x608   : > { %27263 = vmatprep.mubr.msk.bf16.mxu1 %vm7466_vm3, %v33596_v62  ;;  %27388 = vmatpush3.bf16.msra.mxu1 %v32119_v8  ;;  %v9682_v8 = vshrl.u32 %v33596_v62, 16  ;;  %v9694_v1 = vor.u32 %v9692_v39, %v9690_v43 }
 0x609   : > { %27389 = vmatprep.subr.bf16.mxu1 %v32120_v15 }
 0x60a   : > { %v9687_v24 = vor.u32 %v9686_v3, %v9682_v8  ;;  %v9708_v3 = vrot.slane %v9706_v47, 1 }
 0x60c   : > { %27390 = vmatpush3.bf16.msra.mxu1 %v32120_v15  ;;  %v39740_v15 = vld [vmem:[#allocation3_spill] sm:$0xff]  ;;  %v35013_v45 = vsel %vm1413_vm1, %v9687_v24, %v9690_v43  ;;  %v9720_v24 = vshll.u32 %v33844_v36, 16 }
 0x60d   : > { %27519 = vmatprep.subr.bf16.mxu1 %v32121_v23 }
 0x60e   : > { %v9722_v14 = vrot.slane %v9720_v24, 1 }
 0x60f   : > { %27264 = vmatmul.mubr.msk.bf16.gmra.mrb[8].mxu1 %vm7466_vm3, %v33206_v32 }
 0x610   : > { %27267 = vmatprep.mubr.msk.bf16.mxu1 %vm7466_vm3, %v33808_v56 }
 0x617   : > { %27268 = vmatmul.mubr.msk.bf16.gmra.mrb[12].mxu1 %vm7466_vm3, %v33420_v54 }
 0x618   : > { %27271 = vmatprep.mubr.msk.bf16.mxu1 %vm7466_vm3, %v33808_v56 }
 0x61f   : > { %27272 = vmatmul.mubr.msk.bf16.gmra.mrb[16].mxu1 %vm7466_vm3, %v33420_v54 }
 0x620   : > { %27275 = vmatprep.mubr.msk.bf16.mxu1 %vm7466_vm3, %v33844_v36 }
 0x627   : > { %27276 = vmatmul.mubr.msk.bf16.gmra.mrb[20].mxu1 %vm7466_vm3, %v33364_v9 }
 0x628   : > { %27279 = vmatprep.mubr.msk.bf16.mxu1 %vm7466_vm3, %v33844_v36 }
 0x62f   : > { %27280 = vmatmul.mubr.msk.bf16.gmra.mrb[24].mxu1 %vm7466_vm3, %v33364_v9 }
 0x630   : > { %27283 = vmatprep.mubr.msk.bf16.mxu1 %vm7466_vm3, %v33890_v16 }
 0x637   : > { %27284 = vmatmul.mubr.msk.bf16.gmra.mrb[28].mxu1 %vm7466_vm3, %v33619_v19 }
 0x638   : > { %27287 = vmatprep.mubr.msk.bf16.mxu1 %vm7466_vm3, %v33890_v16 }
 0x63f   : > { %27288 = vmatmul.mubr.msk.bf16.gmra.mrb[32].mxu1 %vm7466_vm3, %v33619_v19 }
 0x640   : > { %27291 = vmatprep.mubr.msk.bf16.mxu1 %vm7466_vm3, %v34036_v55 }
 0x647   : > { %27292 = vmatmul.mubr.msk.bf16.gmra.mrb[36].mxu1 %vm7466_vm3, %v33547_v31 }
 0x648   : > { %27295 = vmatprep.mubr.msk.bf16.mxu1 %vm7466_vm3, %v34036_v55 }
 0x64f   : > { %27296 = vmatmul.mubr.msk.bf16.gmra.mrb[40].mxu1 %vm7466_vm3, %v33547_v31 }
 0x650   : > { %27299 = vmatprep.mubr.msk.bf16.mxu1 %vm7466_vm3, %v34103_v17 }
 0x657   : > { %27300 = vmatmul.mubr.msk.bf16.gmra.mrb[44].mxu1 %vm7466_vm3, %v33846_v0 }
 0x658   : > { %27303 = vmatprep.mubr.msk.bf16.mxu1 %vm7466_vm3, %v34103_v17 }
 0x65f   : > { %27304 = vmatmul.mubr.msk.bf16.gmra.mrb[48].mxu1 %vm7466_vm3, %v33846_v0 }
 0x660   : > { %27307 = vmatprep.mubr.msk.bf16.mxu1 %vm7466_vm3, %v34230_v60 }
 0x667   : > { %27308 = vmatmul.mubr.msk.bf16.gmra.mrb[52].mxu1 %vm7466_vm3, %v39735_v52 }
 0x668   : > { %27311 = vmatprep.mubr.msk.bf16.mxu1 %vm7466_vm3, %v34230_v60 }
 0x66f   : > { %27312 = vmatmul.mubr.msk.bf16.gmra.mrb[56].mxu1 %vm7466_vm3, %v39735_v52 }
 0x670   : > { %27315 = vmatprep.mubr.msk.bf16.mxu1 %vm7466_vm3, %v34283_v27 }
 0x677   : > { %27316 = vmatmul.mubr.msk.bf16.gmra.mrb[60].mxu1 %vm7466_vm3, %v34072_v21 }
 0x678   : > { %27319 = vmatprep.mubr.msk.bf16.mxu1 %vm7466_vm3, %v34283_v27 }
 0x67f   : > { %27320 = vmatmul.mubr.msk.bf16.gmra.mrb[64].mxu1 %vm7466_vm3, %v34072_v21 }
 0x680   : > { %27323 = vmatprep.mubr.msk.bf16.mxu1 %vm7466_vm3, %v34281_v33 }
 0x687   : > { %27324 = vmatmul.mubr.msk.bf16.gmra.mrb[68].mxu1 %vm7466_vm3, %v33996_v20 }
 0x688   : > { %27327 = vmatprep.mubr.msk.bf16.mxu1 %vm7466_vm3, %v34281_v33 }
 0x68f   : > { %27328 = vmatmul.mubr.msk.bf16.gmra.mrb[72].mxu1 %vm7466_vm3, %v33996_v20 }
 0x690   : > { %27331 = vmatprep.mubr.msk.bf16.mxu1 %vm7466_vm3, %v34468_v4 }
 0x697   : > { %27332 = vmatmul.mubr.msk.bf16.gmra.mrb[76].mxu1 %vm7466_vm3, %v34259_v25 }
 0x698   : > { %27335 = vmatprep.mubr.msk.bf16.mxu1 %vm7466_vm3, %v34468_v4 }
 0x69f   : > { %27336 = vmatmul.mubr.msk.bf16.gmra.mrb[80].mxu1 %vm7466_vm3, %v34259_v25 }
 0x6a0   : > { %27339 = vmatprep.mubr.msk.bf16.mxu1 %vm7466_vm3, %v34471_v58 }
 0x6a7   : > { %27340 = vmatmul.mubr.msk.bf16.gmra.mrb[84].mxu1 %vm7466_vm3, %v34188_v6 }
 0x6a8   : > { %27343 = vmatprep.mubr.msk.bf16.mxu1 %vm7466_vm3, %v34471_v58 }
 0x6af   : > { %27344 = vmatmul.mubr.msk.bf16.gmra.mrb[88].mxu1 %vm7466_vm3, %v34188_v6 }
 0x6b0   : > { %27347 = vmatprep.mubr.msk.bf16.mxu1 %vm7466_vm3, %v34598_v49 }
 0x6b7   : > { %27348 = vmatmul.mubr.msk.bf16.gmra.mrb[92].mxu1 %vm7466_vm3, %v34433_v22 }
 0x6b8   : > { %27351 = vmatprep.mubr.msk.bf16.mxu1 %vm7466_vm3, %v34598_v49 }
 0x6bf   : > { %27352 = vmatmul.mubr.msk.bf16.gmra.mrb[96].mxu1 %vm7466_vm3, %v34433_v22 }
 0x6c0   : > { %27355 = vmatprep.mubr.msk.bf16.mxu1 %vm7466_vm3, %v34623_v12 }
 0x6c7   : > { %27356 = vmatmul.mubr.msk.bf16.gmra.mrb[100].mxu1 %vm7466_vm3, %v34403_v50 }
 0x6c8   : > { %27359 = vmatprep.mubr.msk.bf16.mxu1 %vm7466_vm3, %v34623_v12 }
 0x6cf   : > { %27360 = vmatmul.mubr.msk.bf16.gmra.mrb[104].mxu1 %vm7466_vm3, %v34403_v50 }
 0x6d0   : > { %27363 = vmatprep.mubr.msk.bf16.mxu1 %vm7466_vm3, %v34646_v57 }
 0x6d7   : > { %27364 = vmatmul.mubr.msk.bf16.gmra.mrb[108].mxu1 %vm7466_vm3, %v34594_v61 }
 0x6d8   : > { %27367 = vmatprep.mubr.msk.bf16.mxu1 %vm7466_vm3, %v34646_v57 }
 0x6df   : > { %27368 = vmatmul.mubr.msk.bf16.gmra.mrb[112].mxu1 %vm7466_vm3, %v34594_v61 }
 0x6e0   : > { %27371 = vmatprep.mubr.msk.bf16.mxu1 %vm7466_vm3, %v34677_v53 }
 0x6e7   : > { %27372 = vmatmul.mubr.msk.bf16.gmra.mrb[116].mxu1 %vm7466_vm3, %v34566_v46 }
 0x6e8   : > { %27375 = vmatprep.mubr.msk.bf16.mxu1 %vm7466_vm3, %v34677_v53 }
 0x6ef   : > { %27376 = vmatmul.mubr.msk.bf16.gmra.mrb[120].mxu1 %vm7466_vm3, %v34566_v46 }
 0x6f0   : > { %27379 = vmatprep.mubr.msk.bf16.mxu1 %vm7466_vm3, %v34677_v53 }
 0x6f7   : > { %27380 = vmatmul.mubr.msk.bf16.gmra.mrb[124].mxu1 %vm7466_vm3, %v34566_v46 }
 0x6f8   : > { %27391 = vmatprep.mubr.msk.bf16.mxu1 %vm7466_vm3, %v34977_v38 }
 0x6ff   : > { %27392 = vmatmul.mubr.msk.bf16.vlgmr.msra.gmra.mrb[0].mxu1 %vm7466_vm3, %v34987_v5 }
 0x700   : > { %27520 = vmatpush3.bf16.msra.mxu1 %v32121_v23  ;;  %27395 = vmatprep.mubr.msk.bf16.mxu1 %vm7466_vm3, %v34977_v38  ;;  %v39741_v23 = vrot.slane %v39740_v15, 7  ;;  %v9710_v15 = vshrl.u32 %v33420_v54, 16 }
 0x701   : > { %27521 = vmatprep.subr.bf16.mxu1 %v32122_v13 }
 0x702   : > { %v7380_v40 = vsel %vm440_vm0, %v39741_v23, %v7290_v11 }
 0x703   : > { %v35008_v51 = vpack.c.bf16 %v7380_v40, %v7380_v40  ;;  %v9712_v40 = vor.u32 %v9710_v15, %v9708_v3 }
 0x704   : > { %27522 = vmatpush3.bf16.msra.mxu1 %v32122_v13  ;;  %v9700_v13 = vshrl.u32 %v33808_v56, 16 }
 0x705   : > { %27523 = vmatprep.subr.bf16.mxu1 %v32123_v35  ;;  %v9696_v10 = vshll.u32 %v35008_v51, 16 }
 0x706   : > { %v9705_v11 = vor.u32 %v9704_v26, %v9700_v13  ;;  %v9723_v13 = vor.u32 %v9722_v14, %v9718_v18  ;;  %v9742_v14 = vshll.u32 %v33619_v19, 16  ;;  %v9736_v18 = vshrl.u32 %v33890_v16, 16 }
 0x707   : > { %27396 = vmatmul.mubr.msk.bf16.gmra.mrb[4].mxu1 %vm7466_vm3, %v34987_v5  ;;  %v9698_v30 = vrot.slane %v9696_v10, 1  ;;  %v39745_v10 = vld [vmem:[#allocation7_spill] sm:$0xff] }
 0x708   : > { %27399 = vmatprep.mubr.msk.bf16.mxu1 %vm7466_vm3, %v34977_v38  ;;  %27524 = vmatpush3.bf16.msra.mxu1 %v32123_v35  ;;  %v39743_v35 = vld [vmem:[#allocation10_spill] sm:$0xff]  ;;  %v35039_v8 = vsel %vm1413_vm1, %v9705_v11, %v9708_v3  ;;  %v9728_v11 = vshrl.u32 %v33364_v9, 16 }
 0x709   : > { %v35021_v59 = vsel %vm1413_vm1, %v9694_v1, %v9698_v30  ;;  %v39744_v29 = vrot.slane %v39743_v35, 7  ;;  %v7298_v1 = vrot.slane %v39745_v10, %v33105_v48  ;;  %v9724_v30 = vshll.u32 %v33364_v9, 16 }
 0x70b   : > { %v7381_v44 = vsel %vm440_vm0, %v39744_v29, %v7294_v28  ;;  %v39746_v28 = vld [vmem:[#allocation8_spill] sm:$0xff]  ;;  %v9726_v35 = vrot.slane %v9724_v30, 1  ;;  %v32124_v30 = vld [vmem:[%s39363_s3 + $0x98] sm:$0xff]  }
 0x70c   : > { %v35034_v63 = vpack.c.bf16 %v7381_v44, %v7381_v44  ;;  %v39747_v26 = vrot.slane %v39746_v28, 7  ;;  %v39749_v28 = vld [vmem:[#allocation18_spill] sm:$0xff]  ;;  %27525 = vmatprep.subr.bf16.mxu1 %v32124_v30 }
 0x70d   : > { %v35065_v44 = vsel %vm1413_vm1, %v9723_v13, %v9726_v35  ;;  %v9730_v15 = vor.u32 %v9728_v11, %v9726_v35  ;;  %v9744_v35 = vrot.slane %v9742_v14, 1  ;;  %27526 = vmatpush3.bf16.msra.mxu1 %v32124_v30  ;;  %v39751_v14 = vld [vmem:[#allocation13_spill] sm:$0xff] }
 0x70e   : > { %v9714_v23 = vshll.u32 %v35034_v63, 16  ;;  %v7382_v47 = vsel %vm440_vm0, %v39747_v26, %v7298_v1  ;;  %v39750_v26 = vrot.slane %v39749_v28, 7  ;;  %v7306_v30 = vrot.slane %v39751_v14, %v33105_v48 }
 0x70f   : > { %27400 = vmatmul.mubr.msk.bf16.gmra.mrb[8].mxu1 %vm7466_vm3, %v34987_v5  ;;  %v35060_v29 = vpack.c.bf16 %v7382_v47, %v7382_v47  ;;  %v9760_v28 = vshll.u32 %v33547_v31, 16 }
 0x710   : > { %27403 = vmatprep.mubr.msk.bf16.mxu1 %vm7466_vm3, %v35013_v45  ;;  %v9716_v43 = vrot.slane %v9714_v23, 1  ;;  %v9738_v23 = vshll.u32 %v33890_v16, 16 }
 0x711   : > { %v9732_v3 = vshll.u32 %v35060_v29, 16 }
 0x712   : > { %v35047_v39 = vsel %vm1413_vm1, %v9712_v40, %v9716_v43  ;;  %v39748_v43 = vld [vmem:[#allocation17_spill] sm:$0xff]  ;;  %v9740_v1 = vrot.slane %v9738_v23, 1 }
 0x713   : > { %v9734_v40 = vrot.slane %v9732_v3, 1  ;;  %v7302_v10 = vrot.slane %v39748_v43, %v33105_v48  ;;  %v9756_v43 = vshll.u32 %v34036_v55, 16 }
 0x714   : > { %v9741_v13 = vor.u32 %v9740_v1, %v9736_v18 }
 0x715   : > { %v35073_v24 = vsel %vm1413_vm1, %v9730_v15, %v9734_v40  ;;  %v7383_v47 = vsel %vm440_vm0, %v39750_v26, %v7302_v10  ;;  %v9746_v15 = vshrl.u32 %v33619_v19, 16  ;;  %v9758_v18 = vrot.slane %v9756_v43, 1 }
 0x716   : > { %v35089_v11 = vpack.c.bf16 %v7383_v47, %v7383_v47  ;;  %v35094_v3 = vsel %vm1413_vm1, %v9741_v13, %v9744_v35  ;;  %v9754_v26 = vshrl.u32 %v34036_v55, 16  ;;  %v39752_v47 = vld [vmem:[#allocation14_spill] sm:$0xff] }
 0x717   : > { %27404 = vmatmul.mubr.msk.bf16.gmra.mrb[12].mxu1 %vm7466_vm3, %v35021_v59  ;;  %v9748_v40 = vor.u32 %v9746_v15, %v9744_v35  ;;  %v39753_v13 = vrot.slane %v39752_v47, 7 }
 0x718   : > { %27407 = vmatprep.mubr.msk.bf16.mxu1 %vm7466_vm3, %v35013_v45  ;;  %v9750_v23 = vshll.u32 %v35089_v11, 16  ;;  %v9759_v15 = vor.u32 %v9758_v18, %v9754_v26  ;;  %v39755_v26 = vld [vmem:[#allocation24_spill] sm:$0xff] }
 0x719   : > { %v7384_v35 = vsel %vm440_vm0, %v39753_v13, %v7306_v30  ;;  %v9774_v30 = vshll.u32 %v34103_v17, 16  ;;  %v7310_v13 = vrot.slane %v39755_v26, %v33105_v48  ;;  %v9782_v26 = vshrl.u32 %v33846_v0, 16 }
 0x71a   : > { %v9752_v10 = vrot.slane %v9750_v23, 1  ;;  %v9762_v23 = vrot.slane %v9760_v28, 1 }
 0x71c   : > { %v35102_v1 = vsel %vm1413_vm1, %v9748_v40, %v9752_v10  ;;  %v35115_v40 = vpack.c.bf16 %v7384_v35, %v7384_v35  ;;  %v35120_v43 = vsel %vm1413_vm1, %v9759_v15, %v9762_v23  ;;  %v9764_v10 = vshrl.u32 %v33547_v31, 16 }
 0x71d   : > { %v9776_v35 = vrot.slane %v9774_v30, 1  ;;  %v9778_v15 = vshll.u32 %v33846_v0, 16  ;;  %v9832_v31 = vshll.u32 %v33996_v20, 16 }
 0x71e   : > { %39754 = vst [vmem:[#allocation19_spill] sm:$0xff] %v35115_v40  ;;  %v9768_v14 = vshll.u32 %v35115_v40, 16  ;;  %v9766_v47 = vor.u32 %v9764_v10, %v9762_v23  ;;  %v9772_v23 = vshrl.u32 %v34103_v17, 16  ;;  %v39756_v10 = vld [vmem:[#allocation25_spill] sm:$0xff] }
 0x71f   : > { %27408 = vmatmul.mubr.msk.bf16.gmra.mrb[16].mxu1 %vm7466_vm3, %v35021_v59  ;;  %v39757_v40 = vrot.slane %v39756_v10, 7 }
 0x720   : > { %27411 = vmatprep.mubr.msk.bf16.mxu1 %vm7466_vm3, %v35039_v8  ;;  %v9770_v18 = vrot.slane %v9768_v14, 1 }
 0x721   : > { %v7385_v14 = vsel %vm440_vm0, %v39757_v40, %v7310_v13  ;;  %v9792_v40 = vshll.u32 %v34230_v60, 16 }
 0x722   : > { %v35128_v28 = vsel %vm1413_vm1, %v9766_v47, %v9770_v18  ;;  %v9777_v47 = vor.u32 %v9776_v35, %v9772_v23  ;;  %v9780_v18 = vrot.slane %v9778_v15, 1  ;;  %v35141_v55 = vpack.c.bf16 %v7385_v14, %v7385_v14  ;;  %v39759_v15 = vld [vmem:[#allocation21_spill] sm:$0xff] }
 0x723   : > { %v7314_v23 = vrot.slane %v39759_v15, %v33105_v48  ;;  %v9794_v14 = vrot.slane %v9792_v40, 1  ;;  %v9800_v15 = vshrl.u32 %v39735_v52, 16 }
 0x724   : > { %39758 = vst [vmem:[#allocation6_spill] sm:$0xff] %v35141_v55  ;;  %v35146_v30 = vsel %vm1413_vm1, %v9777_v47, %v9780_v18  ;;  %v9786_v17 = vshll.u32 %v35141_v55, 16  ;;  %v9784_v10 = vor.u32 %v9782_v26, %v9780_v18  ;;  %v9796_v47 = vshll.u32 %v39735_v52, 16  ;;  %v39760_v26 = vld [vmem:[#allocation22_spill] sm:$0xff] }
 0x725   : > { %v9790_v18 = vshrl.u32 %v34230_v60, 16  ;;  %v39761_v55 = vrot.slane %v39760_v26, 7 }
 0x726   : > { %v9788_v13 = vrot.slane %v9786_v17, 1 }
 0x727   : > { %27412 = vmatmul.mubr.msk.bf16.gmra.mrb[20].mxu1 %vm7466_vm3, %v35047_v39  ;;  %v7386_v17 = vsel %vm440_vm0, %v39761_v55, %v7314_v23  ;;  %v9810_v55 = vshll.u32 %v34283_v27, 16 }
 0x728   : > { %27415 = vmatprep.mubr.msk.bf16.mxu1 %vm7466_vm3, %v35039_v8  ;;  %v35154_v35 = vsel %vm1413_vm1, %v9784_v10, %v9788_v13  ;;  %v9795_v10 = vor.u32 %v9794_v14, %v9790_v18  ;;  %v9798_v13 = vrot.slane %v9796_v47, 1  ;;  %v35167_v0 = vpack.c.bf16 %v7386_v17, %v7386_v17  ;;  %v39763_v47 = vld [vmem:[#allocation30_spill] sm:$0xff] }
 0x729   : > { %v7318_v18 = vrot.slane %v39763_v47, %v33105_v48  ;;  %v9812_v17 = vrot.slane %v9810_v55, 1 }
 0x72a   : > { %39762 = vst [vmem:[#allocation4_spill] sm:$0xff] %v35167_v0  ;;  %v35172_v40 = vsel %vm1413_vm1, %v9795_v10, %v9798_v13  ;;  %v9804_v60 = vshll.u32 %v35167_v0, 16  ;;  %v9802_v26 = vor.u32 %v9800_v15, %v9798_v13  ;;  %v9814_v10 = vshll.u32 %v34072_v21, 16  ;;  %v35192_v13 = vld [vmem:[%s39363_s3 + $0xe0] sm:$0xff]   ;;  %v39764_v15 = vld [vmem:[#allocation32_spill] sm:$0xff] }
 0x72b   : > { %27655 = vmatprep.subr.bf16.mxu1 %v35192_v13 }
 0x72c   : > { %v9806_v23 = vrot.slane %v9804_v60, 1  ;;  %v9808_v60 = vshrl.u32 %v34283_v27, 16  ;;  %v9816_v55 = vrot.slane %v9814_v10, 1  ;;  %v9818_v27 = vshrl.u32 %v34072_v21, 16 }
 0x72e   : > { %v35180_v14 = vsel %vm1413_vm1, %v9802_v26, %v9806_v23  ;;  %v39765_v26 = vrot.slane %v39764_v15, 7  ;;  %v9813_v47 = vor.u32 %v9812_v17, %v9808_v60  ;;  %v39767_v60 = vld [vmem:[#allocation27_spill] sm:$0xff] }
 0x72f   : > { %27416 = vmatmul.mubr.msk.bf16.gmra.mrb[24].mxu1 %vm7466_vm3, %v35047_v39 }
 0x730   : > { %27419 = vmatprep.mubr.msk.bf16.mxu1 %vm7466_vm3, %v35065_v44  ;;  %v7387_v23 = vsel %vm440_vm0, %v39765_v26, %v7318_v18  ;;  %v35204_v52 = vsel %vm1413_vm1, %v9813_v47, %v9816_v55  ;;  %v9820_v18 = vor.u32 %v9818_v27, %v9816_v55  ;;  %v9828_v26 = vshll.u32 %v34281_v33, 16  ;;  %v39768_v55 = vld [vmem:[#allocation28_spill] sm:$0xff] }
 0x731   : > { %v35199_v0 = vpack.c.bf16 %v7387_v23, %v7387_v23  ;;  %v7322_v23 = vrot.slane %v39767_v60, %v33105_v48  ;;  %v9826_v27 = vshrl.u32 %v34281_v33, 16  ;;  %v9836_v60 = vshrl.u32 %v33996_v20, 16 }
 0x732   : > { %v9830_v47 = vrot.slane %v9828_v26, 1 }
 0x733   : > { %39766 = vst [vmem:[#allocation5_spill] sm:$0xff] %v35199_v0  ;;  %v9822_v15 = vshll.u32 %v35199_v0, 16  ;;  %v39769_v0 = vrot.slane %v39768_v55, 7 }
 0x735   : > { %v9824_v17 = vrot.slane %v9822_v15, 1  ;;  %v7388_v15 = vsel %vm440_vm0, %v39769_v0, %v7322_v23  ;;  %v9846_v0 = vshll.u32 %v34468_v4, 16 }
 0x736   : > { %v35225_v21 = vpack.c.bf16 %v7388_v15, %v7388_v15 }
 0x737   : > { %27420 = vmatmul.mubr.msk.bf16.gmra.mrb[28].mxu1 %vm7466_vm3, %v35073_v24  ;;  %v35212_v10 = vsel %vm1413_vm1, %v9820_v18, %v9824_v17  ;;  %v9831_v18 = vor.u32 %v9830_v47, %v9826_v27  ;;  %v9834_v17 = vrot.slane %v9832_v31, 1  ;;  %v39771_v47 = vld [vmem:[#allocation36_spill] sm:$0xff]  ;;  %v9848_v15 = vrot.slane %v9846_v0, 1 }
 0x738   : > { %27423 = vmatprep.mubr.msk.bf16.mxu1 %vm7466_vm3, %v35065_v44  ;;  %39770 = vst [vmem:[#allocation2_spill] sm:$0xff] %v35225_v21  ;;  %v9840_v33 = vshll.u32 %v35225_v21, 16  ;;  %v7326_v27 = vrot.slane %v39771_v47, %v33105_v48  ;;  %v9854_v47 = vshrl.u32 %v34259_v25, 16 }
 0x739   : > { %v35230_v26 = vsel %vm1413_vm1, %v9831_v18, %v9834_v17  ;;  %v9838_v55 = vor.u32 %v9836_v60, %v9834_v17  ;;  %v9850_v18 = vshll.u32 %v34259_v25, 16  ;;  %v9844_v17 = vshrl.u32 %v34468_v4, 16  ;;  %v39772_v60 = vld [vmem:[#allocation37_spill] sm:$0xff] }
 0x73a   : > { %v9842_v23 = vrot.slane %v9840_v33, 1  ;;  %v39773_v21 = vrot.slane %v39772_v60, 7 }
 0x73c   : > { %v35238_v31 = vsel %vm1413_vm1, %v9838_v55, %v9842_v23  ;;  %v7389_v33 = vsel %vm440_vm0, %v39773_v21, %v7326_v27  ;;  %v9849_v55 = vor.u32 %v9848_v15, %v9844_v17  ;;  %v9852_v23 = vrot.slane %v9850_v18, 1  ;;  %v39775_v18 = vld [vmem:[#allocation35_spill] sm:$0xff] }
 0x73d   : > { %v35251_v20 = vpack.c.bf16 %v7389_v33, %v7389_v33  ;;  %v9864_v21 = vshll.u32 %v34471_v58, 16  ;;  %v7330_v17 = vrot.slane %v39775_v18, %v33105_v48  ;;  %v9872_v18 = vshrl.u32 %v34188_v6, 16 }
 0x73e   : > { %v35256_v0 = vsel %vm1413_vm1, %v9849_v55, %v9852_v23  ;;  %v9856_v60 = vor.u32 %v9854_v47, %v9852_v23  ;;  %v9868_v55 = vshll.u32 %v34188_v6, 16  ;;  %v9862_v23 = vshrl.u32 %v34471_v58, 16  ;;  %v39776_v47 = vld [vmem:[#allocation11_spill] sm:$0xff] }
 0x73f   : > { %27424 = vmatmul.mubr.msk.bf16.gmra.mrb[32].mxu1 %vm7466_vm3, %v35073_v24  ;;  %39774 = vst [vmem:[#allocation3_spill] sm:$0xff] %v35251_v20  ;;  %v9858_v4 = vshll.u32 %v35251_v20, 16  ;;  %v9866_v33 = vrot.slane %v9864_v21, 1  ;;  %v39777_v20 = vrot.slane %v39776_v47, 7 }
 0x740   : > { %27427 = vmatprep.mubr.msk.bf16.mxu1 %vm7466_vm3, %v35094_v3 }
 0x741   : > { %v9860_v27 = vrot.slane %v9858_v4, 1  ;;  %v7390_v4 = vsel %vm440_vm0, %v39777_v20, %v7330_v17  ;;  %v9882_v20 = vshll.u32 %v34598_v49, 16 }
 0x742   : > { %v35277_v25 = vpack.c.bf16 %v7390_v4, %v7390_v4  ;;  %v9886_v4 = vshll.u32 %v34433_v22, 16 }
 0x743   : > { %v35264_v15 = vsel %vm1413_vm1, %v9856_v60, %v9860_v27  ;;  %v9867_v60 = vor.u32 %v9866_v33, %v9862_v23  ;;  %v9870_v27 = vrot.slane %v9868_v55, 1  ;;  %v7334_v55 = vrot.slane %v34381_v7, %v33105_v48 }
 0x744   : > { %39778 = vst [vmem:[#allocation9_spill] sm:$0xff] %v35277_v25  ;;  %v9876_v58 = vshll.u32 %v35277_v25, 16  ;;  %v9884_v23 = vrot.slane %v9882_v20, 1  ;;  %v9890_v20 = vshrl.u32 %v34433_v22, 16 }
 0x745   : > { %v35282_v21 = vsel %vm1413_vm1, %v9867_v60, %v9870_v27  ;;  %v9874_v47 = vor.u32 %v9872_v18, %v9870_v27  ;;  %v9880_v60 = vshrl.u32 %v34598_v49, 16  ;;  %v39779_v27 = vld [vmem:[#allocation41_spill] sm:$0xff] }
 0x746   : > { %v9878_v17 = vrot.slane %v9876_v58, 1  ;;  %v39780_v18 = vrot.slane %v39779_v27, 7 }
 0x747   : > { %27428 = vmatmul.mubr.msk.bf16.gmra.mrb[36].mxu1 %vm7466_vm3, %v35102_v1 }
 0x748   : > { %27431 = vmatprep.mubr.msk.bf16.mxu1 %vm7466_vm3, %v35094_v3  ;;  %v35290_v33 = vsel %vm1413_vm1, %v9874_v47, %v9878_v17  ;;  %v7391_v58 = vsel %vm440_vm0, %v39780_v18, %v7334_v55  ;;  %v9885_v47 = vor.u32 %v9884_v23, %v9880_v60  ;;  %v9888_v17 = vrot.slane %v9886_v4, 1  ;;  %v39782_v60 = vld [vmem:[#allocation20_spill] sm:$0xff] }
 0x749   : > { %v35303_v25 = vpack.c.bf16 %v7391_v58, %v7391_v58  ;;  %v9900_v55 = vshll.u32 %v34623_v12, 16  ;;  %v7338_v18 = vrot.slane %v39782_v60, %v33105_v48 }
 0x74a   : > { %v35308_v7 = vsel %vm1413_vm1, %v9885_v47, %v9888_v17  ;;  %v9892_v27 = vor.u32 %v9890_v20, %v9888_v17  ;;  %v9904_v47 = vshll.u32 %v34403_v50, 16  ;;  %v9898_v17 = vshrl.u32 %v34623_v12, 16  ;;  %v39783_v20 = vld [vmem:[#allocation40_spill] sm:$0xff] }
 0x74b   : > { %39781 = vst [vmem:[#allocation10_spill] sm:$0xff] %v35303_v25  ;;  %v9894_v49 = vshll.u32 %v35303_v25, 16  ;;  %v9902_v58 = vrot.slane %v9900_v55, 1  ;;  %v39784_v25 = vrot.slane %v39783_v20, 7  ;;  %v9908_v55 = vshrl.u32 %v34403_v50, 16 }
 0x74d   : > { %v9896_v23 = vrot.slane %v9894_v49, 1  ;;  %v7392_v49 = vsel %vm440_vm0, %v39784_v25, %v7338_v18  ;;  %v9918_v25 = vshll.u32 %v34646_v57, 16 }
 0x74e   : > { %v35329_v22 = vpack.c.bf16 %v7392_v49, %v7392_v49  ;;  %v9916_v49 = vshrl.u32 %v34646_v57, 16 }
 0x74f   : > { %27432 = vmatmul.mubr.msk.bf16.gmra.mrb[40].mxu1 %vm7466_vm3, %v35102_v1  ;;  %v35316_v4 = vsel %vm1413_vm1, %v9892_v27, %v9896_v23  ;;  %v9903_v27 = vor.u32 %v9902_v58, %v9898_v17  ;;  %v9906_v23 = vrot.slane %v9904_v47, 1  ;;  %v9920_v47 = vrot.slane %v9918_v25, 1 }
 0x750   : > { %27435 = vmatprep.mubr.msk.bf16.mxu1 %vm7466_vm3, %v35120_v43  ;;  %39785 = vst [vmem:[#allocation7_spill] sm:$0xff] %v35329_v22  ;;  %v9912_v60 = vshll.u32 %v35329_v22, 16  ;;  %v9922_v17 = vshll.u32 %v34594_v61, 16 }
 0x751   : > { %v35334_v48 = vsel %vm1413_vm1, %v9903_v27, %v9906_v23  ;;  %v9910_v20 = vor.u32 %v9908_v55, %v9906_v23  ;;  %v9921_v27 = vor.u32 %v9920_v47, %v9916_v49  ;;  %v35352_v23 = vpack.c.bf16 %v34659_v37, %v34659_v37 }
 0x752   : > { %v9914_v18 = vrot.slane %v9912_v60, 1  ;;  %v9924_v22 = vrot.slane %v9922_v17, 1  ;;  %v9926_v60 = vshrl.u32 %v34594_v61, 16  ;;  %v9940_v49 = vshll.u32 %v34566_v46, 16 }
 0x753   : > { %39786 = vst [vmem:[#allocation8_spill] sm:$0xff] %v35352_v23 }
 0x754   : > { %v35342_v58 = vsel %vm1413_vm1, %v9910_v20, %v9914_v18  ;;  %v35357_v55 = vsel %vm1413_vm1, %v9921_v27, %v9924_v22  ;;  %v9930_v20 = vshll.u32 %v35352_v23, 16  ;;  %v9928_v25 = vor.u32 %v9926_v60, %v9924_v22 }
 0x755   : > { %v9936_v18 = vshll.u32 %v34677_v53, 16  ;;  %v9934_v27 = vshrl.u32 %v34677_v53, 16  ;;  %v9942_v23 = vrot.slane %v9940_v49, 1  ;;  %v35375_v22 = vpack.c.bf16 %v34670_v2, %v34670_v2  ;;  %v32127_v2 = vld [vmem:[%s39363_s3 + $0xf0] sm:$0xff]   ;;  %v32130_v49 = vld [vmem:[%s39363_s3 + $0x48] sm:$0xff]  }
 0x756   : > { %v9932_v47 = vrot.slane %v9930_v20, 1  ;;  %v9944_v20 = vshrl.u32 %v34566_v46, 16 }
 0x757   : > { %27436 = vmatmul.mubr.msk.bf16.gmra.mrb[44].mxu1 %vm7466_vm3, %v35128_v28  ;;  %v9938_v17 = vrot.slane %v9936_v18, 1 }
 0x758   : > { %27439 = vmatprep.mubr.msk.bf16.mxu1 %vm7466_vm3, %v35120_v43  ;;  %v35365_v37 = vsel %vm1413_vm1, %v9928_v25, %v9932_v47  ;;  %v9948_v25 = vshll.u32 %v35375_v22, 16  ;;  %v9946_v18 = vor.u32 %v9944_v20, %v9942_v23  ;;  %v39793_v20 = vld [vmem:[#allocation23_spill] sm:$0xff] }
 0x759   : > { %v9939_v57 = vor.u32 %v9938_v17, %v9934_v27  ;;  %v32131_v27 = vld [vmem:[%s39363_s3 + $0x50] sm:$0xff]  }
 0x75a   : > { %v9950_v47 = vrot.slane %v9948_v25, 1  ;;  %v12250_v25 = vrot.slane %v39793_v20, 1 }
 0x75b   : > { %v35380_v60 = vsel %vm1413_vm1, %v9939_v57, %v9942_v23  ;;  %v32126_v57 = vld [vmem:[%s39363_s3 + $0xe8] sm:$0xff]   ;;  %v32129_v23 = vld [vmem:[%s39363_s3 + $0x40] sm:$0xff]  }
 0x75c   : > { %v35387_v17 = vsel %vm1413_vm1, %v9946_v18, %v9950_v47  ;;  %v39794_v18 = vld [vmem:[#allocation12_spill] sm:$0xff] }
 0x75d   : > { %v12249_v47 = vrot.slane %v39794_v18, 1 }
 0x75f   : > { %27440 = vmatmul.mubr.msk.bf16.gmra.mrb[48].mxu1 %vm7466_vm3, %v35128_v28 }
 0x760   : > { %27443 = vmatprep.mubr.msk.bf16.mxu1 %vm7466_vm3, %v35146_v30 }
 0x767   : > { %27444 = vmatmul.mubr.msk.bf16.gmra.mrb[52].mxu1 %vm7466_vm3, %v35154_v35 }
 0x768   : > { %27447 = vmatprep.mubr.msk.bf16.mxu1 %vm7466_vm3, %v35146_v30 }
 0x76f   : > { %27448 = vmatmul.mubr.msk.bf16.gmra.mrb[56].mxu1 %vm7466_vm3, %v35154_v35 }
 0x770   : > { %27451 = vmatprep.mubr.msk.bf16.mxu1 %vm7466_vm3, %v35172_v40 }
 0x777   : > { %27452 = vmatmul.mubr.msk.bf16.gmra.mrb[60].mxu1 %vm7466_vm3, %v35180_v14 }
 0x778   : > { %27455 = vmatprep.mubr.msk.bf16.mxu1 %vm7466_vm3, %v35172_v40 }
 0x77f   : > { %27456 = vmatmul.mubr.msk.bf16.gmra.mrb[64].mxu1 %vm7466_vm3, %v35180_v14 }
 0x780   : > { %27459 = vmatprep.mubr.msk.bf16.mxu1 %vm7466_vm3, %v35204_v52 }
 0x787   : > { %27460 = vmatmul.mubr.msk.bf16.gmra.mrb[68].mxu1 %vm7466_vm3, %v35212_v10 }
 0x788   : > { %27463 = vmatprep.mubr.msk.bf16.mxu1 %vm7466_vm3, %v35204_v52 }
 0x78f   : > { %27464 = vmatmul.mubr.msk.bf16.gmra.mrb[72].mxu1 %vm7466_vm3, %v35212_v10 }
 0x790   : > { %27467 = vmatprep.mubr.msk.bf16.mxu1 %vm7466_vm3, %v35230_v26 }
 0x797   : > { %27468 = vmatmul.mubr.msk.bf16.gmra.mrb[76].mxu1 %vm7466_vm3, %v35238_v31 }
 0x798   : > { %27471 = vmatprep.mubr.msk.bf16.mxu1 %vm7466_vm3, %v35230_v26 }
 0x79f   : > { %27472 = vmatmul.mubr.msk.bf16.gmra.mrb[80].mxu1 %vm7466_vm3, %v35238_v31 }
 0x7a0   : > { %27475 = vmatprep.mubr.msk.bf16.mxu1 %vm7466_vm3, %v35256_v0 }
 0x7a7   : > { %27476 = vmatmul.mubr.msk.bf16.gmra.mrb[84].mxu1 %vm7466_vm3, %v35264_v15 }
 0x7a8   : > { %27479 = vmatprep.mubr.msk.bf16.mxu1 %vm7466_vm3, %v35256_v0 }
 0x7af   : > { %27480 = vmatmul.mubr.msk.bf16.gmra.mrb[88].mxu1 %vm7466_vm3, %v35264_v15 }
 0x7b0   : > { %27483 = vmatprep.mubr.msk.bf16.mxu1 %vm7466_vm3, %v35282_v21 }
 0x7b7   : > { %27484 = vmatmul.mubr.msk.bf16.gmra.mrb[92].mxu1 %vm7466_vm3, %v35290_v33 }
 0x7b8   : > { %27487 = vmatprep.mubr.msk.bf16.mxu1 %vm7466_vm3, %v35282_v21 }
 0x7bf   : > { %27488 = vmatmul.mubr.msk.bf16.gmra.mrb[96].mxu1 %vm7466_vm3, %v35290_v33 }
 0x7c0   : > { %27491 = vmatprep.mubr.msk.bf16.mxu1 %vm7466_vm3, %v35308_v7 }
 0x7c7   : > { %27492 = vmatmul.mubr.msk.bf16.gmra.mrb[100].mxu1 %vm7466_vm3, %v35316_v4 }
 0x7c8   : > { %27495 = vmatprep.mubr.msk.bf16.mxu1 %vm7466_vm3, %v35308_v7 }
 0x7cf   : > { %27496 = vmatmul.mubr.msk.bf16.gmra.mrb[104].mxu1 %vm7466_vm3, %v35316_v4 }
 0x7d0   : > { %27499 = vmatprep.mubr.msk.bf16.mxu1 %vm7466_vm3, %v35334_v48 }
 0x7d7   : > { %27500 = vmatmul.mubr.msk.bf16.gmra.mrb[108].mxu1 %vm7466_vm3, %v35342_v58 }
 0x7d8   : > { %27503 = vmatprep.mubr.msk.bf16.mxu1 %vm7466_vm3, %v35334_v48 }
 0x7df   : > { %27504 = vmatmul.mubr.msk.bf16.gmra.mrb[112].mxu1 %vm7466_vm3, %v35342_v58 }
 0x7e0   : > { %27507 = vmatprep.mubr.msk.bf16.mxu1 %vm7466_vm3, %v35357_v55 }
 0x7e7   : > { %27508 = vmatmul.mubr.msk.bf16.gmra.mrb[116].mxu1 %vm7466_vm3, %v35365_v37 }
 0x7e8   : > { %27511 = vmatprep.mubr.msk.bf16.mxu1 %vm7466_vm3, %v35357_v55 }
 0x7ef   : > { %27512 = vmatmul.mubr.msk.bf16.gmra.mrb[120].mxu1 %vm7466_vm3, %v35365_v37 }
 0x7f0   : > { %27515 = vmatprep.mubr.msk.bf16.mxu1 %vm7466_vm3, %v35380_v60 }
 0x7f7   : > { %27516 = vmatmul.mubr.msk.bf16.gmra.mrb[124].mxu1 %vm7466_vm3, %v35387_v17 }
 0x7f8   : > { %27527 = vmatprep.mubr.msk.bf16.mxu1 %vm7466_vm3, %v34977_v38 }
 0x7ff   : > { %27528 = vmatmul.mubr.msk.bf16.vlgmr.msra.gmra.mrb[0].mxu1 %vm7466_vm3, %v34987_v5 }
 0x800   : > { %27656 = vmatpush3.bf16.msra.mxu1 %v35192_v13  ;;  %27531 = vmatprep.mubr.msk.bf16.mxu1 %vm7466_vm3, %v34977_v38  ;;  %v32128_v13 = vld [vmem:[%s39363_s3 + $0xf8] sm:$0xff]  }
 0x801   : > { %27657 = vmatprep.subr.bf16.mxu1 %v32126_v57 }
 0x804   : > { %27658 = vmatpush3.bf16.msra.mxu1 %v32126_v57  ;;  %v39795_v57 = vld [vmem:[#allocation4_spill] sm:$0xff] }
 0x805   : > { %27659 = vmatprep.subr.bf16.mxu1 %v32127_v2 }
 0x807   : > { %27532 = vmatmul.mubr.msk.bf16.gmra.mrb[4].mxu1 %vm7466_vm3, %v34987_v5 }
 0x808   : > { %27535 = vmatprep.mubr.msk.bf16.mxu1 %vm7466_vm3, %v35013_v45  ;;  %27660 = vmatpush3.bf16.msra.mxu1 %v32127_v2  ;;  %v12252_v2 = vrot.slane %v39795_v57, 1  ;;  %v12280_v57 = vrot.slane %v34403_v50, 1  ;;  %v12285_v50 = vrot.slane %v34594_v61, 1  ;;  %v12290_v61 = vrot.slane %v34566_v46, 1  ;;  %v32138_v46 = vld [vmem:[%s39363_s3 + $0x108] sm:$0xff]  }
 0x809   : > { %27661 = vmatprep.subr.bf16.mxu1 %v32128_v13 }
 0x80c   : > { %27662 = vmatpush3.bf16.msra.mxu1 %v32128_v13  ;;  %v35813_v13 = vsel %vm2426_vm2, %v12250_v25, %v12252_v2  ;;  %v12279_v2 = vrot.slane %v34623_v12, 1  ;;  %v39811_v12 = vld [vmem:[#allocation46_spill] sm:$0xff] }
 0x80d   : > { %27791 = vmatprep.subr.bf16.mxu1 %v32129_v23 }
 0x80f   : > { %27536 = vmatmul.mubr.msk.bf16.gmra.mrb[8].mxu1 %vm7466_vm3, %v35021_v59 }
 0x810   : > { %27539 = vmatprep.mubr.msk.bf16.mxu1 %vm7466_vm3, %v35013_v45 }
 0x817   : > { %27540 = vmatmul.mubr.msk.bf16.gmra.mrb[12].mxu1 %vm7466_vm3, %v35021_v59 }
 0x818   : > { %27543 = vmatprep.mubr.msk.bf16.mxu1 %vm7466_vm3, %v35039_v8 }
 0x81f   : > { %27544 = vmatmul.mubr.msk.bf16.gmra.mrb[16].mxu1 %vm7466_vm3, %v35047_v39 }
 0x820   : > { %27547 = vmatprep.mubr.msk.bf16.mxu1 %vm7466_vm3, %v35039_v8 }
 0x827   : > { %27548 = vmatmul.mubr.msk.bf16.gmra.mrb[20].mxu1 %vm7466_vm3, %v35047_v39 }
 0x828   : > { %27551 = vmatprep.mubr.msk.bf16.mxu1 %vm7466_vm3, %v35065_v44 }
 0x82f   : > { %27552 = vmatmul.mubr.msk.bf16.gmra.mrb[24].mxu1 %vm7466_vm3, %v35073_v24 }
 0x830   : > { %27555 = vmatprep.mubr.msk.bf16.mxu1 %vm7466_vm3, %v35065_v44 }
 0x837   : > { %27556 = vmatmul.mubr.msk.bf16.gmra.mrb[28].mxu1 %vm7466_vm3, %v35073_v24 }
 0x838   : > { %27559 = vmatprep.mubr.msk.bf16.mxu1 %vm7466_vm3, %v35094_v3 }
 0x83f   : > { %27560 = vmatmul.mubr.msk.bf16.gmra.mrb[32].mxu1 %vm7466_vm3, %v35102_v1 }
 0x840   : > { %27563 = vmatprep.mubr.msk.bf16.mxu1 %vm7466_vm3, %v35094_v3 }
 0x847   : > { %27564 = vmatmul.mubr.msk.bf16.gmra.mrb[36].mxu1 %vm7466_vm3, %v35102_v1 }
 0x848   : > { %27567 = vmatprep.mubr.msk.bf16.mxu1 %vm7466_vm3, %v35120_v43 }
 0x84f   : > { %27568 = vmatmul.mubr.msk.bf16.gmra.mrb[40].mxu1 %vm7466_vm3, %v35128_v28 }
 0x850   : > { %27571 = vmatprep.mubr.msk.bf16.mxu1 %vm7466_vm3, %v35120_v43 }
 0x857   : > { %27572 = vmatmul.mubr.msk.bf16.gmra.mrb[44].mxu1 %vm7466_vm3, %v35128_v28 }
 0x858   : > { %27575 = vmatprep.mubr.msk.bf16.mxu1 %vm7466_vm3, %v35146_v30 }
 0x85f   : > { %27576 = vmatmul.mubr.msk.bf16.gmra.mrb[48].mxu1 %vm7466_vm3, %v35154_v35 }
 0x860   : > { %27579 = vmatprep.mubr.msk.bf16.mxu1 %vm7466_vm3, %v35146_v30 }
 0x867   : > { %27580 = vmatmul.mubr.msk.bf16.gmra.mrb[52].mxu1 %vm7466_vm3, %v35154_v35 }
 0x868   : > { %27583 = vmatprep.mubr.msk.bf16.mxu1 %vm7466_vm3, %v35172_v40 }
 0x86f   : > { %27584 = vmatmul.mubr.msk.bf16.gmra.mrb[56].mxu1 %vm7466_vm3, %v35180_v14 }
 0x870   : > { %27587 = vmatprep.mubr.msk.bf16.mxu1 %vm7466_vm3, %v35172_v40 }
 0x877   : > { %27588 = vmatmul.mubr.msk.bf16.gmra.mrb[60].mxu1 %vm7466_vm3, %v35180_v14 }
 0x878   : > { %27591 = vmatprep.mubr.msk.bf16.mxu1 %vm7466_vm3, %v35204_v52 }
 0x87f   : > { %27592 = vmatmul.mubr.msk.bf16.gmra.mrb[64].mxu1 %vm7466_vm3, %v35212_v10 }
 0x880   : > { %27595 = vmatprep.mubr.msk.bf16.mxu1 %vm7466_vm3, %v35204_v52 }
 0x887   : > { %27596 = vmatmul.mubr.msk.bf16.gmra.mrb[68].mxu1 %vm7466_vm3, %v35212_v10 }
 0x888   : > { %27599 = vmatprep.mubr.msk.bf16.mxu1 %vm7466_vm3, %v35230_v26 }
 0x88f   : > { %27600 = vmatmul.mubr.msk.bf16.gmra.mrb[72].mxu1 %vm7466_vm3, %v35238_v31 }
 0x890   : > { %27603 = vmatprep.mubr.msk.bf16.mxu1 %vm7466_vm3, %v35230_v26 }
 0x897   : > { %27604 = vmatmul.mubr.msk.bf16.gmra.mrb[76].mxu1 %vm7466_vm3, %v35238_v31 }
 0x898   : > { %27607 = vmatprep.mubr.msk.bf16.mxu1 %vm7466_vm3, %v35256_v0 }
 0x89f   : > { %27608 = vmatmul.mubr.msk.bf16.gmra.mrb[80].mxu1 %vm7466_vm3, %v35264_v15 }
 0x8a0   : > { %27611 = vmatprep.mubr.msk.bf16.mxu1 %vm7466_vm3, %v35256_v0 }
 0x8a7   : > { %27612 = vmatmul.mubr.msk.bf16.gmra.mrb[84].mxu1 %vm7466_vm3, %v35264_v15 }
 0x8a8   : > { %27615 = vmatprep.mubr.msk.bf16.mxu1 %vm7466_vm3, %v35282_v21 }
 0x8af   : > { %27616 = vmatmul.mubr.msk.bf16.gmra.mrb[88].mxu1 %vm7466_vm3, %v35290_v33 }
 0x8b0   : > { %27619 = vmatprep.mubr.msk.bf16.mxu1 %vm7466_vm3, %v35282_v21 }
 0x8b7   : > { %27620 = vmatmul.mubr.msk.bf16.gmra.mrb[92].mxu1 %vm7466_vm3, %v35290_v33 }
 0x8b8   : > { %27623 = vmatprep.mubr.msk.bf16.mxu1 %vm7466_vm3, %v35308_v7 }
 0x8bf   : > { %27624 = vmatmul.mubr.msk.bf16.gmra.mrb[96].mxu1 %vm7466_vm3, %v35316_v4 }
 0x8c0   : > { %27627 = vmatprep.mubr.msk.bf16.mxu1 %vm7466_vm3, %v35308_v7 }
 0x8c7   : > { %27628 = vmatmul.mubr.msk.bf16.gmra.mrb[100].mxu1 %vm7466_vm3, %v35316_v4 }
 0x8c8   : > { %27631 = vmatprep.mubr.msk.bf16.mxu1 %vm7466_vm3, %v35334_v48 }
 0x8cf   : > { %27632 = vmatmul.mubr.msk.bf16.gmra.mrb[104].mxu1 %vm7466_vm3, %v35342_v58 }
 0x8d0   : > { %27635 = vmatprep.mubr.msk.bf16.mxu1 %vm7466_vm3, %v35334_v48 }
 0x8d7   : > { %27636 = vmatmul.mubr.msk.bf16.gmra.mrb[108].mxu1 %vm7466_vm3, %v35342_v58 }
 0x8d8   : > { %27639 = vmatprep.mubr.msk.bf16.mxu1 %vm7466_vm3, %v35357_v55 }
 0x8df   : > { %27640 = vmatmul.mubr.msk.bf16.gmra.mrb[112].mxu1 %vm7466_vm3, %v35365_v37 }
 0x8e0   : > { %27643 = vmatprep.mubr.msk.bf16.mxu1 %vm7466_vm3, %v35357_v55 }
 0x8e7   : > { %27644 = vmatmul.mubr.msk.bf16.gmra.mrb[116].mxu1 %vm7466_vm3, %v35365_v37 }
 0x8e8   : > { %27647 = vmatprep.mubr.msk.bf16.mxu1 %vm7466_vm3, %v35380_v60 }
 0x8ef   : > { %27648 = vmatmul.mubr.msk.bf16.gmra.mrb[120].mxu1 %vm7466_vm3, %v35387_v17 }
 0x8f0   : > { %27651 = vmatprep.mubr.msk.bf16.mxu1 %vm7466_vm3, %v35380_v60 }
 0x8f7   : > { %27652 = vmatmul.mubr.msk.bf16.gmra.mrb[124].mxu1 %vm7466_vm3, %v35387_v17 }
 0x8f8   : > { %27663 = vmatprep.mubr.msk.bf16.mxu1 %vm7466_vm3, %v34977_v38  ;;  %v32132_v38 = vld [vmem:[%s39363_s3 + $0x58] sm:$0xff]  }
 0x8ff   : > { %27664 = vmatmul.mubr.msk.bf16.vlgmr.msra.gmra.mrb[0].mxu1 %vm7466_vm3, %v34987_v5  ;;  %v32133_v5 = vld [vmem:[%s39363_s3 + $0xa0] sm:$0xff]  }
 0x900   : > { %27792 = vmatpush3.bf16.msra.mxu1 %v32129_v23  ;;  %27667 = vmatprep.mubr.msk.bf16.mxu1 %vm7466_vm3, %v35013_v45  ;;  %v35822_v23 = vld [vmem:[%s39363_s3 + $0x100] sm:$0xff]  }
 0x901   : > { %27793 = vmatprep.subr.bf16.mxu1 %v32130_v49 }
 0x904   : > { %27794 = vmatpush3.bf16.msra.mxu1 %v32130_v49  ;;  %v39796_v49 = vld [vmem:[#allocation33_spill] sm:$0xff] }
 0x905   : > { %27795 = vmatprep.subr.bf16.mxu1 %v32131_v27 }
 0x907   : > { %27668 = vmatmul.mubr.msk.bf16.gmra.mrb[4].mxu1 %vm7466_vm3, %v35021_v59 }
 0x908   : > { %27671 = vmatprep.mubr.msk.bf16.mxu1 %vm7466_vm3, %v35013_v45  ;;  %27796 = vmatpush3.bf16.msra.mxu1 %v32131_v27  ;;  %v12214_v45 = vrot.slane %v39733_v41, 1  ;;  %v32135_v41 = vld [vmem:[%s39363_s3 + $0xb0] sm:$0xff]   ;;  %v12255_v27 = vrot.slane %v39796_v49, 1  ;;  %v35915_v49 = vsel %vm2426_vm2, %v12279_v2, %v12280_v57 }
 0x909   : > { %27797 = vmatprep.subr.bf16.mxu1 %v32132_v38 }
 0x90c   : > { %27798 = vmatpush3.bf16.msra.mxu1 %v32132_v38  ;;  %v39797_v38 = vld [vmem:[#allocation39_spill] sm:$0xff] }
 0x90d   : > { %27927 = vmatprep.subr.bf16.mxu1 %v32133_v5 }
 0x90f   : > { %27672 = vmatmul.mubr.msk.bf16.gmra.mrb[8].mxu1 %vm7466_vm3, %v35021_v59 }
 0x910   : > { %27675 = vmatprep.mubr.msk.bf16.mxu1 %vm7466_vm3, %v35039_v8 }
 0x917   : > { %27676 = vmatmul.mubr.msk.bf16.gmra.mrb[12].mxu1 %vm7466_vm3, %v35047_v39 }
 0x918   : > { %27679 = vmatprep.mubr.msk.bf16.mxu1 %vm7466_vm3, %v35039_v8  ;;  %v12217_v8 = vrot.slane %v34972_v42, 1  ;;  %v12219_v42 = vrot.slane %v33596_v62, 1  ;;  %v12224_v62 = vrot.slane %v33808_v56, 1  ;;  %v12229_v56 = vrot.slane %v33844_v36, 1 }
 0x919   : > { %v12235_v36 = vrot.slane %v33619_v19, 1  ;;  %v39787_v19 = vld [vmem:[#allocation16_spill] sm:$0xff] }
 0x91f   : > { %27680 = vmatmul.mubr.msk.bf16.gmra.mrb[16].mxu1 %vm7466_vm3, %v35047_v39  ;;  %v32134_v39 = vld [vmem:[%s39363_s3 + $0xa8] sm:$0xff]  }
 0x920   : > { %27683 = vmatprep.mubr.msk.bf16.mxu1 %vm7466_vm3, %v35065_v44 }
 0x927   : > { %27684 = vmatmul.mubr.msk.bf16.gmra.mrb[20].mxu1 %vm7466_vm3, %v35073_v24 }
 0x928   : > { %27687 = vmatprep.mubr.msk.bf16.mxu1 %vm7466_vm3, %v35065_v44 }
 0x92f   : > { %27688 = vmatmul.mubr.msk.bf16.gmra.mrb[24].mxu1 %vm7466_vm3, %v35073_v24 }
 0x930   : > { %27691 = vmatprep.mubr.msk.bf16.mxu1 %vm7466_vm3, %v35094_v3 }
 0x937   : > { %27692 = vmatmul.mubr.msk.bf16.gmra.mrb[28].mxu1 %vm7466_vm3, %v35102_v1 }
 0x938   : > { %27695 = vmatprep.mubr.msk.bf16.mxu1 %vm7466_vm3, %v35094_v3  ;;  %v12222_v3 = vrot.slane %v35008_v51, 1  ;;  %v12227_v51 = vrot.slane %v35034_v63, 1  ;;  %v12232_v63 = vrot.slane %v35060_v29, 1 }
 0x93f   : > { %27696 = vmatmul.mubr.msk.bf16.gmra.mrb[32].mxu1 %vm7466_vm3, %v35102_v1 }
 0x940   : > { %27699 = vmatprep.mubr.msk.bf16.mxu1 %vm7466_vm3, %v35120_v43 }
 0x947   : > { %27700 = vmatmul.mubr.msk.bf16.gmra.mrb[36].mxu1 %vm7466_vm3, %v35128_v28 }
 0x948   : > { %27703 = vmatprep.mubr.msk.bf16.mxu1 %vm7466_vm3, %v35120_v43 }
 0x94f   : > { %27704 = vmatmul.mubr.msk.bf16.gmra.mrb[40].mxu1 %vm7466_vm3, %v35128_v28 }
 0x950   : > { %27707 = vmatprep.mubr.msk.bf16.mxu1 %vm7466_vm3, %v35146_v30 }
 0x957   : > { %27708 = vmatmul.mubr.msk.bf16.gmra.mrb[44].mxu1 %vm7466_vm3, %v35154_v35 }
 0x958   : > { %27711 = vmatprep.mubr.msk.bf16.mxu1 %vm7466_vm3, %v35146_v30 }
 0x95f   : > { %27712 = vmatmul.mubr.msk.bf16.gmra.mrb[48].mxu1 %vm7466_vm3, %v35154_v35 }
 0x960   : > { %27715 = vmatprep.mubr.msk.bf16.mxu1 %vm7466_vm3, %v35172_v40 }
 0x967   : > { %27716 = vmatmul.mubr.msk.bf16.gmra.mrb[52].mxu1 %vm7466_vm3, %v35180_v14 }
 0x968   : > { %27719 = vmatprep.mubr.msk.bf16.mxu1 %vm7466_vm3, %v35172_v40  ;;  %v12234_v40 = vrot.slane %v33890_v16, 1  ;;  %v12240_v16 = vrot.slane %v39787_v19, 1 }
 0x96a   : > { %v35756_v29 = vsel %vm2426_vm2, %v12234_v40, %v12235_v36 }
 0x96f   : > { %27720 = vmatmul.mubr.msk.bf16.gmra.mrb[56].mxu1 %vm7466_vm3, %v35180_v14  ;;  %v12237_v14 = vrot.slane %v35089_v11, 1  ;;  %v39789_v11 = vld [vmem:[#allocation19_spill] sm:$0xff] }
 0x970   : > { %27723 = vmatprep.mubr.msk.bf16.mxu1 %vm7466_vm3, %v35204_v52 }
 0x977   : > { %27724 = vmatmul.mubr.msk.bf16.gmra.mrb[60].mxu1 %vm7466_vm3, %v35212_v10 }
 0x978   : > { %27727 = vmatprep.mubr.msk.bf16.mxu1 %vm7466_vm3, %v35204_v52  ;;  %v12215_v52 = vrot.slane %v39734_v34, 1  ;;  %v12220_v34 = vrot.slane %v33206_v32, 1  ;;  %v12225_v32 = vrot.slane %v33420_v54, 1  ;;  %v12230_v54 = vrot.slane %v33364_v9, 1  ;;  %v32136_v9 = vld [vmem:[%s39363_s3 + $0xb8] sm:$0xff]  }
 0x97a   : > { %v35675_v59 = vsel %vm2426_vm2, %v12214_v45, %v12215_v52  ;;  %v35684_v44 = vsel %vm2426_vm2, %v12215_v52, %v12217_v8  ;;  %v35702_v24 = vsel %vm2426_vm2, %v12219_v42, %v12220_v34  ;;  %v35708_v1 = vsel %vm2426_vm2, %v12220_v34, %v12222_v3  ;;  %v39798_v45 = vld [vmem:[#allocation5_spill] sm:$0xff]  ;;  %v39800_v42 = vld [vmem:[#allocation15_spill] sm:$0xff] }
 0x97b   : > { %v35719_v43 = vsel %vm2426_vm2, %v12224_v62, %v12225_v32  ;;  %v35725_v28 = vsel %vm2426_vm2, %v12225_v32, %v12227_v51  ;;  %v35736_v30 = vsel %vm2426_vm2, %v12229_v56, %v12230_v54  ;;  %v35742_v35 = vsel %vm2426_vm2, %v12230_v54, %v12232_v63  ;;  %v39801_v62 = vld [vmem:[#allocation2_spill] sm:$0xff] }
 0x97c   : > { %v12257_v8 = vrot.slane %v39798_v45, 1  ;;  %v12259_v3 = vrot.slane %v39800_v42, 1  ;;  %v12262_v51 = vrot.slane %v39801_v62, 1  ;;  %v39802_v56 = vld [vmem:[#allocation38_spill] sm:$0xff]  ;;  %v12284_v45 = vrot.slane %v39811_v12, 1 }
 0x97d   : > { %v12265_v63 = vrot.slane %v39802_v56, 1 }
 0x97f   : > { %27728 = vmatmul.mubr.msk.bf16.gmra.mrb[64].mxu1 %vm7466_vm3, %v35212_v10  ;;  %v35762_v10 = vsel %vm2426_vm2, %v12235_v36, %v12237_v14  ;;  %v39804_v14 = vld [vmem:[#allocation3_spill] sm:$0xff] }
 0x980   : > { %27731 = vmatprep.mubr.msk.bf16.mxu1 %vm7466_vm3, %v35230_v26  ;;  %v12267_v19 = vrot.slane %v39804_v14, 1 }
 0x987   : > { %27732 = vmatmul.mubr.msk.bf16.gmra.mrb[68].mxu1 %vm7466_vm3, %v35238_v31 }
 0x988   : > { %27735 = vmatprep.mubr.msk.bf16.mxu1 %vm7466_vm3, %v35230_v26  ;;  %v39788_v26 = vld [vmem:[#allocation31_spill] sm:$0xff] }
 0x98f   : > { %27736 = vmatmul.mubr.msk.bf16.gmra.mrb[72].mxu1 %vm7466_vm3, %v35238_v31  ;;  %v12239_v31 = vrot.slane %v39788_v26, 1  ;;  %v12270_v26 = vrot.slane %v34188_v6, 1  ;;  %v39807_v6 = vld [vmem:[#allocation42_spill] sm:$0xff] }
 0x990   : > { %27739 = vmatprep.mubr.msk.bf16.mxu1 %vm7466_vm3, %v35256_v0 }
 0x997   : > { %27740 = vmatmul.mubr.msk.bf16.gmra.mrb[76].mxu1 %vm7466_vm3, %v35264_v15 }
 0x998   : > { %27743 = vmatprep.mubr.msk.bf16.mxu1 %vm7466_vm3, %v35256_v0  ;;  %v35773_v0 = vsel %vm2426_vm2, %v12239_v31, %v12240_v16  ;;  %v39805_v31 = vld [vmem:[#allocation44_spill] sm:$0xff] }
 0x99f   : > { %27744 = vmatmul.mubr.msk.bf16.gmra.mrb[80].mxu1 %vm7466_vm3, %v35264_v15  ;;  %v12242_v15 = vrot.slane %v39789_v11, 1  ;;  %v12269_v11 = vrot.slane %v39805_v31, 1 }
 0x9a0   : > { %27747 = vmatprep.mubr.msk.bf16.mxu1 %vm7466_vm3, %v35282_v21 }
 0x9a7   : > { %27748 = vmatmul.mubr.msk.bf16.gmra.mrb[84].mxu1 %vm7466_vm3, %v35290_v33 }
 0x9a8   : > { %27751 = vmatprep.mubr.msk.bf16.mxu1 %vm7466_vm3, %v35282_v21  ;;  %v35779_v21 = vsel %vm2426_vm2, %v12240_v16, %v12242_v15  ;;  %v35870_v16 = vsel %vm2426_vm2, %v12265_v63, %v12267_v19  ;;  %v35881_v15 = vsel %vm2426_vm2, %v12269_v11, %v12270_v26 }
 0x9af   : > { %27752 = vmatmul.mubr.msk.bf16.gmra.mrb[88].mxu1 %vm7466_vm3, %v35290_v33  ;;  %v39790_v33 = vld [vmem:[#allocation26_spill] sm:$0xff] }
 0x9b0   : > { %27755 = vmatprep.mubr.msk.bf16.mxu1 %vm7466_vm3, %v35308_v7 }
 0x9b7   : > { %27756 = vmatmul.mubr.msk.bf16.gmra.mrb[92].mxu1 %vm7466_vm3, %v35316_v4 }
 0x9b8   : > { %27759 = vmatprep.mubr.msk.bf16.mxu1 %vm7466_vm3, %v35308_v7  ;;  %v12245_v7 = vrot.slane %v39790_v33, 1  ;;  %v39806_v33 = vld [vmem:[#allocation9_spill] sm:$0xff] }
 0x9bf   : > { %27760 = vmatmul.mubr.msk.bf16.gmra.mrb[96].mxu1 %vm7466_vm3, %v35316_v4  ;;  %v39791_v4 = vld [vmem:[#allocation34_spill] sm:$0xff] }
 0x9c0   : > { %27763 = vmatprep.mubr.msk.bf16.mxu1 %vm7466_vm3, %v35334_v48 }
 0x9c7   : > { %27764 = vmatmul.mubr.msk.bf16.gmra.mrb[100].mxu1 %vm7466_vm3, %v35342_v58 }
 0x9c8   : > { %27767 = vmatprep.mubr.msk.bf16.mxu1 %vm7466_vm3, %v35334_v48  ;;  %v12244_v48 = vrot.slane %v39791_v4, 1 }
 0x9cf   : > { %27768 = vmatmul.mubr.msk.bf16.gmra.mrb[104].mxu1 %vm7466_vm3, %v35342_v58  ;;  %v35790_v58 = vsel %vm2426_vm2, %v12244_v48, %v12245_v7  ;;  %v12275_v48 = vrot.slane %v39807_v6, 1 }
 0x9d0   : > { %27771 = vmatprep.mubr.msk.bf16.mxu1 %vm7466_vm3, %v35357_v55 }
 0x9d7   : > { %27772 = vmatmul.mubr.msk.bf16.gmra.mrb[108].mxu1 %vm7466_vm3, %v35365_v37 }
 0x9d8   : > { %27775 = vmatprep.mubr.msk.bf16.mxu1 %vm7466_vm3, %v35357_v55  ;;  %v39792_v55 = vld [vmem:[#allocation6_spill] sm:$0xff] }
 0x9df   : > { %27776 = vmatmul.mubr.msk.bf16.gmra.mrb[112].mxu1 %vm7466_vm3, %v35365_v37  ;;  %v12247_v37 = vrot.slane %v39792_v55, 1  ;;  %v39808_v55 = vld [vmem:[#allocation45_spill] sm:$0xff] }
 0x9e0   : > { %27779 = vmatprep.mubr.msk.bf16.mxu1 %vm7466_vm3, %v35380_v60 }
 0x9e7   : > { %27780 = vmatmul.mubr.msk.bf16.gmra.mrb[116].mxu1 %vm7466_vm3, %v35387_v17 }
 0x9e8   : > { %27783 = vmatprep.mubr.msk.bf16.mxu1 %vm7466_vm3, %v35380_v60 }
 0x9ef   : > { %27784 = vmatmul.mubr.msk.bf16.gmra.mrb[120].mxu1 %vm7466_vm3, %v35387_v17 }
 0x9f0   : > { %27787 = vmatprep.mubr.msk.bf16.mxu1 %vm7466_vm3, %v35380_v60  ;;  %v35796_v60 = vsel %vm2426_vm2, %v12245_v7, %v12247_v37  ;;  %v12272_v7 = vrot.slane %v39806_v33, 1  ;;  %v12274_v37 = vrot.slane %v39808_v55, 1 }
 0x9f2   : > { %v35887_v4 = vsel %vm2426_vm2, %v12270_v26, %v12272_v7  ;;  %v35898_v20 = vsel %vm2426_vm2, %v12274_v37, %v12275_v48 }
 0x9f7   : > { %27788 = vmatmul.mubr.msk.bf16.gmra.mrb[124].mxu1 %vm7466_vm3, %v35387_v17  ;;  %v35807_v17 = vsel %vm2426_vm2, %v12249_v47, %v12250_v25  ;;  %v39809_v25 = vld [vmem:[#allocation10_spill] sm:$0xff] }
 0x9f8   : > { %27799 = vmatprep.mubr.msk.bf16.mxu1 %vm7466_vm3, %v35675_v59  ;;  %v12277_v18 = vrot.slane %v39809_v25, 1 }
 0x9fa   : > { %v35904_v47 = vsel %vm2426_vm2, %v12275_v48, %v12277_v18 }
 0x9ff   : > { %27800 = vmatmul.mubr.msk.bf16.vlgmr.msra.gmra.mrb[0].mxu1 %vm7466_vm3, %v35684_v44 }
 0xa00   : > { %27928 = vmatpush3.bf16.msra.mxu1 %v32133_v5  ;;  %27803 = vmatprep.mubr.msk.bf16.mxu1 %vm7466_vm3, %v35675_v59  ;;  %v12254_v5 = vrot.slane %v39797_v38, 1 }
 0xa01   : > { %27929 = vmatprep.subr.bf16.mxu1 %v32134_v39 }
 0xa02   : > { %v35830_v52 = vsel %vm2426_vm2, %v12254_v5, %v12255_v27 }
 0xa04   : > { %27930 = vmatpush3.bf16.msra.mxu1 %v32134_v39  ;;  %v35836_v39 = vsel %vm2426_vm2, %v12255_v27, %v12257_v8  ;;  %v39810_v27 = vld [vmem:[#allocation7_spill] sm:$0xff]  ;;  %v35932_v8 = vsel %vm2426_vm2, %v12284_v45, %v12285_v50 }
 0xa05   : > { %27931 = vmatprep.subr.bf16.mxu1 %v32135_v41  ;;  %v12282_v38 = vrot.slane %v39810_v27, 1 }
 0xa07   : > { %27804 = vmatmul.mubr.msk.bf16.gmra.mrb[4].mxu1 %vm7466_vm3, %v35684_v44  ;;  %v35921_v5 = vsel %vm2426_vm2, %v12280_v57, %v12282_v38 }
 0xa08   : > { %27807 = vmatprep.mubr.msk.bf16.mxu1 %vm7466_vm3, %v35675_v59  ;;  %27932 = vmatpush3.bf16.msra.mxu1 %v32135_v41  ;;  %v39799_v41 = vld [vmem:[#allocation29_spill] sm:$0xff] }
 0xa09   : > { %27933 = vmatprep.subr.bf16.mxu1 %v32136_v9  ;;  %v12260_v34 = vrot.slane %v39799_v41, 1  ;;  %v39812_v41 = vld [vmem:[#allocation8_spill] sm:$0xff] }
 0xa0b   : > { %v35847_v32 = vsel %vm2426_vm2, %v12259_v3, %v12260_v34  ;;  %v35853_v54 = vsel %vm2426_vm2, %v12260_v34, %v12262_v51  ;;  %v12287_v34 = vrot.slane %v39812_v41, 1  ;;  %v12289_v3 = vrot.slane %v34677_v53, 1  ;;  %v32139_v53 = vld [vmem:[%s39363_s3 + $0x110] sm:$0xff]  }
 0xa0c   : > { %27934 = vmatpush3.bf16.msra.mxu1 %v32136_v9  ;;  %v39803_v9 = vld [vmem:[#allocation43_spill] sm:$0xff]  ;;  %v12292_v51 = vrot.slane %v35375_v22, 1  ;;  %v32140_v22 = vld [vmem:[%s39363_s3 + $0x118] sm:$0xff]  }
 0xa0d   : > { %28063 = vmatprep.subr.bf16.mxu1 %v35822_v23  ;;  %v12264_v36 = vrot.slane %v39803_v9, 1  ;;  %v35938_v42 = vsel %vm2426_vm2, %v12285_v50, %v12287_v34  ;;  %v35949_v62 = vsel %vm2426_vm2, %v12289_v3, %v12290_v61 }
 0xa0e   : > { %v35955_v56 = vsel %vm2426_vm2, %v12290_v61, %v12292_v51 }
 0xa0f   : > { %27808 = vmatmul.mubr.msk.bf16.gmra.mrb[8].mxu1 %vm7466_vm3, %v35684_v44  ;;  %v35864_v40 = vsel %vm2426_vm2, %v12264_v36, %v12265_v63 }
 0xa10   : > { %27811 = vmatprep.mubr.msk.bf16.mxu1 %vm7466_vm3, %v35702_v24 }
 0xa17   : > { %27812 = vmatmul.mubr.msk.bf16.gmra.mrb[12].mxu1 %vm7466_vm3, %v35708_v1 }
 0xa18   : > { %27815 = vmatprep.mubr.msk.bf16.mxu1 %vm7466_vm3, %v35702_v24 }
 0xa1f   : > { %27816 = vmatmul.mubr.msk.bf16.gmra.mrb[16].mxu1 %vm7466_vm3, %v35708_v1 }
 0xa20   : > { %27819 = vmatprep.mubr.msk.bf16.mxu1 %vm7466_vm3, %v35719_v43 }
 0xa27   : > { %27820 = vmatmul.mubr.msk.bf16.gmra.mrb[20].mxu1 %vm7466_vm3, %v35725_v28 }
 0xa28   : > { %27823 = vmatprep.mubr.msk.bf16.mxu1 %vm7466_vm3, %v35719_v43 }
 0xa2f   : > { %27824 = vmatmul.mubr.msk.bf16.gmra.mrb[24].mxu1 %vm7466_vm3, %v35725_v28 }
 0xa30   : > { %27827 = vmatprep.mubr.msk.bf16.mxu1 %vm7466_vm3, %v35736_v30 }
 0xa37   : > { %27828 = vmatmul.mubr.msk.bf16.gmra.mrb[28].mxu1 %vm7466_vm3, %v35742_v35 }
 0xa38   : > { %27831 = vmatprep.mubr.msk.bf16.mxu1 %vm7466_vm3, %v35736_v30 }
 0xa3f   : > { %27832 = vmatmul.mubr.msk.bf16.gmra.mrb[32].mxu1 %vm7466_vm3, %v35742_v35 }
 0xa40   : > { %27835 = vmatprep.mubr.msk.bf16.mxu1 %vm7466_vm3, %v35756_v29 }
 0xa47   : > { %27836 = vmatmul.mubr.msk.bf16.gmra.mrb[36].mxu1 %vm7466_vm3, %v35762_v10 }
 0xa48   : > { %27839 = vmatprep.mubr.msk.bf16.mxu1 %vm7466_vm3, %v35756_v29 }
 0xa4f   : > { %27840 = vmatmul.mubr.msk.bf16.gmra.mrb[40].mxu1 %vm7466_vm3, %v35762_v10 }
 0xa50   : > { %27843 = vmatprep.mubr.msk.bf16.mxu1 %vm7466_vm3, %v35773_v0 }
 0xa57   : > { %27844 = vmatmul.mubr.msk.bf16.gmra.mrb[44].mxu1 %vm7466_vm3, %v35779_v21 }
 0xa58   : > { %27847 = vmatprep.mubr.msk.bf16.mxu1 %vm7466_vm3, %v35773_v0 }
 0xa5f   : > { %27848 = vmatmul.mubr.msk.bf16.gmra.mrb[48].mxu1 %vm7466_vm3, %v35779_v21 }
 0xa60   : > { %27851 = vmatprep.mubr.msk.bf16.mxu1 %vm7466_vm3, %v35790_v58 }
 0xa67   : > { %27852 = vmatmul.mubr.msk.bf16.gmra.mrb[52].mxu1 %vm7466_vm3, %v35796_v60 }
 0xa68   : > { %27855 = vmatprep.mubr.msk.bf16.mxu1 %vm7466_vm3, %v35790_v58 }
 0xa6f   : > { %27856 = vmatmul.mubr.msk.bf16.gmra.mrb[56].mxu1 %vm7466_vm3, %v35796_v60 }
 0xa70   : > { %27859 = vmatprep.mubr.msk.bf16.mxu1 %vm7466_vm3, %v35807_v17 }
 0xa77   : > { %27860 = vmatmul.mubr.msk.bf16.gmra.mrb[60].mxu1 %vm7466_vm3, %v35813_v13 }
 0xa78   : > { %27863 = vmatprep.mubr.msk.bf16.mxu1 %vm7466_vm3, %v35807_v17 }
 0xa7f   : > { %27864 = vmatmul.mubr.msk.bf16.gmra.mrb[64].mxu1 %vm7466_vm3, %v35813_v13 }
 0xa80   : > { %27867 = vmatprep.mubr.msk.bf16.mxu1 %vm7466_vm3, %v35830_v52 }
 0xa87   : > { %27868 = vmatmul.mubr.msk.bf16.gmra.mrb[68].mxu1 %vm7466_vm3, %v35836_v39 }
 0xa88   : > { %27871 = vmatprep.mubr.msk.bf16.mxu1 %vm7466_vm3, %v35830_v52 }
 0xa8f   : > { %27872 = vmatmul.mubr.msk.bf16.gmra.mrb[72].mxu1 %vm7466_vm3, %v35836_v39 }
 0xa90   : > { %27875 = vmatprep.mubr.msk.bf16.mxu1 %vm7466_vm3, %v35847_v32 }
 0xa97   : > { %27876 = vmatmul.mubr.msk.bf16.gmra.mrb[76].mxu1 %vm7466_vm3, %v35853_v54 }
 0xa98   : > { %27879 = vmatprep.mubr.msk.bf16.mxu1 %vm7466_vm3, %v35847_v32 }
 0xa9f   : > { %27880 = vmatmul.mubr.msk.bf16.gmra.mrb[80].mxu1 %vm7466_vm3, %v35853_v54 }
 0xaa0   : > { %27883 = vmatprep.mubr.msk.bf16.mxu1 %vm7466_vm3, %v35864_v40 }
 0xaa7   : > { %27884 = vmatmul.mubr.msk.bf16.gmra.mrb[84].mxu1 %vm7466_vm3, %v35870_v16 }
 0xaa8   : > { %27887 = vmatprep.mubr.msk.bf16.mxu1 %vm7466_vm3, %v35864_v40 }
 0xaaf   : > { %27888 = vmatmul.mubr.msk.bf16.gmra.mrb[88].mxu1 %vm7466_vm3, %v35870_v16 }
 0xab0   : > { %27891 = vmatprep.mubr.msk.bf16.mxu1 %vm7466_vm3, %v35881_v15 }
 0xab7   : > { %27892 = vmatmul.mubr.msk.bf16.gmra.mrb[92].mxu1 %vm7466_vm3, %v35887_v4 }
 0xab8   : > { %27895 = vmatprep.mubr.msk.bf16.mxu1 %vm7466_vm3, %v35881_v15 }
 0xabf   : > { %27896 = vmatmul.mubr.msk.bf16.gmra.mrb[96].mxu1 %vm7466_vm3, %v35887_v4 }
 0xac0   : > { %27899 = vmatprep.mubr.msk.bf16.mxu1 %vm7466_vm3, %v35898_v20 }
 0xac7   : > { %27900 = vmatmul.mubr.msk.bf16.gmra.mrb[100].mxu1 %vm7466_vm3, %v35904_v47 }
 0xac8   : > { %27903 = vmatprep.mubr.msk.bf16.mxu1 %vm7466_vm3, %v35898_v20 }
 0xacf   : > { %27904 = vmatmul.mubr.msk.bf16.gmra.mrb[104].mxu1 %vm7466_vm3, %v35904_v47 }
 0xad0   : > { %27907 = vmatprep.mubr.msk.bf16.mxu1 %vm7466_vm3, %v35915_v49 }
 0xad7   : > { %27908 = vmatmul.mubr.msk.bf16.gmra.mrb[108].mxu1 %vm7466_vm3, %v35921_v5 }
 0xad8   : > { %27911 = vmatprep.mubr.msk.bf16.mxu1 %vm7466_vm3, %v35915_v49 }
 0xadf   : > { %27912 = vmatmul.mubr.msk.bf16.gmra.mrb[112].mxu1 %vm7466_vm3, %v35921_v5 }
 0xae0   : > { %27915 = vmatprep.mubr.msk.bf16.mxu1 %vm7466_vm3, %v35932_v8 }
 0xae7   : > { %27916 = vmatmul.mubr.msk.bf16.gmra.mrb[116].mxu1 %vm7466_vm3, %v35938_v42 }
 0xae8   : > { %27919 = vmatprep.mubr.msk.bf16.mxu1 %vm7466_vm3, %v35932_v8 }
 0xaef   : > { %27920 = vmatmul.mubr.msk.bf16.gmra.mrb[120].mxu1 %vm7466_vm3, %v35938_v42 }
 0xaf0   : > { %27923 = vmatprep.mubr.msk.bf16.mxu1 %vm7466_vm3, %v35949_v62 }
 0xaf7   : > { %27924 = vmatmul.mubr.msk.bf16.gmra.mrb[124].mxu1 %vm7466_vm3, %v35955_v56 }
 0xaf8   : > { %27935 = vmatprep.mubr.msk.bf16.mxu1 %vm7466_vm3, %v35675_v59 }
 0xaff   : > { %27936 = vmatmul.mubr.msk.bf16.vlgmr.msra.gmra.mrb[0].mxu1 %vm7466_vm3, %v35684_v44 }
 0xb00   : > { %28064 = vmatpush3.bf16.msra.mxu1 %v35822_v23  ;;  %27939 = vmatprep.mubr.msk.bf16.mxu1 %vm7466_vm3, %v35675_v59 }
 0xb01   : > { %28065 = vmatprep.subr.bf16.mxu1 %v32138_v46 }
 0xb04   : > { %28066 = vmatpush3.bf16.msra.mxu1 %v32138_v46 }
 0xb05   : > { %28067 = vmatprep.subr.bf16.mxu1 %v32139_v53 }
 0xb07   : > { %27940 = vmatmul.mubr.msk.bf16.gmra.mrb[4].mxu1 %vm7466_vm3, %v35684_v44 }
 0xb08   : > { %27943 = vmatprep.mubr.msk.bf16.mxu1 %vm7466_vm3, %v35702_v24  ;;  %28068 = vmatpush3.bf16.msra.mxu1 %v32139_v53 }
 0xb09   : > { %28069 = vmatprep.subr.bf16.mxu1 %v32140_v22 }
 0xb0c   : > { %28070 = vmatpush3.bf16.msra.mxu1 %v32140_v22 }
 0xb0f   : > { %27944 = vmatmul.mubr.msk.bf16.gmra.mrb[8].mxu1 %vm7466_vm3, %v35708_v1 }
 0xb10   : > { %27947 = vmatprep.mubr.msk.bf16.mxu1 %vm7466_vm3, %v35702_v24 }
 0xb17   : > { %27948 = vmatmul.mubr.msk.bf16.gmra.mrb[12].mxu1 %vm7466_vm3, %v35708_v1 }
 0xb18   : > { %27951 = vmatprep.mubr.msk.bf16.mxu1 %vm7466_vm3, %v35719_v43 }
 0xb1f   : > { %27952 = vmatmul.mubr.msk.bf16.gmra.mrb[16].mxu1 %vm7466_vm3, %v35725_v28 }
 0xb20   : > { %27955 = vmatprep.mubr.msk.bf16.mxu1 %vm7466_vm3, %v35719_v43 }
 0xb27   : > { %27956 = vmatmul.mubr.msk.bf16.gmra.mrb[20].mxu1 %vm7466_vm3, %v35725_v28 }
 0xb28   : > { %27959 = vmatprep.mubr.msk.bf16.mxu1 %vm7466_vm3, %v35736_v30 }
 0xb2f   : > { %27960 = vmatmul.mubr.msk.bf16.gmra.mrb[24].mxu1 %vm7466_vm3, %v35742_v35 }
 0xb30   : > { %27963 = vmatprep.mubr.msk.bf16.mxu1 %vm7466_vm3, %v35736_v30 }
 0xb37   : > { %27964 = vmatmul.mubr.msk.bf16.gmra.mrb[28].mxu1 %vm7466_vm3, %v35742_v35 }
 0xb38   : > { %27967 = vmatprep.mubr.msk.bf16.mxu1 %vm7466_vm3, %v35756_v29 }
 0xb3f   : > { %27968 = vmatmul.mubr.msk.bf16.gmra.mrb[32].mxu1 %vm7466_vm3, %v35762_v10 }
 0xb40   : > { %27971 = vmatprep.mubr.msk.bf16.mxu1 %vm7466_vm3, %v35756_v29 }
 0xb47   : > { %27972 = vmatmul.mubr.msk.bf16.gmra.mrb[36].mxu1 %vm7466_vm3, %v35762_v10 }
 0xb48   : > { %27975 = vmatprep.mubr.msk.bf16.mxu1 %vm7466_vm3, %v35773_v0 }
 0xb4f   : > { %27976 = vmatmul.mubr.msk.bf16.gmra.mrb[40].mxu1 %vm7466_vm3, %v35779_v21 }
 0xb50   : > { %27979 = vmatprep.mubr.msk.bf16.mxu1 %vm7466_vm3, %v35773_v0 }
 0xb57   : > { %27980 = vmatmul.mubr.msk.bf16.gmra.mrb[44].mxu1 %vm7466_vm3, %v35779_v21 }
 0xb58   : > { %27983 = vmatprep.mubr.msk.bf16.mxu1 %vm7466_vm3, %v35790_v58 }
 0xb5f   : > { %27984 = vmatmul.mubr.msk.bf16.gmra.mrb[48].mxu1 %vm7466_vm3, %v35796_v60 }
 0xb60   : > { %27987 = vmatprep.mubr.msk.bf16.mxu1 %vm7466_vm3, %v35790_v58 }
 0xb67   : > { %27988 = vmatmul.mubr.msk.bf16.gmra.mrb[52].mxu1 %vm7466_vm3, %v35796_v60 }
 0xb68   : > { %27991 = vmatprep.mubr.msk.bf16.mxu1 %vm7466_vm3, %v35807_v17 }
 0xb6f   : > { %27992 = vmatmul.mubr.msk.bf16.gmra.mrb[56].mxu1 %vm7466_vm3, %v35813_v13 }
 0xb70   : > { %27995 = vmatprep.mubr.msk.bf16.mxu1 %vm7466_vm3, %v35807_v17 }
 0xb77   : > { %27996 = vmatmul.mubr.msk.bf16.gmra.mrb[60].mxu1 %vm7466_vm3, %v35813_v13 }
 0xb78   : > { %27999 = vmatprep.mubr.msk.bf16.mxu1 %vm7466_vm3, %v35830_v52 }
 0xb7f   : > { %28000 = vmatmul.mubr.msk.bf16.gmra.mrb[64].mxu1 %vm7466_vm3, %v35836_v39 }
 0xb80   : > { %28003 = vmatprep.mubr.msk.bf16.mxu1 %vm7466_vm3, %v35830_v52 }
 0xb87   : > { %28004 = vmatmul.mubr.msk.bf16.gmra.mrb[68].mxu1 %vm7466_vm3, %v35836_v39 }
 0xb88   : > { %28007 = vmatprep.mubr.msk.bf16.mxu1 %vm7466_vm3, %v35847_v32 }
 0xb8f   : > { %28008 = vmatmul.mubr.msk.bf16.gmra.mrb[72].mxu1 %vm7466_vm3, %v35853_v54 }
 0xb90   : > { %28011 = vmatprep.mubr.msk.bf16.mxu1 %vm7466_vm3, %v35847_v32 }
 0xb97   : > { %28012 = vmatmul.mubr.msk.bf16.gmra.mrb[76].mxu1 %vm7466_vm3, %v35853_v54 }
 0xb98   : > { %28015 = vmatprep.mubr.msk.bf16.mxu1 %vm7466_vm3, %v35864_v40 }
 0xb9f   : > { %28016 = vmatmul.mubr.msk.bf16.gmra.mrb[80].mxu1 %vm7466_vm3, %v35870_v16 }
 0xba0   : > { %28019 = vmatprep.mubr.msk.bf16.mxu1 %vm7466_vm3, %v35864_v40 }
 0xba7   : > { %28020 = vmatmul.mubr.msk.bf16.gmra.mrb[84].mxu1 %vm7466_vm3, %v35870_v16 }
 0xba8   : > { %28023 = vmatprep.mubr.msk.bf16.mxu1 %vm7466_vm3, %v35881_v15 }
 0xbaf   : > { %28024 = vmatmul.mubr.msk.bf16.gmra.mrb[88].mxu1 %vm7466_vm3, %v35887_v4 }
 0xbb0   : > { %28027 = vmatprep.mubr.msk.bf16.mxu1 %vm7466_vm3, %v35881_v15 }
 0xbb7   : > { %28028 = vmatmul.mubr.msk.bf16.gmra.mrb[92].mxu1 %vm7466_vm3, %v35887_v4 }
 0xbb8   : > { %28031 = vmatprep.mubr.msk.bf16.mxu1 %vm7466_vm3, %v35898_v20 }
 0xbbf   : > { %28032 = vmatmul.mubr.msk.bf16.gmra.mrb[96].mxu1 %vm7466_vm3, %v35904_v47 }
 0xbc0   : > { %28035 = vmatprep.mubr.msk.bf16.mxu1 %vm7466_vm3, %v35898_v20 }
 0xbc7   : > { %28036 = vmatmul.mubr.msk.bf16.gmra.mrb[100].mxu1 %vm7466_vm3, %v35904_v47 }
 0xbc8   : > { %28039 = vmatprep.mubr.msk.bf16.mxu1 %vm7466_vm3, %v35915_v49 }
 0xbcf   : > { %28040 = vmatmul.mubr.msk.bf16.gmra.mrb[104].mxu1 %vm7466_vm3, %v35921_v5 }
 0xbd0   : > { %28043 = vmatprep.mubr.msk.bf16.mxu1 %vm7466_vm3, %v35915_v49 }
 0xbd7   : > { %28044 = vmatmul.mubr.msk.bf16.gmra.mrb[108].mxu1 %vm7466_vm3, %v35921_v5 }
 0xbd8   : > { %28047 = vmatprep.mubr.msk.bf16.mxu1 %vm7466_vm3, %v35932_v8 }
 0xbdf   : > { %28048 = vmatmul.mubr.msk.bf16.gmra.mrb[112].mxu1 %vm7466_vm3, %v35938_v42 }
 0xbe0   : > { %28051 = vmatprep.mubr.msk.bf16.mxu1 %vm7466_vm3, %v35932_v8 }
 0xbe7   : > { %28052 = vmatmul.mubr.msk.bf16.gmra.mrb[116].mxu1 %vm7466_vm3, %v35938_v42 }
 0xbe8   : > { %28055 = vmatprep.mubr.msk.bf16.mxu1 %vm7466_vm3, %v35949_v62 }
 0xbef   : > { %28056 = vmatmul.mubr.msk.bf16.gmra.mrb[120].mxu1 %vm7466_vm3, %v35955_v56 }
 0xbf0   : > { %28059 = vmatprep.mubr.msk.bf16.mxu1 %vm7466_vm3, %v35949_v62 }
 0xbf7   : > { %28060 = vmatmul.mubr.msk.bf16.gmra.mrb[124].mxu1 %vm7466_vm3, %v35955_v56 }
 0xbf8   : > { %28071 = vmatprep.mubr.msk.bf16.mxu1 %vm7466_vm3, %v35675_v59  ;;  %v36120_v59 = vld [vmem:[%s39365_s5 + $0x60] sm:$0xff]  }
 0xbf9   : > { %28335 = vmatprep.subr.bf16.mxu0 %v36120_v59 }
 0xbfa   : > { %28336 = vmatpush3.bf16.msra.mxu0 %v36120_v59 }
 0xbff   : > { %28072 = vmatmul.mubr.msk.bf16.vlgmr.msra.gmra.mrb[0].mxu1 %vm7466_vm3, %v35684_v44  ;;  %v36135_v44 = vld [vmem:[%s39365_s5 + $0x68] sm:$0xff]  }
 0xc00   : > { %28075 = vmatprep.mubr.msk.bf16.mxu1 %vm7466_vm3, %v35702_v24  ;;  %28337 = vmatprep.subr.bf16.mxu0 %v36135_v44 }
 0xc01   : > { %28338 = vmatpush3.bf16.msra.mxu0 %v36135_v44 }
 0xc07   : > { %28076 = vmatmul.mubr.msk.bf16.gmra.mrb[4].mxu1 %vm7466_vm3, %v35708_v1 }
 0xc08   : > { %28079 = vmatprep.mubr.msk.bf16.mxu1 %vm7466_vm3, %v35702_v24  ;;  %v36150_v24 = vld [vmem:[%s39365_s5 + $0x70] sm:$0xff]  }
 0xc09   : > { %28339 = vmatprep.subr.bf16.mxu0 %v36150_v24 }
 0xc0a   : > { %28340 = vmatpush3.bf16.msra.mxu0 %v36150_v24 }
 0xc0f   : > { %28080 = vmatmul.mubr.msk.bf16.gmra.mrb[8].mxu1 %vm7466_vm3, %v35708_v1  ;;  %v36165_v1 = vld [vmem:[%s39365_s5 + $0x78] sm:$0xff]  }
 0xc10   : > { %28083 = vmatprep.mubr.msk.bf16.mxu1 %vm7466_vm3, %v35719_v43  ;;  %28341 = vmatprep.subr.bf16.mxu0 %v36165_v1 }
 0xc11   : > { %28342 = vmatpush3.bf16.msra.mxu0 %v36165_v1 }
 0xc17   : > { %28084 = vmatmul.mubr.msk.bf16.gmra.mrb[12].mxu1 %vm7466_vm3, %v35725_v28 }
 0xc18   : > { %28087 = vmatprep.mubr.msk.bf16.mxu1 %vm7466_vm3, %v35719_v43  ;;  %v36186_v43 = vld [vmem:[%s39365_s5 + $0xc0] sm:$0xff]  }
 0xc19   : > { %28471 = vmatprep.subr.bf16.mxu0 %v36186_v43 }
 0xc1f   : > { %28088 = vmatmul.mubr.msk.bf16.gmra.mrb[16].mxu1 %vm7466_vm3, %v35725_v28  ;;  %v32146_v28 = vld [vmem:[%s39365_s5] sm:$0xff]  }
 0xc20   : > { %28091 = vmatprep.mubr.msk.bf16.mxu1 %vm7466_vm3, %v35736_v30  ;;  %28199 = vmatprep.subr.bf16.mxu1 %v32146_v28 }
 0xc21   : > { %28200 = vmatpush3.bf16.msra.mxu1 %v32146_v28 }
 0xc27   : > { %28092 = vmatmul.mubr.msk.bf16.gmra.mrb[20].mxu1 %vm7466_vm3, %v35742_v35 }
 0xc28   : > { %28095 = vmatprep.mubr.msk.bf16.mxu1 %vm7466_vm3, %v35736_v30  ;;  %v32147_v30 = vld [vmem:[%s39365_s5 + $0x8] sm:$0xff]  }
 0xc29   : > { %28201 = vmatprep.subr.bf16.mxu1 %v32147_v30 }
 0xc2a   : > { %28202 = vmatpush3.bf16.msra.mxu1 %v32147_v30 }
 0xc2f   : > { %28096 = vmatmul.mubr.msk.bf16.gmra.mrb[24].mxu1 %vm7466_vm3, %v35742_v35  ;;  %v32148_v35 = vld [vmem:[%s39365_s5 + $0x10] sm:$0xff]  }
 0xc30   : > { %28099 = vmatprep.mubr.msk.bf16.mxu1 %vm7466_vm3, %v35756_v29  ;;  %28203 = vmatprep.subr.bf16.mxu1 %v32148_v35 }
 0xc31   : > { %28204 = vmatpush3.bf16.msra.mxu1 %v32148_v35 }
 0xc37   : > { %28100 = vmatmul.mubr.msk.bf16.gmra.mrb[28].mxu1 %vm7466_vm3, %v35762_v10 }
 0xc38   : > { %28103 = vmatprep.mubr.msk.bf16.mxu1 %vm7466_vm3, %v35756_v29  ;;  %v32149_v29 = vld [vmem:[%s39365_s5 + $0x18] sm:$0xff]  }
 0xc39   : > { %28205 = vmatprep.subr.bf16.mxu1 %v32149_v29 }
 0xc3a   : > { %28206 = vmatpush3.bf16.msra.mxu1 %v32149_v29 }
 0xc3b   : > { %29423 = vmatprep.subr.bf16.mxu1 %v36120_v59 }
 0xc3f   : > { %28104 = vmatmul.mubr.msk.bf16.gmra.mrb[32].mxu1 %vm7466_vm3, %v35762_v10  ;;  %v36257_v10 = vld [vmem:[%s39364_s4] ss:$0 sm:$0xff] }
 0xc40   : > { %28107 = vmatprep.mubr.msk.bf16.mxu1 %vm7466_vm3, %v35773_v0 }
 0xc47   : > { %28108 = vmatmul.mubr.msk.bf16.gmra.mrb[36].mxu1 %vm7466_vm3, %v35779_v21 }
 0xc48   : > { %28111 = vmatprep.mubr.msk.bf16.mxu1 %vm7466_vm3, %v35773_v0 }
 0xc4f   : > { %28112 = vmatmul.mubr.msk.bf16.gmra.mrb[40].mxu1 %vm7466_vm3, %v35779_v21 }
 0xc50   : > { %28115 = vmatprep.mubr.msk.bf16.mxu1 %vm7466_vm3, %v35790_v58 }
 0xc57   : > { %28116 = vmatmul.mubr.msk.bf16.gmra.mrb[44].mxu1 %vm7466_vm3, %v35796_v60 }
 0xc58   : > { %28119 = vmatprep.mubr.msk.bf16.mxu1 %vm7466_vm3, %v35790_v58 }
 0xc5f   : > { %28120 = vmatmul.mubr.msk.bf16.gmra.mrb[48].mxu1 %vm7466_vm3, %v35796_v60 }
 0xc60   : > { %28123 = vmatprep.mubr.msk.bf16.mxu1 %vm7466_vm3, %v35807_v17 }
 0xc67   : > { %28124 = vmatmul.mubr.msk.bf16.gmra.mrb[52].mxu1 %vm7466_vm3, %v35813_v13 }
 0xc68   : > { %28127 = vmatprep.mubr.msk.bf16.mxu1 %vm7466_vm3, %v35807_v17 }
 0xc6f   : > { %28128 = vmatmul.mubr.msk.bf16.gmra.mrb[56].mxu1 %vm7466_vm3, %v35813_v13 }
 0xc70   : > { %28131 = vmatprep.mubr.msk.bf16.mxu1 %vm7466_vm3, %v35830_v52 }
 0xc77   : > { %28132 = vmatmul.mubr.msk.bf16.gmra.mrb[60].mxu1 %vm7466_vm3, %v35836_v39 }
 0xc78   : > { %28135 = vmatprep.mubr.msk.bf16.mxu1 %vm7466_vm3, %v35830_v52 }
 0xc7f   : > { %28136 = vmatmul.mubr.msk.bf16.gmra.mrb[64].mxu1 %vm7466_vm3, %v35836_v39 }
 0xc80   : > { %28139 = vmatprep.mubr.msk.bf16.mxu1 %vm7466_vm3, %v35847_v32 }
 0xc87   : > { %28140 = vmatmul.mubr.msk.bf16.gmra.mrb[68].mxu1 %vm7466_vm3, %v35853_v54 }
 0xc88   : > { %28143 = vmatprep.mubr.msk.bf16.mxu1 %vm7466_vm3, %v35847_v32 }
 0xc8f   : > { %28144 = vmatmul.mubr.msk.bf16.gmra.mrb[72].mxu1 %vm7466_vm3, %v35853_v54 }
 0xc90   : > { %28147 = vmatprep.mubr.msk.bf16.mxu1 %vm7466_vm3, %v35864_v40 }
 0xc97   : > { %28148 = vmatmul.mubr.msk.bf16.gmra.mrb[76].mxu1 %vm7466_vm3, %v35870_v16 }
 0xc98   : > { %28151 = vmatprep.mubr.msk.bf16.mxu1 %vm7466_vm3, %v35864_v40 }
 0xc9f   : > { %28152 = vmatmul.mubr.msk.bf16.gmra.mrb[80].mxu1 %vm7466_vm3, %v35870_v16 }
 0xca0   : > { %28155 = vmatprep.mubr.msk.bf16.mxu1 %vm7466_vm3, %v35881_v15 }
 0xca7   : > { %28156 = vmatmul.mubr.msk.bf16.gmra.mrb[84].mxu1 %vm7466_vm3, %v35887_v4 }
 0xca8   : > { %28159 = vmatprep.mubr.msk.bf16.mxu1 %vm7466_vm3, %v35881_v15 }
 0xcaf   : > { %28160 = vmatmul.mubr.msk.bf16.gmra.mrb[88].mxu1 %vm7466_vm3, %v35887_v4 }
 0xcb0   : > { %28163 = vmatprep.mubr.msk.bf16.mxu1 %vm7466_vm3, %v35898_v20 }
 0xcb7   : > { %28164 = vmatmul.mubr.msk.bf16.gmra.mrb[92].mxu1 %vm7466_vm3, %v35904_v47 }
 0xcb8   : > { %28167 = vmatprep.mubr.msk.bf16.mxu1 %vm7466_vm3, %v35898_v20 }
 0xcbf   : > { %28168 = vmatmul.mubr.msk.bf16.gmra.mrb[96].mxu1 %vm7466_vm3, %v35904_v47 }
 0xcc0   : > { %28171 = vmatprep.mubr.msk.bf16.mxu1 %vm7466_vm3, %v35915_v49 }
 0xcc7   : > { %28172 = vmatmul.mubr.msk.bf16.gmra.mrb[100].mxu1 %vm7466_vm3, %v35921_v5 }
 0xcc8   : > { %28175 = vmatprep.mubr.msk.bf16.mxu1 %vm7466_vm3, %v35915_v49  ;;  %v32150_v49 = vld [vmem:[%s39365_s5 + $0xc8] sm:$0xff]  }
 0xccf   : > { %28176 = vmatmul.mubr.msk.bf16.gmra.mrb[104].mxu1 %vm7466_vm3, %v35921_v5 }
 0xcd0   : > { %28179 = vmatprep.mubr.msk.bf16.mxu1 %vm7466_vm3, %v35932_v8 }
 0xcd2   : > { %v28073_v0 = vpop.f32.mrb[0].mxu1 }
 0xcd3   : > { %v29463_v21 = vadd.f32 %v28073_v0, %v36257_v10  ;;  %v13869_v58 = vpop.f32.mrb[1].mxu1 }
 0xcd4   : > { %v29464_v60 = vadd.f32 %v36257_v10, %v13869_v58  ;;  %v28074_v17 = vpop.f32.mrb[2].mxu1 }
 0xcd5   : > { %v14510_v13 = vmax.f32 %v29463_v21, 0.0  ;;  %v29465_v23 = vadd.f32 %v28074_v17, %v36257_v10  ;;  %v13872_v52 = vpop.f32.mrb[3].mxu1 }
 0xcd6   : > { %v14508_v39 = vmax.f32 %v29464_v60, 0.0  ;;  %v29466_v32 = vadd.f32 %v36257_v10, %v13872_v52 }
 0xcd7   : > { %v14511_v54 = vmax.f32 %v29465_v23, 0.0  ;;  %28180 = vmatmul.mubr.msk.bf16.gmra.mrb[108].mxu1 %vm7466_vm3, %v35938_v42  ;;  %v14831_v40 = vrot.slane %v14510_v13, 7 }
 0xcd8   : > { %v14668_v63 = vrot.slane %v14508_v39, 1  ;;  %v14828_v9 = vrot.slane %v14508_v39, 7  ;;  %v14509_v36 = vmax.f32 %v29466_v32, 0.0  ;;  %28183 = vmatprep.mubr.msk.bf16.mxu1 %vm7466_vm3, %v35932_v8 }
 0xcd9   : > { %v14833_v14 = vrot.slane %v14511_v54, 7  ;;  %v15212_v19 = vrot.slane %v14511_v54, 5 }
 0xcda   : > { %v14829_v16 = vrot.slane %v14509_v36, 7  ;;  %v28077_v26 = vpop.f32.mrb[4].mxu1  ;;  %v15276_v7 = vsel %vm440_vm0, %v14668_v63, %v14828_v9 }
 0xcdb   : > { %v14834_v31 = vsel %vm440_vm0, %v14831_v40, %v14833_v14  ;;  %v36269_v11 = vsel %vm440_vm0, %v14833_v14, %v15212_v19  ;;  %v29467_v15 = vadd.f32 %v28077_v26, %v36257_v10  ;;  %v13885_v33 = vpop.f32.mrb[5].mxu1 }
 0xcdc   : > { %39813 = vst [vmem:[#allocation17_spill] sm:$0xff] %v36269_v11  ;;  %v14830_v4 = vsel %vm440_vm0, %v14828_v9, %v14829_v16  ;;  %v14832_v6 = vsel %vm440_vm0, %v14829_v16, %v14831_v40  ;;  %v29468_v48 = vadd.f32 %v36257_v10, %v13885_v33  ;;  %v28078_v55 = vpop.f32.mrb[6].mxu1 }
 0xcdd   : > { %v36276_v37 = vpack.c.bf16 %v14830_v4, %v15276_v7  ;;  %v36278_v20 = vpack.c.bf16 %v14834_v31, %v14832_v6  ;;  %v14514_v25 = vmax.f32 %v29467_v15, 0.0  ;;  %v29469_v18 = vadd.f32 %v28078_v55, %v36257_v10  ;;  %v13888_v47 = vpop.f32.mrb[7].mxu1 }
 0xcde   : > { %v14512_v57 = vmax.f32 %v29468_v48, 0.0  ;;  %v29470_v2 = vadd.f32 %v36257_v10, %v13888_v47 }
 0xcdf   : > { %39814 = vst [vmem:[#allocation18_spill] sm:$0xff] %v36276_v37  ;;  %39815 = vst [vmem:[#allocation13_spill] sm:$0xff] %v36278_v20  ;;  %v14515_v27 = vmax.f32 %v29469_v18, 0.0  ;;  %28184 = vmatmul.mubr.msk.bf16.gmra.mrb[112].mxu1 %vm7466_vm3, %v35938_v42  ;;  %28343 = vmatprep.mubr.msk.bf16.mxu0 %vm7466_vm3, %v36276_v37  ;;  %v14838_v12 = vrot.slane %v14514_v25, 7  ;;  %v32151_v42 = vld [vmem:[%s39365_s5 + $0xd0] sm:$0xff]  }
 0xce0   : > { %v14669_v38 = vrot.slane %v14512_v57, 1  ;;  %v14835_v5 = vrot.slane %v14512_v57, 7  ;;  %v14513_v50 = vmax.f32 %v29470_v2, 0.0  ;;  %28187 = vmatprep.mubr.msk.bf16.mxu1 %vm7466_vm3, %v35949_v62  ;;  %28344 = vmatmul.mubr.msk.bf16.vlgmr.msra.gmra.mrb[32].mxu0 %vm7466_vm3, %v36278_v20 }
 0xce1   : > { %v14840_v45 = vrot.slane %v14515_v27, 7  ;;  %v15213_v8 = vrot.slane %v14515_v27, 5  ;;  %28472 = vmatpush3.bf16.msra.mxu0 %v36186_v43 }
 0xce2   : > { %v14836_v41 = vrot.slane %v14513_v50, 7  ;;  %v28081_v34 = vpop.f32.mrb[8].mxu1  ;;  %28473 = vmatprep.subr.bf16.mxu0 %v32150_v49  ;;  %v15277_v53 = vsel %vm440_vm0, %v14669_v38, %v14835_v5 }
 0xce3   : > { %v14841_v61 = vsel %vm440_vm0, %v14838_v12, %v14840_v45  ;;  %v36299_v3 = vsel %vm440_vm0, %v14840_v45, %v15213_v8  ;;  %v29471_v51 = vadd.f32 %v28081_v34, %v36257_v10  ;;  %v13901_v46 = vpop.f32.mrb[9].mxu1 }
 0xce4   : > { %39816 = vst [vmem:[#allocation14_spill] sm:$0xff] %v36299_v3  ;;  %v14837_v22 = vsel %vm440_vm0, %v14835_v5, %v14836_v41  ;;  %v14839_v43 = vsel %vm440_vm0, %v14836_v41, %v14838_v12  ;;  %v29472_v28 = vadd.f32 %v36257_v10, %v13901_v46  ;;  %v28082_v30 = vpop.f32.mrb[10].mxu1 }
 0xce5   : > { %v36306_v35 = vpack.c.bf16 %v14837_v22, %v15277_v53  ;;  %v36308_v29 = vpack.c.bf16 %v14841_v61, %v14839_v43  ;;  %v14518_v0 = vmax.f32 %v29471_v51, 0.0  ;;  %v29473_v21 = vadd.f32 %v28082_v30, %v36257_v10  ;;  %v13904_v58 = vpop.f32.mrb[11].mxu1  ;;  %28474 = vmatpush3.bf16.msra.mxu0 %v32150_v49 }
 0xce6   : > { %v14516_v60 = vmax.f32 %v29472_v28, 0.0  ;;  %v29474_v17 = vadd.f32 %v36257_v10, %v13904_v58  ;;  %28475 = vmatprep.subr.bf16.mxu0 %v32151_v42 }
 0xce7   : > { %39817 = vst [vmem:[#allocation24_spill] sm:$0xff] %v36306_v35  ;;  %39818 = vst [vmem:[#allocation25_spill] sm:$0xff] %v36308_v29  ;;  %v14519_v13 = vmax.f32 %v29473_v21, 0.0  ;;  %28188 = vmatmul.mubr.msk.bf16.gmra.mrb[116].mxu1 %vm7466_vm3, %v35955_v56  ;;  %28347 = vmatprep.mubr.msk.bf16.mxu0 %vm7466_vm3, %v36306_v35  ;;  %v14845_v32 = vrot.slane %v14518_v0, 7 }
 0xce8   : > { %v14670_v23 = vrot.slane %v14516_v60, 1  ;;  %v14842_v52 = vrot.slane %v14516_v60, 7  ;;  %v14517_v39 = vmax.f32 %v29474_v17, 0.0  ;;  %28191 = vmatprep.mubr.msk.bf16.mxu1 %vm7466_vm3, %v35949_v62  ;;  %28348 = vmatmul.mubr.msk.bf16.gmra.mrb[36].mxu0 %vm7466_vm3, %v36308_v29 }
 0xce9   : > { %v14847_v54 = vrot.slane %v14519_v13, 7  ;;  %v15214_v63 = vrot.slane %v14519_v13, 5  ;;  %28476 = vmatpush3.bf16.msra.mxu0 %v32151_v42 }
 0xcea   : > { %v14843_v9 = vrot.slane %v14517_v39, 7  ;;  %v28085_v36 = vpop.f32.mrb[12].mxu1  ;;  %v15278_v26 = vsel %vm440_vm0, %v14670_v23, %v14842_v52 }
 0xceb   : > { %v14848_v40 = vsel %vm440_vm0, %v14845_v32, %v14847_v54  ;;  %v36322_v14 = vsel %vm440_vm0, %v14847_v54, %v15214_v63  ;;  %v29475_v19 = vadd.f32 %v28085_v36, %v36257_v10  ;;  %v13917_v16 = vpop.f32.mrb[13].mxu1 }
 0xcec   : > { %39819 = vst [vmem:[#allocation21_spill] sm:$0xff] %v36322_v14  ;;  %v14844_v31 = vsel %vm440_vm0, %v14842_v52, %v14843_v9  ;;  %v14846_v15 = vsel %vm440_vm0, %v14843_v9, %v14845_v32  ;;  %v29476_v33 = vadd.f32 %v36257_v10, %v13917_v16  ;;  %v28086_v7 = vpop.f32.mrb[14].mxu1 }
 0xced   : > { %v36329_v4 = vpack.c.bf16 %v14844_v31, %v15278_v26  ;;  %v36331_v6 = vpack.c.bf16 %v14848_v40, %v14846_v15  ;;  %v14522_v48 = vmax.f32 %v29475_v19, 0.0  ;;  %v29477_v55 = vadd.f32 %v28086_v7, %v36257_v10  ;;  %v13920_v25 = vpop.f32.mrb[15].mxu1 }
 0xcee   : > { %v14520_v18 = vmax.f32 %v29476_v33, 0.0  ;;  %v29478_v47 = vadd.f32 %v36257_v10, %v13920_v25 }
 0xcef   : > { %39820 = vst [vmem:[#allocation22_spill] sm:$0xff] %v36329_v4  ;;  %39821 = vst [vmem:[#allocation30_spill] sm:$0xff] %v36331_v6  ;;  %v14523_v57 = vmax.f32 %v29477_v55, 0.0  ;;  %28192 = vmatmul.mubr.msk.bf16.gmra.mrb[120].mxu1 %vm7466_vm3, %v35955_v56  ;;  %28351 = vmatprep.mubr.msk.bf16.mxu0 %vm7466_vm3, %v36329_v4  ;;  %v14852_v38 = vrot.slane %v14522_v48, 7 }
 0xcf0   : > { %v14671_v2 = vrot.slane %v14520_v18, 1  ;;  %v14849_v49 = vrot.slane %v14520_v18, 7  ;;  %v14521_v27 = vmax.f32 %v29478_v47, 0.0  ;;  %28195 = vmatprep.mubr.msk.bf16.mxu1 %vm7466_vm3, %v35949_v62  ;;  %28352 = vmatmul.mubr.msk.bf16.gmra.mrb[40].mxu0 %vm7466_vm3, %v36331_v6 }
 0xcf1   : > { %v14854_v5 = vrot.slane %v14523_v57, 7  ;;  %v15215_v50 = vrot.slane %v14523_v57, 5 }
 0xcf2   : > { %v14850_v12 = vrot.slane %v14521_v27, 7  ;;  %v28089_v45 = vpop.f32.mrb[16].mxu1  ;;  %v15279_v61 = vsel %vm440_vm0, %v14671_v2, %v14849_v49 }
 0xcf3   : > { %v14855_v8 = vsel %vm440_vm0, %v14852_v38, %v14854_v5  ;;  %v36345_v41 = vsel %vm440_vm0, %v14854_v5, %v15215_v50  ;;  %v29479_v34 = vadd.f32 %v28089_v45, %v36257_v10  ;;  %v13933_v42 = vpop.f32.mrb[17].mxu1 }
 0xcf4   : > { %39822 = vst [vmem:[#allocation32_spill] sm:$0xff] %v36345_v41  ;;  %v14851_v62 = vsel %vm440_vm0, %v14849_v49, %v14850_v12  ;;  %v14853_v51 = vsel %vm440_vm0, %v14850_v12, %v14852_v38  ;;  %v29480_v46 = vadd.f32 %v36257_v10, %v13933_v42  ;;  %v28090_v53 = vpop.f32.mrb[18].mxu1 }
 0xcf5   : > { %v36352_v22 = vpack.c.bf16 %v14851_v62, %v15279_v61  ;;  %v36354_v43 = vpack.c.bf16 %v14855_v8, %v14853_v51  ;;  %v14526_v28 = vmax.f32 %v29479_v34, 0.0  ;;  %v29481_v30 = vadd.f32 %v28090_v53, %v36257_v10  ;;  %v13936_v0 = vpop.f32.mrb[19].mxu1 }
 0xcf6   : > { %v14524_v21 = vmax.f32 %v29480_v46, 0.0  ;;  %v29482_v58 = vadd.f32 %v36257_v10, %v13936_v0 }
 0xcf7   : > { %39823 = vst [vmem:[#allocation27_spill] sm:$0xff] %v36352_v22  ;;  %39824 = vst [vmem:[#allocation28_spill] sm:$0xff] %v36354_v43  ;;  %v14527_v60 = vmax.f32 %v29481_v30, 0.0  ;;  %28196 = vmatmul.mubr.msk.bf16.gmra.mrb[124].mxu1 %vm7466_vm3, %v35955_v56  ;;  %28355 = vmatprep.mubr.msk.bf16.mxu0 %vm7466_vm3, %v36352_v22  ;;  %v14859_v52 = vrot.slane %v14526_v28, 7 }
 0xcf8   : > { %v14672_v17 = vrot.slane %v14524_v21, 1  ;;  %v14856_v13 = vrot.slane %v14524_v21, 7  ;;  %v14525_v23 = vmax.f32 %v29482_v58, 0.0  ;;  %28207 = vmatprep.mubr.msk.bf16.mxu1 %vm7466_vm3, %v36306_v35  ;;  %28356 = vmatmul.mubr.msk.bf16.gmra.mrb[44].mxu0 %vm7466_vm3, %v36354_v43 }
 0xcf9   : > { %v14861_v39 = vrot.slane %v14527_v60, 7  ;;  %v15216_v32 = vrot.slane %v14527_v60, 5  ;;  %v32152_v60 = vld [vmem:[%s39365_s5 + $0xd8] sm:$0xff]  }
 0xcfa   : > { %v14857_v54 = vrot.slane %v14525_v23, 7  ;;  %v28093_v63 = vpop.f32.mrb[20].mxu1  ;;  %v15280_v19 = vsel %vm440_vm0, %v14672_v17, %v14856_v13  ;;  %28477 = vmatprep.subr.bf16.mxu0 %v32152_v60 }
 0xcfb   : > { %v14862_v9 = vsel %vm440_vm0, %v14859_v52, %v14861_v39  ;;  %v36368_v56 = vsel %vm440_vm0, %v14861_v39, %v15216_v32  ;;  %v29483_v36 = vadd.f32 %v28093_v63, %v36257_v10  ;;  %v13949_v40 = vpop.f32.mrb[21].mxu1  ;;  %28478 = vmatpush3.bf16.msra.mxu0 %v32152_v60 }
 0xcfc   : > { %39825 = vst [vmem:[#allocation36_spill] sm:$0xff] %v36368_v56  ;;  %v14858_v16 = vsel %vm440_vm0, %v14856_v13, %v14857_v54  ;;  %v14860_v26 = vsel %vm440_vm0, %v14857_v54, %v14859_v52  ;;  %v29484_v31 = vadd.f32 %v36257_v10, %v13949_v40  ;;  %v28094_v15 = vpop.f32.mrb[22].mxu1 }
 0xcfd   : > { %v36375_v33 = vpack.c.bf16 %v14858_v16, %v15280_v19  ;;  %v36377_v7 = vpack.c.bf16 %v14862_v9, %v14860_v26  ;;  %v14530_v48 = vmax.f32 %v29483_v36, 0.0  ;;  %v29485_v55 = vadd.f32 %v28094_v15, %v36257_v10  ;;  %v13952_v25 = vpop.f32.mrb[23].mxu1 }
 0xcfe   : > { %v14528_v18 = vmax.f32 %v29484_v31, 0.0  ;;  %v29486_v47 = vadd.f32 %v36257_v10, %v13952_v25 }
 0xcff   : > { %39826 = vst [vmem:[#allocation37_spill] sm:$0xff] %v36375_v33  ;;  %39827 = vst [vmem:[#allocation35_spill] sm:$0xff] %v36377_v7  ;;  %v14531_v57 = vmax.f32 %v29485_v55, 0.0  ;;  %28208 = vmatmul.mubr.msk.bf16.vlgmr.msra.gmra.mrb[128].mxu1 %vm7466_vm3, %v36308_v29  ;;  %28359 = vmatprep.mubr.msk.bf16.mxu0 %vm7466_vm3, %v36375_v33  ;;  %v14866_v38 = vrot.slane %v14530_v48, 7 }
 0xd00   : > { %v14673_v2 = vrot.slane %v14528_v18, 1  ;;  %v14863_v49 = vrot.slane %v14528_v18, 7  ;;  %v14529_v27 = vmax.f32 %v29486_v47, 0.0  ;;  %28211 = vmatprep.mubr.msk.bf16.mxu1 %vm7466_vm3, %v36276_v37  ;;  %28360 = vmatmul.mubr.msk.bf16.gmra.mrb[48].mxu0 %vm7466_vm3, %v36377_v7 }
 0xd01   : > { %v14868_v5 = vrot.slane %v14531_v57, 7  ;;  %v15217_v50 = vrot.slane %v14531_v57, 5  ;;  %29427 = vmatpush3.bf16.msra.mxu1 %v36120_v59 }
 0xd02   : > { %v14864_v12 = vrot.slane %v14529_v27, 7  ;;  %v28097_v45 = vpop.f32.mrb[24].mxu1  ;;  %29424 = vmatprep.subr.bf16.mxu1 %v36135_v44  ;;  %v15281_v62 = vsel %vm440_vm0, %v14673_v2, %v14863_v49 }
 0xd03   : > { %v14869_v8 = vsel %vm440_vm0, %v14866_v38, %v14868_v5  ;;  %v36393_v34 = vsel %vm440_vm0, %v14868_v5, %v15217_v50  ;;  %v29487_v42 = vadd.f32 %v28097_v45, %v36257_v10  ;;  %v13965_v61 = vpop.f32.mrb[25].mxu1 }
 0xd04   : > { %39828 = vst [vmem:[#allocation11_spill] sm:$0xff] %v36393_v34  ;;  %v14865_v51 = vsel %vm440_vm0, %v14863_v49, %v14864_v12  ;;  %v14867_v46 = vsel %vm440_vm0, %v14864_v12, %v14866_v38  ;;  %v29488_v59 = vadd.f32 %v36257_v10, %v13965_v61  ;;  %v28098_v53 = vpop.f32.mrb[26].mxu1 }
 0xd05   : > { %v36400_v28 = vpack.c.bf16 %v14865_v51, %v15281_v62  ;;  %v36402_v30 = vpack.c.bf16 %v14869_v8, %v14867_v46  ;;  %v14534_v0 = vmax.f32 %v29487_v42, 0.0  ;;  %v29489_v21 = vadd.f32 %v28098_v53, %v36257_v10  ;;  %v13968_v58 = vpop.f32.mrb[27].mxu1  ;;  %29428 = vmatpush3.bf16.msra.mxu1 %v36135_v44 }
 0xd06   : > { %v14532_v17 = vmax.f32 %v29488_v59, 0.0  ;;  %v29490_v13 = vadd.f32 %v36257_v10, %v13968_v58  ;;  %29425 = vmatprep.subr.bf16.mxu1 %v36150_v24 }
 0xd07   : > { %39829 = vst [vmem:[#allocation41_spill] sm:$0xff] %v36400_v28  ;;  %39830 = vst [vmem:[#allocation20_spill] sm:$0xff] %v36402_v30  ;;  %v14535_v23 = vmax.f32 %v29489_v21, 0.0  ;;  %28212 = vmatmul.mubr.msk.bf16.gmra.mrb[132].mxu1 %vm7466_vm3, %v36278_v20  ;;  %28363 = vmatprep.mubr.msk.bf16.mxu0 %vm7466_vm3, %v36400_v28  ;;  %v14873_v44 = vrot.slane %v14534_v0, 7 }
 0xd08   : > { %v14674_v52 = vrot.slane %v14532_v17, 1  ;;  %v14870_v39 = vrot.slane %v14532_v17, 7  ;;  %v14533_v32 = vmax.f32 %v29490_v13, 0.0  ;;  %28215 = vmatprep.mubr.msk.bf16.mxu1 %vm7466_vm3, %v36306_v35  ;;  %28364 = vmatmul.mubr.msk.bf16.gmra.mrb[52].mxu0 %vm7466_vm3, %v36402_v30 }
 0xd09   : > { %v14875_v54 = vrot.slane %v14535_v23, 7  ;;  %v15218_v63 = vrot.slane %v14535_v23, 5  ;;  %29429 = vmatpush3.bf16.msra.mxu1 %v36150_v24 }
 0xd0a   : > { %v14871_v9 = vrot.slane %v14533_v32, 7  ;;  %v28101_v36 = vpop.f32.mrb[28].mxu1  ;;  %29426 = vmatprep.subr.bf16.mxu1 %v36165_v1  ;;  %v15282_v31 = vsel %vm440_vm0, %v14674_v52, %v14870_v39 }
 0xd0b   : > { %v14876_v40 = vsel %vm440_vm0, %v14873_v44, %v14875_v54  ;;  %v36423_v19 = vsel %vm440_vm0, %v14875_v54, %v15218_v63  ;;  %v29491_v16 = vadd.f32 %v28101_v36, %v36257_v10  ;;  %v13981_v26 = vpop.f32.mrb[29].mxu1 }
 0xd0c   : > { %39831 = vst [vmem:[#allocation40_spill] sm:$0xff] %v36423_v19  ;;  %v14872_v15 = vsel %vm440_vm0, %v14870_v39, %v14871_v9  ;;  %v14874_v48 = vsel %vm440_vm0, %v14871_v9, %v14873_v44  ;;  %v29492_v24 = vadd.f32 %v36257_v10, %v13981_v26  ;;  %v28102_v55 = vpop.f32.mrb[30].mxu1 }
 0xd0d   : > { %v36430_v25 = vpack.c.bf16 %v14872_v15, %v15282_v31  ;;  %v36432_v18 = vpack.c.bf16 %v14876_v40, %v14874_v48  ;;  %v14538_v47 = vmax.f32 %v29491_v16, 0.0  ;;  %v29493_v57 = vadd.f32 %v28102_v55, %v36257_v10  ;;  %v13984_v2 = vpop.f32.mrb[31].mxu1  ;;  %29430 = vmatpush3.bf16.msra.mxu1 %v36165_v1 }
 0xd0e   : > { %v14536_v49 = vmax.f32 %v29492_v24, 0.0  ;;  %v29494_v27 = vadd.f32 %v36257_v10, %v13984_v2 }
 0xd0f   : > { %39832 = vst [vmem:[#allocation16_spill] sm:$0xff] %v36430_v25  ;;  %39833 = vst [vmem:[#allocation31_spill] sm:$0xff] %v36432_v18  ;;  %v14539_v38 = vmax.f32 %v29493_v57, 0.0  ;;  %28216 = vmatmul.mubr.msk.bf16.gmra.mrb[136].mxu1 %vm7466_vm3, %v36308_v29  ;;  %28367 = vmatprep.mubr.msk.bf16.mxu0 %vm7466_vm3, %v36430_v25  ;;  %v14880_v1 = vrot.slane %v14538_v47, 7 }
 0xd10   : > { %v14675_v5 = vrot.slane %v14536_v49, 1  ;;  %v14877_v50 = vrot.slane %v14536_v49, 7  ;;  %v14537_v12 = vmax.f32 %v29494_v27, 0.0  ;;  %28219 = vmatprep.mubr.msk.bf16.mxu1 %vm7466_vm3, %v36329_v4  ;;  %28368 = vmatmul.mubr.msk.bf16.gmra.mrb[56].mxu0 %vm7466_vm3, %v36432_v18 }
 0xd11   : > { %v14882_v45 = vrot.slane %v14539_v38, 7  ;;  %v15219_v8 = vrot.slane %v14539_v38, 5 }
 0xd12   : > { %v14878_v42 = vrot.slane %v14537_v12, 7  ;;  %v28105_v61 = vpop.f32.mrb[32].mxu1  ;;  %v15283_v53 = vsel %vm440_vm0, %v14675_v5, %v14877_v50 }
 0xd13   : > { %v14883_v62 = vsel %vm440_vm0, %v14880_v1, %v14882_v45  ;;  %v36447_v51 = vsel %vm440_vm0, %v14882_v45, %v15219_v8  ;;  %v29495_v46 = vadd.f32 %v28105_v61, %v36257_v10  ;;  %v13997_v59 = vpop.f32.mrb[33].mxu1 }
 0xd14   : > { %39834 = vst [vmem:[#allocation19_spill] sm:$0xff] %v36447_v51  ;;  %v14879_v0 = vsel %vm440_vm0, %v14877_v50, %v14878_v42  ;;  %v14881_v21 = vsel %vm440_vm0, %v14878_v42, %v14880_v1  ;;  %v29496_v58 = vadd.f32 %v36257_v10, %v13997_v59  ;;  %v28106_v60 = vpop.f32.mrb[34].mxu1 }
 0xd15   : > { %v36454_v17 = vpack.c.bf16 %v14879_v0, %v15283_v53  ;;  %v36456_v13 = vpack.c.bf16 %v14883_v62, %v14881_v21  ;;  %v14542_v23 = vmax.f32 %v29495_v46, 0.0  ;;  %v29497_v52 = vadd.f32 %v28106_v60, %v36257_v10  ;;  %v14000_v39 = vpop.f32.mrb[35].mxu1 }
 0xd16   : > { %v14540_v32 = vmax.f32 %v29496_v58, 0.0  ;;  %v29498_v44 = vadd.f32 %v36257_v10, %v14000_v39 }
 0xd17   : > { %39835 = vst [vmem:[#allocation26_spill] sm:$0xff] %v36454_v17  ;;  %39836 = vst [vmem:[#allocation34_spill] sm:$0xff] %v36456_v13  ;;  %v14543_v54 = vmax.f32 %v29497_v52, 0.0  ;;  %28220 = vmatmul.mubr.msk.bf16.gmra.mrb[140].mxu1 %vm7466_vm3, %v36331_v6  ;;  %28371 = vmatprep.mubr.msk.bf16.mxu0 %vm7466_vm3, %v36454_v17  ;;  %v14887_v40 = vrot.slane %v14542_v23, 7 }
 0xd18   : > { %v14676_v63 = vrot.slane %v14540_v32, 1  ;;  %v14884_v9 = vrot.slane %v14540_v32, 7  ;;  %v14541_v36 = vmax.f32 %v29498_v44, 0.0  ;;  %28223 = vmatprep.mubr.msk.bf16.mxu1 %vm7466_vm3, %v36352_v22  ;;  %28372 = vmatmul.mubr.msk.bf16.gmra.mrb[60].mxu0 %vm7466_vm3, %v36456_v13 }
 0xd19   : > { %v14889_v16 = vrot.slane %v14543_v54, 7  ;;  %v15220_v26 = vrot.slane %v14543_v54, 5 }
 0xd1a   : > { %v14885_v31 = vrot.slane %v14541_v36, 7  ;;  %v28109_v15 = vpop.f32.mrb[36].mxu1  ;;  %v15284_v57 = vsel %vm440_vm0, %v14676_v63, %v14884_v9 }
 0xd1b   : > { %v14890_v48 = vsel %vm440_vm0, %v14887_v40, %v14889_v16  ;;  %v36470_v24 = vsel %vm440_vm0, %v14889_v16, %v15220_v26  ;;  %v29499_v55 = vadd.f32 %v28109_v15, %v36257_v10  ;;  %v14013_v47 = vpop.f32.mrb[37].mxu1 }
 0xd1c   : > { %39837 = vst [vmem:[#allocation6_spill] sm:$0xff] %v36470_v24  ;;  %v14886_v2 = vsel %vm440_vm0, %v14884_v9, %v14885_v31  ;;  %v14888_v49 = vsel %vm440_vm0, %v14885_v31, %v14887_v40  ;;  %v29500_v27 = vadd.f32 %v36257_v10, %v14013_v47  ;;  %v28110_v38 = vpop.f32.mrb[38].mxu1 }
 0xd1d   : > { %v36477_v5 = vpack.c.bf16 %v14886_v2, %v15284_v57  ;;  %v36479_v50 = vpack.c.bf16 %v14890_v48, %v14888_v49  ;;  %v14546_v12 = vmax.f32 %v29499_v55, 0.0  ;;  %v29501_v1 = vadd.f32 %v28110_v38, %v36257_v10  ;;  %v14016_v45 = vpop.f32.mrb[39].mxu1 }
 0xd1e   : > { %v14544_v8 = vmax.f32 %v29500_v27, 0.0  ;;  %v29502_v42 = vadd.f32 %v36257_v10, %v14016_v45 }
 0xd1f   : > { %39838 = vst [vmem:[#allocation23_spill] sm:$0xff] %v36477_v5  ;;  %39839 = vst [vmem:[#allocation12_spill] sm:$0xff] %v36479_v50  ;;  %v14547_v61 = vmax.f32 %v29501_v1, 0.0  ;;  %28224 = vmatmul.mubr.msk.bf16.gmra.mrb[144].mxu1 %vm7466_vm3, %v36354_v43  ;;  %28375 = vmatprep.mubr.msk.bf16.mxu0 %vm7466_vm3, %v36477_v5  ;;  %v14894_v53 = vrot.slane %v14546_v12, 7 }
 0xd20   : > { %v14677_v62 = vrot.slane %v14544_v8, 1  ;;  %v14891_v46 = vrot.slane %v14544_v8, 7  ;;  %v14545_v59 = vmax.f32 %v29502_v42, 0.0  ;;  %28227 = vmatprep.mubr.msk.bf16.mxu1 %vm7466_vm3, %v36375_v33  ;;  %28376 = vmatmul.mubr.msk.bf16.gmra.mrb[64].mxu0 %vm7466_vm3, %v36479_v50 }
 0xd21   : > { %v14896_v0 = vrot.slane %v14547_v61, 7  ;;  %v15221_v21 = vrot.slane %v14547_v61, 5 }
 0xd22   : > { %v14892_v58 = vrot.slane %v14545_v59, 7  ;;  %v28113_v60 = vpop.f32.mrb[40].mxu1  ;;  %v15285_v44 = vsel %vm440_vm0, %v14677_v62, %v14891_v46 }
 0xd23   : > { %v14897_v23 = vsel %vm440_vm0, %v14894_v53, %v14896_v0  ;;  %v36493_v52 = vsel %vm440_vm0, %v14896_v0, %v15221_v21  ;;  %v29503_v39 = vadd.f32 %v28113_v60, %v36257_v10  ;;  %v14029_v32 = vpop.f32.mrb[41].mxu1 }
 0xd24   : > { %39840 = vst [vmem:[#allocation4_spill] sm:$0xff] %v36493_v52  ;;  %v14893_v54 = vsel %vm440_vm0, %v14891_v46, %v14892_v58  ;;  %v14895_v63 = vsel %vm440_vm0, %v14892_v58, %v14894_v53  ;;  %v29504_v9 = vadd.f32 %v36257_v10, %v14029_v32  ;;  %v28114_v36 = vpop.f32.mrb[42].mxu1 }
 0xd25   : > { %v36500_v40 = vpack.c.bf16 %v14893_v54, %v15285_v44  ;;  %v36502_v16 = vpack.c.bf16 %v14897_v23, %v14895_v63  ;;  %v14550_v26 = vmax.f32 %v29503_v39, 0.0  ;;  %v29505_v31 = vadd.f32 %v28114_v36, %v36257_v10  ;;  %v14032_v15 = vpop.f32.mrb[43].mxu1 }
 0xd26   : > { %v14548_v48 = vmax.f32 %v29504_v9, 0.0  ;;  %v29506_v55 = vadd.f32 %v36257_v10, %v14032_v15 }
 0xd27   : > { %39841 = vst [vmem:[#allocation33_spill] sm:$0xff] %v36500_v40  ;;  %39842 = vst [vmem:[#allocation39_spill] sm:$0xff] %v36502_v16  ;;  %v14551_v47 = vmax.f32 %v29505_v31, 0.0  ;;  %28228 = vmatmul.mubr.msk.bf16.gmra.mrb[148].mxu1 %vm7466_vm3, %v36377_v7  ;;  %28379 = vmatprep.mubr.msk.bf16.mxu0 %vm7466_vm3, %v36500_v40  ;;  %v14901_v27 = vrot.slane %v14550_v26, 7 }
 0xd28   : > { %v14678_v57 = vrot.slane %v14548_v48, 1  ;;  %v14898_v2 = vrot.slane %v14548_v48, 7  ;;  %v14549_v49 = vmax.f32 %v29506_v55, 0.0  ;;  %28231 = vmatprep.mubr.msk.bf16.mxu1 %vm7466_vm3, %v36400_v28  ;;  %28380 = vmatmul.mubr.msk.bf16.gmra.mrb[68].mxu0 %vm7466_vm3, %v36502_v16 }
 0xd29   : > { %v14903_v38 = vrot.slane %v14551_v47, 7  ;;  %v15222_v12 = vrot.slane %v14551_v47, 5 }
 0xd2a   : > { %v14899_v1 = vrot.slane %v14549_v49, 7  ;;  %v28117_v45 = vpop.f32.mrb[44].mxu1  ;;  %v15286_v46 = vsel %vm440_vm0, %v14678_v57, %v14898_v2 }
 0xd2b   : > { %v14904_v8 = vsel %vm440_vm0, %v14901_v27, %v14903_v38  ;;  %v36516_v42 = vsel %vm440_vm0, %v14903_v38, %v15222_v12  ;;  %v29507_v61 = vadd.f32 %v28117_v45, %v36257_v10  ;;  %v14045_v62 = vpop.f32.mrb[45].mxu1 }
 0xd2c   : > { %39843 = vst [vmem:[#allocation5_spill] sm:$0xff] %v36516_v42  ;;  %v14900_v59 = vsel %vm440_vm0, %v14898_v2, %v14899_v1  ;;  %v14902_v53 = vsel %vm440_vm0, %v14899_v1, %v14901_v27  ;;  %v29508_v0 = vadd.f32 %v36257_v10, %v14045_v62  ;;  %v28118_v21 = vpop.f32.mrb[46].mxu1 }
 0xd2d   : > { %v36523_v58 = vpack.c.bf16 %v14900_v59, %v15286_v46  ;;  %v36525_v60 = vpack.c.bf16 %v14904_v8, %v14902_v53  ;;  %v14554_v23 = vmax.f32 %v29507_v61, 0.0  ;;  %v29509_v39 = vadd.f32 %v28118_v21, %v36257_v10  ;;  %v14048_v32 = vpop.f32.mrb[47].mxu1 }
 0xd2e   : > { %v14552_v44 = vmax.f32 %v29508_v0, 0.0  ;;  %v29510_v54 = vadd.f32 %v36257_v10, %v14048_v32 }
 0xd2f   : > { %39844 = vst [vmem:[#allocation29_spill] sm:$0xff] %v36523_v58  ;;  %39845 = vst [vmem:[#allocation15_spill] sm:$0xff] %v36525_v60  ;;  %v14555_v63 = vmax.f32 %v29509_v39, 0.0  ;;  %28232 = vmatmul.mubr.msk.bf16.gmra.mrb[152].mxu1 %vm7466_vm3, %v36402_v30  ;;  %28383 = vmatprep.mubr.msk.bf16.mxu0 %vm7466_vm3, %v36523_v58  ;;  %v14908_v31 = vrot.slane %v14554_v23, 7 }
 0xd30   : > { %v14679_v9 = vrot.slane %v14552_v44, 1  ;;  %v14905_v36 = vrot.slane %v14552_v44, 7  ;;  %v14553_v26 = vmax.f32 %v29510_v54, 0.0  ;;  %28235 = vmatprep.mubr.msk.bf16.mxu1 %vm7466_vm3, %v36430_v25  ;;  %28384 = vmatmul.mubr.msk.bf16.gmra.mrb[72].mxu0 %vm7466_vm3, %v36525_v60 }
 0xd31   : > { %v14910_v15 = vrot.slane %v14555_v63, 7  ;;  %v15223_v48 = vrot.slane %v14555_v63, 5 }
 0xd32   : > { %v14906_v55 = vrot.slane %v14553_v26, 7  ;;  %v28121_v47 = vpop.f32.mrb[48].mxu1  ;;  %v15287_v38 = vsel %vm440_vm0, %v14679_v9, %v14905_v36 }
 0xd33   : > { %v14911_v57 = vsel %vm440_vm0, %v14908_v31, %v14910_v15  ;;  %v36539_v2 = vsel %vm440_vm0, %v14910_v15, %v15223_v48  ;;  %v29511_v49 = vadd.f32 %v28121_v47, %v36257_v10  ;;  %v14061_v27 = vpop.f32.mrb[49].mxu1 }
 0xd34   : > { %39846 = vst [vmem:[#allocation2_spill] sm:$0xff] %v36539_v2  ;;  %v14907_v12 = vsel %vm440_vm0, %v14905_v36, %v14906_v55  ;;  %v14909_v1 = vsel %vm440_vm0, %v14906_v55, %v14908_v31  ;;  %v29512_v45 = vadd.f32 %v36257_v10, %v14061_v27  ;;  %v28122_v8 = vpop.f32.mrb[50].mxu1 }
 0xd35   : > { %v36546_v61 = vpack.c.bf16 %v14907_v12, %v15287_v38  ;;  %v36548_v62 = vpack.c.bf16 %v14911_v57, %v14909_v1  ;;  %v14558_v46 = vmax.f32 %v29511_v49, 0.0  ;;  %v29513_v59 = vadd.f32 %v28122_v8, %v36257_v10  ;;  %v14064_v53 = vpop.f32.mrb[51].mxu1 }
 0xd36   : > { %v14556_v0 = vmax.f32 %v29512_v45, 0.0  ;;  %v29514_v21 = vadd.f32 %v36257_v10, %v14064_v53 }
 0xd37   : > { %39847 = vst [vmem:[#allocation38_spill] sm:$0xff] %v36546_v61  ;;  %39848 = vst [vmem:[#allocation43_spill] sm:$0xff] %v36548_v62  ;;  %v14559_v23 = vmax.f32 %v29513_v59, 0.0  ;;  %28236 = vmatmul.mubr.msk.bf16.gmra.mrb[156].mxu1 %vm7466_vm3, %v36432_v18  ;;  %28387 = vmatprep.mubr.msk.bf16.mxu0 %vm7466_vm3, %v36546_v61  ;;  %v14915_v54 = vrot.slane %v14558_v46, 7  ;;  %v36577_v59 = vld [vmem:[%s39365_s5 + $0x20] sm:$0xff]  }
 0xd38   : > { %v14680_v39 = vrot.slane %v14556_v0, 1  ;;  %v14912_v32 = vrot.slane %v14556_v0, 7  ;;  %v14557_v44 = vmax.f32 %v29514_v21, 0.0  ;;  %28239 = vmatprep.mubr.msk.bf16.mxu1 %vm7466_vm3, %v36454_v17  ;;  %28388 = vmatmul.mubr.msk.bf16.gmra.mrb[76].mxu0 %vm7466_vm3, %v36548_v62 }
 0xd39   : > { %v14917_v63 = vrot.slane %v14559_v23, 7  ;;  %v15224_v9 = vrot.slane %v14559_v23, 5  ;;  %28607 = vmatprep.subr.bf16.mxu0 %v36577_v59 }
 0xd3a   : > { %v14913_v36 = vrot.slane %v14557_v44, 7  ;;  %v28125_v26 = vpop.f32.mrb[52].mxu1  ;;  %v15288_v47 = vsel %vm440_vm0, %v14680_v39, %v14912_v32 }
 0xd3b   : > { %v14918_v31 = vsel %vm440_vm0, %v14915_v54, %v14917_v63  ;;  %v36562_v15 = vsel %vm440_vm0, %v14917_v63, %v15224_v9  ;;  %v29515_v48 = vadd.f32 %v28125_v26, %v36257_v10  ;;  %v14077_v55 = vpop.f32.mrb[53].mxu1 }
 0xd3c   : > { %39849 = vst [vmem:[#allocation3_spill] sm:$0xff] %v36562_v15  ;;  %v14914_v57 = vsel %vm440_vm0, %v14912_v32, %v14913_v36  ;;  %v14916_v49 = vsel %vm440_vm0, %v14913_v36, %v14915_v54  ;;  %v29516_v27 = vadd.f32 %v36257_v10, %v14077_v55  ;;  %v28126_v38 = vpop.f32.mrb[54].mxu1 }
 0xd3d   : > { %v36569_v12 = vpack.c.bf16 %v14914_v57, %v15288_v47  ;;  %v36571_v1 = vpack.c.bf16 %v14918_v31, %v14916_v49  ;;  %v14562_v45 = vmax.f32 %v29515_v48, 0.0  ;;  %v29517_v8 = vadd.f32 %v28126_v38, %v36257_v10  ;;  %v14080_v46 = vpop.f32.mrb[55].mxu1 }
 0xd3e   : > { %v14560_v53 = vmax.f32 %v29516_v27, 0.0  ;;  %v29518_v0 = vadd.f32 %v36257_v10, %v14080_v46 }
 0xd3f   : > { %39850 = vst [vmem:[#allocation44_spill] sm:$0xff] %v36569_v12  ;;  %39851 = vst [vmem:[#allocation9_spill] sm:$0xff] %v36571_v1  ;;  %v14563_v21 = vmax.f32 %v29517_v8, 0.0  ;;  %28240 = vmatmul.mubr.msk.bf16.gmra.mrb[160].mxu1 %vm7466_vm3, %v36456_v13  ;;  %28391 = vmatprep.mubr.msk.bf16.mxu0 %vm7466_vm3, %v36569_v12  ;;  %v14922_v44 = vrot.slane %v14562_v45, 7 }
 0xd40   : > { %v14681_v23 = vrot.slane %v14560_v53, 1  ;;  %v14919_v39 = vrot.slane %v14560_v53, 7  ;;  %v14561_v32 = vmax.f32 %v29518_v0, 0.0  ;;  %28243 = vmatprep.mubr.msk.bf16.mxu1 %vm7466_vm3, %v36477_v5  ;;  %28392 = vmatmul.mubr.msk.bf16.gmra.mrb[80].mxu0 %vm7466_vm3, %v36571_v1 }
 0xd41   : > { %v14924_v54 = vrot.slane %v14563_v21, 7  ;;  %v15225_v63 = vrot.slane %v14563_v21, 5 }
 0xd42   : > { %v14920_v9 = vrot.slane %v14561_v32, 7  ;;  %v28129_v36 = vpop.f32.mrb[56].mxu1  ;;  %v15289_v47 = vsel %vm440_vm0, %v14681_v23, %v14919_v39 }
 0xd43   : > { %v14925_v26 = vsel %vm440_vm0, %v14922_v44, %v14924_v54  ;;  %v36591_v31 = vsel %vm440_vm0, %v14924_v54, %v15225_v63  ;;  %v29519_v48 = vadd.f32 %v28129_v36, %v36257_v10  ;;  %v14093_v55 = vpop.f32.mrb[57].mxu1 }
 0xd44   : > { %39852 = vst [vmem:[#allocation42_spill] sm:$0xff] %v36591_v31  ;;  %v14921_v57 = vsel %vm440_vm0, %v14919_v39, %v14920_v9  ;;  %v14923_v49 = vsel %vm440_vm0, %v14920_v9, %v14922_v44  ;;  %v29520_v27 = vadd.f32 %v36257_v10, %v14093_v55  ;;  %v28130_v38 = vpop.f32.mrb[58].mxu1 }
 0xd45   : > { %v36598_v45 = vpack.c.bf16 %v14921_v57, %v15289_v47  ;;  %v36600_v8 = vpack.c.bf16 %v14925_v26, %v14923_v49  ;;  %v14566_v46 = vmax.f32 %v29519_v48, 0.0  ;;  %v29521_v53 = vadd.f32 %v28130_v38, %v36257_v10  ;;  %v14096_v0 = vpop.f32.mrb[59].mxu1 }
 0xd46   : > { %v14564_v21 = vmax.f32 %v29520_v27, 0.0  ;;  %v29522_v32 = vadd.f32 %v36257_v10, %v14096_v0 }
 0xd47   : > { %39853 = vst [vmem:[#allocation45_spill] sm:$0xff] %v36598_v45  ;;  %39854 = vst [vmem:[#allocation10_spill] sm:$0xff] %v36600_v8  ;;  %v14567_v54 = vmax.f32 %v29521_v53, 0.0  ;;  %28244 = vmatmul.mubr.msk.bf16.gmra.mrb[164].mxu1 %vm7466_vm3, %v36479_v50  ;;  %28395 = vmatprep.mubr.msk.bf16.mxu0 %vm7466_vm3, %v36598_v45  ;;  %v14929_v63 = vrot.slane %v14566_v46, 7 }
 0xd48   : > { %v14682_v23 = vrot.slane %v14564_v21, 1  ;;  %v14926_v39 = vrot.slane %v14564_v21, 7  ;;  %v14565_v44 = vmax.f32 %v29522_v32, 0.0  ;;  %28247 = vmatprep.mubr.msk.bf16.mxu1 %vm7466_vm3, %v36500_v40  ;;  %28396 = vmatmul.mubr.msk.bf16.gmra.mrb[84].mxu0 %vm7466_vm3, %v36600_v8 }
 0xd49   : > { %v14931_v9 = vrot.slane %v14567_v54, 7  ;;  %v15226_v36 = vrot.slane %v14567_v54, 5 }
 0xd4a   : > { %v14927_v26 = vrot.slane %v14565_v44, 7  ;;  %v28133_v48 = vpop.f32.mrb[60].mxu1  ;;  %v15290_v27 = vsel %vm440_vm0, %v14682_v23, %v14926_v39 }
 0xd4b   : > { %v14932_v55 = vsel %vm440_vm0, %v14929_v63, %v14931_v9  ;;  %v36614_v47 = vsel %vm440_vm0, %v14931_v9, %v15226_v36  ;;  %v29523_v57 = vadd.f32 %v28133_v48, %v36257_v10  ;;  %v14109_v49 = vpop.f32.mrb[61].mxu1 }
 0xd4c   : > { %39855 = vst [vmem:[#allocation7_spill] sm:$0xff] %v36614_v47  ;;  %v14928_v38 = vsel %vm440_vm0, %v14926_v39, %v14927_v26  ;;  %v14930_v53 = vsel %vm440_vm0, %v14927_v26, %v14929_v63  ;;  %v29524_v46 = vadd.f32 %v36257_v10, %v14109_v49  ;;  %v28134_v0 = vpop.f32.mrb[62].mxu1 }
 0xd4d   : > { %v36621_v21 = vpack.c.bf16 %v14928_v38, %v15290_v27  ;;  %v36623_v32 = vpack.c.bf16 %v14932_v55, %v14930_v53  ;;  %v14570_v54 = vmax.f32 %v29523_v57, 0.0  ;;  %v29525_v44 = vadd.f32 %v28134_v0, %v36257_v10  ;;  %v14112_v9 = vpop.f32.mrb[63].mxu1 }
 0xd4e   : > { %v14568_v36 = vmax.f32 %v29524_v46, 0.0  ;;  %v29526_v48 = vadd.f32 %v36257_v10, %v14112_v9 }
 0xd4f   : > { %39856 = vst [vmem:[#allocation46_spill] sm:$0xff] %v36621_v21  ;;  %39857 = vst [vmem:[#allocation8_spill] sm:$0xff] %v36623_v32  ;;  %v14571_v47 = vmax.f32 %v29525_v44, 0.0  ;;  %28248 = vmatmul.mubr.msk.bf16.gmra.mrb[168].mxu1 %vm7466_vm3, %v36502_v16  ;;  %28399 = vmatprep.mubr.msk.bf16.mxu0 %vm7466_vm3, %v36621_v21  ;;  %v14936_v26 = vrot.slane %v14570_v54, 7 }
 0xd50   : > { %v14683_v23 = vrot.slane %v14568_v36, 1  ;;  %v14933_v39 = vrot.slane %v14568_v36, 7  ;;  %v14569_v63 = vmax.f32 %v29526_v48, 0.0  ;;  %28251 = vmatprep.mubr.msk.bf16.mxu1 %vm7466_vm3, %v36523_v58  ;;  %28400 = vmatmul.mubr.msk.bf16.gmra.mrb[88].mxu0 %vm7466_vm3, %v36623_v32 }
 0xd51   : > { %v14938_v55 = vrot.slane %v14571_v47, 7  ;;  %v15227_v57 = vrot.slane %v14571_v47, 5 }
 0xd52   : > { %v14934_v49 = vrot.slane %v14569_v63, 7  ;;  %v28137_v27 = vpop.f32.mrb[64].mxu1  ;;  %v15291_v44 = vsel %vm440_vm0, %v14683_v23, %v14933_v39 }
 0xd53   : > { %v14939_v38 = vsel %vm440_vm0, %v14936_v26, %v14938_v55  ;;  %v36637_v53 = vsel %vm440_vm0, %v14938_v55, %v15227_v57  ;;  %v29527_v46 = vadd.f32 %v28137_v27, %v36257_v10  ;;  %v14125_v0 = vpop.f32.mrb[65].mxu1 }
 0xd54   : > { %39858 = vst [vmem:[#allocation47_spill] sm:$0xff] %v36637_v53  ;;  %v14935_v9 = vsel %vm440_vm0, %v14933_v39, %v14934_v49  ;;  %v14937_v36 = vsel %vm440_vm0, %v14934_v49, %v14936_v26  ;;  %v29528_v54 = vadd.f32 %v36257_v10, %v14125_v0  ;;  %v28138_v48 = vpop.f32.mrb[66].mxu1 }
 0xd55   : > { %v36644_v47 = vpack.c.bf16 %v14935_v9, %v15291_v44  ;;  %v36646_v63 = vpack.c.bf16 %v14939_v38, %v14937_v36  ;;  %v14574_v31 = vmax.f32 %v29527_v46, 0.0  ;;  %v29529_v55 = vadd.f32 %v28138_v48, %v36257_v10  ;;  %v14128_v57 = vpop.f32.mrb[67].mxu1 }
 0xd56   : > { %v14572_v53 = vmax.f32 %v29528_v54, 0.0  ;;  %v29530_v27 = vadd.f32 %v36257_v10, %v14128_v57 }
 0xd57   : > { %39859 = vst [vmem:[#allocation48_spill] sm:$0xff] %v36644_v47  ;;  %39860 = vst [vmem:[#allocation49_spill] sm:$0xff] %v36646_v63  ;;  %v14575_v15 = vmax.f32 %v29529_v55, 0.0  ;;  %28252 = vmatmul.mubr.msk.bf16.gmra.mrb[172].mxu1 %vm7466_vm3, %v36525_v60  ;;  %28403 = vmatprep.mubr.msk.bf16.mxu0 %vm7466_vm3, %v36644_v47  ;;  %v14943_v49 = vrot.slane %v14574_v31, 7 }
 0xd58   : > { %v14684_v23 = vrot.slane %v14572_v53, 1  ;;  %v14940_v39 = vrot.slane %v14572_v53, 7  ;;  %v14573_v26 = vmax.f32 %v29530_v27, 0.0  ;;  %28255 = vmatprep.mubr.msk.bf16.mxu1 %vm7466_vm3, %v36546_v61  ;;  %28404 = vmatmul.mubr.msk.bf16.gmra.mrb[92].mxu0 %vm7466_vm3, %v36646_v63 }
 0xd59   : > { %v14945_v38 = vrot.slane %v14575_v15, 7  ;;  %v15228_v46 = vrot.slane %v14575_v15, 5  ;;  %v36669_v15 = vld [vmem:[%s39364_s4] ss:$0 sm:$0xff] }
 0xd5a   : > { %v14941_v0 = vrot.slane %v14573_v26, 7  ;;  %v28141_v44 = vpop.f32.mrb[68].mxu1  ;;  %v15292_v48 = vsel %vm440_vm0, %v14684_v23, %v14940_v39 }
 0xd5b   : > { %v14946_v9 = vsel %vm440_vm0, %v14943_v49, %v14945_v38  ;;  %v36660_v36 = vsel %vm440_vm0, %v14945_v38, %v15228_v46  ;;  %v29531_v54 = vadd.f32 %v28141_v44, %v36257_v10  ;;  %v14141_v53 = vpop.f32.mrb[69].mxu1 }
 0xd5c   : > { %39861 = vst [vmem:[#allocation50_spill] sm:$0xff] %v36660_v36  ;;  %v14942_v55 = vsel %vm440_vm0, %v14940_v39, %v14941_v0  ;;  %v14944_v57 = vsel %vm440_vm0, %v14941_v0, %v14943_v49  ;;  %v29532_v31 = vadd.f32 %v36669_v15, %v14141_v53  ;;  %v28142_v27 = vpop.f32.mrb[70].mxu1 }
 0xd5d   : > { %v36672_v26 = vpack.c.bf16 %v14942_v55, %v15292_v48  ;;  %v36674_v38 = vpack.c.bf16 %v14946_v9, %v14944_v57  ;;  %v14578_v10 = vmax.f32 %v29531_v54, 0.0  ;;  %v29533_v46 = vadd.f32 %v36669_v15, %v28142_v27  ;;  %v14144_v23 = vpop.f32.mrb[71].mxu1 }
 0xd5e   : > { %v14576_v44 = vmax.f32 %v29532_v31, 0.0  ;;  %v29534_v39 = vadd.f32 %v36669_v15, %v14144_v23 }
 0xd5f   : > { %39862 = vst [vmem:[#allocation51_spill] sm:$0xff] %v36672_v26  ;;  %39863 = vst [vmem:[#allocation52_spill] sm:$0xff] %v36674_v38  ;;  %v14579_v49 = vmax.f32 %v29533_v46, 0.0  ;;  %28256 = vmatmul.mubr.msk.bf16.gmra.mrb[176].mxu1 %vm7466_vm3, %v36548_v62  ;;  %28407 = vmatprep.mubr.msk.bf16.mxu0 %vm7466_vm3, %v36672_v26  ;;  %v14950_v9 = vrot.slane %v14578_v10, 7 }
 0xd60   : > { %v14685_v0 = vrot.slane %v14576_v44, 1  ;;  %v14947_v53 = vrot.slane %v14576_v44, 7  ;;  %v14577_v48 = vmax.f32 %v29534_v39, 0.0  ;;  %28259 = vmatprep.mubr.msk.bf16.mxu1 %vm7466_vm3, %v36569_v12  ;;  %28408 = vmatmul.mubr.msk.bf16.gmra.mrb[96].mxu0 %vm7466_vm3, %v36674_v38 }
 0xd61   : > { %v14952_v54 = vrot.slane %v14579_v49, 7  ;;  %v15229_v55 = vrot.slane %v14579_v49, 5 }
 0xd62   : > { %v14948_v57 = vrot.slane %v14577_v48, 7  ;;  %v28145_v31 = vpop.f32.mrb[72].mxu1  ;;  %v15293_v39 = vsel %vm440_vm0, %v14685_v0, %v14947_v53 }
 0xd63   : > { %v14953_v27 = vsel %vm440_vm0, %v14950_v9, %v14952_v54  ;;  %v36688_v46 = vsel %vm440_vm0, %v14952_v54, %v15229_v55  ;;  %v29535_v23 = vadd.f32 %v36669_v15, %v28145_v31  ;;  %v14157_v44 = vpop.f32.mrb[73].mxu1 }
 0xd64   : > { %39864 = vst [vmem:[#allocation53_spill] sm:$0xff] %v36688_v46  ;;  %v14949_v36 = vsel %vm440_vm0, %v14947_v53, %v14948_v57  ;;  %v14951_v2 = vsel %vm440_vm0, %v14948_v57, %v14950_v9  ;;  %v29536_v10 = vadd.f32 %v36669_v15, %v14157_v44  ;;  %v28146_v42 = vpop.f32.mrb[74].mxu1 }
 0xd65   : > { %v36695_v49 = vpack.c.bf16 %v14949_v36, %v15293_v39  ;;  %v36697_v48 = vpack.c.bf16 %v14953_v27, %v14951_v2  ;;  %v14582_v52 = vmax.f32 %v29535_v23, 0.0  ;;  %v29537_v54 = vadd.f32 %v36669_v15, %v28146_v42  ;;  %v14160_v55 = vpop.f32.mrb[75].mxu1 }
 0xd66   : > { %v14580_v46 = vmax.f32 %v29536_v10, 0.0  ;;  %v29538_v31 = vadd.f32 %v36669_v15, %v14160_v55 }
 0xd67   : > { %39865 = vst [vmem:[#allocation54_spill] sm:$0xff] %v36695_v49  ;;  %39866 = vst [vmem:[#allocation55_spill] sm:$0xff] %v36697_v48  ;;  %v14583_v24 = vmax.f32 %v29537_v54, 0.0  ;;  %28260 = vmatmul.mubr.msk.bf16.gmra.mrb[180].mxu1 %vm7466_vm3, %v36571_v1  ;;  %28411 = vmatprep.mubr.msk.bf16.mxu0 %vm7466_vm3, %v36695_v49  ;;  %v14957_v42 = vrot.slane %v14582_v52, 7 }
 0xd68   : > { %v14686_v0 = vrot.slane %v14580_v46, 1  ;;  %v14954_v53 = vrot.slane %v14580_v46, 7  ;;  %v14581_v36 = vmax.f32 %v29538_v31, 0.0  ;;  %28263 = vmatprep.mubr.msk.bf16.mxu1 %vm7466_vm3, %v36598_v45  ;;  %28412 = vmatmul.mubr.msk.bf16.gmra.mrb[100].mxu0 %vm7466_vm3, %v36697_v48 }
 0xd69   : > { %v14959_v2 = vrot.slane %v14583_v24, 7  ;;  %v15230_v9 = vrot.slane %v14583_v24, 5 }
 0xd6a   : > { %v14955_v57 = vrot.slane %v14581_v36, 7  ;;  %v28149_v27 = vpop.f32.mrb[76].mxu1  ;;  %v15294_v10 = vsel %vm440_vm0, %v14686_v0, %v14954_v53 }
 0xd6b   : > { %v14960_v23 = vsel %vm440_vm0, %v14957_v42, %v14959_v2  ;;  %v36711_v44 = vsel %vm440_vm0, %v14959_v2, %v15230_v9  ;;  %v29539_v39 = vadd.f32 %v36669_v15, %v28149_v27  ;;  %v14173_v46 = vpop.f32.mrb[77].mxu1 }
 0xd6c   : > { %39867 = vst [vmem:[#allocation56_spill] sm:$0xff] %v36711_v44  ;;  %v14956_v54 = vsel %vm440_vm0, %v14954_v53, %v14955_v57  ;;  %v14958_v55 = vsel %vm440_vm0, %v14955_v57, %v14957_v42  ;;  %v29540_v52 = vadd.f32 %v36669_v15, %v14173_v46  ;;  %v28150_v31 = vpop.f32.mrb[78].mxu1 }
 0xd6d   : > { %v36718_v24 = vpack.c.bf16 %v14956_v54, %v15294_v10  ;;  %v36720_v36 = vpack.c.bf16 %v14960_v23, %v14958_v55  ;;  %v14586_v51 = vmax.f32 %v29539_v39, 0.0  ;;  %v29541_v2 = vadd.f32 %v36669_v15, %v28150_v31  ;;  %v14176_v9 = vpop.f32.mrb[79].mxu1 }
 0xd6e   : > { %v14584_v44 = vmax.f32 %v29540_v52, 0.0  ;;  %v29542_v27 = vadd.f32 %v36669_v15, %v14176_v9 }
 0xd6f   : > { %39868 = vst [vmem:[#allocation57_spill] sm:$0xff] %v36718_v24  ;;  %39869 = vst [vmem:[#allocation58_spill] sm:$0xff] %v36720_v36  ;;  %v14587_v19 = vmax.f32 %v29541_v2, 0.0  ;;  %28264 = vmatmul.mubr.msk.bf16.gmra.mrb[184].mxu1 %vm7466_vm3, %v36600_v8  ;;  %28415 = vmatprep.mubr.msk.bf16.mxu0 %vm7466_vm3, %v36718_v24  ;;  %v14964_v57 = vrot.slane %v14586_v51, 7 }
 0xd70   : > { %v14687_v0 = vrot.slane %v14584_v44, 1  ;;  %v14961_v53 = vrot.slane %v14584_v44, 7  ;;  %v14585_v42 = vmax.f32 %v29542_v27, 0.0  ;;  %28267 = vmatprep.mubr.msk.bf16.mxu1 %vm7466_vm3, %v36621_v21  ;;  %28416 = vmatmul.mubr.msk.bf16.gmra.mrb[104].mxu0 %vm7466_vm3, %v36720_v36 }
 0xd71   : > { %v14966_v23 = vrot.slane %v14587_v19, 7  ;;  %v15231_v39 = vrot.slane %v14587_v19, 5 }
 0xd72   : > { %v14962_v46 = vrot.slane %v14585_v42, 7  ;;  %v28153_v10 = vpop.f32.mrb[80].mxu1  ;;  %v15295_v31 = vsel %vm440_vm0, %v14687_v0, %v14961_v53 }
 0xd73   : > { %v14967_v54 = vsel %vm440_vm0, %v14964_v57, %v14966_v23  ;;  %v36734_v55 = vsel %vm440_vm0, %v14966_v23, %v15231_v39  ;;  %v29543_v52 = vadd.f32 %v36669_v15, %v28153_v10  ;;  %v14189_v44 = vpop.f32.mrb[81].mxu1 }
 0xd74   : > { %39870 = vst [vmem:[#allocation59_spill] sm:$0xff] %v36734_v55  ;;  %v14963_v2 = vsel %vm440_vm0, %v14961_v53, %v14962_v46  ;;  %v14965_v9 = vsel %vm440_vm0, %v14962_v46, %v14964_v57  ;;  %v29544_v51 = vadd.f32 %v36669_v15, %v14189_v44  ;;  %v28154_v27 = vpop.f32.mrb[82].mxu1 }
 0xd75   : > { %v36741_v19 = vpack.c.bf16 %v14963_v2, %v15295_v31  ;;  %v36743_v42 = vpack.c.bf16 %v14967_v54, %v14965_v9  ;;  %v14590_v34 = vmax.f32 %v29543_v52, 0.0  ;;  %v29545_v23 = vadd.f32 %v36669_v15, %v28154_v27  ;;  %v14192_v39 = vpop.f32.mrb[83].mxu1 }
 0xd76   : > { %v14588_v55 = vmax.f32 %v29544_v51, 0.0  ;;  %v29546_v10 = vadd.f32 %v36669_v15, %v14192_v39 }
 0xd77   : > { %39871 = vst [vmem:[#allocation60_spill] sm:$0xff] %v36741_v19  ;;  %39872 = vst [vmem:[#allocation61_spill] sm:$0xff] %v36743_v42  ;;  %v14591_v56 = vmax.f32 %v29545_v23, 0.0  ;;  %28268 = vmatmul.mubr.msk.bf16.gmra.mrb[188].mxu1 %vm7466_vm3, %v36623_v32  ;;  %28419 = vmatprep.mubr.msk.bf16.mxu0 %vm7466_vm3, %v36741_v19  ;;  %v14971_v46 = vrot.slane %v14590_v34, 7 }
 0xd78   : > { %v14688_v0 = vrot.slane %v14588_v55, 1  ;;  %v14968_v53 = vrot.slane %v14588_v55, 7  ;;  %v14589_v57 = vmax.f32 %v29546_v10, 0.0  ;;  %28271 = vmatprep.mubr.msk.bf16.mxu1 %vm7466_vm3, %v36644_v47  ;;  %28420 = vmatmul.mubr.msk.bf16.gmra.mrb[108].mxu0 %vm7466_vm3, %v36743_v42 }
 0xd79   : > { %v14973_v54 = vrot.slane %v14591_v56, 7  ;;  %v15232_v52 = vrot.slane %v14591_v56, 5 }
 0xd7a   : > { %v14969_v44 = vrot.slane %v14589_v57, 7  ;;  %v28157_v31 = vpop.f32.mrb[84].mxu1  ;;  %v15296_v27 = vsel %vm440_vm0, %v14688_v0, %v14968_v53 }
 0xd7b   : > { %v14974_v2 = vsel %vm440_vm0, %v14971_v46, %v14973_v54  ;;  %v36757_v9 = vsel %vm440_vm0, %v14973_v54, %v15232_v52  ;;  %v29547_v51 = vadd.f32 %v36669_v15, %v28157_v31  ;;  %v14205_v55 = vpop.f32.mrb[85].mxu1 }
 0xd7c   : > { %39873 = vst [vmem:[#allocation62_spill] sm:$0xff] %v36757_v9  ;;  %v14970_v23 = vsel %vm440_vm0, %v14968_v53, %v14969_v44  ;;  %v14972_v39 = vsel %vm440_vm0, %v14969_v44, %v14971_v46  ;;  %v29548_v34 = vadd.f32 %v36669_v15, %v14205_v55  ;;  %v28158_v10 = vpop.f32.mrb[86].mxu1 }
 0xd7d   : > { %v36764_v56 = vpack.c.bf16 %v14970_v23, %v15296_v27  ;;  %v36766_v57 = vpack.c.bf16 %v14974_v2, %v14972_v39  ;;  %v14594_v41 = vmax.f32 %v29547_v51, 0.0  ;;  %v29549_v54 = vadd.f32 %v36669_v15, %v28158_v10  ;;  %v14208_v52 = vpop.f32.mrb[87].mxu1 }
 0xd7e   : > { %v14592_v9 = vmax.f32 %v29548_v34, 0.0  ;;  %v29550_v31 = vadd.f32 %v36669_v15, %v14208_v52 }
 0xd7f   : > { %39874 = vst [vmem:[#allocation63_spill] sm:$0xff] %v36764_v56  ;;  %39875 = vst [vmem:[#allocation64_spill] sm:$0xff] %v36766_v57  ;;  %v14595_v14 = vmax.f32 %v29549_v54, 0.0  ;;  %28272 = vmatmul.mubr.msk.bf16.gmra.mrb[192].mxu1 %vm7466_vm3, %v36646_v63  ;;  %28423 = vmatprep.mubr.msk.bf16.mxu0 %vm7466_vm3, %v36764_v56  ;;  %v14978_v44 = vrot.slane %v14594_v41, 7 }
 0xd80   : > { %v14689_v0 = vrot.slane %v14592_v9, 1  ;;  %v14975_v53 = vrot.slane %v14592_v9, 7  ;;  %v14593_v46 = vmax.f32 %v29550_v31, 0.0  ;;  %28275 = vmatprep.mubr.msk.bf16.mxu1 %vm7466_vm3, %v36672_v26  ;;  %28424 = vmatmul.mubr.msk.bf16.gmra.mrb[112].mxu0 %vm7466_vm3, %v36766_v57 }
 0xd81   : > { %v14980_v2 = vrot.slane %v14595_v14, 7  ;;  %v15233_v51 = vrot.slane %v14595_v14, 5 }
 0xd82   : > { %v14976_v55 = vrot.slane %v14593_v46, 7  ;;  %v28161_v27 = vpop.f32.mrb[88].mxu1  ;;  %v15297_v10 = vsel %vm440_vm0, %v14689_v0, %v14975_v53 }
 0xd83   : > { %v14981_v23 = vsel %vm440_vm0, %v14978_v44, %v14980_v2  ;;  %v36780_v39 = vsel %vm440_vm0, %v14980_v2, %v15233_v51  ;;  %v29551_v34 = vadd.f32 %v36669_v15, %v28161_v27  ;;  %v14221_v9 = vpop.f32.mrb[89].mxu1 }
 0xd84   : > { %39876 = vst [vmem:[#allocation65_spill] sm:$0xff] %v36780_v39  ;;  %v14977_v54 = vsel %vm440_vm0, %v14975_v53, %v14976_v55  ;;  %v14979_v52 = vsel %vm440_vm0, %v14976_v55, %v14978_v44  ;;  %v29552_v41 = vadd.f32 %v36669_v15, %v14221_v9  ;;  %v28162_v31 = vpop.f32.mrb[90].mxu1 }
 0xd85   : > { %v36787_v14 = vpack.c.bf16 %v14977_v54, %v15297_v10  ;;  %v36789_v46 = vpack.c.bf16 %v14981_v23, %v14979_v52  ;;  %v14598_v11 = vmax.f32 %v29551_v34, 0.0  ;;  %v29553_v2 = vadd.f32 %v36669_v15, %v28162_v31  ;;  %v14224_v51 = vpop.f32.mrb[91].mxu1 }
 0xd86   : > { %v14596_v39 = vmax.f32 %v29552_v41, 0.0  ;;  %v29554_v27 = vadd.f32 %v36669_v15, %v14224_v51 }
 0xd87   : > { %39877 = vst [vmem:[#allocation66_spill] sm:$0xff] %v36787_v14  ;;  %39878 = vst [vmem:[#allocation67_spill] sm:$0xff] %v36789_v46  ;;  %v14599_v20 = vmax.f32 %v29553_v2, 0.0  ;;  %28276 = vmatmul.mubr.msk.bf16.gmra.mrb[196].mxu1 %vm7466_vm3, %v36674_v38  ;;  %28427 = vmatprep.mubr.msk.bf16.mxu0 %vm7466_vm3, %v36787_v14  ;;  %v14985_v55 = vrot.slane %v14598_v11, 7 }
 0xd88   : > { %v14690_v0 = vrot.slane %v14596_v39, 1  ;;  %v14982_v53 = vrot.slane %v14596_v39, 7  ;;  %v14597_v44 = vmax.f32 %v29554_v27, 0.0  ;;  %28279 = vmatprep.mubr.msk.bf16.mxu1 %vm7466_vm3, %v36695_v49  ;;  %28428 = vmatmul.mubr.msk.bf16.gmra.mrb[116].mxu0 %vm7466_vm3, %v36789_v46 }
 0xd89   : > { %v14987_v23 = vrot.slane %v14599_v20, 7  ;;  %v15234_v34 = vrot.slane %v14599_v20, 5 }
 0xd8a   : > { %v14983_v9 = vrot.slane %v14597_v44, 7  ;;  %v28165_v10 = vpop.f32.mrb[92].mxu1  ;;  %v15298_v31 = vsel %vm440_vm0, %v14690_v0, %v14982_v53 }
 0xd8b   : > { %v14988_v54 = vsel %vm440_vm0, %v14985_v55, %v14987_v23  ;;  %v36803_v52 = vsel %vm440_vm0, %v14987_v23, %v15234_v34  ;;  %v29555_v41 = vadd.f32 %v36669_v15, %v28165_v10  ;;  %v14237_v39 = vpop.f32.mrb[93].mxu1 }
 0xd8c   : > { %39879 = vst [vmem:[#allocation68_spill] sm:$0xff] %v36803_v52  ;;  %v14984_v2 = vsel %vm440_vm0, %v14982_v53, %v14983_v9  ;;  %v14986_v51 = vsel %vm440_vm0, %v14983_v9, %v14985_v55  ;;  %v29556_v11 = vadd.f32 %v36669_v15, %v14237_v39  ;;  %v28166_v27 = vpop.f32.mrb[94].mxu1 }
 0xd8d   : > { %v36810_v20 = vpack.c.bf16 %v14984_v2, %v15298_v31  ;;  %v36812_v44 = vpack.c.bf16 %v14988_v54, %v14986_v51  ;;  %v14602_v3 = vmax.f32 %v29555_v41, 0.0  ;;  %v29557_v23 = vadd.f32 %v36669_v15, %v28166_v27  ;;  %v14240_v34 = vpop.f32.mrb[95].mxu1 }
 0xd8e   : > { %v14600_v52 = vmax.f32 %v29556_v11, 0.0  ;;  %v29558_v10 = vadd.f32 %v36669_v15, %v14240_v34 }
 0xd8f   : > { %39880 = vst [vmem:[#allocation69_spill] sm:$0xff] %v36810_v20  ;;  %39881 = vst [vmem:[#allocation70_spill] sm:$0xff] %v36812_v44  ;;  %v14603_v37 = vmax.f32 %v29557_v23, 0.0  ;;  %28280 = vmatmul.mubr.msk.bf16.gmra.mrb[200].mxu1 %vm7466_vm3, %v36697_v48  ;;  %28431 = vmatprep.mubr.msk.bf16.mxu0 %vm7466_vm3, %v36810_v20  ;;  %v14992_v9 = vrot.slane %v14602_v3, 7 }
 0xd90   : > { %v14691_v0 = vrot.slane %v14600_v52, 1  ;;  %v14989_v53 = vrot.slane %v14600_v52, 7  ;;  %v14601_v55 = vmax.f32 %v29558_v10, 0.0  ;;  %28283 = vmatprep.mubr.msk.bf16.mxu1 %vm7466_vm3, %v36718_v24  ;;  %28432 = vmatmul.mubr.msk.bf16.gmra.mrb[120].mxu0 %vm7466_vm3, %v36812_v44 }
 0xd91   : > { %v14994_v54 = vrot.slane %v14603_v37, 7  ;;  %v15235_v41 = vrot.slane %v14603_v37, 5 }
 0xd92   : > { %v14990_v39 = vrot.slane %v14601_v55, 7  ;;  %v28169_v31 = vpop.f32.mrb[96].mxu1  ;;  %v15299_v27 = vsel %vm440_vm0, %v14691_v0, %v14989_v53 }
 0xd93   : > { %v14995_v2 = vsel %vm440_vm0, %v14992_v9, %v14994_v54  ;;  %v36826_v51 = vsel %vm440_vm0, %v14994_v54, %v15235_v41  ;;  %v29559_v11 = vadd.f32 %v36669_v15, %v28169_v31  ;;  %v14253_v52 = vpop.f32.mrb[97].mxu1 }
 0xd94   : > { %39882 = vst [vmem:[#allocation71_spill] sm:$0xff] %v36826_v51  ;;  %v14991_v23 = vsel %vm440_vm0, %v14989_v53, %v14990_v39  ;;  %v14993_v34 = vsel %vm440_vm0, %v14990_v39, %v14992_v9  ;;  %v29560_v3 = vadd.f32 %v36669_v15, %v14253_v52  ;;  %v28170_v10 = vpop.f32.mrb[98].mxu1 }
 0xd95   : > { %v36833_v37 = vpack.c.bf16 %v14991_v23, %v15299_v27  ;;  %v36835_v55 = vpack.c.bf16 %v14995_v2, %v14993_v34  ;;  %v14606_v24 = vmax.f32 %v29559_v11, 0.0  ;;  %v29561_v54 = vadd.f32 %v36669_v15, %v28170_v10  ;;  %v14256_v41 = vpop.f32.mrb[99].mxu1 }
 0xd96   : > { %v14604_v51 = vmax.f32 %v29560_v3, 0.0  ;;  %v29562_v31 = vadd.f32 %v36669_v15, %v14256_v41 }
 0xd97   : > { %39883 = vst [vmem:[#allocation72_spill] sm:$0xff] %v36833_v37  ;;  %39884 = vst [vmem:[#allocation73_spill] sm:$0xff] %v36835_v55  ;;  %v14607_v48 = vmax.f32 %v29561_v54, 0.0  ;;  %28284 = vmatmul.mubr.msk.bf16.gmra.mrb[204].mxu1 %vm7466_vm3, %v36720_v36  ;;  %28435 = vmatprep.mubr.msk.bf16.mxu0 %vm7466_vm3, %v36833_v37  ;;  %v14999_v39 = vrot.slane %v14606_v24, 7 }
 0xd98   : > { %v14692_v0 = vrot.slane %v14604_v51, 1  ;;  %v14996_v53 = vrot.slane %v14604_v51, 7  ;;  %v14605_v9 = vmax.f32 %v29562_v31, 0.0  ;;  %28287 = vmatprep.mubr.msk.bf16.mxu1 %vm7466_vm3, %v36741_v19  ;;  %28436 = vmatmul.mubr.msk.bf16.gmra.mrb[124].mxu0 %vm7466_vm3, %v36835_v55 }
 0xd99   : > { %v15001_v2 = vrot.slane %v14607_v48, 7  ;;  %v15236_v11 = vrot.slane %v14607_v48, 5 }
 0xd9a   : > { %v14997_v52 = vrot.slane %v14605_v9, 7  ;;  %v28173_v27 = vpop.f32.mrb[100].mxu1  ;;  %v15300_v10 = vsel %vm440_vm0, %v14692_v0, %v14996_v53 }
 0xd9b   : > { %v15002_v23 = vsel %vm440_vm0, %v14999_v39, %v15001_v2  ;;  %v36849_v34 = vsel %vm440_vm0, %v15001_v2, %v15236_v11  ;;  %v29563_v3 = vadd.f32 %v36669_v15, %v28173_v27  ;;  %v14269_v51 = vpop.f32.mrb[101].mxu1 }
 0xd9c   : > { %39885 = vst [vmem:[#allocation74_spill] sm:$0xff] %v36849_v34  ;;  %v14998_v54 = vsel %vm440_vm0, %v14996_v53, %v14997_v52  ;;  %v15000_v41 = vsel %vm440_vm0, %v14997_v52, %v14999_v39  ;;  %v29564_v24 = vadd.f32 %v36669_v15, %v14269_v51  ;;  %v28174_v31 = vpop.f32.mrb[102].mxu1 }
 0xd9d   : > { %v36856_v48 = vpack.c.bf16 %v14998_v54, %v15300_v10  ;;  %v36858_v9 = vpack.c.bf16 %v15002_v23, %v15000_v41  ;;  %v14610_v19 = vmax.f32 %v29563_v3, 0.0  ;;  %v29565_v2 = vadd.f32 %v36669_v15, %v28174_v31  ;;  %v14272_v11 = vpop.f32.mrb[103].mxu1 }
 0xd9e   : > { %v14608_v34 = vmax.f32 %v29564_v24, 0.0  ;;  %v29566_v27 = vadd.f32 %v36669_v15, %v14272_v11 }
 0xd9f   : > { %39886 = vst [vmem:[#allocation75_spill] sm:$0xff] %v36856_v48  ;;  %39887 = vst [vmem:[#allocation76_spill] sm:$0xff] %v36858_v9  ;;  %v14611_v36 = vmax.f32 %v29565_v2, 0.0  ;;  %28288 = vmatmul.mubr.msk.bf16.gmra.mrb[208].mxu1 %vm7466_vm3, %v36743_v42  ;;  %28439 = vmatprep.mubr.msk.bf16.mxu0 %vm7466_vm3, %v36856_v48  ;;  %v15006_v52 = vrot.slane %v14610_v19, 7 }
 0xda0   : > { %v14693_v0 = vrot.slane %v14608_v34, 1  ;;  %v15003_v53 = vrot.slane %v14608_v34, 7  ;;  %v14609_v39 = vmax.f32 %v29566_v27, 0.0  ;;  %28291 = vmatprep.mubr.msk.bf16.mxu1 %vm7466_vm3, %v36764_v56  ;;  %28440 = vmatmul.mubr.msk.bf16.gmra.mrb[128].mxu0 %vm7466_vm3, %v36858_v9 }
 0xda1   : > { %v15008_v23 = vrot.slane %v14611_v36, 7  ;;  %v15237_v3 = vrot.slane %v14611_v36, 5 }
 0xda2   : > { %v15004_v51 = vrot.slane %v14609_v39, 7  ;;  %v28177_v10 = vpop.f32.mrb[104].mxu1  ;;  %v15301_v31 = vsel %vm440_vm0, %v14693_v0, %v15003_v53 }
 0xda3   : > { %v15009_v54 = vsel %vm440_vm0, %v15006_v52, %v15008_v23  ;;  %v36872_v41 = vsel %vm440_vm0, %v15008_v23, %v15237_v3  ;;  %v29567_v24 = vadd.f32 %v36669_v15, %v28177_v10  ;;  %v14285_v34 = vpop.f32.mrb[105].mxu1 }
 0xda4   : > { %39888 = vst [vmem:[#allocation77_spill] sm:$0xff] %v36872_v41  ;;  %v15005_v2 = vsel %vm440_vm0, %v15003_v53, %v15004_v51  ;;  %v15007_v11 = vsel %vm440_vm0, %v15004_v51, %v15006_v52  ;;  %v29568_v19 = vadd.f32 %v36669_v15, %v14285_v34  ;;  %v28178_v27 = vpop.f32.mrb[106].mxu1 }
 0xda5   : > { %v36879_v36 = vpack.c.bf16 %v15005_v2, %v15301_v31  ;;  %v36881_v39 = vpack.c.bf16 %v15009_v54, %v15007_v11  ;;  %v14614_v56 = vmax.f32 %v29567_v24, 0.0  ;;  %v29569_v23 = vadd.f32 %v36669_v15, %v28178_v27  ;;  %v14288_v3 = vpop.f32.mrb[107].mxu1 }
 0xda6   : > { %v14612_v41 = vmax.f32 %v29568_v19, 0.0  ;;  %v29570_v10 = vadd.f32 %v36669_v15, %v14288_v3 }
 0xda7   : > { %39889 = vst [vmem:[#allocation78_spill] sm:$0xff] %v36879_v36  ;;  %39890 = vst [vmem:[#allocation79_spill] sm:$0xff] %v36881_v39  ;;  %v14615_v42 = vmax.f32 %v29569_v23, 0.0  ;;  %28292 = vmatmul.mubr.msk.bf16.gmra.mrb[212].mxu1 %vm7466_vm3, %v36766_v57  ;;  %28443 = vmatprep.mubr.msk.bf16.mxu0 %vm7466_vm3, %v36879_v36  ;;  %v15013_v51 = vrot.slane %v14614_v56, 7 }
 0xda8   : > { %v14694_v0 = vrot.slane %v14612_v41, 1  ;;  %v15010_v53 = vrot.slane %v14612_v41, 7  ;;  %v14613_v52 = vmax.f32 %v29570_v10, 0.0  ;;  %28295 = vmatprep.mubr.msk.bf16.mxu1 %vm7466_vm3, %v36787_v14  ;;  %28444 = vmatmul.mubr.msk.bf16.gmra.mrb[132].mxu0 %vm7466_vm3, %v36881_v39 }
 0xda9   : > { %v15015_v54 = vrot.slane %v14615_v42, 7  ;;  %v15238_v24 = vrot.slane %v14615_v42, 5 }
 0xdaa   : > { %v15011_v34 = vrot.slane %v14613_v52, 7  ;;  %v28181_v31 = vpop.f32.mrb[108].mxu1  ;;  %v15302_v27 = vsel %vm440_vm0, %v14694_v0, %v15010_v53 }
 0xdab   : > { %v15016_v2 = vsel %vm440_vm0, %v15013_v51, %v15015_v54  ;;  %v36895_v11 = vsel %vm440_vm0, %v15015_v54, %v15238_v24  ;;  %v29571_v19 = vadd.f32 %v36669_v15, %v28181_v31  ;;  %v14301_v41 = vpop.f32.mrb[109].mxu1 }
 0xdac   : > { %39891 = vst [vmem:[#allocation80_spill] sm:$0xff] %v36895_v11  ;;  %v15012_v23 = vsel %vm440_vm0, %v15010_v53, %v15011_v34  ;;  %v15014_v3 = vsel %vm440_vm0, %v15011_v34, %v15013_v51  ;;  %v29572_v56 = vadd.f32 %v36669_v15, %v14301_v41  ;;  %v28182_v10 = vpop.f32.mrb[110].mxu1 }
 0xdad   : > { %v36902_v42 = vpack.c.bf16 %v15012_v23, %v15302_v27  ;;  %v36904_v52 = vpack.c.bf16 %v15016_v2, %v15014_v3  ;;  %v14618_v14 = vmax.f32 %v29571_v19, 0.0  ;;  %v29573_v54 = vadd.f32 %v36669_v15, %v28182_v10  ;;  %v14304_v24 = vpop.f32.mrb[111].mxu1 }
 0xdae   : > { %v14616_v11 = vmax.f32 %v29572_v56, 0.0  ;;  %v29574_v31 = vadd.f32 %v36669_v15, %v14304_v24 }
 0xdaf   : > { %39892 = vst [vmem:[#allocation81_spill] sm:$0xff] %v36902_v42  ;;  %39893 = vst [vmem:[#allocation82_spill] sm:$0xff] %v36904_v52  ;;  %v14619_v57 = vmax.f32 %v29573_v54, 0.0  ;;  %28296 = vmatmul.mubr.msk.bf16.gmra.mrb[216].mxu1 %vm7466_vm3, %v36789_v46  ;;  %28447 = vmatprep.mubr.msk.bf16.mxu0 %vm7466_vm3, %v36902_v42  ;;  %v15020_v34 = vrot.slane %v14618_v14, 7 }
 0xdb0   : > { %v14695_v0 = vrot.slane %v14616_v11, 1  ;;  %v15017_v53 = vrot.slane %v14616_v11, 7  ;;  %v14617_v51 = vmax.f32 %v29574_v31, 0.0  ;;  %28299 = vmatprep.mubr.msk.bf16.mxu1 %vm7466_vm3, %v36810_v20  ;;  %28448 = vmatmul.mubr.msk.bf16.gmra.mrb[136].mxu0 %vm7466_vm3, %v36904_v52 }
 0xdb1   : > { %v15022_v2 = vrot.slane %v14619_v57, 7  ;;  %v15239_v19 = vrot.slane %v14619_v57, 5  ;;  %28479 = vmatprep.mubr.msk.bf16.mxu0 %vm7466_vm3, %v36306_v35 }
 0xdb2   : > { %v15018_v41 = vrot.slane %v14617_v51, 7  ;;  %v28185_v27 = vpop.f32.mrb[112].mxu1  ;;  %v15303_v10 = vsel %vm440_vm0, %v14695_v0, %v15017_v53  ;;  %v32154_v0 = vld [vmem:[%s39365_s5 + $0x28] sm:$0xff]  }
 0xdb3   : > { %v15023_v23 = vsel %vm440_vm0, %v15020_v34, %v15022_v2  ;;  %v36920_v3 = vsel %vm440_vm0, %v15022_v2, %v15239_v19  ;;  %v29575_v11 = vadd.f32 %v36669_v15, %v28185_v27  ;;  %v14317_v56 = vpop.f32.mrb[113].mxu1 }
 0xdb4   : > { %39894 = vst [vmem:[#allocation83_spill] sm:$0xff] %v36920_v3  ;;  %v15019_v54 = vsel %vm440_vm0, %v15017_v53, %v15018_v41  ;;  %v15021_v14 = vsel %vm440_vm0, %v15018_v41, %v15020_v34  ;;  %v29576_v57 = vadd.f32 %v36669_v15, %v14317_v56  ;;  %v28186_v24 = vpop.f32.mrb[114].mxu1 }
 0xdb5   : > { %v36927_v31 = vpack.c.bf16 %v15019_v54, %v15303_v10  ;;  %v36929_v51 = vpack.c.bf16 %v15023_v23, %v15021_v14  ;;  %v14622_v35 = vmax.f32 %v29575_v11, 0.0  ;;  %v29577_v2 = vadd.f32 %v36669_v15, %v28186_v24  ;;  %v14320_v19 = vpop.f32.mrb[115].mxu1 }
 0xdb6   : > { %v14620_v3 = vmax.f32 %v29576_v57, 0.0  ;;  %v29578_v27 = vadd.f32 %v36669_v15, %v14320_v19 }
 0xdb7   : > { %39895 = vst [vmem:[#allocation84_spill] sm:$0xff] %v36927_v31  ;;  %39896 = vst [vmem:[#allocation85_spill] sm:$0xff] %v36929_v51  ;;  %v14623_v53 = vmax.f32 %v29577_v2, 0.0  ;;  %28300 = vmatmul.mubr.msk.bf16.gmra.mrb[220].mxu1 %vm7466_vm3, %v36812_v44  ;;  %v15027_v23 = vrot.slane %v14622_v35, 7 }
 0xdb8   : > { %v14696_v34 = vrot.slane %v14620_v3, 1  ;;  %v15024_v41 = vrot.slane %v14620_v3, 7  ;;  %v14621_v56 = vmax.f32 %v29578_v27, 0.0  ;;  %28303 = vmatprep.mubr.msk.bf16.mxu1 %vm7466_vm3, %v36833_v37  ;;  %28480 = vmatmul.mubr.msk.bf16.vlgmr.msra.gmra.mrb[32].mxu0 %vm7466_vm3, %v36308_v29  ;;  %v32155_v3 = vld [vmem:[%s39365_s5 + $0x30] sm:$0xff]  }
 0xdb9   : > { %v15029_v11 = vrot.slane %v14623_v53, 7  ;;  %v15240_v10 = vrot.slane %v14623_v53, 5  ;;  %28608 = vmatpush3.bf16.msra.mxu0 %v36577_v59  ;;  %28483 = vmatprep.mubr.msk.bf16.mxu0 %vm7466_vm3, %v36329_v4 }
 0xdba   : > { %v15025_v54 = vrot.slane %v14621_v56, 7  ;;  %v28189_v14 = vpop.f32.mrb[116].mxu1  ;;  %28609 = vmatprep.subr.bf16.mxu0 %v32154_v0  ;;  %v15304_v59 = vsel %vm440_vm0, %v14696_v34, %v15024_v41 }
 0xdbb   : > { %v15030_v57 = vsel %vm440_vm0, %v15027_v23, %v15029_v11  ;;  %v36950_v24 = vsel %vm440_vm0, %v15029_v11, %v15240_v10  ;;  %v29579_v35 = vadd.f32 %v36669_v15, %v28189_v14  ;;  %v14333_v2 = vpop.f32.mrb[117].mxu1 }
 0xdbc   : > { %39897 = vst [vmem:[#allocation86_spill] sm:$0xff] %v36950_v24  ;;  %v15026_v19 = vsel %vm440_vm0, %v15024_v41, %v15025_v54  ;;  %v15028_v27 = vsel %vm440_vm0, %v15025_v54, %v15027_v23  ;;  %v29580_v53 = vadd.f32 %v36669_v15, %v14333_v2  ;;  %v28190_v56 = vpop.f32.mrb[118].mxu1 }
 0xdbd   : > { %v36957_v4 = vpack.c.bf16 %v15026_v19, %v15304_v59  ;;  %v36959_v29 = vpack.c.bf16 %v15030_v57, %v15028_v27  ;;  %v14626_v37 = vmax.f32 %v29579_v35, 0.0  ;;  %v29581_v11 = vadd.f32 %v36669_v15, %v28190_v56  ;;  %v14336_v10 = vpop.f32.mrb[119].mxu1  ;;  %28610 = vmatpush3.bf16.msra.mxu0 %v32154_v0 }
 0xdbe   : > { %v14624_v14 = vmax.f32 %v29580_v53, 0.0  ;;  %v29582_v24 = vadd.f32 %v36669_v15, %v14336_v10  ;;  %28611 = vmatprep.subr.bf16.mxu0 %v32155_v3 }
 0xdbf   : > { %39898 = vst [vmem:[#allocation87_spill] sm:$0xff] %v36957_v4  ;;  %39899 = vst [vmem:[#allocation88_spill] sm:$0xff] %v36959_v29  ;;  %v14627_v34 = vmax.f32 %v29581_v11, 0.0  ;;  %28304 = vmatmul.mubr.msk.bf16.gmra.mrb[224].mxu1 %vm7466_vm3, %v36835_v55  ;;  %v15034_v57 = vrot.slane %v14626_v37, 7 }
 0xdc0   : > { %v14697_v41 = vrot.slane %v14624_v14, 1  ;;  %v15031_v23 = vrot.slane %v14624_v14, 7  ;;  %v14625_v54 = vmax.f32 %v29582_v24, 0.0  ;;  %28307 = vmatprep.mubr.msk.bf16.mxu1 %vm7466_vm3, %v36856_v48  ;;  %28484 = vmatmul.mubr.msk.bf16.gmra.mrb[36].mxu0 %vm7466_vm3, %v36331_v6 }
 0xdc1   : > { %v15036_v35 = vrot.slane %v14627_v34, 7  ;;  %v15241_v0 = vrot.slane %v14627_v34, 5  ;;  %28487 = vmatprep.mubr.msk.bf16.mxu0 %vm7466_vm3, %v36352_v22  ;;  %28612 = vmatpush3.bf16.msra.mxu0 %v32155_v3 }
 0xdc2   : > { %v15032_v2 = vrot.slane %v14625_v54, 7  ;;  %v28193_v59 = vpop.f32.mrb[120].mxu1  ;;  %v15305_v56 = vsel %vm440_vm0, %v14697_v41, %v15031_v23 }
 0xdc3   : > { %v15037_v19 = vsel %vm440_vm0, %v15034_v57, %v15036_v35  ;;  %v36973_v27 = vsel %vm440_vm0, %v15036_v35, %v15241_v0  ;;  %v29583_v24 = vadd.f32 %v36669_v15, %v28193_v59  ;;  %v14349_v53 = vpop.f32.mrb[121].mxu1 }
 0xdc4   : > { %39900 = vst [vmem:[#allocation89_spill] sm:$0xff] %v36973_v27  ;;  %v15033_v37 = vsel %vm440_vm0, %v15031_v23, %v15032_v2  ;;  %v15035_v11 = vsel %vm440_vm0, %v15032_v2, %v15034_v57  ;;  %v29584_v10 = vadd.f32 %v36669_v15, %v14349_v53  ;;  %v28194_v14 = vpop.f32.mrb[122].mxu1 }
 0xdc5   : > { %v36980_v3 = vpack.c.bf16 %v15033_v37, %v15305_v56  ;;  %v36982_v34 = vpack.c.bf16 %v15037_v19, %v15035_v11  ;;  %v14630_v54 = vmax.f32 %v29583_v24, 0.0  ;;  %v29585_v35 = vadd.f32 %v36669_v15, %v28194_v14  ;;  %v14352_v0 = vpop.f32.mrb[123].mxu1 }
 0xdc6   : > { %v14628_v27 = vmax.f32 %v29584_v10, 0.0  ;;  %v29586_v59 = vadd.f32 %v36669_v15, %v14352_v0 }
 0xdc7   : > { %39901 = vst [vmem:[#allocation90_spill] sm:$0xff] %v36980_v3  ;;  %39902 = vst [vmem:[#allocation91_spill] sm:$0xff] %v36982_v34  ;;  %v14631_v22 = vmax.f32 %v29585_v35, 0.0  ;;  %28308 = vmatmul.mubr.msk.bf16.gmra.mrb[228].mxu1 %vm7466_vm3, %v36858_v9  ;;  %v15041_v2 = vrot.slane %v14630_v54, 7 }
 0xdc8   : > { %v14698_v41 = vrot.slane %v14628_v27, 1  ;;  %v15038_v23 = vrot.slane %v14628_v27, 7  ;;  %v14629_v57 = vmax.f32 %v29586_v59, 0.0  ;;  %28311 = vmatprep.mubr.msk.bf16.mxu1 %vm7466_vm3, %v36879_v36  ;;  %28488 = vmatmul.mubr.msk.bf16.gmra.mrb[40].mxu0 %vm7466_vm3, %v36354_v43 }
 0xdc9   : > { %v15043_v19 = vrot.slane %v14631_v22, 7  ;;  %v15242_v24 = vrot.slane %v14631_v22, 5  ;;  %28491 = vmatprep.mubr.msk.bf16.mxu0 %vm7466_vm3, %v36375_v33 }
 0xdca   : > { %v15039_v53 = vrot.slane %v14629_v57, 7  ;;  %v28197_v56 = vpop.f32.mrb[124].mxu1  ;;  %v15306_v14 = vsel %vm440_vm0, %v14698_v41, %v15038_v23 }
 0xdcb   : > { %v15044_v37 = vsel %vm440_vm0, %v15041_v2, %v15043_v19  ;;  %v36996_v11 = vsel %vm440_vm0, %v15043_v19, %v15242_v24  ;;  %v29587_v27 = vadd.f32 %v36669_v15, %v28197_v56  ;;  %v14365_v10 = vpop.f32.mrb[125].mxu1 }
 0xdcc   : > { %39903 = vst [vmem:[#allocation92_spill] sm:$0xff] %v36996_v11  ;;  %v15040_v35 = vsel %vm440_vm0, %v15038_v23, %v15039_v53  ;;  %v15042_v54 = vsel %vm440_vm0, %v15039_v53, %v15041_v2  ;;  %v29588_v22 = vadd.f32 %v36669_v15, %v14365_v10  ;;  %v28198_v0 = vpop.f32.mrb[126].mxu1 }
 0xdcd   : > { %v37003_v59 = vpack.c.bf16 %v15040_v35, %v15306_v14  ;;  %v37005_v57 = vpack.c.bf16 %v15044_v37, %v15042_v54  ;;  %v14634_v33 = vmax.f32 %v29587_v27, 0.0  ;;  %v29589_v19 = vadd.f32 %v36669_v15, %v28198_v0  ;;  %v14368_v24 = vpop.f32.mrb[127].mxu1 }
 0xdce   : > { %v14632_v11 = vmax.f32 %v29588_v22, 0.0  ;;  %v29590_v56 = vadd.f32 %v36669_v15, %v14368_v24 }
 0xdcf   : > { %39904 = vst [vmem:[#allocation93_spill] sm:$0xff] %v37003_v59  ;;  %39905 = vst [vmem:[#allocation94_spill] sm:$0xff] %v37005_v57  ;;  %v14635_v43 = vmax.f32 %v29589_v19, 0.0  ;;  %28312 = vmatmul.mubr.msk.bf16.gmra.mrb[232].mxu1 %vm7466_vm3, %v36881_v39  ;;  %v15048_v53 = vrot.slane %v14634_v33, 7 }
 0xdd0   : > { %v14699_v41 = vrot.slane %v14632_v11, 1  ;;  %v15045_v23 = vrot.slane %v14632_v11, 7  ;;  %v14633_v2 = vmax.f32 %v29590_v56, 0.0  ;;  %28315 = vmatprep.mubr.msk.bf16.mxu1 %vm7466_vm3, %v36902_v42  ;;  %28492 = vmatmul.mubr.msk.bf16.gmra.mrb[44].mxu0 %vm7466_vm3, %v36377_v7 }
 0xdd1   : > { %v15050_v37 = vrot.slane %v14635_v43, 7  ;;  %v15243_v27 = vrot.slane %v14635_v43, 5  ;;  %28495 = vmatprep.mubr.msk.bf16.mxu0 %vm7466_vm3, %v36400_v28 }
 0xdd2   : > { %v15046_v15 = vrot.slane %v14633_v2, 7  ;;  %v37017_v10 = vpop.f32.mrb[128].mxu1  ;;  %v15307_v54 = vsel %vm440_vm0, %v14699_v41, %v15045_v23 }
 0xdd3   : > { %39906 = vst [vmem:[#allocation95_spill] sm:$0xff] %v37017_v10  ;;  %v15051_v14 = vsel %vm440_vm0, %v15048_v53, %v15050_v37  ;;  %v37021_v11 = vsel %vm440_vm0, %v15050_v37, %v15243_v27  ;;  %v37023_v35 = vpop.f32.mrb[129].mxu1 }
 0xdd4   : > { %39907 = vst [vmem:[#allocation96_spill] sm:$0xff] %v37021_v11  ;;  %39908 = vst [vmem:[#allocation97_spill] sm:$0xff] %v37023_v35  ;;  %v15047_v22 = vsel %vm440_vm0, %v15045_v23, %v15046_v15  ;;  %v15049_v33 = vsel %vm440_vm0, %v15046_v15, %v15048_v53  ;;  %v37028_v43 = vpop.f32.mrb[130].mxu1 }
 0xdd5   : > { %39909 = vst [vmem:[#allocation98_spill] sm:$0xff] %v37028_v43  ;;  %v37030_v0 = vpack.c.bf16 %v15047_v22, %v15307_v54  ;;  %v37032_v19 = vpack.c.bf16 %v15051_v14, %v15049_v33  ;;  %v37034_v24 = vpop.f32.mrb[131].mxu1 }
 0xdd6   : > { %39912 = vst [vmem:[#allocation101_spill] sm:$0xff] %v37034_v24 }
 0xdd7   : > { %39910 = vst [vmem:[#allocation99_spill] sm:$0xff] %v37030_v0  ;;  %39911 = vst [vmem:[#allocation100_spill] sm:$0xff] %v37032_v19  ;;  %28316 = vmatmul.mubr.msk.bf16.gmra.mrb[236].mxu1 %vm7466_vm3, %v36904_v52 }
 0xdd8   : > { %28319 = vmatprep.mubr.msk.bf16.mxu1 %vm7466_vm3, %v36927_v31  ;;  %28496 = vmatmul.mubr.msk.bf16.gmra.mrb[48].mxu0 %vm7466_vm3, %v36402_v30 }
 0xdd9   : > { %28499 = vmatprep.mubr.msk.bf16.mxu0 %vm7466_vm3, %v36430_v25 }
 0xdda   : > { %v37044_v56 = vpop.f32.mrb[132].mxu1 }
 0xddb   : > { %39913 = vst [vmem:[#allocation102_spill] sm:$0xff] %v37044_v56  ;;  %v37046_v41 = vpop.f32.mrb[133].mxu1 }
 0xddc   : > { %39914 = vst [vmem:[#allocation103_spill] sm:$0xff] %v37046_v41  ;;  %v37048_v23 = vpop.f32.mrb[134].mxu1 }
 0xddd   : > { %39915 = vst [vmem:[#allocation104_spill] sm:$0xff] %v37048_v23  ;;  %v37050_v2 = vpop.f32.mrb[135].mxu1 }
 0xdde   : > { %39916 = vst [vmem:[#allocation105_spill] sm:$0xff] %v37050_v2 }
 0xddf   : > { %28320 = vmatmul.mubr.msk.bf16.gmra.mrb[240].mxu1 %vm7466_vm3, %v36929_v51 }
 0xde0   : > { %28323 = vmatprep.mubr.msk.bf16.mxu1 %vm7466_vm3, %v36957_v4  ;;  %28500 = vmatmul.mubr.msk.bf16.gmra.mrb[52].mxu0 %vm7466_vm3, %v36432_v18 }
 0xde1   : > { %28503 = vmatprep.mubr.msk.bf16.mxu0 %vm7466_vm3, %v36454_v17 }
 0xde2   : > { %v37060_v53 = vpop.f32.mrb[136].mxu1 }
 0xde3   : > { %39917 = vst [vmem:[#allocation106_spill] sm:$0xff] %v37060_v53  ;;  %v37062_v37 = vpop.f32.mrb[137].mxu1 }
 0xde4   : > { %39918 = vst [vmem:[#allocation107_spill] sm:$0xff] %v37062_v37  ;;  %v37064_v27 = vpop.f32.mrb[138].mxu1 }
 0xde5   : > { %39919 = vst [vmem:[#allocation108_spill] sm:$0xff] %v37064_v27  ;;  %v37066_v15 = vpop.f32.mrb[139].mxu1 }
 0xde6   : > { %39920 = vst [vmem:[#allocation109_spill] sm:$0xff] %v37066_v15 }
 0xde7   : > { %28324 = vmatmul.mubr.msk.bf16.gmra.mrb[244].mxu1 %vm7466_vm3, %v36959_v29 }
 0xde8   : > { %28327 = vmatprep.mubr.msk.bf16.mxu1 %vm7466_vm3, %v36980_v3  ;;  %28504 = vmatmul.mubr.msk.bf16.gmra.mrb[56].mxu0 %vm7466_vm3, %v36456_v13 }
 0xde9   : > { %28507 = vmatprep.mubr.msk.bf16.mxu0 %vm7466_vm3, %v36477_v5 }
 0xdea   : > { %v37076_v14 = vpop.f32.mrb[140].mxu1 }
 0xdeb   : > { %39921 = vst [vmem:[#allocation110_spill] sm:$0xff] %v37076_v14  ;;  %v37078_v54 = vpop.f32.mrb[141].mxu1 }
 0xdec   : > { %39922 = vst [vmem:[#allocation111_spill] sm:$0xff] %v37078_v54  ;;  %v37080_v22 = vpop.f32.mrb[142].mxu1 }
 0xded   : > { %39923 = vst [vmem:[#allocation112_spill] sm:$0xff] %v37080_v22  ;;  %v37082_v33 = vpop.f32.mrb[143].mxu1 }
 0xdee   : > { %39924 = vst [vmem:[#allocation113_spill] sm:$0xff] %v37082_v33  ;;  %v32156_v33 = vld [vmem:[%s39365_s5 + $0x38] sm:$0xff]  }
 0xdef   : > { %28328 = vmatmul.mubr.msk.bf16.gmra.mrb[248].mxu1 %vm7466_vm3, %v36982_v34  ;;  %28613 = vmatprep.subr.bf16.mxu0 %v32156_v33 }
 0xdf0   : > { %28331 = vmatprep.mubr.msk.bf16.mxu1 %vm7466_vm3, %v37003_v59  ;;  %28508 = vmatmul.mubr.msk.bf16.gmra.mrb[60].mxu0 %vm7466_vm3, %v36479_v50 }
 0xdf1   : > { %28511 = vmatprep.mubr.msk.bf16.mxu0 %vm7466_vm3, %v36500_v40  ;;  %28614 = vmatpush3.bf16.msra.mxu0 %v32156_v33 }
 0xdf2   : > { %v37092_v15 = vpop.f32.mrb[144].mxu1 }
 0xdf3   : > { %39925 = vst [vmem:[#allocation114_spill] sm:$0xff] %v37092_v15  ;;  %v37094_v14 = vpop.f32.mrb[145].mxu1 }
 0xdf4   : > { %39926 = vst [vmem:[#allocation115_spill] sm:$0xff] %v37094_v14  ;;  %v37096_v54 = vpop.f32.mrb[146].mxu1 }
 0xdf5   : > { %39927 = vst [vmem:[#allocation116_spill] sm:$0xff] %v37096_v54  ;;  %v37098_v22 = vpop.f32.mrb[147].mxu1 }
 0xdf6   : > { %39928 = vst [vmem:[#allocation117_spill] sm:$0xff] %v37098_v22 }
 0xdf7   : > { %28332 = vmatmul.mubr.msk.bf16.gmra.mrb[252].mxu1 %vm7466_vm3, %v37005_v57 }
 0xdf8   : > { %28451 = vmatprep.mubr.msk.bf16.mxu1 %vm7466_vm3, %v36927_v31  ;;  %28512 = vmatmul.mubr.msk.bf16.gmra.mrb[64].mxu0 %vm7466_vm3, %v36502_v16 }
 0xdf9   : > { %28515 = vmatprep.mubr.msk.bf16.mxu0 %vm7466_vm3, %v36523_v58 }
 0xdfa   : > { %v37111_v54 = vpop.f32.mrb[148].mxu1 }
 0xdfb   : > { %39929 = vst [vmem:[#allocation118_spill] sm:$0xff] %v37111_v54  ;;  %v37113_v22 = vpop.f32.mrb[149].mxu1 }
 0xdfc   : > { %39930 = vst [vmem:[#allocation119_spill] sm:$0xff] %v37113_v22  ;;  %v37115_v14 = vpop.f32.mrb[150].mxu1 }
 0xdfd   : > { %39931 = vst [vmem:[#allocation120_spill] sm:$0xff] %v37115_v14  ;;  %v37117_v15 = vpop.f32.mrb[151].mxu1 }
 0xdfe   : > { %39932 = vst [vmem:[#allocation121_spill] sm:$0xff] %v37117_v15 }
 0xdff   : > { %28452 = vmatmul.mubr.msk.bf16.vlgmr.msra.gmra.mrb[236].mxu1 %vm7466_vm3, %v36929_v51 }
 0xe00   : > { %28455 = vmatprep.mubr.msk.bf16.mxu1 %vm7466_vm3, %v36957_v4  ;;  %28516 = vmatmul.mubr.msk.bf16.gmra.mrb[68].mxu0 %vm7466_vm3, %v36525_v60 }
 0xe01   : > { %28519 = vmatprep.mubr.msk.bf16.mxu0 %vm7466_vm3, %v36546_v61 }
 0xe02   : > { %v37127_v54 = vpop.f32.mrb[152].mxu1 }
 0xe03   : > { %39933 = vst [vmem:[#allocation122_spill] sm:$0xff] %v37127_v54  ;;  %v37129_v33 = vpop.f32.mrb[153].mxu1 }
 0xe04   : > { %39934 = vst [vmem:[#allocation123_spill] sm:$0xff] %v37129_v33  ;;  %v37131_v22 = vpop.f32.mrb[154].mxu1 }
 0xe05   : > { %39935 = vst [vmem:[#allocation124_spill] sm:$0xff] %v37131_v22  ;;  %v37133_v14 = vpop.f32.mrb[155].mxu1 }
 0xe06   : > { %39936 = vst [vmem:[#allocation125_spill] sm:$0xff] %v37133_v14 }
 0xe07   : > { %28456 = vmatmul.mubr.msk.bf16.gmra.mrb[240].mxu1 %vm7466_vm3, %v36959_v29 }
 0xe08   : > { %28459 = vmatprep.mubr.msk.bf16.mxu1 %vm7466_vm3, %v36980_v3  ;;  %28520 = vmatmul.mubr.msk.bf16.gmra.mrb[72].mxu0 %vm7466_vm3, %v36548_v62 }
 0xe09   : > { %28523 = vmatprep.mubr.msk.bf16.mxu0 %vm7466_vm3, %v36569_v12 }
 0xe0a   : > { %v37143_v15 = vpop.f32.mrb[156].mxu1 }
 0xe0b   : > { %39937 = vst [vmem:[#allocation126_spill] sm:$0xff] %v37143_v15  ;;  %v37145_v54 = vpop.f32.mrb[157].mxu1 }
 0xe0c   : > { %39938 = vst [vmem:[#allocation127_spill] sm:$0xff] %v37145_v54  ;;  %v37147_v33 = vpop.f32.mrb[158].mxu1 }
 0xe0d   : > { %39939 = vst [vmem:[#allocation128_spill] sm:$0xff] %v37147_v33  ;;  %v37149_v22 = vpop.f32.mrb[159].mxu1 }
 0xe0e   : > { %39940 = vst [vmem:[#allocation129_spill] sm:$0xff] %v37149_v22 }
 0xe0f   : > { %28460 = vmatmul.mubr.msk.bf16.gmra.mrb[244].mxu1 %vm7466_vm3, %v36982_v34 }
 0xe10   : > { %28463 = vmatprep.mubr.msk.bf16.mxu1 %vm7466_vm3, %v37003_v59  ;;  %28524 = vmatmul.mubr.msk.bf16.gmra.mrb[76].mxu0 %vm7466_vm3, %v36571_v1 }
 0xe11   : > { %28527 = vmatprep.mubr.msk.bf16.mxu0 %vm7466_vm3, %v36598_v45 }
 0xe12   : > { %v37159_v14 = vpop.f32.mrb[160].mxu1 }
 0xe13   : > { %39941 = vst [vmem:[#allocation130_spill] sm:$0xff] %v37159_v14  ;;  %v37161_v15 = vpop.f32.mrb[161].mxu1 }
 0xe14   : > { %39942 = vst [vmem:[#allocation131_spill] sm:$0xff] %v37161_v15  ;;  %v37163_v54 = vpop.f32.mrb[162].mxu1 }
 0xe15   : > { %39943 = vst [vmem:[#allocation132_spill] sm:$0xff] %v37163_v54  ;;  %v37165_v33 = vpop.f32.mrb[163].mxu1 }
 0xe16   : > { %39944 = vst [vmem:[#allocation133_spill] sm:$0xff] %v37165_v33 }
 0xe17   : > { %28464 = vmatmul.mubr.msk.bf16.gmra.mrb[248].mxu1 %vm7466_vm3, %v37005_v57 }
 0xe18   : > { %28467 = vmatprep.mubr.msk.bf16.mxu1 %vm7466_vm3, %v37030_v0  ;;  %28528 = vmatmul.mubr.msk.bf16.gmra.mrb[80].mxu0 %vm7466_vm3, %v36600_v8 }
 0xe19   : > { %28531 = vmatprep.mubr.msk.bf16.mxu0 %vm7466_vm3, %v36621_v21 }
 0xe1a   : > { %v37175_v22 = vpop.f32.mrb[164].mxu1 }
 0xe1b   : > { %39945 = vst [vmem:[#allocation134_spill] sm:$0xff] %v37175_v22  ;;  %v37177_v14 = vpop.f32.mrb[165].mxu1 }
 0xe1c   : > { %39946 = vst [vmem:[#allocation135_spill] sm:$0xff] %v37177_v14  ;;  %v37179_v15 = vpop.f32.mrb[166].mxu1 }
 0xe1d   : > { %39947 = vst [vmem:[#allocation136_spill] sm:$0xff] %v37179_v15  ;;  %v37181_v54 = vpop.f32.mrb[167].mxu1 }
 0xe1e   : > { %39948 = vst [vmem:[#allocation137_spill] sm:$0xff] %v37181_v54 }
 0xe1f   : > { %28468 = vmatmul.mubr.msk.bf16.gmra.mrb[252].mxu1 %vm7466_vm3, %v37032_v19 }
 0xe20   : > { %28532 = vmatmul.mubr.msk.bf16.gmra.mrb[84].mxu0 %vm7466_vm3, %v36623_v32 }
 0xe21   : > { %28535 = vmatprep.mubr.msk.bf16.mxu0 %vm7466_vm3, %v36644_v47 }
 0xe22   : > { %v37189_v33 = vpop.f32.mrb[168].mxu1 }
 0xe23   : > { %39949 = vst [vmem:[#allocation138_spill] sm:$0xff] %v37189_v33  ;;  %v37191_v27 = vpop.f32.mrb[169].mxu1 }
 0xe24   : > { %39950 = vst [vmem:[#allocation139_spill] sm:$0xff] %v37191_v27  ;;  %v37193_v22 = vpop.f32.mrb[170].mxu1  ;;  %v39962_v27 = vld [vmem:[#allocation57_spill] sm:$0xff] }
 0xe25   : > { %39951 = vst [vmem:[#allocation140_spill] sm:$0xff] %v37193_v22  ;;  %v37195_v14 = vpop.f32.mrb[171].mxu1 }
 0xe26   : > { %39952 = vst [vmem:[#allocation141_spill] sm:$0xff] %v37195_v14  ;;  %v37216_v14 = vld [vmem:[%s39365_s5 + $0x80] sm:$0xff]  }
 0xe27   : > { %28743 = vmatprep.subr.bf16.mxu0 %v37216_v14 }
 0xe28   : > { %28536 = vmatmul.mubr.msk.bf16.gmra.mrb[88].mxu0 %vm7466_vm3, %v36646_v63 }
 0xe29   : > { %28539 = vmatprep.mubr.msk.bf16.mxu0 %vm7466_vm3, %v36672_v26 }
 0xe2a   : > { %v37201_v54 = vpop.f32.mrb[172].mxu1 }
 0xe2b   : > { %39953 = vst [vmem:[#allocation142_spill] sm:$0xff] %v37201_v54  ;;  %v37203_v15 = vpop.f32.mrb[173].mxu1 }
 0xe2c   : > { %39954 = vst [vmem:[#allocation143_spill] sm:$0xff] %v37203_v15  ;;  %v37205_v37 = vpop.f32.mrb[174].mxu1  ;;  %v39961_v15 = vld [vmem:[#allocation55_spill] sm:$0xff] }
 0xe2d   : > { %39955 = vst [vmem:[#allocation144_spill] sm:$0xff] %v37205_v37  ;;  %v37207_v53 = vpop.f32.mrb[175].mxu1 }
 0xe2e   : > { %39956 = vst [vmem:[#allocation145_spill] sm:$0xff] %v37207_v53 }
 0xe30   : > { %28540 = vmatmul.mubr.msk.bf16.gmra.mrb[92].mxu0 %vm7466_vm3, %v36674_v38 }
 0xe31   : > { %28543 = vmatprep.mubr.msk.bf16.mxu0 %vm7466_vm3, %v36695_v49 }
 0xe32   : > { %v37218_v22 = vpop.f32.mrb[176].mxu1 }
 0xe33   : > { %39957 = vst [vmem:[#allocation146_spill] sm:$0xff] %v37218_v22  ;;  %v37220_v54 = vpop.f32.mrb[177].mxu1 }
 0xe34   : > { %39958 = vst [vmem:[#allocation147_spill] sm:$0xff] %v37220_v54  ;;  %v37223_v37 = vpop.f32.mrb[178].mxu1  ;;  %v39967_v54 = vld [vmem:[#allocation58_spill] sm:$0xff] }
 0xe35   : > { %39959 = vst [vmem:[#allocation148_spill] sm:$0xff] %v37223_v37  ;;  %v37225_v53 = vpop.f32.mrb[179].mxu1  ;;  %v39968_v37 = vld [vmem:[#allocation60_spill] sm:$0xff] }
 0xe36   : > { %39960 = vst [vmem:[#allocation149_spill] sm:$0xff] %v37225_v53 }
 0xe38   : > { %28544 = vmatmul.mubr.msk.bf16.gmra.mrb[96].mxu0 %vm7466_vm3, %v39961_v15 }
 0xe39   : > { %28547 = vmatprep.mubr.msk.bf16.mxu0 %vm7466_vm3, %v39962_v27 }
 0xe3a   : > { %v37231_v33 = vpop.f32.mrb[180].mxu1 }
 0xe3b   : > { %39963 = vst [vmem:[#allocation150_spill] sm:$0xff] %v37231_v33  ;;  %v37233_v2 = vpop.f32.mrb[181].mxu1  ;;  %v39973_v33 = vld [vmem:[#allocation61_spill] sm:$0xff] }
 0xe3c   : > { %39964 = vst [vmem:[#allocation151_spill] sm:$0xff] %v37233_v2  ;;  %v37235_v23 = vpop.f32.mrb[182].mxu1 }
 0xe3d   : > { %39965 = vst [vmem:[#allocation152_spill] sm:$0xff] %v37235_v23  ;;  %v37237_v22 = vpop.f32.mrb[183].mxu1  ;;  %v39974_v23 = vld [vmem:[#allocation63_spill] sm:$0xff] }
 0xe3e   : > { %39966 = vst [vmem:[#allocation153_spill] sm:$0xff] %v37237_v22 }
 0xe40   : > { %28548 = vmatmul.mubr.msk.bf16.gmra.mrb[100].mxu0 %vm7466_vm3, %v39967_v54 }
 0xe41   : > { %28551 = vmatprep.mubr.msk.bf16.mxu0 %vm7466_vm3, %v39968_v37 }
 0xe42   : > { %v37243_v53 = vpop.f32.mrb[184].mxu1 }
 0xe43   : > { %39969 = vst [vmem:[#allocation154_spill] sm:$0xff] %v37243_v53  ;;  %v37245_v41 = vpop.f32.mrb[185].mxu1  ;;  %v39979_v53 = vld [vmem:[#allocation64_spill] sm:$0xff] }
 0xe44   : > { %39970 = vst [vmem:[#allocation155_spill] sm:$0xff] %v37245_v41  ;;  %v37247_v56 = vpop.f32.mrb[186].mxu1 }
 0xe45   : > { %39971 = vst [vmem:[#allocation156_spill] sm:$0xff] %v37247_v56  ;;  %v37249_v24 = vpop.f32.mrb[187].mxu1  ;;  %v39980_v56 = vld [vmem:[#allocation66_spill] sm:$0xff] }
 0xe46   : > { %39972 = vst [vmem:[#allocation157_spill] sm:$0xff] %v37249_v24 }
 0xe48   : > { %28552 = vmatmul.mubr.msk.bf16.gmra.mrb[104].mxu0 %vm7466_vm3, %v39973_v33 }
 0xe49   : > { %28555 = vmatprep.mubr.msk.bf16.mxu0 %vm7466_vm3, %v39974_v23 }
 0xe4a   : > { %v37255_v22 = vpop.f32.mrb[188].mxu1 }
 0xe4b   : > { %39975 = vst [vmem:[#allocation158_spill] sm:$0xff] %v37255_v22  ;;  %v37257_v2 = vpop.f32.mrb[189].mxu1 }
 0xe4c   : > { %39976 = vst [vmem:[#allocation159_spill] sm:$0xff] %v37257_v2  ;;  %v37259_v43 = vpop.f32.mrb[190].mxu1 }
 0xe4d   : > { %39977 = vst [vmem:[#allocation160_spill] sm:$0xff] %v37259_v43  ;;  %v37261_v35 = vpop.f32.mrb[191].mxu1 }
 0xe4e   : > { %39978 = vst [vmem:[#allocation161_spill] sm:$0xff] %v37261_v35 }
 0xe50   : > { %28556 = vmatmul.mubr.msk.bf16.gmra.mrb[108].mxu0 %vm7466_vm3, %v39979_v53 }
 0xe51   : > { %28559 = vmatprep.mubr.msk.bf16.mxu0 %vm7466_vm3, %v39980_v56 }
 0xe52   : > { %v37267_v24 = vpop.f32.mrb[192].mxu1 }
 0xe53   : > { %39981 = vst [vmem:[#allocation162_spill] sm:$0xff] %v37267_v24  ;;  %v37269_v41 = vpop.f32.mrb[193].mxu1 }
 0xe54   : > { %39982 = vst [vmem:[#allocation163_spill] sm:$0xff] %v37269_v41  ;;  %v37271_v10 = vpop.f32.mrb[194].mxu1 }
 0xe55   : > { %39983 = vst [vmem:[#allocation164_spill] sm:$0xff] %v37271_v10  ;;  %v37273_v11 = vpop.f32.mrb[195].mxu1  ;;  %v39989_v10 = vld [vmem:[#allocation72_spill] sm:$0xff] }
 0xe56   : > { %39984 = vst [vmem:[#allocation165_spill] sm:$0xff] %v37273_v11 }
 0xe58   : > { %28560 = vmatmul.mubr.msk.bf16.gmra.mrb[112].mxu0 %vm7466_vm3, %v36789_v46 }
 0xe59   : > { %28563 = vmatprep.mubr.msk.bf16.mxu0 %vm7466_vm3, %v36810_v20 }
 0xe5a   : > { %v37279_v35 = vpop.f32.mrb[196].mxu1 }
 0xe5b   : > { %39985 = vst [vmem:[#allocation166_spill] sm:$0xff] %v37279_v35  ;;  %v37281_v43 = vpop.f32.mrb[197].mxu1 }
 0xe5c   : > { %39986 = vst [vmem:[#allocation167_spill] sm:$0xff] %v37281_v43  ;;  %v37283_v2 = vpop.f32.mrb[198].mxu1 }
 0xe5d   : > { %39987 = vst [vmem:[#allocation168_spill] sm:$0xff] %v37283_v2  ;;  %v37285_v22 = vpop.f32.mrb[199].mxu1 }
 0xe5e   : > { %39988 = vst [vmem:[#allocation169_spill] sm:$0xff] %v37285_v22 }
 0xe60   : > { %28564 = vmatmul.mubr.msk.bf16.gmra.mrb[116].mxu0 %vm7466_vm3, %v36812_v44 }
 0xe61   : > { %28567 = vmatprep.mubr.msk.bf16.mxu0 %vm7466_vm3, %v39989_v10 }
 0xe62   : > { %v37291_v11 = vpop.f32.mrb[200].mxu1 }
 0xe63   : > { %39990 = vst [vmem:[#allocation170_spill] sm:$0xff] %v37291_v11  ;;  %v37293_v41 = vpop.f32.mrb[201].mxu1 }
 0xe64   : > { %39991 = vst [vmem:[#allocation171_spill] sm:$0xff] %v37293_v41  ;;  %v37295_v24 = vpop.f32.mrb[202].mxu1 }
 0xe65   : > { %39992 = vst [vmem:[#allocation172_spill] sm:$0xff] %v37295_v24  ;;  %v37297_v20 = vpop.f32.mrb[203].mxu1 }
 0xe66   : > { %39993 = vst [vmem:[#allocation173_spill] sm:$0xff] %v37297_v20 }
 0xe68   : > { %28568 = vmatmul.mubr.msk.bf16.gmra.mrb[120].mxu0 %vm7466_vm3, %v36835_v55 }
 0xe69   : > { %28571 = vmatprep.mubr.msk.bf16.mxu0 %vm7466_vm3, %v36856_v48 }
 0xe6a   : > { %v37303_v22 = vpop.f32.mrb[204].mxu1 }
 0xe6b   : > { %39994 = vst [vmem:[#allocation174_spill] sm:$0xff] %v37303_v22  ;;  %v37305_v2 = vpop.f32.mrb[205].mxu1 }
 0xe6c   : > { %39995 = vst [vmem:[#allocation175_spill] sm:$0xff] %v37305_v2  ;;  %v37307_v43 = vpop.f32.mrb[206].mxu1 }
 0xe6d   : > { %39996 = vst [vmem:[#allocation176_spill] sm:$0xff] %v37307_v43  ;;  %v37309_v35 = vpop.f32.mrb[207].mxu1 }
 0xe6e   : > { %39997 = vst [vmem:[#allocation177_spill] sm:$0xff] %v37309_v35 }
 0xe70   : > { %28572 = vmatmul.mubr.msk.bf16.gmra.mrb[124].mxu0 %vm7466_vm3, %v36858_v9 }
 0xe71   : > { %28575 = vmatprep.mubr.msk.bf16.mxu0 %vm7466_vm3, %v36879_v36 }
 0xe72   : > { %v37315_v20 = vpop.f32.mrb[208].mxu1 }
 0xe73   : > { %39998 = vst [vmem:[#allocation178_spill] sm:$0xff] %v37315_v20  ;;  %v37317_v24 = vpop.f32.mrb[209].mxu1 }
 0xe74   : > { %39999 = vst [vmem:[#allocation179_spill] sm:$0xff] %v37317_v24  ;;  %v37319_v41 = vpop.f32.mrb[210].mxu1 }
 0xe75   : > { %40000 = vst [vmem:[#allocation180_spill] sm:$0xff] %v37319_v41  ;;  %v37321_v11 = vpop.f32.mrb[211].mxu1 }
 0xe76   : > { %40001 = vst [vmem:[#allocation181_spill] sm:$0xff] %v37321_v11 }
 0xe78   : > { %28576 = vmatmul.mubr.msk.bf16.gmra.mrb[128].mxu0 %vm7466_vm3, %v36881_v39 }
 0xe79   : > { %28579 = vmatprep.mubr.msk.bf16.mxu0 %vm7466_vm3, %v36902_v42 }
 0xe7a   : > { %v37327_v35 = vpop.f32.mrb[212].mxu1 }
 0xe7b   : > { %40002 = vst [vmem:[#allocation182_spill] sm:$0xff] %v37327_v35  ;;  %v37329_v43 = vpop.f32.mrb[213].mxu1 }
 0xe7c   : > { %40003 = vst [vmem:[#allocation183_spill] sm:$0xff] %v37329_v43  ;;  %v37331_v2 = vpop.f32.mrb[214].mxu1 }
 0xe7d   : > { %40004 = vst [vmem:[#allocation184_spill] sm:$0xff] %v37331_v2  ;;  %v37333_v22 = vpop.f32.mrb[215].mxu1 }
 0xe7e   : > { %40005 = vst [vmem:[#allocation185_spill] sm:$0xff] %v37333_v22 }
 0xe80   : > { %28580 = vmatmul.mubr.msk.bf16.gmra.mrb[132].mxu0 %vm7466_vm3, %v36904_v52 }
 0xe81   : > { %28583 = vmatprep.mubr.msk.bf16.mxu0 %vm7466_vm3, %v36927_v31 }
 0xe82   : > { %v37339_v11 = vpop.f32.mrb[216].mxu1 }
 0xe83   : > { %40006 = vst [vmem:[#allocation186_spill] sm:$0xff] %v37339_v11  ;;  %v37341_v41 = vpop.f32.mrb[217].mxu1 }
 0xe84   : > { %40007 = vst [vmem:[#allocation187_spill] sm:$0xff] %v37341_v41  ;;  %v37343_v24 = vpop.f32.mrb[218].mxu1 }
 0xe85   : > { %40008 = vst [vmem:[#allocation188_spill] sm:$0xff] %v37343_v24  ;;  %v37345_v20 = vpop.f32.mrb[219].mxu1 }
 0xe86   : > { %40009 = vst [vmem:[#allocation189_spill] sm:$0xff] %v37345_v20 }
 0xe88   : > { %28584 = vmatmul.mubr.msk.bf16.gmra.mrb[136].mxu0 %vm7466_vm3, %v36929_v51  ;;  %v40033_v51 = vld [vmem:[#allocation17_spill] sm:$0xff] }
 0xe89   : > { %28587 = vmatprep.mubr.msk.bf16.mxu0 %vm7466_vm3, %v36957_v4 }
 0xe8a   : > { %v37351_v22 = vpop.f32.mrb[220].mxu1 }
 0xe8b   : > { %40010 = vst [vmem:[#allocation190_spill] sm:$0xff] %v37351_v22  ;;  %v37353_v2 = vpop.f32.mrb[221].mxu1 }
 0xe8c   : > { %40011 = vst [vmem:[#allocation191_spill] sm:$0xff] %v37353_v2  ;;  %v37355_v43 = vpop.f32.mrb[222].mxu1 }
 0xe8d   : > { %40012 = vst [vmem:[#allocation192_spill] sm:$0xff] %v37355_v43  ;;  %v37357_v35 = vpop.f32.mrb[223].mxu1 }
 0xe8e   : > { %40013 = vst [vmem:[#allocation193_spill] sm:$0xff] %v37357_v35 }
 0xe90   : > { %28588 = vmatmul.mubr.msk.bf16.gmra.mrb[140].mxu0 %vm7466_vm3, %v36959_v29  ;;  %v40029_v29 = vld [vmem:[#allocation14_spill] sm:$0xff] }
 0xe91   : > { %28591 = vmatprep.mubr.msk.bf16.mxu0 %vm7466_vm3, %v36980_v3  ;;  %v40028_v3 = vld [vmem:[#allocation18_spill] sm:$0xff] }
 0xe92   : > { %v37363_v20 = vpop.f32.mrb[224].mxu1 }
 0xe93   : > { %40014 = vst [vmem:[#allocation194_spill] sm:$0xff] %v37363_v20  ;;  %v37365_v24 = vpop.f32.mrb[225].mxu1  ;;  %v40025_v20 = vld [vmem:[#allocation24_spill] sm:$0xff] }
 0xe94   : > { %40015 = vst [vmem:[#allocation195_spill] sm:$0xff] %v37365_v24  ;;  %v37367_v41 = vpop.f32.mrb[226].mxu1 }
 0xe95   : > { %40016 = vst [vmem:[#allocation196_spill] sm:$0xff] %v37367_v41  ;;  %v37369_v11 = vpop.f32.mrb[227].mxu1 }
 0xe96   : > { %40017 = vst [vmem:[#allocation197_spill] sm:$0xff] %v37369_v11 }
 0xe98   : > { %28592 = vmatmul.mubr.msk.bf16.gmra.mrb[144].mxu0 %vm7466_vm3, %v36982_v34 }
 0xe99   : > { %28595 = vmatprep.mubr.msk.bf16.mxu0 %vm7466_vm3, %v37003_v59 }
 0xe9a   : > { %v37375_v35 = vpop.f32.mrb[228].mxu1 }
 0xe9b   : > { %40018 = vst [vmem:[#allocation198_spill] sm:$0xff] %v37375_v35  ;;  %v37377_v43 = vpop.f32.mrb[229].mxu1  ;;  %v17754_v35 = vshll.u32 %v40025_v20, 16 }
 0xe9c   : > { %40019 = vst [vmem:[#allocation199_spill] sm:$0xff] %v37377_v43  ;;  %v37379_v2 = vpop.f32.mrb[230].mxu1  ;;  %v40027_v43 = vld [vmem:[#allocation25_spill] sm:$0xff] }
 0xe9d   : > { %40020 = vst [vmem:[#allocation200_spill] sm:$0xff] %v37379_v2  ;;  %v37381_v22 = vpop.f32.mrb[231].mxu1  ;;  %v17752_v2 = vshrl.u32 %v40025_v20, 16  ;;  %v17762_v20 = vshrl.u32 %v40027_v43, 16 }
 0xe9e   : > { %40021 = vst [vmem:[#allocation201_spill] sm:$0xff] %v37381_v22  ;;  %v17756_v22 = vrot.slane %v17754_v35, 1 }
 0xea0   : > { %28596 = vmatmul.mubr.msk.bf16.gmra.mrb[148].mxu0 %vm7466_vm3, %v37005_v57 }
 0xea1   : > { %28599 = vmatprep.mubr.msk.bf16.mxu0 %vm7466_vm3, %v37030_v0  ;;  %v17758_v0 = vshll.u32 %v40027_v43, 16  ;;  %v40043_v43 = vld [vmem:[#allocation37_spill] sm:$0xff] }
 0xea2   : > { %v37387_v11 = vpop.f32.mrb[232].mxu1 }
 0xea3   : > { %40022 = vst [vmem:[#allocation202_spill] sm:$0xff] %v37387_v11  ;;  %v37389_v41 = vpop.f32.mrb[233].mxu1  ;;  %v17757_v11 = vor.u32 %v17756_v22, %v17752_v2  ;;  %v17760_v4 = vrot.slane %v17758_v0, 1  ;;  %v17770_v2 = vshrl.u32 %v40028_v3, 16  ;;  %v40032_v22 = vld [vmem:[#allocation13_spill] sm:$0xff] }
 0xea4   : > { %40023 = vst [vmem:[#allocation203_spill] sm:$0xff] %v37389_v41  ;;  %v37391_v24 = vpop.f32.mrb[234].mxu1  ;;  %v17772_v41 = vshll.u32 %v40028_v3, 16 }
 0xea5   : > { %40024 = vst [vmem:[#allocation204_spill] sm:$0xff] %v37391_v24  ;;  %v37394_v34 = vpop.f32.mrb[235].mxu1  ;;  %v37405_v24 = vpack.c.bf16 %v40029_v29, %v40029_v29  ;;  %v37410_v35 = vsel %vm1413_vm1, %v17757_v11, %v17760_v4  ;;  %v17776_v29 = vshll.u32 %v40032_v22, 16 }
 0xea6   : > { %40026 = vst [vmem:[#allocation205_spill] sm:$0xff] %v37394_v34  ;;  %40031 = vst [vmem:[#allocation206_spill] sm:$0xff] %v37410_v35  ;;  %v17774_v34 = vrot.slane %v17772_v41, 1  ;;  %v32158_v41 = vld [vmem:[%s39365_s5 + $0x88] sm:$0xff]  }
 0xea7   : > { %40030 = vst [vmem:[#allocation14_spill] sm:$0xff] %v37405_v24  ;;  %v17778_v31 = vrot.slane %v17776_v29, 1 }
 0xea8   : > { %28600 = vmatmul.mubr.msk.bf16.gmra.mrb[152].mxu0 %vm7466_vm3, %v37032_v19  ;;  %v17766_v19 = vshll.u32 %v37405_v24, 16  ;;  %v17775_v0 = vor.u32 %v17774_v34, %v17770_v2 }
 0xea9   : > { %28603 = vmatprep.mubr.msk.bf16.mxu0 %vm7466_vm3, %v37003_v59  ;;  %v17764_v59 = vor.u32 %v17762_v20, %v17760_v4  ;;  %v17780_v4 = vshrl.u32 %v40032_v22, 16 }
 0xeaa   : > { %v17768_v11 = vrot.slane %v17766_v19, 1  ;;  %v37431_v3 = vsel %vm1413_vm1, %v17775_v0, %v17778_v31 }
 0xeab   : > { %v17782_v34 = vor.u32 %v17780_v4, %v17778_v31  ;;  %v17794_v31 = vshll.u32 %v36331_v6, 16  ;;  %v40038_v4 = vld [vmem:[#allocation27_spill] sm:$0xff] }
 0xeac   : > { %v37426_v24 = vsel %vm1413_vm1, %v17764_v59, %v17768_v11  ;;  %v40036_v59 = vld [vmem:[#allocation22_spill] sm:$0xff] }
 0xead   : > { %40035 = vst [vmem:[#allocation207_spill] sm:$0xff] %v37426_v24  ;;  %v17790_v19 = vshll.u32 %v40036_v59, 16  ;;  %v17788_v0 = vshrl.u32 %v40036_v59, 16  ;;  %v40042_v59 = vld [vmem:[#allocation28_spill] sm:$0xff] }
 0xeaf   : > { %v17792_v29 = vrot.slane %v17790_v19, 1 }
 0xeb0   : > { %28604 = vmatmul.mubr.msk.bf16.gmra.mrb[156].mxu0 %vm7466_vm3, %v37005_v57  ;;  %v37420_v57 = vpack.c.bf16 %v40033_v51, %v40033_v51  ;;  %v32159_v51 = vld [vmem:[%s39365_s5 + $0x90] sm:$0xff]  }
 0xeb1   : > { %28615 = vmatprep.mubr.msk.bf16.mxu0 %vm7466_vm3, %v37410_v35  ;;  %v17793_v11 = vor.u32 %v17792_v29, %v17788_v0  ;;  %v17806_v0 = vshrl.u32 %v40038_v4, 16 }
 0xeb2   : > { %40034 = vst [vmem:[#allocation17_spill] sm:$0xff] %v37420_v57  ;;  %v17784_v20 = vshll.u32 %v37420_v57, 16 }
 0xeb4   : > { %v17786_v2 = vrot.slane %v17784_v20, 1  ;;  %v17808_v20 = vshll.u32 %v40038_v4, 16 }
 0xeb8   : > { %28616 = vmatmul.mubr.msk.bf16.vlgmr.msra.gmra.mrb[32].mxu0 %vm7466_vm3, %v37426_v24 }
 0xeb9   : > { %28744 = vmatpush3.bf16.msra.mxu0 %v37216_v14  ;;  %28619 = vmatprep.mubr.msk.bf16.mxu0 %vm7466_vm3, %v37431_v3  ;;  %v37443_v14 = vsel %vm1413_vm1, %v17782_v34, %v17786_v2  ;;  %v17796_v34 = vrot.slane %v17794_v31, 1  ;;  %v17810_v2 = vrot.slane %v17808_v20, 1 }
 0xeba   : > { %28745 = vmatprep.subr.bf16.mxu0 %v32158_v41  ;;  %40037 = vst [vmem:[#allocation208_spill] sm:$0xff] %v37443_v14 }
 0xebb   : > { %v37459_v19 = vsel %vm1413_vm1, %v17793_v11, %v17796_v34  ;;  %v17811_v31 = vor.u32 %v17810_v2, %v17806_v0 }
 0xebc   : > { %40041 = vst [vmem:[#allocation209_spill] sm:$0xff] %v37459_v19 }
 0xebd   : > { %28746 = vmatpush3.bf16.msra.mxu0 %v32158_v41  ;;  %v40039_v41 = vld [vmem:[#allocation21_spill] sm:$0xff] }
 0xebe   : > { %28747 = vmatprep.subr.bf16.mxu0 %v32159_v51  ;;  %v37454_v57 = vpack.c.bf16 %v40039_v41, %v40039_v41  ;;  %v17812_v41 = vshll.u32 %v40042_v59, 16 }
 0xec0   : > { %28620 = vmatmul.mubr.msk.bf16.gmra.mrb[36].mxu0 %vm7466_vm3, %v37443_v14  ;;  %40040 = vst [vmem:[#allocation21_spill] sm:$0xff] %v37454_v57  ;;  %v17802_v29 = vshll.u32 %v37454_v57, 16  ;;  %v17814_v14 = vrot.slane %v17812_v41, 1 }
 0xec1   : > { %28623 = vmatprep.mubr.msk.bf16.mxu0 %vm7466_vm3, %v37410_v35  ;;  %28748 = vmatpush3.bf16.msra.mxu0 %v32159_v51  ;;  %v17798_v51 = vshrl.u32 %v36331_v6, 16  ;;  %v17826_v35 = vshll.u32 %v40043_v43, 16 }
 0xec2   : > { %v17804_v20 = vrot.slane %v17802_v29, 1  ;;  %v37478_v4 = vsel %vm1413_vm1, %v17811_v31, %v17814_v14 }
 0xec3   : > { %v17800_v22 = vor.u32 %v17798_v51, %v17796_v34  ;;  %v17828_v57 = vrot.slane %v17826_v35, 1  ;;  %v17816_v34 = vshrl.u32 %v40042_v59, 16  ;;  %v17824_v51 = vshrl.u32 %v40043_v43, 16 }
 0xec4   : > { %v17844_v35 = vshll.u32 %v36400_v28, 16 }
 0xec5   : > { %v17818_v0 = vor.u32 %v17816_v34, %v17814_v14  ;;  %v17829_v31 = vor.u32 %v17828_v57, %v17824_v51  ;;  %v17834_v34 = vshrl.u32 %v36377_v7, 16 }
 0xec6   : > { %v17846_v57 = vrot.slane %v17844_v35, 1  ;;  %v17862_v35 = vshll.u32 %v36430_v25, 16 }
 0xec8   : > { %28624 = vmatmul.mubr.msk.bf16.gmra.mrb[40].mxu0 %vm7466_vm3, %v37426_v24  ;;  %v40044_v24 = vld [vmem:[#allocation32_spill] sm:$0xff] }
 0xec9   : > { %28627 = vmatprep.mubr.msk.bf16.mxu0 %vm7466_vm3, %v37459_v19  ;;  %v37470_v11 = vpack.c.bf16 %v40044_v24, %v40044_v24  ;;  %v37473_v19 = vsel %vm1413_vm1, %v17800_v22, %v17804_v20  ;;  %v17830_v22 = vshll.u32 %v36377_v7, 16  ;;  %v40049_v20 = vld [vmem:[#allocation36_spill] sm:$0xff] }
 0xeca   : > { %v37495_v6 = vpack.c.bf16 %v40049_v20, %v40049_v20 }
 0xecb   : > { %40045 = vst [vmem:[#allocation32_spill] sm:$0xff] %v37470_v11  ;;  %v17820_v24 = vshll.u32 %v37470_v11, 16 }
 0xecc   : > { %40050 = vst [vmem:[#allocation36_spill] sm:$0xff] %v37495_v6  ;;  %v17838_v51 = vshll.u32 %v37495_v6, 16 }
 0xecd   : > { %v17822_v11 = vrot.slane %v17820_v24, 1  ;;  %v17842_v24 = vshrl.u32 %v36400_v28, 16 }
 0xece   : > { %v17840_v6 = vrot.slane %v17838_v51, 1  ;;  %v17860_v51 = vshrl.u32 %v36430_v25, 16 }
 0xecf   : > { %v37500_v43 = vsel %vm1413_vm1, %v17818_v0, %v17822_v11  ;;  %v17848_v11 = vshll.u32 %v36402_v30, 16 }
 0xed0   : > { %28628 = vmatmul.mubr.msk.bf16.gmra.mrb[44].mxu0 %vm7466_vm3, %v37473_v19 }
 0xed1   : > { %28631 = vmatprep.mubr.msk.bf16.mxu0 %vm7466_vm3, %v37478_v4 }
 0xed2   : > { %v37484_v2 = vpop.f32.mrb[236].mxu1 }
 0xed3   : > { %40046 = vst [vmem:[#allocation210_spill] sm:$0xff] %v37484_v2  ;;  %v37488_v29 = vpop.f32.mrb[237].mxu1  ;;  %v17832_v2 = vrot.slane %v17830_v22, 1 }
 0xed4   : > { %40047 = vst [vmem:[#allocation211_spill] sm:$0xff] %v37488_v29  ;;  %v37490_v41 = vpop.f32.mrb[238].mxu1 }
 0xed5   : > { %40048 = vst [vmem:[#allocation212_spill] sm:$0xff] %v37490_v41  ;;  %v37497_v59 = vpop.f32.mrb[239].mxu1  ;;  %v37505_v14 = vsel %vm1413_vm1, %v17829_v31, %v17832_v2  ;;  %v17836_v0 = vor.u32 %v17834_v34, %v17832_v2  ;;  %v17847_v31 = vor.u32 %v17846_v57, %v17842_v24  ;;  %v40055_v41 = vld [vmem:[#allocation11_spill] sm:$0xff]  ;;  %v17864_v57 = vrot.slane %v17862_v35, 1 }
 0xed6   : > { %40051 = vst [vmem:[#allocation213_spill] sm:$0xff] %v37497_v59  ;;  %v37522_v29 = vpack.c.bf16 %v40055_v41, %v40055_v41  ;;  %v17852_v41 = vshrl.u32 %v36402_v30, 16  ;;  %v17880_v35 = vshll.u32 %v36454_v17, 16 }
 0xed7   : > { %v37527_v28 = vsel %vm1413_vm1, %v17836_v0, %v17840_v6  ;;  %v17866_v6 = vshll.u32 %v36432_v18, 16 }
 0xed8   : > { %28632 = vmatmul.mubr.msk.bf16.gmra.mrb[48].mxu0 %vm7466_vm3, %v37500_v43  ;;  %40056 = vst [vmem:[#allocation11_spill] sm:$0xff] %v37522_v29  ;;  %v17856_v34 = vshll.u32 %v37522_v29, 16 }
 0xed9   : > { %28635 = vmatprep.mubr.msk.bf16.mxu0 %vm7466_vm3, %v37505_v14 }
 0xeda   : > { %v37511_v20 = vpop.f32.mrb[240].mxu1  ;;  %v17858_v29 = vrot.slane %v17856_v34, 1  ;;  %v17878_v34 = vshrl.u32 %v36454_v17, 16 }
 0xedb   : > { %40052 = vst [vmem:[#allocation214_spill] sm:$0xff] %v37511_v20  ;;  %v37515_v22 = vpop.f32.mrb[241].mxu1  ;;  %v17850_v20 = vrot.slane %v17848_v11, 1 }
 0xedc   : > { %40053 = vst [vmem:[#allocation215_spill] sm:$0xff] %v37515_v22  ;;  %v37517_v59 = vpop.f32.mrb[242].mxu1 }
 0xedd   : > { %40054 = vst [vmem:[#allocation216_spill] sm:$0xff] %v37517_v59  ;;  %v37524_v7 = vpop.f32.mrb[243].mxu1  ;;  %v37532_v2 = vsel %vm1413_vm1, %v17847_v31, %v17850_v20  ;;  %v17854_v0 = vor.u32 %v17852_v41, %v17850_v20  ;;  %v17865_v31 = vor.u32 %v17864_v57, %v17860_v51  ;;  %v40061_v59 = vld [vmem:[#allocation40_spill] sm:$0xff]  ;;  %v17882_v57 = vrot.slane %v17880_v35, 1 }
 0xede   : > { %40057 = vst [vmem:[#allocation217_spill] sm:$0xff] %v37524_v7  ;;  %v37549_v22 = vpack.c.bf16 %v40061_v59, %v40061_v59  ;;  %v17870_v59 = vshrl.u32 %v36432_v18, 16  ;;  %v17898_v35 = vshll.u32 %v36477_v5, 16 }
 0xedf   : > { %v37554_v25 = vsel %vm1413_vm1, %v17854_v0, %v17858_v29  ;;  %v17884_v29 = vshll.u32 %v36456_v13, 16 }
 0xee0   : > { %28636 = vmatmul.mubr.msk.bf16.gmra.mrb[52].mxu0 %vm7466_vm3, %v37527_v28  ;;  %40062 = vst [vmem:[#allocation40_spill] sm:$0xff] %v37549_v22  ;;  %v17874_v41 = vshll.u32 %v37549_v22, 16 }
 0xee1   : > { %28639 = vmatprep.mubr.msk.bf16.mxu0 %vm7466_vm3, %v37532_v2 }
 0xee2   : > { %v37538_v24 = vpop.f32.mrb[244].mxu1  ;;  %v17876_v22 = vrot.slane %v17874_v41, 1  ;;  %v32160_v41 = vld [vmem:[%s39365_s5 + $0x98] sm:$0xff]  }
 0xee3   : > { %40058 = vst [vmem:[#allocation218_spill] sm:$0xff] %v37538_v24  ;;  %v37542_v11 = vpop.f32.mrb[245].mxu1  ;;  %v17868_v24 = vrot.slane %v17866_v6, 1  ;;  %28749 = vmatprep.subr.bf16.mxu0 %v32160_v41 }
 0xee4   : > { %40059 = vst [vmem:[#allocation219_spill] sm:$0xff] %v37542_v11  ;;  %v37544_v7 = vpop.f32.mrb[246].mxu1  ;;  %28750 = vmatpush3.bf16.msra.mxu0 %v32160_v41  ;;  %v17920_v41 = vshll.u32 %v36502_v16, 16 }
 0xee5   : > { %40060 = vst [vmem:[#allocation220_spill] sm:$0xff] %v37544_v7  ;;  %v37551_v30 = vpop.f32.mrb[247].mxu1  ;;  %v37559_v20 = vsel %vm1413_vm1, %v17865_v31, %v17868_v24  ;;  %v17872_v0 = vor.u32 %v17870_v59, %v17868_v24  ;;  %v17883_v31 = vor.u32 %v17882_v57, %v17878_v34  ;;  %v40067_v7 = vld [vmem:[#allocation19_spill] sm:$0xff]  ;;  %v17900_v57 = vrot.slane %v17898_v35, 1 }
 0xee6   : > { %40063 = vst [vmem:[#allocation221_spill] sm:$0xff] %v37551_v30  ;;  %v37576_v11 = vpack.c.bf16 %v40067_v7, %v40067_v7  ;;  %v17888_v7 = vshrl.u32 %v36456_v13, 16  ;;  %v17896_v34 = vshrl.u32 %v36477_v5, 16 }
 0xee7   : > { %v37581_v17 = vsel %vm1413_vm1, %v17872_v0, %v17876_v22 }
 0xee8   : > { %28640 = vmatmul.mubr.msk.bf16.gmra.mrb[56].mxu0 %vm7466_vm3, %v37554_v25  ;;  %40068 = vst [vmem:[#allocation19_spill] sm:$0xff] %v37576_v11  ;;  %v17892_v59 = vshll.u32 %v37576_v11, 16 }
 0xee9   : > { %28643 = vmatprep.mubr.msk.bf16.mxu0 %vm7466_vm3, %v37559_v20 }
 0xeea   : > { %v37565_v51 = vpop.f32.mrb[248].mxu1 }
 0xeeb   : > { %40064 = vst [vmem:[#allocation222_spill] sm:$0xff] %v37565_v51  ;;  %v37569_v6 = vpop.f32.mrb[249].mxu1  ;;  %v17886_v51 = vrot.slane %v17884_v29, 1  ;;  %v17902_v29 = vshll.u32 %v36479_v50, 16 }
 0xeec   : > { %40065 = vst [vmem:[#allocation223_spill] sm:$0xff] %v37569_v6  ;;  %v37571_v30 = vpop.f32.mrb[250].mxu1  ;;  %v40074_v6 = vld [vmem:[#allocation6_spill] sm:$0xff] }
 0xeed   : > { %40066 = vst [vmem:[#allocation224_spill] sm:$0xff] %v37571_v30  ;;  %v37578_v18 = vpop.f32.mrb[251].mxu1  ;;  %v37586_v24 = vsel %vm1413_vm1, %v17883_v31, %v17886_v51  ;;  %v17890_v31 = vor.u32 %v17888_v7, %v17886_v51  ;;  %v17916_v30 = vshll.u32 %v36500_v40, 16  ;;  %v37606_v11 = vpack.c.bf16 %v40074_v6, %v40074_v6 }
 0xeee   : > { %40069 = vst [vmem:[#allocation225_spill] sm:$0xff] %v37578_v18  ;;  %40070 = vst [vmem:[#allocation226_spill] sm:$0xff] %v37586_v24  ;;  %v17901_v18 = vor.u32 %v17900_v57, %v17896_v34  ;;  %v17904_v5 = vrot.slane %v17902_v29, 1  ;;  %v17906_v6 = vshrl.u32 %v36479_v50, 16  ;;  %v17934_v29 = vshll.u32 %v36523_v58, 16 }
 0xeef   : > { %40075 = vst [vmem:[#allocation6_spill] sm:$0xff] %v37606_v11  ;;  %v17918_v57 = vrot.slane %v17916_v30, 1  ;;  %v17910_v7 = vshll.u32 %v37606_v11, 16 }
 0xef0   : > { %28644 = vmatmul.mubr.msk.bf16.gmra.mrb[60].mxu0 %vm7466_vm3, %v37581_v17  ;;  %v37616_v51 = vsel %vm1413_vm1, %v17901_v18, %v17904_v5 }
 0xef1   : > { %28647 = vmatprep.mubr.msk.bf16.mxu0 %vm7466_vm3, %v37586_v24  ;;  %v17912_v30 = vrot.slane %v17910_v7, 1  ;;  %v17938_v7 = vshll.u32 %v36525_v60, 16 }
 0xef2   : > { %v37595_v22 = vpop.f32.mrb[252].mxu1 }
 0xef3   : > { %40071 = vst [vmem:[#allocation227_spill] sm:$0xff] %v37595_v22  ;;  %v37599_v0 = vpop.f32.mrb[253].mxu1  ;;  %v17894_v22 = vrot.slane %v17892_v59, 1  ;;  %v17914_v59 = vshrl.u32 %v36500_v40, 16  ;;  %v17936_v40 = vrot.slane %v17934_v29, 1 }
 0xef4   : > { %40072 = vst [vmem:[#allocation228_spill] sm:$0xff] %v37599_v0  ;;  %v37601_v35 = vpop.f32.mrb[254].mxu1 }
 0xef5   : > { %40073 = vst [vmem:[#allocation229_spill] sm:$0xff] %v37601_v35  ;;  %v37608_v13 = vpop.f32.mrb[255].mxu1  ;;  %v37611_v24 = vsel %vm1413_vm1, %v17890_v31, %v17894_v22  ;;  %v17908_v22 = vor.u32 %v17906_v6, %v17904_v5  ;;  %v17919_v34 = vor.u32 %v17918_v57, %v17914_v59  ;;  %v40077_v31 = vld [vmem:[#allocation4_spill] sm:$0xff]  ;;  %v17924_v5 = vshrl.u32 %v36502_v16, 16 }
 0xef6   : > { %40076 = vst [vmem:[#allocation230_spill] sm:$0xff] %v37608_v13  ;;  %v37627_v18 = vpack.c.bf16 %v40077_v31, %v40077_v31  ;;  %v17922_v13 = vrot.slane %v17920_v41, 1  ;;  %v17932_v6 = vshrl.u32 %v36523_v58, 16  ;;  %v40079_v31 = vld [vmem:[#allocation5_spill] sm:$0xff] }
 0xef7   : > { %v37630_v35 = vsel %vm1413_vm1, %v17908_v22, %v17912_v30  ;;  %v17952_v22 = vshll.u32 %v36546_v61, 16  ;;  %v17940_v30 = vrot.slane %v17938_v7, 1 }
 0xef8   : > { %28648 = vmatmul.mubr.msk.bf16.gmra.mrb[64].mxu0 %vm7466_vm3, %v37611_v24  ;;  %40078 = vst [vmem:[#allocation4_spill] sm:$0xff] %v37627_v18  ;;  %v37635_v0 = vsel %vm1413_vm1, %v17919_v34, %v17922_v13  ;;  %v17928_v57 = vshll.u32 %v37627_v18, 16  ;;  %v17926_v59 = vor.u32 %v17924_v5, %v17922_v13  ;;  %v17937_v41 = vor.u32 %v17936_v40, %v17932_v6 }
 0xef9   : > { %28651 = vmatprep.mubr.msk.bf16.mxu0 %vm7466_vm3, %v37616_v51  ;;  %v37646_v34 = vpack.c.bf16 %v40079_v31, %v40079_v31  ;;  %v17954_v18 = vrot.slane %v17952_v22, 1  ;;  %v17942_v13 = vshrl.u32 %v36525_v60, 16  ;;  %v17950_v5 = vshrl.u32 %v36546_v61, 16  ;;  %v40081_v31 = vld [vmem:[#allocation2_spill] sm:$0xff] }
 0xefa   : > { %v17930_v29 = vrot.slane %v17928_v57, 1  ;;  %v37654_v58 = vsel %vm1413_vm1, %v17937_v41, %v17940_v30  ;;  %v17956_v57 = vshll.u32 %v36548_v62, 16  ;;  %v37665_v41 = vpack.c.bf16 %v40081_v31, %v40081_v31  ;;  %v40083_v31 = vld [vmem:[#allocation3_spill] sm:$0xff] }
 0xefb   : > { %40080 = vst [vmem:[#allocation5_spill] sm:$0xff] %v37646_v34  ;;  %v17946_v40 = vshll.u32 %v37646_v34, 16  ;;  %v17944_v6 = vor.u32 %v17942_v13, %v17940_v30  ;;  %v17955_v7 = vor.u32 %v17954_v18, %v17950_v5  ;;  %v17960_v18 = vshrl.u32 %v36548_v62, 16 }
 0xefc   : > { %v37649_v11 = vsel %vm1413_vm1, %v17926_v59, %v17930_v29  ;;  %v17970_v59 = vshll.u32 %v36569_v12, 16  ;;  %40082 = vst [vmem:[#allocation2_spill] sm:$0xff] %v37665_v41  ;;  %v17958_v29 = vrot.slane %v17956_v57, 1  ;;  %v17964_v30 = vshll.u32 %v37665_v41, 16 }
 0xefd   : > { %v17948_v22 = vrot.slane %v17946_v40, 1  ;;  %v17968_v13 = vshrl.u32 %v36569_v12, 16  ;;  %v17974_v40 = vshll.u32 %v36571_v1, 16 }
 0xefe   : > { %v37673_v61 = vsel %vm1413_vm1, %v17955_v7, %v17958_v29  ;;  %v17972_v34 = vrot.slane %v17970_v59, 1  ;;  %v17962_v5 = vor.u32 %v17960_v18, %v17958_v29  ;;  %v37684_v7 = vpack.c.bf16 %v40083_v31, %v40083_v31  ;;  %v40085_v31 = vld [vmem:[#allocation42_spill] sm:$0xff] }
 0xeff   : > { %v37668_v16 = vsel %vm1413_vm1, %v17944_v6, %v17948_v22  ;;  %v17988_v6 = vshll.u32 %v36598_v45, 16  ;;  %v17966_v59 = vrot.slane %v17964_v30, 1  ;;  %v17976_v22 = vrot.slane %v17974_v40, 1 }
 0xf00   : > { %28652 = vmatmul.mubr.msk.bf16.gmra.mrb[68].mxu0 %vm7466_vm3, %v37630_v35  ;;  %v17973_v57 = vor.u32 %v17972_v34, %v17968_v13  ;;  %40084 = vst [vmem:[#allocation3_spill] sm:$0xff] %v37684_v7  ;;  %v17978_v34 = vshrl.u32 %v36571_v1, 16  ;;  %v17982_v29 = vshll.u32 %v37684_v7, 16  ;;  %v17986_v18 = vshrl.u32 %v36598_v45, 16 }
 0xf01   : > { %28655 = vmatprep.mubr.msk.bf16.mxu0 %vm7466_vm3, %v37635_v0  ;;  %v37687_v60 = vsel %vm1413_vm1, %v17962_v5, %v17966_v59  ;;  %v17990_v41 = vrot.slane %v17988_v6, 1  ;;  %v17992_v30 = vshll.u32 %v36600_v8, 16  ;;  %v18006_v5 = vshll.u32 %v36621_v21, 16 }
 0xf02   : > { %v37692_v12 = vsel %vm1413_vm1, %v17973_v57, %v17976_v22  ;;  %v17980_v13 = vor.u32 %v17978_v34, %v17976_v22  ;;  %v37703_v57 = vpack.c.bf16 %v40085_v31, %v40085_v31  ;;  %v17984_v6 = vrot.slane %v17982_v29, 1  ;;  %v40087_v31 = vld [vmem:[#allocation7_spill] sm:$0xff] }
 0xf03   : > { %v17991_v40 = vor.u32 %v17990_v41, %v17986_v18  ;;  %v17994_v59 = vrot.slane %v17992_v30, 1  ;;  %v18008_v7 = vrot.slane %v18006_v5, 1  ;;  %v17996_v41 = vshrl.u32 %v36600_v8, 16 }
 0xf04   : > { %40086 = vst [vmem:[#allocation42_spill] sm:$0xff] %v37703_v57  ;;  %v37706_v62 = vsel %vm1413_vm1, %v17980_v13, %v17984_v6  ;;  %v18000_v22 = vshll.u32 %v37703_v57, 16  ;;  %v18004_v34 = vshrl.u32 %v36621_v21, 16  ;;  %v18010_v29 = vshll.u32 %v36623_v32, 16 }
 0xf05   : > { %v37711_v45 = vsel %vm1413_vm1, %v17991_v40, %v17994_v59  ;;  %v17998_v18 = vor.u32 %v17996_v41, %v17994_v59  ;;  %v18024_v13 = vshll.u32 %v36644_v47, 16  ;;  %v37722_v40 = vpack.c.bf16 %v40087_v31, %v40087_v31  ;;  %v40089_v31 = vld [vmem:[#allocation47_spill] sm:$0xff] }
 0xf06   : > { %v18009_v30 = vor.u32 %v18008_v7, %v18004_v34  ;;  %v18002_v5 = vrot.slane %v18000_v22, 1  ;;  %v18012_v6 = vrot.slane %v18010_v29, 1  ;;  %v18014_v7 = vshrl.u32 %v36623_v32, 16 }
 0xf07   : > { %40088 = vst [vmem:[#allocation7_spill] sm:$0xff] %v37722_v40  ;;  %v18026_v57 = vrot.slane %v18024_v13, 1  ;;  %v18018_v59 = vshll.u32 %v37722_v40, 16  ;;  %v18022_v41 = vshrl.u32 %v36644_v47, 16  ;;  %v18028_v22 = vshll.u32 %v36646_v63, 16 }
 0xf08   : > { %28656 = vmatmul.mubr.msk.bf16.gmra.mrb[72].mxu0 %vm7466_vm3, %v37649_v11  ;;  %v37725_v1 = vsel %vm1413_vm1, %v17998_v18, %v18002_v5  ;;  %v37730_v21 = vsel %vm1413_vm1, %v18009_v30, %v18012_v6  ;;  %v18016_v34 = vor.u32 %v18014_v7, %v18012_v6  ;;  %v18042_v18 = vshll.u32 %v36672_v26, 16  ;;  %v37758_v7 = vld [vmem:[%s39365_s5 + $0xe0] sm:$0xff]  }
 0xf09   : > { %28659 = vmatprep.mubr.msk.bf16.mxu0 %vm7466_vm3, %v37654_v58  ;;  %v18027_v29 = vor.u32 %v18026_v57, %v18022_v41  ;;  %v37741_v30 = vpack.c.bf16 %v40089_v31, %v40089_v31  ;;  %v18020_v13 = vrot.slane %v18018_v59, 1  ;;  %v18030_v5 = vrot.slane %v18028_v22, 1  ;;  %28879 = vmatprep.subr.bf16.mxu0 %v37758_v7 }
 0xf0a   : > { %v18044_v40 = vrot.slane %v18042_v18, 1  ;;  %v18032_v57 = vshrl.u32 %v36646_v63, 16  ;;  %v18040_v59 = vshrl.u32 %v36672_v26, 16  ;;  %v18046_v41 = vshll.u32 %v36674_v38, 16  ;;  %v40091_v18 = vld [vmem:[#allocation50_spill] sm:$0xff] }
 0xf0b   : > { %40090 = vst [vmem:[#allocation47_spill] sm:$0xff] %v37741_v30  ;;  %v37744_v8 = vsel %vm1413_vm1, %v18016_v34, %v18020_v13  ;;  %v37749_v47 = vsel %vm1413_vm1, %v18027_v29, %v18030_v5  ;;  %v18036_v6 = vshll.u32 %v37741_v30, 16  ;;  %v18060_v29 = vshll.u32 %v36695_v49, 16 }
 0xf0c   : > { %v18034_v22 = vor.u32 %v18032_v57, %v18030_v5  ;;  %v18045_v34 = vor.u32 %v18044_v40, %v18040_v59  ;;  %v37766_v31 = vpack.c.bf16 %v40091_v18, %v40091_v18  ;;  %v18048_v30 = vrot.slane %v18046_v41, 1 }
 0xf0d   : > { %v18038_v13 = vrot.slane %v18036_v6, 1  ;;  %v18062_v5 = vrot.slane %v18060_v29, 1  ;;  %v18050_v40 = vshrl.u32 %v36674_v38, 16  ;;  %v18058_v6 = vshrl.u32 %v36695_v49, 16 }
 0xf0e   : > { %40092 = vst [vmem:[#allocation50_spill] sm:$0xff] %v37766_v31  ;;  %v37774_v26 = vsel %vm1413_vm1, %v18045_v34, %v18048_v30  ;;  %v18054_v57 = vshll.u32 %v37766_v31, 16  ;;  %v18064_v59 = vshll.u32 %v39961_v15, 16  ;;  %v18078_v18 = vshll.u32 %v39962_v27, 16 }
 0xf0f   : > { %v37769_v63 = vsel %vm1413_vm1, %v18034_v22, %v18038_v13  ;;  %v18052_v41 = vor.u32 %v18050_v40, %v18048_v30  ;;  %v18063_v22 = vor.u32 %v18062_v5, %v18058_v6  ;;  %v40093_v13 = vld [vmem:[#allocation53_spill] sm:$0xff]  ;;  %v18068_v30 = vshrl.u32 %v39961_v15, 16 }
 0xf10   : > { %28660 = vmatmul.mubr.msk.bf16.gmra.mrb[76].mxu0 %vm7466_vm3, %v37668_v16  ;;  %v37785_v34 = vpack.c.bf16 %v40093_v13, %v40093_v13  ;;  %v18056_v29 = vrot.slane %v18054_v57, 1  ;;  %v18066_v32 = vrot.slane %v18064_v59, 1  ;;  %v18080_v31 = vrot.slane %v18078_v18, 1  ;;  %v40095_v13 = vld [vmem:[#allocation56_spill] sm:$0xff] }
 0xf11   : > { %28663 = vmatprep.mubr.msk.bf16.mxu0 %vm7466_vm3, %v37673_v61  ;;  %v18076_v40 = vshrl.u32 %v39962_v27, 16  ;;  %v18082_v57 = vshll.u32 %v39967_v54, 16 }
 0xf12   : > { %40094 = vst [vmem:[#allocation53_spill] sm:$0xff] %v37785_v34  ;;  %v37788_v50 = vsel %vm1413_vm1, %v18052_v41, %v18056_v29  ;;  %v37793_v49 = vsel %vm1413_vm1, %v18063_v22, %v18066_v32  ;;  %v18072_v5 = vshll.u32 %v37785_v34, 16  ;;  %v18070_v6 = vor.u32 %v18068_v30, %v18066_v32 }
 0xf13   : > { %v18081_v59 = vor.u32 %v18080_v31, %v18076_v40  ;;  %v18096_v41 = vshll.u32 %v39968_v37, 16  ;;  %v37804_v22 = vpack.c.bf16 %v40095_v13, %v40095_v13  ;;  %v18084_v29 = vrot.slane %v18082_v57, 1  ;;  %v40097_v13 = vld [vmem:[#allocation59_spill] sm:$0xff] }
 0xf14   : > { %v18074_v18 = vrot.slane %v18072_v5, 1  ;;  %v18086_v32 = vshrl.u32 %v39967_v54, 16  ;;  %v18094_v30 = vshrl.u32 %v39968_v37, 16  ;;  %v18100_v5 = vshll.u32 %v39973_v33, 16 }
 0xf15   : > { %40096 = vst [vmem:[#allocation56_spill] sm:$0xff] %v37804_v22  ;;  %v37812_v27 = vsel %vm1413_vm1, %v18081_v59, %v18084_v29  ;;  %v18098_v34 = vrot.slane %v18096_v41, 1  ;;  %v18090_v31 = vshll.u32 %v37804_v22, 16  ;;  %v37823_v59 = vpack.c.bf16 %v40097_v13, %v40097_v13  ;;  %v40099_v13 = vld [vmem:[#allocation62_spill] sm:$0xff] }
 0xf16   : > { %v37807_v38 = vsel %vm1413_vm1, %v18070_v6, %v18074_v18  ;;  %v18088_v40 = vor.u32 %v18086_v32, %v18084_v29  ;;  %v18114_v6 = vshll.u32 %v39974_v23, 16  ;;  %v18102_v18 = vrot.slane %v18100_v5, 1 }
 0xf17   : > { %v18099_v57 = vor.u32 %v18098_v34, %v18094_v30  ;;  %40098 = vst [vmem:[#allocation59_spill] sm:$0xff] %v37823_v59  ;;  %v18092_v41 = vrot.slane %v18090_v31, 1  ;;  %v18104_v34 = vshrl.u32 %v39973_v33, 16  ;;  %v18108_v29 = vshll.u32 %v37823_v59, 16 }
 0xf18   : > { %28664 = vmatmul.mubr.msk.bf16.gmra.mrb[80].mxu0 %vm7466_vm3, %v37687_v60  ;;  %v18116_v22 = vrot.slane %v18114_v6, 1  ;;  %v18112_v32 = vshrl.u32 %v39974_v23, 16  ;;  %v18118_v31 = vshll.u32 %v39979_v53, 16 }
 0xf19   : > { %28667 = vmatprep.mubr.msk.bf16.mxu0 %vm7466_vm3, %v37692_v12  ;;  %v37826_v15 = vsel %vm1413_vm1, %v18088_v40, %v18092_v41  ;;  %v37831_v37 = vsel %vm1413_vm1, %v18099_v57, %v18102_v18  ;;  %v18106_v30 = vor.u32 %v18104_v34, %v18102_v18  ;;  %v18132_v40 = vshll.u32 %v39980_v56, 16 }
 0xf1a   : > { %v18117_v5 = vor.u32 %v18116_v22, %v18112_v32  ;;  %v37842_v57 = vpack.c.bf16 %v40099_v13, %v40099_v13  ;;  %v18110_v6 = vrot.slane %v18108_v29, 1  ;;  %v18120_v41 = vrot.slane %v18118_v31, 1 }
 0xf1b   : > { %v18134_v59 = vrot.slane %v18132_v40, 1  ;;  %v18122_v22 = vshrl.u32 %v39979_v53, 16  ;;  %v18130_v34 = vshrl.u32 %v39980_v56, 16  ;;  %v18136_v29 = vshll.u32 %v36789_v46, 16 }
 0xf1c   : > { %40100 = vst [vmem:[#allocation62_spill] sm:$0xff] %v37842_v57  ;;  %v37845_v54 = vsel %vm1413_vm1, %v18106_v30, %v18110_v6  ;;  %v37850_v23 = vsel %vm1413_vm1, %v18117_v5, %v18120_v41  ;;  %v18126_v18 = vshll.u32 %v37842_v57, 16  ;;  %v40102_v30 = vld [vmem:[#allocation69_spill] sm:$0xff] }
 0xf1d   : > { %40101 = vst [vmem:[#allocation231_spill] sm:$0xff] %v37850_v23  ;;  %v18124_v32 = vor.u32 %v18122_v22, %v18120_v41  ;;  %v18135_v31 = vor.u32 %v18134_v59, %v18130_v34  ;;  %v18150_v13 = vshll.u32 %v40102_v30, 16  ;;  %v40103_v6 = vld [vmem:[#allocation65_spill] sm:$0xff]  ;;  %v18138_v33 = vrot.slane %v18136_v29, 1 }
 0xf1e   : > { %v37861_v5 = vpack.c.bf16 %v40103_v6, %v40103_v6  ;;  %v18128_v40 = vrot.slane %v18126_v18, 1  ;;  %v18140_v59 = vshrl.u32 %v36789_v46, 16  ;;  %v18148_v22 = vshrl.u32 %v40102_v30, 16  ;;  %v40105_v6 = vld [vmem:[#allocation68_spill] sm:$0xff] }
 0xf1f   : > { %v37869_v56 = vsel %vm1413_vm1, %v18135_v31, %v18138_v33  ;;  %v18152_v57 = vrot.slane %v18150_v13, 1  ;;  %v18154_v18 = vshll.u32 %v36812_v44, 16  ;;  %v37880_v31 = vpack.c.bf16 %v40105_v6, %v40105_v6  ;;  %v40107_v6 = vld [vmem:[#allocation71_spill] sm:$0xff] }
 0xf20   : > { %28668 = vmatmul.mubr.msk.bf16.gmra.mrb[84].mxu0 %vm7466_vm3, %v37706_v62  ;;  %40104 = vst [vmem:[#allocation65_spill] sm:$0xff] %v37861_v5  ;;  %v18144_v41 = vshll.u32 %v37861_v5, 16  ;;  %v18142_v34 = vor.u32 %v18140_v59, %v18138_v33  ;;  %v18158_v33 = vshrl.u32 %v36812_v44, 16  ;;  %v18166_v59 = vshrl.u32 %v39989_v10, 16 }
 0xf21   : > { %28671 = vmatprep.mubr.msk.bf16.mxu0 %vm7466_vm3, %v37711_v45  ;;  %v18153_v29 = vor.u32 %v18152_v57, %v18148_v22  ;;  %40106 = vst [vmem:[#allocation68_spill] sm:$0xff] %v37880_v31  ;;  %v18162_v57 = vshll.u32 %v37880_v31, 16 }
 0xf22   : > { %v18146_v13 = vrot.slane %v18144_v41, 1  ;;  %v18172_v41 = vshll.u32 %v36835_v55, 16 }
 0xf24   : > { %v37883_v53 = vsel %vm1413_vm1, %v18142_v34, %v18146_v13  ;;  %v18186_v34 = vshll.u32 %v36856_v48, 16  ;;  %v18174_v13 = vrot.slane %v18172_v41, 1 }
 0xf26   : > { %v18188_v31 = vrot.slane %v18186_v34, 1 }
 0xf28   : > { %28672 = vmatmul.mubr.msk.bf16.gmra.mrb[88].mxu0 %vm7466_vm3, %v37725_v1 }
 0xf29   : > { %28675 = vmatprep.mubr.msk.bf16.mxu0 %vm7466_vm3, %v37730_v21 }
 0xf30   : > { %28676 = vmatmul.mubr.msk.bf16.gmra.mrb[92].mxu0 %vm7466_vm3, %v37744_v8 }
 0xf31   : > { %28679 = vmatprep.mubr.msk.bf16.mxu0 %vm7466_vm3, %v37749_v47 }
 0xf38   : > { %28680 = vmatmul.mubr.msk.bf16.gmra.mrb[96].mxu0 %vm7466_vm3, %v37769_v63 }
 0xf39   : > { %28683 = vmatprep.mubr.msk.bf16.mxu0 %vm7466_vm3, %v37774_v26 }
 0xf40   : > { %28684 = vmatmul.mubr.msk.bf16.gmra.mrb[100].mxu0 %vm7466_vm3, %v37788_v50 }
 0xf41   : > { %28687 = vmatprep.mubr.msk.bf16.mxu0 %vm7466_vm3, %v37793_v49 }
 0xf48   : > { %28688 = vmatmul.mubr.msk.bf16.gmra.mrb[104].mxu0 %vm7466_vm3, %v37807_v38 }
 0xf49   : > { %28691 = vmatprep.mubr.msk.bf16.mxu0 %vm7466_vm3, %v37812_v27 }
 0xf50   : > { %28692 = vmatmul.mubr.msk.bf16.gmra.mrb[108].mxu0 %vm7466_vm3, %v37826_v15 }
 0xf51   : > { %28695 = vmatprep.mubr.msk.bf16.mxu0 %vm7466_vm3, %v37831_v37 }
 0xf58   : > { %28696 = vmatmul.mubr.msk.bf16.gmra.mrb[112].mxu0 %vm7466_vm3, %v37845_v54 }
 0xf59   : > { %28699 = vmatprep.mubr.msk.bf16.mxu0 %vm7466_vm3, %v37850_v23  ;;  %v37864_v23 = vsel %vm1413_vm1, %v18124_v32, %v18128_v40  ;;  %v18168_v32 = vshll.u32 %v39989_v10, 16  ;;  %v18156_v40 = vrot.slane %v18154_v18, 1 }
 0xf5b   : > { %v37888_v30 = vsel %vm1413_vm1, %v18153_v29, %v18156_v40  ;;  %v18170_v5 = vrot.slane %v18168_v32, 1  ;;  %v18160_v22 = vor.u32 %v18158_v33, %v18156_v40  ;;  %v37899_v29 = vpack.c.bf16 %v40107_v6, %v40107_v6  ;;  %v40109_v6 = vld [vmem:[#allocation74_spill] sm:$0xff] }
 0xf5c   : > { %v18164_v32 = vrot.slane %v18162_v57, 1  ;;  %v18184_v33 = vshrl.u32 %v36856_v48, 16  ;;  %v18190_v57 = vshll.u32 %v36858_v9, 16 }
 0xf5d   : > { %v18171_v18 = vor.u32 %v18170_v5, %v18166_v59  ;;  %40108 = vst [vmem:[#allocation71_spill] sm:$0xff] %v37899_v29  ;;  %v18176_v5 = vshrl.u32 %v36835_v55, 16  ;;  %v18180_v40 = vshll.u32 %v37899_v29, 16 }
 0xf5e   : > { %v37902_v46 = vsel %vm1413_vm1, %v18160_v22, %v18164_v32  ;;  %v18189_v41 = vor.u32 %v18188_v31, %v18184_v33  ;;  %v18204_v22 = vshll.u32 %v36879_v36, 16  ;;  %v18192_v32 = vrot.slane %v18190_v57, 1 }
 0xf5f   : > { %v37907_v10 = vsel %vm1413_vm1, %v18171_v18, %v18174_v13  ;;  %v18178_v59 = vor.u32 %v18176_v5, %v18174_v13  ;;  %v37918_v18 = vpack.c.bf16 %v40109_v6, %v40109_v6  ;;  %v18182_v34 = vrot.slane %v18180_v40, 1  ;;  %v40111_v6 = vld [vmem:[#allocation77_spill] sm:$0xff] }
 0xf60   : > { %28700 = vmatmul.mubr.msk.bf16.gmra.mrb[116].mxu0 %vm7466_vm3, %v37864_v23  ;;  %v37926_v48 = vsel %vm1413_vm1, %v18189_v41, %v18192_v32  ;;  %v18206_v29 = vrot.slane %v18204_v22, 1  ;;  %v18194_v31 = vshrl.u32 %v36858_v9, 16  ;;  %v18202_v5 = vshrl.u32 %v36879_v36, 16 }
 0xf61   : > { %28703 = vmatprep.mubr.msk.bf16.mxu0 %vm7466_vm3, %v37869_v56  ;;  %40110 = vst [vmem:[#allocation74_spill] sm:$0xff] %v37918_v18  ;;  %v37921_v44 = vsel %vm1413_vm1, %v18178_v59, %v18182_v34  ;;  %v18198_v13 = vshll.u32 %v37918_v18, 16  ;;  %v18208_v40 = vshll.u32 %v36881_v39, 16  ;;  %v18222_v59 = vshll.u32 %v36902_v42, 16 }
 0xf62   : > { %v18196_v33 = vor.u32 %v18194_v31, %v18192_v32  ;;  %v18207_v57 = vor.u32 %v18206_v29, %v18202_v5  ;;  %v37937_v41 = vpack.c.bf16 %v40111_v6, %v40111_v6  ;;  %v18212_v29 = vshrl.u32 %v36881_v39, 16  ;;  %v40121_v39 = vld [vmem:[#allocation83_spill] sm:$0xff] }
 0xf63   : > { %v18200_v22 = vrot.slane %v18198_v13, 1  ;;  %v18210_v34 = vrot.slane %v18208_v40, 1  ;;  %v18224_v18 = vrot.slane %v18222_v59, 1  ;;  %v18220_v31 = vshrl.u32 %v36902_v42, 16 }
 0xf64   : > { %40112 = vst [vmem:[#allocation77_spill] sm:$0xff] %v37937_v41  ;;  %v18216_v32 = vshll.u32 %v37937_v41, 16  ;;  %v18226_v13 = vshll.u32 %v36904_v52, 16 }
 0xf65   : > { %v37940_v55 = vsel %vm1413_vm1, %v18196_v33, %v18200_v22  ;;  %v37945_v36 = vsel %vm1413_vm1, %v18207_v57, %v18210_v34  ;;  %v18214_v5 = vor.u32 %v18212_v29, %v18210_v34  ;;  %v18225_v40 = vor.u32 %v18224_v18, %v18220_v31  ;;  %v40114_v33 = vld [vmem:[#allocation84_spill] sm:$0xff] }
 0xf66   : > { %40113 = vst [vmem:[#allocation232_spill] sm:$0xff] %v37945_v36  ;;  %v18240_v6 = vshll.u32 %v40114_v33, 16  ;;  %v40115_v22 = vld [vmem:[#allocation80_spill] sm:$0xff]  ;;  %v18218_v59 = vrot.slane %v18216_v32, 1  ;;  %v18228_v9 = vrot.slane %v18226_v13, 1  ;;  %v18230_v18 = vshrl.u32 %v36904_v52, 16 }
 0xf67   : > { %v37956_v57 = vpack.c.bf16 %v40115_v22, %v40115_v22  ;;  %v18238_v29 = vshrl.u32 %v40114_v33, 16  ;;  %v40119_v32 = vld [vmem:[#allocation85_spill] sm:$0xff]  ;;  %v40120_v22 = vld [vmem:[#allocation87_spill] sm:$0xff]  ;;  %v40127_v52 = vld [vmem:[#allocation86_spill] sm:$0xff] }
 0xf68   : > { %28704 = vmatmul.mubr.msk.bf16.gmra.mrb[120].mxu0 %vm7466_vm3, %v37883_v53  ;;  %v37964_v42 = vsel %vm1413_vm1, %v18225_v40, %v18228_v9  ;;  %v18242_v41 = vrot.slane %v18240_v6, 1  ;;  %v18244_v31 = vshll.u32 %v40119_v32, 16  ;;  %v18232_v13 = vor.u32 %v18230_v18, %v18228_v9  ;;  %v40125_v18 = vld [vmem:[#allocation88_spill] sm:$0xff] }
 0xf69   : > { %28707 = vmatprep.mubr.msk.bf16.mxu0 %vm7466_vm3, %v37888_v30  ;;  %40116 = vst [vmem:[#allocation80_spill] sm:$0xff] %v37956_v57  ;;  %40118 = vst [vmem:[#allocation234_spill] sm:$0xff] %v37964_v42  ;;  %v18234_v34 = vshll.u32 %v37956_v57, 16  ;;  %v37975_v40 = vpack.c.bf16 %v40121_v39, %v40121_v39  ;;  %v18248_v9 = vshrl.u32 %v40119_v32, 16  ;;  %v40133_v32 = vld [vmem:[#allocation89_spill] sm:$0xff] }
 0xf6b   : > { %40122 = vst [vmem:[#allocation83_spill] sm:$0xff] %v37975_v40  ;;  %v18236_v6 = vrot.slane %v18234_v34, 1  ;;  %v18252_v39 = vshll.u32 %v37975_v40, 16  ;;  %v18262_v34 = vshll.u32 %v40125_v18, 16 }
 0xf70   : > { %28708 = vmatmul.mubr.msk.bf16.gmra.mrb[124].mxu0 %vm7466_vm3, %v37902_v46 }
 0xf71   : > { %28711 = vmatprep.mubr.msk.bf16.mxu0 %vm7466_vm3, %v37907_v10 }
 0xf78   : > { %28712 = vmatmul.mubr.msk.bf16.gmra.mrb[128].mxu0 %vm7466_vm3, %v37921_v44 }
 0xf79   : > { %28715 = vmatprep.mubr.msk.bf16.mxu0 %vm7466_vm3, %v37926_v48 }
 0xf80   : > { %28716 = vmatmul.mubr.msk.bf16.gmra.mrb[132].mxu0 %vm7466_vm3, %v37940_v55 }
 0xf81   : > { %28719 = vmatprep.mubr.msk.bf16.mxu0 %vm7466_vm3, %v37945_v36  ;;  %v37959_v36 = vsel %vm1413_vm1, %v18214_v5, %v18218_v59  ;;  %v18243_v5 = vor.u32 %v18242_v41, %v18238_v29  ;;  %v18258_v59 = vshll.u32 %v40120_v22, 16  ;;  %v18256_v41 = vshrl.u32 %v40120_v22, 16 }
 0xf82   : > { %40117 = vst [vmem:[#allocation233_spill] sm:$0xff] %v37959_v36 }
 0xf83   : > { %v18260_v57 = vrot.slane %v18258_v59, 1  ;;  %v18254_v59 = vrot.slane %v18252_v39, 1 }
 0xf88   : > { %28720 = vmatmul.mubr.msk.bf16.gmra.mrb[136].mxu0 %vm7466_vm3, %v37959_v36  ;;  %v18246_v36 = vrot.slane %v18244_v31, 1  ;;  %v18261_v31 = vor.u32 %v18260_v57, %v18256_v41 }
 0xf89   : > { %28723 = vmatprep.mubr.msk.bf16.mxu0 %vm7466_vm3, %v37964_v42  ;;  %v37978_v42 = vsel %vm1413_vm1, %v18232_v13, %v18236_v6  ;;  %v40126_v13 = vld [vmem:[#allocation90_spill] sm:$0xff] }
 0xf8a   : > { %40123 = vst [vmem:[#allocation235_spill] sm:$0xff] %v37978_v42  ;;  %v37983_v33 = vsel %vm1413_vm1, %v18243_v5, %v18246_v36  ;;  %v18250_v29 = vor.u32 %v18248_v9, %v18246_v36  ;;  %v18276_v6 = vshll.u32 %v40126_v13, 16  ;;  %v37994_v5 = vpack.c.bf16 %v40127_v52, %v40127_v52  ;;  %v40131_v9 = vld [vmem:[#allocation91_spill] sm:$0xff] }
 0xf8b   : > { %40124 = vst [vmem:[#allocation236_spill] sm:$0xff] %v37983_v33  ;;  %v18266_v36 = vshrl.u32 %v40125_v18, 16  ;;  %v18274_v57 = vshrl.u32 %v40126_v13, 16  ;;  %v18280_v39 = vshll.u32 %v40131_v9, 16 }
 0xf8c   : > { %40128 = vst [vmem:[#allocation86_spill] sm:$0xff] %v37994_v5  ;;  %v18278_v40 = vrot.slane %v18276_v6, 1  ;;  %v18270_v52 = vshll.u32 %v37994_v5, 16 }
 0xf8e   : > { %v18272_v6 = vrot.slane %v18270_v52, 1 }
 0xf90   : > { %28724 = vmatmul.mubr.msk.bf16.gmra.mrb[140].mxu0 %vm7466_vm3, %v37978_v42  ;;  %v18264_v42 = vrot.slane %v18262_v34, 1  ;;  %v18279_v34 = vor.u32 %v18278_v40, %v18274_v57 }
 0xf91   : > { %28727 = vmatprep.mubr.msk.bf16.mxu0 %vm7466_vm3, %v37983_v33  ;;  %v37997_v33 = vsel %vm1413_vm1, %v18250_v29, %v18254_v59  ;;  %v40132_v29 = vld [vmem:[#allocation93_spill] sm:$0xff] }
 0xf92   : > { %40129 = vst [vmem:[#allocation237_spill] sm:$0xff] %v37997_v33  ;;  %v38002_v22 = vsel %vm1413_vm1, %v18261_v31, %v18264_v42  ;;  %v18268_v41 = vor.u32 %v18266_v36, %v18264_v42  ;;  %v18294_v59 = vshll.u32 %v40132_v29, 16  ;;  %v38013_v31 = vpack.c.bf16 %v40133_v32, %v40133_v32  ;;  %v40137_v36 = vld [vmem:[#allocation94_spill] sm:$0xff] }
 0xf93   : > { %40130 = vst [vmem:[#allocation238_spill] sm:$0xff] %v38002_v22  ;;  %v18284_v42 = vshrl.u32 %v40131_v9, 16  ;;  %v18292_v40 = vshrl.u32 %v40132_v29, 16  ;;  %v18298_v52 = vshll.u32 %v40137_v36, 16 }
 0xf94   : > { %40134 = vst [vmem:[#allocation89_spill] sm:$0xff] %v38013_v31  ;;  %v18296_v5 = vrot.slane %v18294_v59, 1  ;;  %v18288_v32 = vshll.u32 %v38013_v31, 16 }
 0xf95   : > { %v18300_v18 = vrot.slane %v18298_v52, 1  ;;  %v32162_v52 = vld [vmem:[%s39365_s5 + $0xe8] sm:$0xff]  }
 0xf98   : > { %28728 = vmatmul.mubr.msk.bf16.gmra.mrb[144].mxu0 %vm7466_vm3, %v37997_v33  ;;  %v18282_v33 = vrot.slane %v18280_v39, 1  ;;  %v18297_v39 = vor.u32 %v18296_v5, %v18292_v40 }
 0xf99   : > { %28731 = vmatprep.mubr.msk.bf16.mxu0 %vm7466_vm3, %v38002_v22  ;;  %v38016_v22 = vsel %vm1413_vm1, %v18268_v41, %v18272_v6  ;;  %v40138_v41 = vld [vmem:[#allocation92_spill] sm:$0xff] }
 0xf9a   : > { %40135 = vst [vmem:[#allocation239_spill] sm:$0xff] %v38016_v22  ;;  %v38021_v13 = vsel %vm1413_vm1, %v18279_v34, %v18282_v33  ;;  %v18286_v57 = vor.u32 %v18284_v42, %v18282_v33  ;;  %v38031_v6 = vpack.c.bf16 %v40138_v41, %v40138_v41  ;;  %v18290_v34 = vrot.slane %v18288_v32, 1  ;;  %v40144_v41 = vld [vmem:[#allocation209_spill] sm:$0xff] }
 0xf9b   : > { %40136 = vst [vmem:[#allocation240_spill] sm:$0xff] %v38021_v13  ;;  %v38039_v31 = vsel %vm1413_vm1, %v18297_v39, %v18300_v18  ;;  %v18302_v33 = vshrl.u32 %v40137_v36, 16  ;;  %v32163_v39 = vld [vmem:[%s39365_s5 + $0xf0] sm:$0xff]   ;;  %v40154_v36 = vld [vmem:[#allocation99_spill] sm:$0xff] }
 0xf9c   : > { %40139 = vst [vmem:[#allocation92_spill] sm:$0xff] %v38031_v6  ;;  %v38034_v59 = vsel %vm1413_vm1, %v18286_v57, %v18290_v34  ;;  %40140 = vst [vmem:[#allocation241_spill] sm:$0xff] %v38039_v31  ;;  %v18306_v5 = vshll.u32 %v38031_v6, 16  ;;  %v40141_v57 = vld [vmem:[#allocation208_spill] sm:$0xff]  ;;  %v32164_v34 = vld [vmem:[%s39365_s5 + $0xf8] sm:$0xff]   ;;  %v19204_v29 = vshll.u32 %v40154_v36, 16 }
 0xf9d   : > { %v18304_v42 = vor.u32 %v18302_v33, %v18300_v18  ;;  %v40142_v18 = vld [vmem:[#allocation206_spill] sm:$0xff] }
 0xf9e   : > { %v18308_v40 = vrot.slane %v18306_v5, 1  ;;  %v32165_v33 = vld [vmem:[%s39365_s5 + $0x40] sm:$0xff]   ;;  %v40146_v5 = vld [vmem:[#allocation231_spill] sm:$0xff]  ;;  %v19206_v9 = vrot.slane %v19204_v29, 1 }
 0xf9f   : > { %v40153_v6 = vld [vmem:[#allocation238_spill] sm:$0xff] }
 0xfa0   : > { %28732 = vmatmul.mubr.msk.bf16.gmra.mrb[148].mxu0 %vm7466_vm3, %v38016_v22  ;;  %v38046_v32 = vsel %vm1413_vm1, %v18304_v42, %v18308_v40  ;;  %v40147_v42 = vld [vmem:[#allocation232_spill] sm:$0xff]  ;;  %v40148_v40 = vld [vmem:[#allocation233_spill] sm:$0xff] }
 0xfa1   : > { %28735 = vmatprep.mubr.msk.bf16.mxu0 %vm7466_vm3, %v38021_v13 }
 0xfa8   : > { %28736 = vmatmul.mubr.msk.bf16.gmra.mrb[152].mxu0 %vm7466_vm3, %v38034_v59 }
 0xfa9   : > { %28739 = vmatprep.mubr.msk.bf16.mxu0 %vm7466_vm3, %v38039_v31 }
 0xfb0   : > { %28740 = vmatmul.mubr.msk.bf16.gmra.mrb[156].mxu0 %vm7466_vm3, %v38046_v32 }
 0xfb1   : > { %28751 = vmatprep.mubr.msk.bf16.mxu0 %vm7466_vm3, %v37431_v3  ;;  %v40143_v3 = vld [vmem:[#allocation207_spill] sm:$0xff] }
 0xfb8   : > { %28752 = vmatmul.mubr.msk.bf16.vlgmr.msra.gmra.mrb[32].mxu0 %vm7466_vm3, %v40141_v57  ;;  %v40150_v57 = vld [vmem:[#allocation235_spill] sm:$0xff] }
 0xfb9   : > { %28880 = vmatpush3.bf16.msra.mxu0 %v37758_v7  ;;  %28755 = vmatprep.mubr.msk.bf16.mxu0 %vm7466_vm3, %v40142_v18  ;;  %v40145_v7 = vld [vmem:[#allocation226_spill] sm:$0xff] }
 0xfba   : > { %28881 = vmatprep.subr.bf16.mxu0 %v32162_v52 }
 0xfbd   : > { %28882 = vmatpush3.bf16.msra.mxu0 %v32162_v52  ;;  %v40149_v52 = vld [vmem:[#allocation234_spill] sm:$0xff] }
 0xfbe   : > { %28883 = vmatprep.subr.bf16.mxu0 %v32163_v39 }
 0xfc0   : > { %28756 = vmatmul.mubr.msk.bf16.gmra.mrb[36].mxu0 %vm7466_vm3, %v40143_v3 }
 0xfc1   : > { %28759 = vmatprep.mubr.msk.bf16.mxu0 %vm7466_vm3, %v40144_v41  ;;  %28884 = vmatpush3.bf16.msra.mxu0 %v32163_v39  ;;  %v40151_v39 = vld [vmem:[#allocation236_spill] sm:$0xff] }
 0xfc2   : > { %28885 = vmatprep.subr.bf16.mxu0 %v32164_v34 }
 0xfc5   : > { %28886 = vmatpush3.bf16.msra.mxu0 %v32164_v34  ;;  %v40152_v34 = vld [vmem:[#allocation237_spill] sm:$0xff] }
 0xfc6   : > { %29015 = vmatprep.subr.bf16.mxu0 %v32165_v33 }
 0xfc8   : > { %28760 = vmatmul.mubr.msk.bf16.gmra.mrb[40].mxu0 %vm7466_vm3, %v37473_v19 }
 0xfc9   : > { %28763 = vmatprep.mubr.msk.bf16.mxu0 %vm7466_vm3, %v37478_v4 }
 0xfd0   : > { %28764 = vmatmul.mubr.msk.bf16.gmra.mrb[44].mxu0 %vm7466_vm3, %v37500_v43 }
 0xfd1   : > { %28767 = vmatprep.mubr.msk.bf16.mxu0 %vm7466_vm3, %v37505_v14 }
 0xfd8   : > { %28768 = vmatmul.mubr.msk.bf16.gmra.mrb[48].mxu0 %vm7466_vm3, %v37527_v28 }
 0xfd9   : > { %28771 = vmatprep.mubr.msk.bf16.mxu0 %vm7466_vm3, %v37532_v2 }
 0xfe0   : > { %28772 = vmatmul.mubr.msk.bf16.gmra.mrb[52].mxu0 %vm7466_vm3, %v37554_v25 }
 0xfe1   : > { %28775 = vmatprep.mubr.msk.bf16.mxu0 %vm7466_vm3, %v37559_v20 }
 0xfe8   : > { %28776 = vmatmul.mubr.msk.bf16.gmra.mrb[56].mxu0 %vm7466_vm3, %v37581_v17 }
 0xfe9   : > { %28779 = vmatprep.mubr.msk.bf16.mxu0 %vm7466_vm3, %v40145_v7 }
 0xff0   : > { %28780 = vmatmul.mubr.msk.bf16.gmra.mrb[60].mxu0 %vm7466_vm3, %v37611_v24 }
 0xff1   : > { %28783 = vmatprep.mubr.msk.bf16.mxu0 %vm7466_vm3, %v37616_v51 }
 0xff8   : > { %28784 = vmatmul.mubr.msk.bf16.gmra.mrb[64].mxu0 %vm7466_vm3, %v37630_v35 }
 0xff9   : > { %28787 = vmatprep.mubr.msk.bf16.mxu0 %vm7466_vm3, %v37635_v0 }
0x1000   : > { %28788 = vmatmul.mubr.msk.bf16.gmra.mrb[68].mxu0 %vm7466_vm3, %v37649_v11 }
0x1001   : > { %28791 = vmatprep.mubr.msk.bf16.mxu0 %vm7466_vm3, %v37654_v58 }
0x1008   : > { %28792 = vmatmul.mubr.msk.bf16.gmra.mrb[72].mxu0 %vm7466_vm3, %v37668_v16 }
0x1009   : > { %28795 = vmatprep.mubr.msk.bf16.mxu0 %vm7466_vm3, %v37673_v61 }
0x1010   : > { %28796 = vmatmul.mubr.msk.bf16.gmra.mrb[76].mxu0 %vm7466_vm3, %v37687_v60 }
0x1011   : > { %28799 = vmatprep.mubr.msk.bf16.mxu0 %vm7466_vm3, %v37692_v12 }
0x1018   : > { %28800 = vmatmul.mubr.msk.bf16.gmra.mrb[80].mxu0 %vm7466_vm3, %v37706_v62 }
0x1019   : > { %28803 = vmatprep.mubr.msk.bf16.mxu0 %vm7466_vm3, %v37711_v45 }
0x1020   : > { %28804 = vmatmul.mubr.msk.bf16.gmra.mrb[84].mxu0 %vm7466_vm3, %v37725_v1 }
0x1021   : > { %28807 = vmatprep.mubr.msk.bf16.mxu0 %vm7466_vm3, %v37730_v21 }
0x1028   : > { %28808 = vmatmul.mubr.msk.bf16.gmra.mrb[88].mxu0 %vm7466_vm3, %v37744_v8 }
0x1029   : > { %28811 = vmatprep.mubr.msk.bf16.mxu0 %vm7466_vm3, %v37749_v47 }
0x1030   : > { %28812 = vmatmul.mubr.msk.bf16.gmra.mrb[92].mxu0 %vm7466_vm3, %v37769_v63 }
0x1031   : > { %28815 = vmatprep.mubr.msk.bf16.mxu0 %vm7466_vm3, %v37774_v26 }
0x1038   : > { %28816 = vmatmul.mubr.msk.bf16.gmra.mrb[96].mxu0 %vm7466_vm3, %v37788_v50 }
0x1039   : > { %28819 = vmatprep.mubr.msk.bf16.mxu0 %vm7466_vm3, %v37793_v49 }
0x1040   : > { %28820 = vmatmul.mubr.msk.bf16.gmra.mrb[100].mxu0 %vm7466_vm3, %v37807_v38 }
0x1041   : > { %28823 = vmatprep.mubr.msk.bf16.mxu0 %vm7466_vm3, %v37812_v27 }
0x1048   : > { %28824 = vmatmul.mubr.msk.bf16.gmra.mrb[104].mxu0 %vm7466_vm3, %v37826_v15 }
0x1049   : > { %28827 = vmatprep.mubr.msk.bf16.mxu0 %vm7466_vm3, %v37831_v37 }
0x1050   : > { %28828 = vmatmul.mubr.msk.bf16.gmra.mrb[108].mxu0 %vm7466_vm3, %v37845_v54 }
0x1051   : > { %28831 = vmatprep.mubr.msk.bf16.mxu0 %vm7466_vm3, %v40146_v5 }
0x1058   : > { %28832 = vmatmul.mubr.msk.bf16.gmra.mrb[112].mxu0 %vm7466_vm3, %v37864_v23 }
0x1059   : > { %28835 = vmatprep.mubr.msk.bf16.mxu0 %vm7466_vm3, %v37869_v56 }
0x1060   : > { %28836 = vmatmul.mubr.msk.bf16.gmra.mrb[116].mxu0 %vm7466_vm3, %v37883_v53 }
0x1061   : > { %28839 = vmatprep.mubr.msk.bf16.mxu0 %vm7466_vm3, %v37888_v30 }
0x1068   : > { %28840 = vmatmul.mubr.msk.bf16.gmra.mrb[120].mxu0 %vm7466_vm3, %v37902_v46 }
0x1069   : > { %28843 = vmatprep.mubr.msk.bf16.mxu0 %vm7466_vm3, %v37907_v10 }
0x1070   : > { %28844 = vmatmul.mubr.msk.bf16.gmra.mrb[124].mxu0 %vm7466_vm3, %v37921_v44 }
0x1071   : > { %28847 = vmatprep.mubr.msk.bf16.mxu0 %vm7466_vm3, %v37926_v48 }
0x1078   : > { %28848 = vmatmul.mubr.msk.bf16.gmra.mrb[128].mxu0 %vm7466_vm3, %v37940_v55 }
0x1079   : > { %28851 = vmatprep.mubr.msk.bf16.mxu0 %vm7466_vm3, %v40147_v42 }
0x1080   : > { %28852 = vmatmul.mubr.msk.bf16.gmra.mrb[132].mxu0 %vm7466_vm3, %v40148_v40 }
0x1081   : > { %28855 = vmatprep.mubr.msk.bf16.mxu0 %vm7466_vm3, %v40149_v52  ;;  %v40156_v52 = vld [vmem:[#allocation96_spill] sm:$0xff] }
0x1088   : > { %28856 = vmatmul.mubr.msk.bf16.gmra.mrb[136].mxu0 %vm7466_vm3, %v40150_v57 }
0x1089   : > { %28859 = vmatprep.mubr.msk.bf16.mxu0 %vm7466_vm3, %v40151_v39  ;;  %v40155_v39 = vld [vmem:[#allocation100_spill] sm:$0xff] }
0x108a   : > { %v19208_v57 = vshll.u32 %v40155_v39, 16  ;;  %v19212_v29 = vshrl.u32 %v40155_v39, 16  ;;  %v40251_v39 = vld [vmem:[#allocation84_spill] sm:$0xff] }
0x108c   : > { %v19210_v40 = vrot.slane %v19208_v57, 1 }
0x1090   : > { %28860 = vmatmul.mubr.msk.bf16.gmra.mrb[140].mxu0 %vm7466_vm3, %v40152_v34  ;;  %v19202_v34 = vshrl.u32 %v40154_v36, 16 }
0x1091   : > { %28863 = vmatprep.mubr.msk.bf16.mxu0 %vm7466_vm3, %v40153_v6 }
0x1092   : > { %v19207_v6 = vor.u32 %v19206_v9, %v19202_v34 }
0x1098   : > { %28864 = vmatmul.mubr.msk.bf16.gmra.mrb[144].mxu0 %vm7466_vm3, %v38016_v22  ;;  %v38190_v22 = vpack.c.bf16 %v40156_v52, %v40156_v52 }
0x1099   : > { %28867 = vmatprep.mubr.msk.bf16.mxu0 %vm7466_vm3, %v38021_v13  ;;  %v38195_v13 = vsel %vm1413_vm1, %v19207_v6, %v19210_v40  ;;  %v32166_v6 = vld [vmem:[%s39365_s5 + $0x48] sm:$0xff]  }
0x109a   : > { %40157 = vst [vmem:[#allocation208_spill] sm:$0xff] %v38190_v22  ;;  %v19216_v36 = vshll.u32 %v38190_v22, 16  ;;  %v40247_v22 = vld [vmem:[#allocation82_spill] sm:$0xff] }
0x109c   : > { %v19218_v9 = vrot.slane %v19216_v36, 1  ;;  %v40179_v36 = vld [vmem:[#allocation37_spill] sm:$0xff] }
0x10a0   : > { %28868 = vmatmul.mubr.msk.bf16.gmra.mrb[148].mxu0 %vm7466_vm3, %v38034_v59 }
0x10a1   : > { %28871 = vmatprep.mubr.msk.bf16.mxu0 %vm7466_vm3, %v38039_v31  ;;  %v19214_v31 = vor.u32 %v19212_v29, %v19210_v40  ;;  %v40183_v40 = vld [vmem:[#allocation20_spill] sm:$0xff] }
0x10a2   : > { %v20757_v52 = vrot.slane %v40183_v40, 1  ;;  %v40202_v40 = vld [vmem:[#allocation2_spill] sm:$0xff] }
0x10a3   : > { %v38202_v34 = vsel %vm1413_vm1, %v19214_v31, %v19218_v9  ;;  %v32167_v31 = vld [vmem:[%s39365_s5 + $0x50] sm:$0xff]   ;;  %v40184_v9 = vld [vmem:[#allocation11_spill] sm:$0xff] }
0x10a8   : > { %28872 = vmatmul.mubr.msk.bf16.gmra.mrb[152].mxu0 %vm7466_vm3, %v38046_v32 }
0x10a9   : > { %28875 = vmatprep.mubr.msk.bf16.mxu0 %vm7466_vm3, %v38195_v13 }
0x10b0   : > { %28876 = vmatmul.mubr.msk.bf16.gmra.mrb[156].mxu0 %vm7466_vm3, %v38202_v34 }
0x10b1   : > { %28887 = vmatprep.mubr.msk.bf16.mxu0 %vm7466_vm3, %v40142_v18 }
0x10b8   : > { %28888 = vmatmul.mubr.msk.bf16.vlgmr.msra.gmra.mrb[32].mxu0 %vm7466_vm3, %v40143_v3 }
0x10b9   : > { %29016 = vmatpush3.bf16.msra.mxu0 %v32165_v33  ;;  %28891 = vmatprep.mubr.msk.bf16.mxu0 %vm7466_vm3, %v40144_v41 }
0x10ba   : > { %29017 = vmatprep.subr.bf16.mxu0 %v32166_v6 }
0x10bd   : > { %29018 = vmatpush3.bf16.msra.mxu0 %v32166_v6  ;;  %v40185_v6 = vld [vmem:[#allocation16_spill] sm:$0xff] }
0x10be   : > { %29019 = vmatprep.subr.bf16.mxu0 %v32167_v31 }
0x10c0   : > { %28892 = vmatmul.mubr.msk.bf16.gmra.mrb[36].mxu0 %vm7466_vm3, %v37473_v19 }
0x10c1   : > { %28895 = vmatprep.mubr.msk.bf16.mxu0 %vm7466_vm3, %v37478_v4  ;;  %29020 = vmatpush3.bf16.msra.mxu0 %v32167_v31  ;;  %v20761_v31 = vrot.slane %v40185_v6, 1  ;;  %v40204_v6 = vld [vmem:[#allocation9_spill] sm:$0xff] }
0x10c8   : > { %28896 = vmatmul.mubr.msk.bf16.gmra.mrb[40].mxu0 %vm7466_vm3, %v37500_v43 }
0x10c9   : > { %28899 = vmatprep.mubr.msk.bf16.mxu0 %vm7466_vm3, %v37505_v14  ;;  %v40175_v14 = vld [vmem:[#allocation21_spill] sm:$0xff] }
0x10d0   : > { %28900 = vmatmul.mubr.msk.bf16.gmra.mrb[44].mxu0 %vm7466_vm3, %v37527_v28  ;;  %v32168_v28 = vld [vmem:[%s39365_s5 + $0x58] sm:$0xff]  }
0x10d1   : > { %28903 = vmatprep.mubr.msk.bf16.mxu0 %vm7466_vm3, %v37532_v2  ;;  %29021 = vmatprep.subr.bf16.mxu0 %v32168_v28  ;;  %v20744_v2 = vrot.slane %v40175_v14, 1  ;;  %v40196_v14 = vld [vmem:[#allocation4_spill] sm:$0xff] }
0x10d2   : > { %29022 = vmatpush3.bf16.msra.mxu0 %v32168_v28  ;;  %v40186_v28 = vld [vmem:[#allocation31_spill] sm:$0xff] }
0x10d8   : > { %28904 = vmatmul.mubr.msk.bf16.gmra.mrb[48].mxu0 %vm7466_vm3, %v37554_v25  ;;  %v32169_v25 = vld [vmem:[%s39365_s5 + $0xa0] sm:$0xff]  }
0x10d9   : > { %28907 = vmatprep.mubr.msk.bf16.mxu0 %vm7466_vm3, %v37559_v20  ;;  %29151 = vmatprep.subr.bf16.mxu0 %v32169_v25 }
0x10e0   : > { %28908 = vmatmul.mubr.msk.bf16.gmra.mrb[52].mxu0 %vm7466_vm3, %v37581_v17  ;;  %v40158_v17 = vld [vmem:[#allocation233_spill] sm:$0xff] }
0x10e1   : > { %28911 = vmatprep.mubr.msk.bf16.mxu0 %vm7466_vm3, %v40145_v7  ;;  %v40181_v7 = vld [vmem:[#allocation36_spill] sm:$0xff] }
0x10e2   : > { %v20754_v33 = vrot.slane %v40181_v7, 1  ;;  %v40201_v7 = vld [vmem:[#allocation43_spill] sm:$0xff] }
0x10e8   : > { %28912 = vmatmul.mubr.msk.bf16.gmra.mrb[56].mxu0 %vm7466_vm3, %v37611_v24  ;;  %v40177_v24 = vld [vmem:[#allocation28_spill] sm:$0xff] }
0x10e9   : > { %28915 = vmatprep.mubr.msk.bf16.mxu0 %vm7466_vm3, %v37616_v51 }
0x10f0   : > { %28916 = vmatmul.mubr.msk.bf16.gmra.mrb[60].mxu0 %vm7466_vm3, %v37630_v35 }
0x10f1   : > { %28919 = vmatprep.mubr.msk.bf16.mxu0 %vm7466_vm3, %v37635_v0  ;;  %v20747_v0 = vrot.slane %v40177_v24, 1  ;;  %v40198_v24 = vld [vmem:[#allocation15_spill] sm:$0xff] }
0x10f8   : > { %28920 = vmatmul.mubr.msk.bf16.gmra.mrb[64].mxu0 %vm7466_vm3, %v37649_v11  ;;  %v40176_v11 = vld [vmem:[#allocation27_spill] sm:$0xff] }
0x10f9   : > { %28923 = vmatprep.mubr.msk.bf16.mxu0 %vm7466_vm3, %v37654_v58  ;;  %v40161_v58 = vld [vmem:[#allocation236_spill] sm:$0xff]  ;;  %v20746_v20 = vrot.slane %v40176_v11, 1  ;;  %v40197_v11 = vld [vmem:[#allocation29_spill] sm:$0xff] }
0x10fb   : > { %v38398_v51 = vsel %vm2426_vm2, %v20746_v20, %v20747_v0  ;;  %v20781_v20 = vrot.slane %v40197_v11, 1 }
0x1100   : > { %28924 = vmatmul.mubr.msk.bf16.gmra.mrb[68].mxu0 %vm7466_vm3, %v37668_v16  ;;  %v40160_v16 = vld [vmem:[#allocation235_spill] sm:$0xff] }
0x1101   : > { %28927 = vmatprep.mubr.msk.bf16.mxu0 %vm7466_vm3, %v37673_v61  ;;  %v40163_v61 = vld [vmem:[#allocation238_spill] sm:$0xff] }
0x1108   : > { %28928 = vmatmul.mubr.msk.bf16.gmra.mrb[72].mxu0 %vm7466_vm3, %v37687_v60  ;;  %v40162_v60 = vld [vmem:[#allocation237_spill] sm:$0xff] }
0x1109   : > { %28931 = vmatprep.mubr.msk.bf16.mxu0 %vm7466_vm3, %v37692_v12  ;;  %v40165_v12 = vld [vmem:[#allocation240_spill] sm:$0xff] }
0x1110   : > { %28932 = vmatmul.mubr.msk.bf16.gmra.mrb[76].mxu0 %vm7466_vm3, %v37706_v62  ;;  %v40164_v62 = vld [vmem:[#allocation239_spill] sm:$0xff] }
0x1111   : > { %28935 = vmatprep.mubr.msk.bf16.mxu0 %vm7466_vm3, %v37711_v45  ;;  %v40167_v45 = vld [vmem:[#allocation24_spill] sm:$0xff] }
0x1118   : > { %28936 = vmatmul.mubr.msk.bf16.gmra.mrb[80].mxu0 %vm7466_vm3, %v37725_v1  ;;  %v40166_v1 = vld [vmem:[#allocation241_spill] sm:$0xff] }
0x1119   : > { %28939 = vmatprep.mubr.msk.bf16.mxu0 %vm7466_vm3, %v37730_v21  ;;  %v40168_v21 = vld [vmem:[#allocation25_spill] sm:$0xff] }
0x1120   : > { %28940 = vmatmul.mubr.msk.bf16.gmra.mrb[84].mxu0 %vm7466_vm3, %v37744_v8  ;;  %v20731_v8 = vrot.slane %v40167_v45, 1 }
0x1121   : > { %28943 = vmatprep.mubr.msk.bf16.mxu0 %vm7466_vm3, %v37749_v47  ;;  %v20732_v47 = vrot.slane %v40168_v21, 1  ;;  %v40190_v21 = vld [vmem:[#allocation19_spill] sm:$0xff] }
0x1128   : > { %28944 = vmatmul.mubr.msk.bf16.gmra.mrb[88].mxu0 %vm7466_vm3, %v37769_v63  ;;  %v38349_v63 = vsel %vm2426_vm2, %v20731_v8, %v20732_v47  ;;  %v32172_v8 = vld [vmem:[%s39365_s5 + $0xb8] sm:$0xff]  }
0x1129   : > { %28947 = vmatprep.mubr.msk.bf16.mxu0 %vm7466_vm3, %v37774_v26  ;;  %v40169_v26 = vld [vmem:[#allocation14_spill] sm:$0xff] }
0x1130   : > { %28948 = vmatmul.mubr.msk.bf16.gmra.mrb[92].mxu0 %vm7466_vm3, %v37788_v50  ;;  %v40159_v50 = vld [vmem:[#allocation234_spill] sm:$0xff] }
0x1131   : > { %28951 = vmatprep.mubr.msk.bf16.mxu0 %vm7466_vm3, %v37793_v49  ;;  %v40170_v49 = vld [vmem:[#allocation18_spill] sm:$0xff] }
0x1138   : > { %28952 = vmatmul.mubr.msk.bf16.gmra.mrb[96].mxu0 %vm7466_vm3, %v37807_v38  ;;  %v20734_v38 = vrot.slane %v40169_v26, 1  ;;  %v40191_v26 = vld [vmem:[#allocation23_spill] sm:$0xff] }
0x1139   : > { %28955 = vmatprep.mubr.msk.bf16.mxu0 %vm7466_vm3, %v37812_v27  ;;  %v40173_v27 = vld [vmem:[#allocation22_spill] sm:$0xff] }
0x1140   : > { %28956 = vmatmul.mubr.msk.bf16.gmra.mrb[100].mxu0 %vm7466_vm3, %v37826_v15  ;;  %v20741_v15 = vrot.slane %v40173_v27, 1  ;;  %v40195_v27 = vld [vmem:[#allocation39_spill] sm:$0xff] }
0x1141   : > { %28959 = vmatprep.mubr.msk.bf16.mxu0 %vm7466_vm3, %v37831_v37 }
0x1148   : > { %28960 = vmatmul.mubr.msk.bf16.gmra.mrb[104].mxu0 %vm7466_vm3, %v37845_v54  ;;  %v40174_v54 = vld [vmem:[#allocation30_spill] sm:$0xff] }
0x1149   : > { %28963 = vmatprep.mubr.msk.bf16.mxu0 %vm7466_vm3, %v40146_v5  ;;  %v20742_v4 = vrot.slane %v40174_v54, 1  ;;  %v40182_v5 = vld [vmem:[#allocation41_spill] sm:$0xff] }
0x114b   : > { %v38385_v19 = vsel %vm2426_vm2, %v20741_v15, %v20742_v4  ;;  %v38393_v35 = vsel %vm2426_vm2, %v20742_v4, %v20744_v2  ;;  %v20777_v15 = vrot.slane %v40195_v27, 1  ;;  %v20779_v2 = vrot.slane %v40196_v14, 1 }
0x1150   : > { %28964 = vmatmul.mubr.msk.bf16.gmra.mrb[108].mxu0 %vm7466_vm3, %v37864_v23  ;;  %v40172_v23 = vld [vmem:[#allocation17_spill] sm:$0xff] }
0x1151   : > { %28967 = vmatprep.mubr.msk.bf16.mxu0 %vm7466_vm3, %v37869_v56  ;;  %v32171_v56 = vld [vmem:[%s39365_s5 + $0xb0] sm:$0xff]  }
0x1158   : > { %28968 = vmatmul.mubr.msk.bf16.gmra.mrb[112].mxu0 %vm7466_vm3, %v37883_v53  ;;  %v20739_v53 = vrot.slane %v40172_v23, 1  ;;  %v40194_v23 = vld [vmem:[#allocation33_spill] sm:$0xff] }
0x1159   : > { %28971 = vmatprep.mubr.msk.bf16.mxu0 %vm7466_vm3, %v37888_v30  ;;  %v40178_v30 = vld [vmem:[#allocation32_spill] sm:$0xff] }
0x1160   : > { %28972 = vmatmul.mubr.msk.bf16.gmra.mrb[116].mxu0 %vm7466_vm3, %v37902_v46  ;;  %v20736_v46 = vrot.slane %v40170_v49, 1  ;;  %v40192_v49 = vld [vmem:[#allocation12_spill] sm:$0xff] }
0x1161   : > { %28975 = vmatprep.mubr.msk.bf16.mxu0 %vm7466_vm3, %v37907_v10  ;;  %v38360_v10 = vsel %vm2426_vm2, %v20732_v47, %v20734_v38  ;;  %v20769_v47 = vrot.slane %v40190_v21, 1  ;;  %v20771_v38 = vrot.slane %v40191_v26, 1 }
0x1168   : > { %28976 = vmatmul.mubr.msk.bf16.gmra.mrb[120].mxu0 %vm7466_vm3, %v37921_v44  ;;  %v40171_v44 = vld [vmem:[#allocation13_spill] sm:$0xff] }
0x1169   : > { %28979 = vmatprep.mubr.msk.bf16.mxu0 %vm7466_vm3, %v37926_v48  ;;  %v32170_v48 = vld [vmem:[%s39365_s5 + $0xa8] sm:$0xff]  }
0x1170   : > { %28980 = vmatmul.mubr.msk.bf16.gmra.mrb[124].mxu0 %vm7466_vm3, %v37940_v55  ;;  %v20737_v55 = vrot.slane %v40171_v44, 1 }
0x1171   : > { %28983 = vmatprep.mubr.msk.bf16.mxu0 %vm7466_vm3, %v40147_v42  ;;  %v20756_v42 = vrot.slane %v40182_v5, 1 }
0x1172   : > { %v38365_v43 = vsel %vm2426_vm2, %v20736_v46, %v20737_v55  ;;  %v38374_v37 = vsel %vm2426_vm2, %v20737_v55, %v20739_v53  ;;  %v20772_v46 = vrot.slane %v40192_v49, 1  ;;  %v20776_v53 = vrot.slane %v40194_v23, 1 }
0x1173   : > { %v38424_v29 = vsel %vm2426_vm2, %v20756_v42, %v20757_v52 }
0x1174   : > { %v38466_v55 = vsel %vm2426_vm2, %v20771_v38, %v20772_v46  ;;  %v38479_v4 = vsel %vm2426_vm2, %v20776_v53, %v20777_v15  ;;  %v40209_v38 = vld [vmem:[#allocation46_spill] sm:$0xff]  ;;  %v40211_v53 = vld [vmem:[#allocation7_spill] sm:$0xff] }
0x1175   : > { %v20801_v49 = vrot.slane %v40209_v38, 1  ;;  %v20804_v27 = vrot.slane %v40211_v53, 1  ;;  %v40222_v38 = vld [vmem:[#allocation58_spill] sm:$0xff]  ;;  %v40223_v53 = vld [vmem:[#allocation56_spill] sm:$0xff] }
0x1178   : > { %28984 = vmatmul.mubr.msk.bf16.gmra.mrb[128].mxu0 %vm7466_vm3, %v40158_v17 }
0x1179   : > { %28987 = vmatprep.mubr.msk.bf16.mxu0 %vm7466_vm3, %v40159_v50 }
0x1180   : > { %28988 = vmatmul.mubr.msk.bf16.gmra.mrb[132].mxu0 %vm7466_vm3, %v40160_v16  ;;  %v40187_v16 = vld [vmem:[#allocation40_spill] sm:$0xff] }
0x1181   : > { %28991 = vmatprep.mubr.msk.bf16.mxu0 %vm7466_vm3, %v40161_v58  ;;  %v20764_v58 = vrot.slane %v40187_v16, 1  ;;  %v40205_v16 = vld [vmem:[#allocation3_spill] sm:$0xff] }
0x1188   : > { %28992 = vmatmul.mubr.msk.bf16.gmra.mrb[136].mxu0 %vm7466_vm3, %v40162_v60  ;;  %v40188_v60 = vld [vmem:[#allocation26_spill] sm:$0xff] }
0x1189   : > { %28995 = vmatprep.mubr.msk.bf16.mxu0 %vm7466_vm3, %v40163_v61  ;;  %v20766_v61 = vrot.slane %v40188_v60, 1  ;;  %v40206_v60 = vld [vmem:[#allocation45_spill] sm:$0xff] }
0x1190   : > { %28996 = vmatmul.mubr.msk.bf16.gmra.mrb[140].mxu0 %vm7466_vm3, %v40164_v62  ;;  %v40189_v62 = vld [vmem:[#allocation34_spill] sm:$0xff] }
0x1191   : > { %28999 = vmatprep.mubr.msk.bf16.mxu0 %vm7466_vm3, %v40165_v12  ;;  %v20767_v12 = vrot.slane %v40189_v62, 1  ;;  %v40207_v62 = vld [vmem:[#allocation10_spill] sm:$0xff] }
0x1193   : > { %v38450_v45 = vsel %vm2426_vm2, %v20766_v61, %v20767_v12  ;;  %v38461_v44 = vsel %vm2426_vm2, %v20767_v12, %v20769_v47  ;;  %v20796_v61 = vrot.slane %v40206_v60, 1  ;;  %v20797_v12 = vrot.slane %v40207_v62, 1  ;;  %v40208_v47 = vld [vmem:[#allocation42_spill] sm:$0xff]  ;;  %v40220_v62 = vld [vmem:[#allocation53_spill] sm:$0xff] }
0x1194   : > { %v20799_v26 = vrot.slane %v40208_v47, 1  ;;  %v40221_v47 = vld [vmem:[#allocation57_spill] sm:$0xff] }
0x1195   : > { %v38531_v21 = vsel %vm2426_vm2, %v20796_v61, %v20797_v12 }
0x1198   : > { %29000 = vmatmul.mubr.msk.bf16.gmra.mrb[144].mxu0 %vm7466_vm3, %v38034_v59  ;;  %v20751_v59 = vrot.slane %v40179_v36, 1  ;;  %v40199_v36 = vld [vmem:[#allocation5_spill] sm:$0xff] }
0x1199   : > { %29003 = vmatprep.mubr.msk.bf16.mxu0 %vm7466_vm3, %v40166_v1 }
0x11a0   : > { %29004 = vmatmul.mubr.msk.bf16.gmra.mrb[148].mxu0 %vm7466_vm3, %v38046_v32 }
0x11a1   : > { %29007 = vmatprep.mubr.msk.bf16.mxu0 %vm7466_vm3, %v38195_v13  ;;  %v20749_v13 = vrot.slane %v40178_v30, 1  ;;  %v38487_v30 = vsel %vm2426_vm2, %v20777_v15, %v20779_v2  ;;  %v40212_v15 = vld [vmem:[#allocation48_spill] sm:$0xff]  ;;  %v40213_v2 = vld [vmem:[#allocation49_spill] sm:$0xff] }
0x11a2   : > { %v20806_v14 = vrot.slane %v40212_v15, 1  ;;  %v20807_v11 = vrot.slane %v40213_v2, 1  ;;  %v40224_v15 = vld [vmem:[#allocation60_spill] sm:$0xff]  ;;  %v40225_v2 = vld [vmem:[#allocation61_spill] sm:$0xff] }
0x11a3   : > { %v38406_v3 = vsel %vm2426_vm2, %v20747_v0, %v20749_v13  ;;  %v20782_v0 = vrot.slane %v40198_v24, 1 }
0x11a4   : > { %v38557_v24 = vsel %vm2426_vm2, %v20806_v14, %v20807_v11  ;;  %v20826_v14 = vrot.slane %v40224_v15, 1  ;;  %v40233_v15 = vld [vmem:[#allocation69_spill] sm:$0xff] }
0x11a5   : > { %v38492_v13 = vsel %vm2426_vm2, %v20781_v20, %v20782_v0 }
0x11a8   : > { %29008 = vmatmul.mubr.msk.bf16.gmra.mrb[152].mxu0 %vm7466_vm3, %v38202_v34  ;;  %v20759_v34 = vrot.slane %v40184_v9, 1  ;;  %v40203_v9 = vld [vmem:[#allocation44_spill] sm:$0xff] }
0x11a9   : > { %29011 = vmatprep.mubr.msk.bf16.mxu0 %vm7466_vm3, %v40166_v1 }
0x11aa   : > { %v38432_v17 = vsel %vm2426_vm2, %v20757_v52, %v20759_v34  ;;  %v20789_v52 = vrot.slane %v40202_v40, 1  ;;  %v20791_v34 = vrot.slane %v40203_v9, 1  ;;  %v40217_v9 = vld [vmem:[#allocation50_spill] sm:$0xff] }
0x11b0   : > { %29012 = vmatmul.mubr.msk.bf16.gmra.mrb[156].mxu0 %vm7466_vm3, %v38046_v32  ;;  %v40180_v32 = vld [vmem:[#allocation35_spill] sm:$0xff] }
0x11b1   : > { %29023 = vmatprep.mubr.msk.bf16.mxu0 %vm7466_vm3, %v38349_v63  ;;  %v20752_v18 = vrot.slane %v40180_v32, 1  ;;  %v40200_v32 = vld [vmem:[#allocation38_spill] sm:$0xff] }
0x11b3   : > { %v38411_v41 = vsel %vm2426_vm2, %v20751_v59, %v20752_v18  ;;  %v38419_v57 = vsel %vm2426_vm2, %v20752_v18, %v20754_v33  ;;  %v20784_v59 = vrot.slane %v40199_v36, 1  ;;  %v20786_v18 = vrot.slane %v40200_v32, 1  ;;  %v40214_v36 = vld [vmem:[#allocation47_spill] sm:$0xff] }
0x11b4   : > { %v20787_v33 = vrot.slane %v40201_v7, 1  ;;  %v40215_v32 = vld [vmem:[#allocation51_spill] sm:$0xff]  ;;  %v40216_v7 = vld [vmem:[#allocation52_spill] sm:$0xff] }
0x11b5   : > { %v38500_v5 = vsel %vm2426_vm2, %v20782_v0, %v20784_v59  ;;  %v38564_v0 = vld [vmem:[%s39365_s5 + $0x100] sm:$0xff]   ;;  %v20809_v59 = vrot.slane %v40214_v36, 1 }
0x11b6   : > { %v38505_v42 = vsel %vm2426_vm2, %v20786_v18, %v20787_v33  ;;  %v20811_v18 = vrot.slane %v40215_v32, 1  ;;  %v40226_v32 = vld [vmem:[#allocation59_spill] sm:$0xff] }
0x11b7   : > { %v38571_v40 = vsel %vm2426_vm2, %v20807_v11, %v20809_v59  ;;  %v20827_v11 = vrot.slane %v40225_v2, 1  ;;  %v40234_v2 = vld [vmem:[#allocation70_spill] sm:$0xff] }
0x11b8   : > { %29024 = vmatmul.mubr.msk.bf16.vlgmr.msra.gmra.mrb[32].mxu0 %vm7466_vm3, %v38360_v10 }
0x11b9   : > { %29152 = vmatpush3.bf16.msra.mxu0 %v32169_v25  ;;  %29027 = vmatprep.mubr.msk.bf16.mxu0 %vm7466_vm3, %v38365_v43  ;;  %v20762_v25 = vrot.slane %v40186_v28, 1  ;;  %v38513_v28 = vsel %vm2426_vm2, %v20787_v33, %v20789_v52  ;;  %v20812_v33 = vrot.slane %v40216_v7, 1  ;;  %v38615_v59 = vsel %vm2426_vm2, %v20826_v14, %v20827_v11  ;;  %v40227_v7 = vld [vmem:[#allocation63_spill] sm:$0xff] }
0x11ba   : > { %29153 = vmatprep.subr.bf16.mxu0 %v32170_v48  ;;  %v20841_v14 = vrot.slane %v40233_v15, 1  ;;  %v40240_v15 = vld [vmem:[#allocation76_spill] sm:$0xff] }
0x11bb   : > { %v38437_v50 = vsel %vm2426_vm2, %v20761_v31, %v20762_v25  ;;  %v38445_v1 = vsel %vm2426_vm2, %v20762_v25, %v20764_v58  ;;  %v20792_v31 = vrot.slane %v40204_v6, 1  ;;  %v20794_v58 = vrot.slane %v40205_v16, 1  ;;  %v40218_v6 = vld [vmem:[#allocation54_spill] sm:$0xff]  ;;  %v40219_v16 = vld [vmem:[#allocation55_spill] sm:$0xff] }
0x11bc   : > { %v38576_v52 = vsel %vm2426_vm2, %v20811_v18, %v20812_v33  ;;  %v20829_v18 = vrot.slane %v40226_v32, 1 }
0x11bd   : > { %29154 = vmatpush3.bf16.msra.mxu0 %v32170_v48  ;;  %v40193_v48 = vld [vmem:[#allocation6_spill] sm:$0xff]  ;;  %v38518_v25 = vsel %vm2426_vm2, %v20791_v34, %v20792_v31  ;;  %v20814_v34 = vrot.slane %v40217_v9, 1  ;;  %v40228_v9 = vld [vmem:[#allocation64_spill] sm:$0xff] }
0x11be   : > { %29155 = vmatprep.subr.bf16.mxu0 %v32171_v56 }
0x11bf   : > { %v38584_v60 = vsel %vm2426_vm2, %v20812_v33, %v20814_v34  ;;  %v20831_v33 = vrot.slane %v40227_v7, 1  ;;  %v20832_v34 = vrot.slane %v40228_v9, 1  ;;  %v40235_v7 = vld [vmem:[#allocation68_spill] sm:$0xff] }
0x11c0   : > { %29028 = vmatmul.mubr.msk.bf16.gmra.mrb[36].mxu0 %vm7466_vm3, %v38374_v37  ;;  %v40236_v9 = vld [vmem:[#allocation72_spill] sm:$0xff] }
0x11c1   : > { %29031 = vmatprep.mubr.msk.bf16.mxu0 %vm7466_vm3, %v38349_v63  ;;  %29156 = vmatpush3.bf16.msra.mxu0 %v32171_v56  ;;  %v20774_v56 = vrot.slane %v40193_v48, 1 }
0x11c2   : > { %29157 = vmatprep.subr.bf16.mxu0 %v32172_v8 }
0x11c3   : > { %v38474_v54 = vsel %vm2426_vm2, %v20772_v46, %v20774_v56  ;;  %v40210_v46 = vld [vmem:[#allocation8_spill] sm:$0xff]  ;;  %v38539_v56 = vsel %vm2426_vm2, %v20797_v12, %v20799_v26  ;;  %v20819_v12 = vrot.slane %v40220_v62, 1  ;;  %v20821_v26 = vrot.slane %v40221_v47, 1  ;;  %v40230_v62 = vld [vmem:[#allocation66_spill] sm:$0xff]  ;;  %v40231_v47 = vld [vmem:[#allocation67_spill] sm:$0xff] }
0x11c4   : > { %v20802_v48 = vrot.slane %v40210_v46, 1 }
0x11c5   : > { %29158 = vmatpush3.bf16.msra.mxu0 %v32172_v8  ;;  %v38526_v8 = vsel %vm2426_vm2, %v20792_v31, %v20794_v58  ;;  %v20816_v31 = vrot.slane %v40218_v6, 1  ;;  %v20817_v58 = vrot.slane %v40219_v16, 1  ;;  %v38623_v6 = vsel %vm2426_vm2, %v20827_v11, %v20829_v18  ;;  %v40229_v16 = vld [vmem:[#allocation62_spill] sm:$0xff] }
0x11c6   : > { %v38544_v23 = vsel %vm2426_vm2, %v20801_v49, %v20802_v48  ;;  %v38552_v20 = vsel %vm2426_vm2, %v20802_v48, %v20804_v27  ;;  %29287 = vmatprep.subr.bf16.mxu0 %v38564_v0  ;;  %v20822_v49 = vrot.slane %v40222_v38, 1  ;;  %v20824_v27 = vrot.slane %v40223_v53, 1  ;;  %v40232_v53 = vld [vmem:[#allocation65_spill] sm:$0xff] }
0x11c7   : > { %v38589_v61 = vsel %vm2426_vm2, %v20816_v31, %v20817_v58  ;;  %v38597_v46 = vsel %vm2426_vm2, %v20817_v58, %v20819_v12  ;;  %v38628_v31 = vsel %vm2426_vm2, %v20831_v33, %v20832_v34  ;;  %v20834_v58 = vrot.slane %v40229_v16, 1  ;;  %v40237_v16 = vld [vmem:[#allocation73_spill] sm:$0xff] }
0x11c8   : > { %29032 = vmatmul.mubr.msk.bf16.gmra.mrb[40].mxu0 %vm7466_vm3, %v38360_v10  ;;  %v38602_v48 = vsel %vm2426_vm2, %v20821_v26, %v20822_v49  ;;  %v38610_v36 = vsel %vm2426_vm2, %v20822_v49, %v20824_v27  ;;  %v20836_v12 = vrot.slane %v40230_v62, 1  ;;  %v20837_v26 = vrot.slane %v40231_v47, 1  ;;  %v40238_v47 = vld [vmem:[#allocation71_spill] sm:$0xff] }
0x11c9   : > { %29035 = vmatprep.mubr.msk.bf16.mxu0 %vm7466_vm3, %v38385_v19  ;;  %v38636_v38 = vsel %vm2426_vm2, %v20832_v34, %v20834_v58  ;;  %v20839_v27 = vrot.slane %v40232_v53, 1  ;;  %v20842_v11 = vrot.slane %v40234_v2, 1  ;;  %v20844_v33 = vrot.slane %v40235_v7, 1  ;;  %v40239_v53 = vld [vmem:[#allocation75_spill] sm:$0xff]  ;;  %v40241_v7 = vld [vmem:[#allocation74_spill] sm:$0xff] }
0x11ca   : > { %v38641_v49 = vsel %vm2426_vm2, %v20836_v12, %v20837_v26  ;;  %v20846_v34 = vrot.slane %v40236_v9, 1  ;;  %v20847_v58 = vrot.slane %v40237_v16, 1  ;;  %v40242_v9 = vld [vmem:[#allocation78_spill] sm:$0xff]  ;;  %v40243_v16 = vld [vmem:[#allocation79_spill] sm:$0xff] }
0x11cb   : > { %v38649_v32 = vsel %vm2426_vm2, %v20837_v26, %v20839_v27  ;;  %v38654_v18 = vsel %vm2426_vm2, %v20841_v14, %v20842_v11  ;;  %v38662_v62 = vsel %vm2426_vm2, %v20842_v11, %v20844_v33  ;;  %v20849_v26 = vrot.slane %v40238_v47, 1 }
0x11cc   : > { %v38667_v12 = vsel %vm2426_vm2, %v20846_v34, %v20847_v58  ;;  %v20851_v27 = vrot.slane %v40239_v53, 1  ;;  %v20852_v14 = vrot.slane %v40240_v15, 1  ;;  %v20854_v33 = vrot.slane %v40241_v7, 1  ;;  %v40246_v15 = vld [vmem:[#allocation81_spill] sm:$0xff] }
0x11cd   : > { %v38675_v2 = vsel %vm2426_vm2, %v20847_v58, %v20849_v26  ;;  %v20856_v34 = vrot.slane %v40242_v9, 1  ;;  %v20857_v47 = vrot.slane %v40243_v16, 1  ;;  %v40245_v26 = vld [vmem:[#allocation77_spill] sm:$0xff]  ;;  %v20861_v7 = vrot.slane %v40246_v15, 1 }
0x11ce   : > { %v38680_v11 = vsel %vm2426_vm2, %v20851_v27, %v20852_v14  ;;  %v38688_v53 = vsel %vm2426_vm2, %v20852_v14, %v20854_v33  ;;  %v20859_v27 = vrot.slane %v40245_v26, 1  ;;  %v20862_v9 = vrot.slane %v40247_v22, 1  ;;  %v40250_v33 = vld [vmem:[#allocation80_spill] sm:$0xff] }
0x11cf   : > { %v38693_v58 = vsel %vm2426_vm2, %v20856_v34, %v20857_v47  ;;  %v20864_v34 = vrot.slane %v40250_v33, 1  ;;  %v20866_v26 = vrot.slane %v40251_v39, 1 }
0x11d0   : > { %29036 = vmatmul.mubr.msk.bf16.gmra.mrb[44].mxu0 %vm7466_vm3, %v38393_v35  ;;  %40244 = vst [vmem:[#allocation206_spill] sm:$0xff] %v38693_v58  ;;  %v38701_v16 = vsel %vm2426_vm2, %v20857_v47, %v20859_v27  ;;  %v38706_v14 = vsel %vm2426_vm2, %v20861_v7, %v20862_v9  ;;  %v40255_v27 = vld [vmem:[#allocation83_spill] sm:$0xff] }
0x11d1   : > { %29039 = vmatprep.mubr.msk.bf16.mxu0 %vm7466_vm3, %v38398_v51  ;;  %40248 = vst [vmem:[#allocation207_spill] sm:$0xff] %v38701_v16  ;;  %40249 = vst [vmem:[#allocation209_spill] sm:$0xff] %v38706_v14  ;;  %v38714_v22 = vsel %vm2426_vm2, %v20862_v9, %v20864_v34  ;;  %v20869_v7 = vrot.slane %v40255_v27, 1  ;;  %v40260_v34 = vld [vmem:[#allocation86_spill] sm:$0xff] }
0x11d2   : > { %40253 = vst [vmem:[#allocation226_spill] sm:$0xff] %v38714_v22 }
0x11d8   : > { %29040 = vmatmul.mubr.msk.bf16.gmra.mrb[48].mxu0 %vm7466_vm3, %v38406_v3 }
0x11d9   : > { %29043 = vmatprep.mubr.msk.bf16.mxu0 %vm7466_vm3, %v38411_v41 }
0x11e0   : > { %29044 = vmatmul.mubr.msk.bf16.gmra.mrb[52].mxu0 %vm7466_vm3, %v38419_v57 }
0x11e1   : > { %29047 = vmatprep.mubr.msk.bf16.mxu0 %vm7466_vm3, %v38424_v29 }
0x11e8   : > { %29048 = vmatmul.mubr.msk.bf16.gmra.mrb[56].mxu0 %vm7466_vm3, %v38432_v17 }
0x11e9   : > { %29051 = vmatprep.mubr.msk.bf16.mxu0 %vm7466_vm3, %v38437_v50 }
0x11f0   : > { %29052 = vmatmul.mubr.msk.bf16.gmra.mrb[60].mxu0 %vm7466_vm3, %v38445_v1 }
0x11f1   : > { %29055 = vmatprep.mubr.msk.bf16.mxu0 %vm7466_vm3, %v38450_v45 }
0x11f8   : > { %29056 = vmatmul.mubr.msk.bf16.gmra.mrb[64].mxu0 %vm7466_vm3, %v38461_v44 }
0x11f9   : > { %29059 = vmatprep.mubr.msk.bf16.mxu0 %vm7466_vm3, %v38466_v55 }
0x1200   : > { %29060 = vmatmul.mubr.msk.bf16.gmra.mrb[68].mxu0 %vm7466_vm3, %v38474_v54 }
0x1201   : > { %29063 = vmatprep.mubr.msk.bf16.mxu0 %vm7466_vm3, %v38479_v4 }
0x1208   : > { %29064 = vmatmul.mubr.msk.bf16.gmra.mrb[72].mxu0 %vm7466_vm3, %v38487_v30 }
0x1209   : > { %29067 = vmatprep.mubr.msk.bf16.mxu0 %vm7466_vm3, %v38492_v13 }
0x1210   : > { %29068 = vmatmul.mubr.msk.bf16.gmra.mrb[76].mxu0 %vm7466_vm3, %v38500_v5 }
0x1211   : > { %29071 = vmatprep.mubr.msk.bf16.mxu0 %vm7466_vm3, %v38505_v42 }
0x1218   : > { %29072 = vmatmul.mubr.msk.bf16.gmra.mrb[80].mxu0 %vm7466_vm3, %v38513_v28 }
0x1219   : > { %29075 = vmatprep.mubr.msk.bf16.mxu0 %vm7466_vm3, %v38518_v25 }
0x1220   : > { %29076 = vmatmul.mubr.msk.bf16.gmra.mrb[84].mxu0 %vm7466_vm3, %v38526_v8 }
0x1221   : > { %29079 = vmatprep.mubr.msk.bf16.mxu0 %vm7466_vm3, %v38531_v21 }
0x1228   : > { %29080 = vmatmul.mubr.msk.bf16.gmra.mrb[88].mxu0 %vm7466_vm3, %v38539_v56 }
0x1229   : > { %29083 = vmatprep.mubr.msk.bf16.mxu0 %vm7466_vm3, %v38544_v23 }
0x1230   : > { %29084 = vmatmul.mubr.msk.bf16.gmra.mrb[92].mxu0 %vm7466_vm3, %v38552_v20 }
0x1231   : > { %29087 = vmatprep.mubr.msk.bf16.mxu0 %vm7466_vm3, %v38557_v24 }
0x1238   : > { %29088 = vmatmul.mubr.msk.bf16.gmra.mrb[96].mxu0 %vm7466_vm3, %v38571_v40 }
0x1239   : > { %29091 = vmatprep.mubr.msk.bf16.mxu0 %vm7466_vm3, %v38576_v52 }
0x1240   : > { %29092 = vmatmul.mubr.msk.bf16.gmra.mrb[100].mxu0 %vm7466_vm3, %v38584_v60 }
0x1241   : > { %29095 = vmatprep.mubr.msk.bf16.mxu0 %vm7466_vm3, %v38589_v61 }
0x1248   : > { %29096 = vmatmul.mubr.msk.bf16.gmra.mrb[104].mxu0 %vm7466_vm3, %v38597_v46 }
0x1249   : > { %29099 = vmatprep.mubr.msk.bf16.mxu0 %vm7466_vm3, %v38602_v48 }
0x1250   : > { %29100 = vmatmul.mubr.msk.bf16.gmra.mrb[108].mxu0 %vm7466_vm3, %v38610_v36 }
0x1251   : > { %29103 = vmatprep.mubr.msk.bf16.mxu0 %vm7466_vm3, %v38615_v59 }
0x1258   : > { %29104 = vmatmul.mubr.msk.bf16.gmra.mrb[112].mxu0 %vm7466_vm3, %v38623_v6 }
0x1259   : > { %29107 = vmatprep.mubr.msk.bf16.mxu0 %vm7466_vm3, %v38628_v31 }
0x1260   : > { %29108 = vmatmul.mubr.msk.bf16.gmra.mrb[116].mxu0 %vm7466_vm3, %v38636_v38 }
0x1261   : > { %29111 = vmatprep.mubr.msk.bf16.mxu0 %vm7466_vm3, %v38641_v49 }
0x1268   : > { %29112 = vmatmul.mubr.msk.bf16.gmra.mrb[120].mxu0 %vm7466_vm3, %v38649_v32 }
0x1269   : > { %29115 = vmatprep.mubr.msk.bf16.mxu0 %vm7466_vm3, %v38654_v18 }
0x1270   : > { %29116 = vmatmul.mubr.msk.bf16.gmra.mrb[124].mxu0 %vm7466_vm3, %v38662_v62 }
0x1271   : > { %29119 = vmatprep.mubr.msk.bf16.mxu0 %vm7466_vm3, %v38667_v12 }
0x1278   : > { %29120 = vmatmul.mubr.msk.bf16.gmra.mrb[128].mxu0 %vm7466_vm3, %v38675_v2 }
0x1279   : > { %29123 = vmatprep.mubr.msk.bf16.mxu0 %vm7466_vm3, %v38680_v11 }
0x1280   : > { %29124 = vmatmul.mubr.msk.bf16.gmra.mrb[132].mxu0 %vm7466_vm3, %v38688_v53 }
0x1281   : > { %29127 = vmatprep.mubr.msk.bf16.mxu0 %vm7466_vm3, %v38693_v58  ;;  %v40252_v58 = vld [vmem:[#allocation85_spill] sm:$0xff] }
0x1282   : > { %v20867_v15 = vrot.slane %v40252_v58, 1 }
0x1284   : > { %v38719_v47 = vsel %vm2426_vm2, %v20866_v26, %v20867_v15  ;;  %v38727_v58 = vsel %vm2426_vm2, %v20867_v15, %v20869_v7  ;;  %v20874_v26 = vrot.slane %v40260_v34, 1  ;;  %v40265_v7 = vld [vmem:[#allocation89_spill] sm:$0xff] }
0x1285   : > { %40254 = vst [vmem:[#allocation231_spill] sm:$0xff] %v38719_v47  ;;  %40258 = vst [vmem:[#allocation232_spill] sm:$0xff] %v38727_v58 }
0x1288   : > { %29128 = vmatmul.mubr.msk.bf16.gmra.mrb[136].mxu0 %vm7466_vm3, %v38701_v16  ;;  %v40257_v16 = vld [vmem:[#allocation88_spill] sm:$0xff] }
0x1289   : > { %29131 = vmatprep.mubr.msk.bf16.mxu0 %vm7466_vm3, %v38706_v14  ;;  %v40256_v14 = vld [vmem:[#allocation87_spill] sm:$0xff]  ;;  %v20872_v39 = vrot.slane %v40257_v16, 1 }
0x128a   : > { %v20871_v33 = vrot.slane %v40256_v14, 1 }
0x128b   : > { %v38740_v16 = vsel %vm2426_vm2, %v20872_v39, %v20874_v26  ;;  %v40269_v26 = vld [vmem:[#allocation92_spill] sm:$0xff] }
0x128c   : > { %v38732_v9 = vsel %vm2426_vm2, %v20871_v33, %v20872_v39  ;;  %40263 = vst [vmem:[#allocation233_spill] sm:$0xff] %v38740_v16  ;;  %v20879_v33 = vrot.slane %v40265_v7, 1 }
0x128d   : > { %40259 = vst [vmem:[#allocation96_spill] sm:$0xff] %v38732_v9 }
0x1290   : > { %29132 = vmatmul.mubr.msk.bf16.gmra.mrb[140].mxu0 %vm7466_vm3, %v38714_v22  ;;  %v40262_v22 = vld [vmem:[#allocation91_spill] sm:$0xff] }
0x1291   : > { %29135 = vmatprep.mubr.msk.bf16.mxu0 %vm7466_vm3, %v38719_v47  ;;  %v40261_v47 = vld [vmem:[#allocation90_spill] sm:$0xff]  ;;  %v20877_v14 = vrot.slane %v40262_v22, 1 }
0x1292   : > { %v20876_v27 = vrot.slane %v40261_v47, 1 }
0x1293   : > { %v38753_v22 = vsel %vm2426_vm2, %v20877_v14, %v20879_v33  ;;  %v40273_v33 = vld [vmem:[#allocation226_spill] sm:$0xff] }
0x1294   : > { %v38745_v15 = vsel %vm2426_vm2, %v20876_v27, %v20877_v14  ;;  %40268 = vst [vmem:[#allocation235_spill] sm:$0xff] %v38753_v22  ;;  %v20884_v27 = vrot.slane %v40269_v26, 1  ;;  %v40272_v14 = vld [vmem:[#allocation209_spill] sm:$0xff]  ;;  %v40276_v26 = vld [vmem:[#allocation96_spill] sm:$0xff] }
0x1295   : > { %40264 = vst [vmem:[#allocation234_spill] sm:$0xff] %v38745_v15 }
0x1298   : > { %29136 = vmatmul.mubr.msk.bf16.gmra.mrb[144].mxu0 %vm7466_vm3, %v38727_v58  ;;  %v40267_v58 = vld [vmem:[#allocation94_spill] sm:$0xff] }
0x1299   : > { %29139 = vmatprep.mubr.msk.bf16.mxu0 %vm7466_vm3, %v38732_v9  ;;  %v40266_v9 = vld [vmem:[#allocation93_spill] sm:$0xff]  ;;  %v20882_v47 = vrot.slane %v40267_v58, 1  ;;  %v32174_v58 = vld [vmem:[%s39365_s5 + $0x108] sm:$0xff]  }
0x129a   : > { %v20881_v34 = vrot.slane %v40266_v9, 1  ;;  %v32175_v9 = vld [vmem:[%s39365_s5 + $0x110] sm:$0xff]  }
0x129b   : > { %v38764_v7 = vsel %vm2426_vm2, %v20882_v47, %v20884_v27  ;;  %v40277_v27 = vld [vmem:[#allocation99_spill] sm:$0xff] }
0x129c   : > { %v38758_v39 = vsel %vm2426_vm2, %v20881_v34, %v20882_v47  ;;  %v40274_v34 = vld [vmem:[#allocation231_spill] sm:$0xff]  ;;  %v40275_v47 = vld [vmem:[#allocation232_spill] sm:$0xff] }
0x12a0   : > { %29140 = vmatmul.mubr.msk.bf16.gmra.mrb[148].mxu0 %vm7466_vm3, %v38740_v16 }
0x12a1   : > { %29143 = vmatprep.mubr.msk.bf16.mxu0 %vm7466_vm3, %v38745_v15 }
0x12a8   : > { %29144 = vmatmul.mubr.msk.bf16.gmra.mrb[152].mxu0 %vm7466_vm3, %v38753_v22 }
0x12a9   : > { %29147 = vmatprep.mubr.msk.bf16.mxu0 %vm7466_vm3, %v38758_v39 }
0x12b0   : > { %29148 = vmatmul.mubr.msk.bf16.gmra.mrb[156].mxu0 %vm7466_vm3, %v38764_v7 }
0x12b1   : > { %29159 = vmatprep.mubr.msk.bf16.mxu0 %vm7466_vm3, %v38365_v43  ;;  %v32176_v43 = vld [vmem:[%s39365_s5 + $0x118] sm:$0xff]  }
0x12b8   : > { %29160 = vmatmul.mubr.msk.bf16.vlgmr.msra.gmra.mrb[32].mxu0 %vm7466_vm3, %v38374_v37  ;;  %v40270_v37 = vld [vmem:[#allocation206_spill] sm:$0xff] }
0x12b9   : > { %29288 = vmatpush3.bf16.msra.mxu0 %v38564_v0  ;;  %29163 = vmatprep.mubr.msk.bf16.mxu0 %vm7466_vm3, %v38349_v63  ;;  %v40271_v0 = vld [vmem:[#allocation207_spill] sm:$0xff] }
0x12ba   : > { %29289 = vmatprep.subr.bf16.mxu0 %v32174_v58 }
0x12bd   : > { %29290 = vmatpush3.bf16.msra.mxu0 %v32174_v58  ;;  %v21781_v58 = vrot.slane %v40277_v27, 1 }
0x12be   : > { %29291 = vmatprep.subr.bf16.mxu0 %v32175_v9 }
0x12c0   : > { %29164 = vmatmul.mubr.msk.bf16.gmra.mrb[36].mxu0 %vm7466_vm3, %v38360_v10 }
0x12c1   : > { %29167 = vmatprep.mubr.msk.bf16.mxu0 %vm7466_vm3, %v38385_v19  ;;  %29292 = vmatpush3.bf16.msra.mxu0 %v32175_v9  ;;  %v40278_v9 = vld [vmem:[#allocation100_spill] sm:$0xff] }
0x12c2   : > { %29293 = vmatprep.subr.bf16.mxu0 %v32176_v43 }
0x12c5   : > { %29294 = vmatpush3.bf16.msra.mxu0 %v32176_v43  ;;  %v21782_v43 = vrot.slane %v40278_v9, 1  ;;  %v40298_v9 = vld [vmem:[#allocation112_spill] sm:$0xff] }
0x12c8   : > { %29168 = vmatmul.mubr.msk.bf16.gmra.mrb[40].mxu0 %vm7466_vm3, %v38393_v35 }
0x12c9   : > { %29171 = vmatprep.mubr.msk.bf16.mxu0 %vm7466_vm3, %v38398_v51 }
0x12d0   : > { %29172 = vmatmul.mubr.msk.bf16.gmra.mrb[44].mxu0 %vm7466_vm3, %v38406_v3 }
0x12d1   : > { %29175 = vmatprep.mubr.msk.bf16.mxu0 %vm7466_vm3, %v38411_v41 }
0x12d8   : > { %29176 = vmatmul.mubr.msk.bf16.gmra.mrb[48].mxu0 %vm7466_vm3, %v38419_v57 }
0x12d9   : > { %29179 = vmatprep.mubr.msk.bf16.mxu0 %vm7466_vm3, %v38424_v29 }
0x12e0   : > { %29180 = vmatmul.mubr.msk.bf16.gmra.mrb[52].mxu0 %vm7466_vm3, %v38432_v17 }
0x12e1   : > { %29183 = vmatprep.mubr.msk.bf16.mxu0 %vm7466_vm3, %v38437_v50 }
0x12e8   : > { %29184 = vmatmul.mubr.msk.bf16.gmra.mrb[56].mxu0 %vm7466_vm3, %v38445_v1 }
0x12e9   : > { %29187 = vmatprep.mubr.msk.bf16.mxu0 %vm7466_vm3, %v38450_v45 }
0x12f0   : > { %29188 = vmatmul.mubr.msk.bf16.gmra.mrb[60].mxu0 %vm7466_vm3, %v38461_v44 }
0x12f1   : > { %29191 = vmatprep.mubr.msk.bf16.mxu0 %vm7466_vm3, %v38466_v55 }
0x12f8   : > { %29192 = vmatmul.mubr.msk.bf16.gmra.mrb[64].mxu0 %vm7466_vm3, %v38474_v54 }
0x12f9   : > { %29195 = vmatprep.mubr.msk.bf16.mxu0 %vm7466_vm3, %v38479_v4 }
0x1300   : > { %29196 = vmatmul.mubr.msk.bf16.gmra.mrb[68].mxu0 %vm7466_vm3, %v38487_v30 }
0x1301   : > { %29199 = vmatprep.mubr.msk.bf16.mxu0 %vm7466_vm3, %v38492_v13 }
0x1308   : > { %29200 = vmatmul.mubr.msk.bf16.gmra.mrb[72].mxu0 %vm7466_vm3, %v38500_v5 }
0x1309   : > { %29203 = vmatprep.mubr.msk.bf16.mxu0 %vm7466_vm3, %v38505_v42 }
0x1310   : > { %29204 = vmatmul.mubr.msk.bf16.gmra.mrb[76].mxu0 %vm7466_vm3, %v38513_v28 }
0x1311   : > { %29207 = vmatprep.mubr.msk.bf16.mxu0 %vm7466_vm3, %v38518_v25 }
0x1318   : > { %29208 = vmatmul.mubr.msk.bf16.gmra.mrb[80].mxu0 %vm7466_vm3, %v38526_v8 }
0x1319   : > { %29211 = vmatprep.mubr.msk.bf16.mxu0 %vm7466_vm3, %v38531_v21 }
0x1320   : > { %29212 = vmatmul.mubr.msk.bf16.gmra.mrb[84].mxu0 %vm7466_vm3, %v38539_v56 }
0x1321   : > { %29215 = vmatprep.mubr.msk.bf16.mxu0 %vm7466_vm3, %v38544_v23 }
0x1328   : > { %29216 = vmatmul.mubr.msk.bf16.gmra.mrb[88].mxu0 %vm7466_vm3, %v38552_v20 }
0x1329   : > { %29219 = vmatprep.mubr.msk.bf16.mxu0 %vm7466_vm3, %v38557_v24 }
0x1330   : > { %29220 = vmatmul.mubr.msk.bf16.gmra.mrb[92].mxu0 %vm7466_vm3, %v38571_v40 }
0x1331   : > { %29223 = vmatprep.mubr.msk.bf16.mxu0 %vm7466_vm3, %v38576_v52 }
0x1338   : > { %29224 = vmatmul.mubr.msk.bf16.gmra.mrb[96].mxu0 %vm7466_vm3, %v38584_v60 }
0x1339   : > { %29227 = vmatprep.mubr.msk.bf16.mxu0 %vm7466_vm3, %v38589_v61 }
0x1340   : > { %29228 = vmatmul.mubr.msk.bf16.gmra.mrb[100].mxu0 %vm7466_vm3, %v38597_v46 }
0x1341   : > { %29231 = vmatprep.mubr.msk.bf16.mxu0 %vm7466_vm3, %v38602_v48 }
0x1348   : > { %29232 = vmatmul.mubr.msk.bf16.gmra.mrb[104].mxu0 %vm7466_vm3, %v38610_v36 }
0x1349   : > { %29235 = vmatprep.mubr.msk.bf16.mxu0 %vm7466_vm3, %v38615_v59 }
0x1350   : > { %29236 = vmatmul.mubr.msk.bf16.gmra.mrb[108].mxu0 %vm7466_vm3, %v38623_v6 }
0x1351   : > { %29239 = vmatprep.mubr.msk.bf16.mxu0 %vm7466_vm3, %v38628_v31 }
0x1358   : > { %29240 = vmatmul.mubr.msk.bf16.gmra.mrb[112].mxu0 %vm7466_vm3, %v38636_v38 }
0x1359   : > { %29243 = vmatprep.mubr.msk.bf16.mxu0 %vm7466_vm3, %v38641_v49 }
0x1360   : > { %29244 = vmatmul.mubr.msk.bf16.gmra.mrb[116].mxu0 %vm7466_vm3, %v38649_v32 }
0x1361   : > { %29247 = vmatprep.mubr.msk.bf16.mxu0 %vm7466_vm3, %v38654_v18 }
0x1368   : > { %29248 = vmatmul.mubr.msk.bf16.gmra.mrb[120].mxu0 %vm7466_vm3, %v38662_v62 }
0x1369   : > { %29251 = vmatprep.mubr.msk.bf16.mxu0 %vm7466_vm3, %v38667_v12 }
0x1370   : > { %29252 = vmatmul.mubr.msk.bf16.gmra.mrb[124].mxu0 %vm7466_vm3, %v38675_v2 }
0x1371   : > { %29255 = vmatprep.mubr.msk.bf16.mxu0 %vm7466_vm3, %v38680_v11 }
0x1378   : > { %29256 = vmatmul.mubr.msk.bf16.gmra.mrb[128].mxu0 %vm7466_vm3, %v38688_v53 }
0x1379   : > { %29259 = vmatprep.mubr.msk.bf16.mxu0 %vm7466_vm3, %v40270_v37 }
0x1380   : > { %29260 = vmatmul.mubr.msk.bf16.gmra.mrb[132].mxu0 %vm7466_vm3, %v40271_v0 }
0x1381   : > { %29263 = vmatprep.mubr.msk.bf16.mxu0 %vm7466_vm3, %v40272_v14 }
0x1388   : > { %29264 = vmatmul.mubr.msk.bf16.gmra.mrb[136].mxu0 %vm7466_vm3, %v40273_v33 }
0x1389   : > { %29267 = vmatprep.mubr.msk.bf16.mxu0 %vm7466_vm3, %v40274_v34 }
0x1390   : > { %29268 = vmatmul.mubr.msk.bf16.gmra.mrb[140].mxu0 %vm7466_vm3, %v40275_v47 }
0x1391   : > { %29271 = vmatprep.mubr.msk.bf16.mxu0 %vm7466_vm3, %v40276_v26  ;;  %v38905_v26 = vsel %vm2426_vm2, %v21781_v58, %v21782_v43 }
0x1398   : > { %29272 = vmatmul.mubr.msk.bf16.gmra.mrb[144].mxu0 %vm7466_vm3, %v38740_v16 }
0x1399   : > { %29275 = vmatprep.mubr.msk.bf16.mxu0 %vm7466_vm3, %v38745_v15  ;;  %v40279_v15 = vld [vmem:[#allocation208_spill] sm:$0xff] }
0x139a   : > { %v21784_v16 = vrot.slane %v40279_v15, 1 }
0x13a0   : > { %29276 = vmatmul.mubr.msk.bf16.gmra.mrb[148].mxu0 %vm7466_vm3, %v38753_v22  ;;  %v38911_v22 = vsel %vm2426_vm2, %v21782_v43, %v21784_v16 }
0x13a1   : > { %29279 = vmatprep.mubr.msk.bf16.mxu0 %vm7466_vm3, %v38758_v39 }
0x13a8   : > { %29280 = vmatmul.mubr.msk.bf16.gmra.mrb[152].mxu0 %vm7466_vm3, %v38764_v7 }
0x13a9   : > { %29283 = vmatprep.mubr.msk.bf16.mxu0 %vm7466_vm3, %v38905_v26 }
0x13b0   : > { %29284 = vmatmul.mubr.msk.bf16.gmra.mrb[156].mxu0 %vm7466_vm3, %v38911_v22 }
0x13b1   : > { %29295 = vmatprep.mubr.msk.bf16.mxu0 %vm7466_vm3, %v38349_v63  ;;  %v39024_v63 = vld [vmem:[%s39366_s6] ss:$0 sm:$0xff] }
0x13b2   : > { %v16189_v43 = vadd.f32 %v40298_v9, %v39024_v63 }
0x13b8   : > { %29296 = vmatmul.mubr.msk.bf16.vlgmr.msra.gmra.mrb[32].mxu0 %vm7466_vm3, %v38360_v10  ;;  %v40280_v10 = vld [vmem:[#allocation96_spill] sm:$0xff] }
0x13b9   : > { %29299 = vmatprep.mubr.msk.bf16.mxu0 %vm7466_vm3, %v38385_v19  ;;  %v40281_v19 = vld [vmem:[#allocation95_spill] sm:$0xff] }
0x13c0   : > { %29300 = vmatmul.mubr.msk.bf16.gmra.mrb[36].mxu0 %vm7466_vm3, %v38393_v35  ;;  %v16176_v35 = vadd.f32 %v40281_v19, %v39024_v63 }
0x13c1   : > { %29303 = vmatprep.mubr.msk.bf16.mxu0 %vm7466_vm3, %v38398_v51  ;;  %v40282_v51 = vld [vmem:[#allocation97_spill] sm:$0xff] }
0x13c8   : > { %29304 = vmatmul.mubr.msk.bf16.gmra.mrb[40].mxu0 %vm7466_vm3, %v38406_v3  ;;  %v16174_v3 = vadd.f32 %v39024_v63, %v40282_v51 }
0x13c9   : > { %29307 = vmatprep.mubr.msk.bf16.mxu0 %vm7466_vm3, %v38411_v41 }
0x13d0   : > { %29308 = vmatmul.mubr.msk.bf16.gmra.mrb[44].mxu0 %vm7466_vm3, %v38419_v57  ;;  %v40283_v57 = vld [vmem:[#allocation98_spill] sm:$0xff] }
0x13d1   : > { %29311 = vmatprep.mubr.msk.bf16.mxu0 %vm7466_vm3, %v38424_v29  ;;  %v16177_v29 = vadd.f32 %v40283_v57, %v39024_v63 }
0x13d8   : > { %29312 = vmatmul.mubr.msk.bf16.gmra.mrb[48].mxu0 %vm7466_vm3, %v38432_v17 }
0x13d9   : > { %29315 = vmatprep.mubr.msk.bf16.mxu0 %vm7466_vm3, %v38437_v50 }
0x13e0   : > { %29316 = vmatmul.mubr.msk.bf16.gmra.mrb[52].mxu0 %vm7466_vm3, %v38445_v1  ;;  %v40284_v1 = vld [vmem:[#allocation101_spill] sm:$0xff] }
0x13e1   : > { %29319 = vmatprep.mubr.msk.bf16.mxu0 %vm7466_vm3, %v38450_v45  ;;  %v16175_v45 = vadd.f32 %v39024_v63, %v40284_v1  ;;  %v40301_v1 = vld [vmem:[#allocation115_spill] sm:$0xff] }
0x13e8   : > { %29320 = vmatmul.mubr.msk.bf16.gmra.mrb[56].mxu0 %vm7466_vm3, %v38461_v44 }
0x13e9   : > { %29323 = vmatprep.mubr.msk.bf16.mxu0 %vm7466_vm3, %v38466_v55 }
0x13f0   : > { %29324 = vmatmul.mubr.msk.bf16.gmra.mrb[60].mxu0 %vm7466_vm3, %v38474_v54 }
0x13f1   : > { %29327 = vmatprep.mubr.msk.bf16.mxu0 %vm7466_vm3, %v38479_v4 }
0x13f8   : > { %29328 = vmatmul.mubr.msk.bf16.gmra.mrb[64].mxu0 %vm7466_vm3, %v38487_v30 }
0x13f9   : > { %29331 = vmatprep.mubr.msk.bf16.mxu0 %vm7466_vm3, %v38492_v13  ;;  %v40285_v13 = vld [vmem:[#allocation233_spill] sm:$0xff] }
0x1400   : > { %29332 = vmatmul.mubr.msk.bf16.gmra.mrb[68].mxu0 %vm7466_vm3, %v38500_v5  ;;  %v40286_v5 = vld [vmem:[#allocation234_spill] sm:$0xff] }
0x1401   : > { %29335 = vmatprep.mubr.msk.bf16.mxu0 %vm7466_vm3, %v38505_v42  ;;  %v40287_v42 = vld [vmem:[#allocation102_spill] sm:$0xff] }
0x1408   : > { %29336 = vmatmul.mubr.msk.bf16.gmra.mrb[72].mxu0 %vm7466_vm3, %v38513_v28  ;;  %v16180_v28 = vadd.f32 %v40287_v42, %v39024_v63 }
0x1409   : > { %29339 = vmatprep.mubr.msk.bf16.mxu0 %vm7466_vm3, %v38518_v25  ;;  %v40288_v25 = vld [vmem:[#allocation103_spill] sm:$0xff] }
0x1410   : > { %29340 = vmatmul.mubr.msk.bf16.gmra.mrb[76].mxu0 %vm7466_vm3, %v38526_v8  ;;  %v16178_v8 = vadd.f32 %v39024_v63, %v40288_v25 }
0x1411   : > { %29343 = vmatprep.mubr.msk.bf16.mxu0 %vm7466_vm3, %v38531_v21 }
0x1418   : > { %29344 = vmatmul.mubr.msk.bf16.gmra.mrb[80].mxu0 %vm7466_vm3, %v38539_v56  ;;  %v40289_v56 = vld [vmem:[#allocation104_spill] sm:$0xff] }
0x1419   : > { %29347 = vmatprep.mubr.msk.bf16.mxu0 %vm7466_vm3, %v38544_v23  ;;  %v16181_v23 = vadd.f32 %v40289_v56, %v39024_v63  ;;  %v40305_v56 = vld [vmem:[#allocation119_spill] sm:$0xff] }
0x1420   : > { %29348 = vmatmul.mubr.msk.bf16.gmra.mrb[84].mxu0 %vm7466_vm3, %v38552_v20 }
0x1421   : > { %29351 = vmatprep.mubr.msk.bf16.mxu0 %vm7466_vm3, %v38557_v24 }
0x1428   : > { %29352 = vmatmul.mubr.msk.bf16.gmra.mrb[88].mxu0 %vm7466_vm3, %v38571_v40  ;;  %v40290_v40 = vld [vmem:[#allocation105_spill] sm:$0xff] }
0x1429   : > { %29355 = vmatprep.mubr.msk.bf16.mxu0 %vm7466_vm3, %v38576_v52  ;;  %v16179_v52 = vadd.f32 %v39024_v63, %v40290_v40 }
0x1430   : > { %29356 = vmatmul.mubr.msk.bf16.gmra.mrb[92].mxu0 %vm7466_vm3, %v38584_v60 }
0x1431   : > { %29359 = vmatprep.mubr.msk.bf16.mxu0 %vm7466_vm3, %v38589_v61 }
0x1438   : > { %29360 = vmatmul.mubr.msk.bf16.gmra.mrb[96].mxu0 %vm7466_vm3, %v38597_v46 }
0x1439   : > { %29363 = vmatprep.mubr.msk.bf16.mxu0 %vm7466_vm3, %v38602_v48 }
0x1440   : > { %29364 = vmatmul.mubr.msk.bf16.gmra.mrb[100].mxu0 %vm7466_vm3, %v38610_v36 }
0x1441   : > { %29367 = vmatprep.mubr.msk.bf16.mxu0 %vm7466_vm3, %v38615_v59  ;;  %v40291_v59 = vld [vmem:[#allocation235_spill] sm:$0xff] }
0x1448   : > { %29368 = vmatmul.mubr.msk.bf16.gmra.mrb[104].mxu0 %vm7466_vm3, %v38623_v6  ;;  %v40292_v6 = vld [vmem:[#allocation106_spill] sm:$0xff] }
0x1449   : > { %29371 = vmatprep.mubr.msk.bf16.mxu0 %vm7466_vm3, %v38628_v31  ;;  %v16184_v31 = vadd.f32 %v40292_v6, %v39024_v63 }
0x1450   : > { %29372 = vmatmul.mubr.msk.bf16.gmra.mrb[108].mxu0 %vm7466_vm3, %v38636_v38  ;;  %v40293_v38 = vld [vmem:[#allocation107_spill] sm:$0xff] }
0x1451   : > { %29375 = vmatprep.mubr.msk.bf16.mxu0 %vm7466_vm3, %v38641_v49  ;;  %v16182_v49 = vadd.f32 %v39024_v63, %v40293_v38 }
0x1458   : > { %29376 = vmatmul.mubr.msk.bf16.gmra.mrb[112].mxu0 %vm7466_vm3, %v38649_v32 }
0x1459   : > { %29379 = vmatprep.mubr.msk.bf16.mxu0 %vm7466_vm3, %v38654_v18  ;;  %v40294_v18 = vld [vmem:[#allocation108_spill] sm:$0xff] }
0x1460   : > { %29380 = vmatmul.mubr.msk.bf16.gmra.mrb[116].mxu0 %vm7466_vm3, %v38662_v62  ;;  %v16185_v62 = vadd.f32 %v40294_v18, %v39024_v63 }
0x1461   : > { %29383 = vmatprep.mubr.msk.bf16.mxu0 %vm7466_vm3, %v38667_v12 }
0x1468   : > { %29384 = vmatmul.mubr.msk.bf16.gmra.mrb[120].mxu0 %vm7466_vm3, %v38675_v2 }
0x1469   : > { %29387 = vmatprep.mubr.msk.bf16.mxu0 %vm7466_vm3, %v38680_v11  ;;  %v40295_v11 = vld [vmem:[#allocation109_spill] sm:$0xff] }
0x1470   : > { %29388 = vmatmul.mubr.msk.bf16.gmra.mrb[124].mxu0 %vm7466_vm3, %v38688_v53  ;;  %v16183_v53 = vadd.f32 %v39024_v63, %v40295_v11 }
0x1471   : > { %29391 = vmatprep.mubr.msk.bf16.mxu0 %vm7466_vm3, %v40270_v37 }
0x1478   : > { %29392 = vmatmul.mubr.msk.bf16.gmra.mrb[128].mxu0 %vm7466_vm3, %v40271_v0 }
0x1479   : > { %29395 = vmatprep.mubr.msk.bf16.mxu0 %vm7466_vm3, %v40272_v14 }
0x1480   : > { %29396 = vmatmul.mubr.msk.bf16.gmra.mrb[132].mxu0 %vm7466_vm3, %v40273_v33  ;;  %v40296_v33 = vld [vmem:[#allocation110_spill] sm:$0xff] }
0x1481   : > { %29399 = vmatprep.mubr.msk.bf16.mxu0 %vm7466_vm3, %v40274_v34  ;;  %v16188_v34 = vadd.f32 %v40296_v33, %v39024_v63 }
0x1488   : > { %29400 = vmatmul.mubr.msk.bf16.gmra.mrb[136].mxu0 %vm7466_vm3, %v40275_v47  ;;  %v40297_v47 = vld [vmem:[#allocation111_spill] sm:$0xff] }
0x1489   : > { %29403 = vmatprep.mubr.msk.bf16.mxu0 %vm7466_vm3, %v40280_v10  ;;  %v16186_v27 = vadd.f32 %v39024_v63, %v40297_v47  ;;  %v40312_v47 = vld [vmem:[#allocation126_spill] sm:$0xff] }
0x148b   : > { %v29297_v41 = vpop.f32.mrb[32].mxu0 }
0x148c   : > { %v29592_v17 = vadd.f32 %v29297_v41, %v16176_v35  ;;  %v22565_v50 = vpop.f32.mrb[33].mxu0  ;;  %v40299_v35 = vld [vmem:[#allocation113_spill] sm:$0xff] }
0x148d   : > { %v29594_v44 = vadd.f32 %v22565_v50, %v16174_v3  ;;  %v29298_v55 = vpop.f32.mrb[34].mxu0  ;;  %v16187_v51 = vadd.f32 %v39024_v63, %v40299_v35 }
0x148e   : > { %v29596_v54 = vadd.f32 %v29298_v55, %v16177_v29  ;;  %v22568_v4 = vpop.f32.mrb[35].mxu0  ;;  %v40302_v55 = vld [vmem:[#allocation116_spill] sm:$0xff] }
0x148f   : > { %v29598_v30 = vadd.f32 %v22568_v4, %v16175_v45  ;;  %23204 = vxpose.xlu0.b32.start [1/16] (narrow) %v29594_v44, 8  ;;  %v16190_v45 = vadd.f32 %v39024_v63, %v40301_v1 }
0x1490   : > { %29404 = vmatmul.mubr.msk.bf16.gmra.mrb[140].mxu0 %vm7466_vm3, %v40285_v13  ;;  %v40303_v13 = vld [vmem:[#allocation117_spill] sm:$0xff] }
0x1491   : > { %29407 = vmatprep.mubr.msk.bf16.mxu0 %vm7466_vm3, %v40286_v5  ;;  %v16191_v5 = vadd.f32 %v39024_v63, %v40303_v13 }
0x1493   : > { %23205 = vxpose.xlu0.b32.cont [2/16] (narrow) %v29598_v30, 8  ;;  %v29301_v21 = vpop.f32.mrb[36].mxu0 }
0x1494   : > { %v29600_v20 = vadd.f32 %v29301_v21, %v16180_v28  ;;  %v22581_v24 = vpop.f32.mrb[37].mxu0 }
0x1495   : > { %v29602_v60 = vadd.f32 %v22581_v24, %v16178_v8  ;;  %v29302_v61 = vpop.f32.mrb[38].mxu0  ;;  %v40304_v8 = vld [vmem:[#allocation118_spill] sm:$0xff]  ;;  %v40306_v24 = vld [vmem:[#allocation120_spill] sm:$0xff] }
0x1496   : > { %v29604_v46 = vadd.f32 %v29302_v61, %v16181_v23  ;;  %v22584_v48 = vpop.f32.mrb[39].mxu0  ;;  %v16196_v21 = vadd.f32 %v40304_v8, %v39024_v63  ;;  %v16194_v23 = vadd.f32 %v39024_v63, %v40305_v56  ;;  %v16197_v40 = vadd.f32 %v40306_v24, %v39024_v63  ;;  %v40307_v61 = vld [vmem:[#allocation121_spill] sm:$0xff]  ;;  %v40320_v56 = vld [vmem:[#allocation134_spill] sm:$0xff] }
0x1497   : > { %v29606_v36 = vadd.f32 %v22584_v48, %v16179_v52  ;;  %23206 = vxpose.xlu0.b32.cont [3/16] (narrow) %v29592_v17, 8  ;;  %v40300_v17 = vld [vmem:[#allocation114_spill] sm:$0xff] }
0x1498   : > { %29408 = vmatmul.mubr.msk.bf16.gmra.mrb[144].mxu0 %vm7466_vm3, %v40291_v59  ;;  %v16192_v50 = vadd.f32 %v40300_v17, %v39024_v63 }
0x1499   : > { %29411 = vmatprep.mubr.msk.bf16.mxu0 %vm7466_vm3, %v38758_v39 }
0x149b   : > { %23207 = vxpose.xlu0.b32.cont [4/16] (narrow) %v29596_v54, 8  ;;  %v29305_v32 = vpop.f32.mrb[40].mxu0  ;;  %v16193_v54 = vadd.f32 %v40302_v55, %v39024_v63  ;;  %v40317_v55 = vld [vmem:[#allocation131_spill] sm:$0xff] }
0x149c   : > { %v29608_v12 = vadd.f32 %v29305_v32, %v16184_v31  ;;  %v22597_v2 = vpop.f32.mrb[41].mxu0  ;;  %v40308_v31 = vld [vmem:[#allocation122_spill] sm:$0xff] }
0x149d   : > { %v29610_v16 = vadd.f32 %v22597_v2, %v16182_v49  ;;  %v29306_v15 = vpop.f32.mrb[42].mxu0  ;;  %v16200_v38 = vadd.f32 %v40308_v31, %v39024_v63  ;;  %v40309_v49 = vld [vmem:[#allocation123_spill] sm:$0xff] }
0x149e   : > { %v29612_v37 = vadd.f32 %v29306_v15, %v16185_v62  ;;  %v22600_v0 = vpop.f32.mrb[43].mxu0  ;;  %v16198_v32 = vadd.f32 %v39024_v63, %v40309_v49  ;;  %v40310_v62 = vld [vmem:[#allocation124_spill] sm:$0xff] }
0x149f   : > { %v29614_v14 = vadd.f32 %v22600_v0, %v16183_v53  ;;  %23208 = vxpose.xlu0.b32.cont [5/16] (narrow) %v29602_v60, 8  ;;  %v16201_v2 = vadd.f32 %v40310_v62, %v39024_v63 }
0x14a0   : > { %29412 = vmatmul.mubr.msk.bf16.gmra.mrb[148].mxu0 %vm7466_vm3, %v38764_v7 }
0x14a1   : > { %29415 = vmatprep.mubr.msk.bf16.mxu0 %vm7466_vm3, %v38905_v26 }
0x14a3   : > { %23209 = vxpose.xlu0.b32.cont [6/16] (narrow) %v29606_v36, 8  ;;  %v29309_v58 = vpop.f32.mrb[44].mxu0 }
0x14a4   : > { %v39072_v10 = vadd.f32 %v29309_v58, %v16188_v34  ;;  %v22613_v19 = vpop.f32.mrb[45].mxu0 }
0x14a5   : > { %v29618_v3 = vadd.f32 %v22613_v19, %v16186_v27  ;;  %v29310_v41 = vpop.f32.mrb[46].mxu0  ;;  %v40313_v27 = vld [vmem:[#allocation127_spill] sm:$0xff] }
0x14a6   : > { %v39076_v26 = vadd.f32 %v29310_v41, %v16189_v43  ;;  %v22616_v57 = vpop.f32.mrb[47].mxu0  ;;  %v16202_v58 = vadd.f32 %v39024_v63, %v40313_v27  ;;  %v40314_v43 = vld [vmem:[#allocation128_spill] sm:$0xff]  ;;  %v40315_v41 = vld [vmem:[#allocation129_spill] sm:$0xff]  ;;  %v40328_v27 = vld [vmem:[#allocation142_spill] sm:$0xff] }
0x14a7   : > { %v29622_v29 = vadd.f32 %v22616_v57, %v16187_v51  ;;  %23210 = vxpose.xlu0.b32.cont [7/16] (narrow) %v29600_v20, 8  ;;  %v16205_v19 = vadd.f32 %v40314_v43, %v39024_v63  ;;  %v16203_v57 = vadd.f32 %v39024_v63, %v40315_v41 }
0x14a8   : > { %29416 = vmatmul.mubr.msk.bf16.gmra.mrb[152].mxu0 %vm7466_vm3, %v38911_v22 }
0x14a9   : > { %29419 = vmatprep.mubr.msk.bf16.mxu0 %vm7466_vm3, %v38758_v39 }
0x14ab   : > { %23211 = vxpose.xlu0.b32.cont [8/16] (narrow) %v29604_v46, 8  ;;  %v29313_v44 = vpop.f32.mrb[48].mxu0  ;;  %v16195_v46 = vadd.f32 %v39024_v63, %v40307_v61 }
0x14ac   : > { %v29624_v4 = vadd.f32 %v29313_v44, %v16192_v50  ;;  %v22629_v30 = vpop.f32.mrb[49].mxu0 }
0x14ad   : > { %v29626_v22 = vadd.f32 %v22629_v30, %v16190_v45  ;;  %v29314_v42 = vpop.f32.mrb[50].mxu0  ;;  %v40318_v30 = vld [vmem:[#allocation132_spill] sm:$0xff] }
0x14ae   : > { %v29628_v28 = vadd.f32 %v29314_v42, %v16193_v54  ;;  %v22632_v39 = vpop.f32.mrb[51].mxu0  ;;  %v16206_v54 = vadd.f32 %v39024_v63, %v40317_v55  ;;  %v16209_v13 = vadd.f32 %v40318_v30, %v39024_v63  ;;  %v40319_v42 = vld [vmem:[#allocation133_spill] sm:$0xff]  ;;  %v40333_v30 = vld [vmem:[#allocation147_spill] sm:$0xff] }
0x14af   : > { %v29630_v25 = vadd.f32 %v22632_v39, %v16191_v5  ;;  %23212 = vxpose.xlu0.b32.cont [9/16] (narrow) %v29610_v16, 8  ;;  %23236 = vxpose.xlu1.b32.start [1/16] (narrow) %v29626_v22, 8  ;;  %v40311_v16 = vld [vmem:[#allocation125_spill] sm:$0xff] }
0x14b0   : > { %29420 = vmatmul.mubr.msk.bf16.gmra.mrb[156].mxu0 %vm7466_vm3, %v38764_v7  ;;  %v16199_v15 = vadd.f32 %v39024_v63, %v40311_v16 }
0x14b3   : > { %23213 = vxpose.xlu0.b32.cont [10/16] (narrow) %v29614_v14, 8  ;;  %23237 = vxpose.xlu1.b32.cont [2/16] (narrow) %v29630_v25, 8  ;;  %v29317_v20 = vpop.f32.mrb[52].mxu0 }
0x14b4   : > { %v29632_v52 = vadd.f32 %v29317_v20, %v16196_v21  ;;  %v22645_v60 = vpop.f32.mrb[53].mxu0 }
0x14b5   : > { %v29634_v48 = vadd.f32 %v22645_v60, %v16194_v23  ;;  %v29318_v36 = vpop.f32.mrb[54].mxu0  ;;  %v40321_v23 = vld [vmem:[#allocation135_spill] sm:$0xff] }
0x14b6   : > { %v29636_v7 = vadd.f32 %v29318_v36, %v16197_v40  ;;  %v22648_v59 = vpop.f32.mrb[55].mxu0  ;;  %v16210_v20 = vadd.f32 %v39024_v63, %v40321_v23  ;;  %v40322_v40 = vld [vmem:[#allocation136_spill] sm:$0xff]  ;;  %v40336_v23 = vld [vmem:[#allocation150_spill] sm:$0xff] }
0x14b7   : > { %v29638_v6 = vadd.f32 %v22648_v59, %v16195_v46  ;;  %23214 = vxpose.xlu0.b32.cont [11/16] (narrow) %v29608_v12, 8  ;;  %23238 = vxpose.xlu1.b32.cont [3/16] (narrow) %v29624_v4, 8  ;;  %v40323_v46 = vld [vmem:[#allocation137_spill] sm:$0xff] }
0x14bb   : > { %23215 = vxpose.xlu0.b32.cont [12/16] (narrow) %v29612_v37, 8  ;;  %23239 = vxpose.xlu1.b32.cont [4/16] (narrow) %v29628_v28, 8  ;;  %v29321_v18 = vpop.f32.mrb[56].mxu0  ;;  %v16204_v37 = vadd.f32 %v40312_v47, %v39024_v63  ;;  %v16207_v28 = vadd.f32 %v39024_v63, %v40319_v42 }
0x14bc   : > { %v29640_v11 = vadd.f32 %v29321_v18, %v16200_v38  ;;  %v22661_v53 = vpop.f32.mrb[57].mxu0  ;;  %v40324_v38 = vld [vmem:[#allocation138_spill] sm:$0xff] }
0x14bd   : > { %v29642_v0 = vadd.f32 %v22661_v53, %v16198_v32  ;;  %v29322_v12 = vpop.f32.mrb[58].mxu0  ;;  %v16216_v49 = vadd.f32 %v40324_v38, %v39024_v63  ;;  %v40325_v32 = vld [vmem:[#allocation139_spill] sm:$0xff] }
0x14be   : > { %v29644_v14 = vadd.f32 %v29322_v12, %v16201_v2  ;;  %v22664_v33 = vpop.f32.mrb[59].mxu0  ;;  %v16214_v18 = vadd.f32 %v39024_v63, %v40325_v32  ;;  %v40326_v2 = vld [vmem:[#allocation140_spill] sm:$0xff] }
0x14bf   : > { %v29646_v34 = vadd.f32 %v22664_v33, %v16199_v15  ;;  %23216 = vxpose.xlu0.b32.cont [13/16] (narrow) %v29618_v3, 8  ;;  %23240 = vxpose.xlu1.b32.cont [5/16] (narrow) %v29634_v48, 8  ;;  %v16211_v48 = vadd.f32 %v39024_v63, %v40323_v46  ;;  %v16217_v53 = vadd.f32 %v40326_v2, %v39024_v63 }
0x14c3   : > { %23217 = vxpose.xlu0.b32.cont [14/16] (narrow) %v29622_v29, 8  ;;  %23241 = vxpose.xlu1.b32.cont [6/16] (narrow) %v29638_v6, 8  ;;  %v29325_v9 = vpop.f32.mrb[60].mxu0  ;;  %v40316_v29 = vld [vmem:[#allocation130_spill] sm:$0xff] }
0x14c4   : > { %v39114_v35 = vadd.f32 %v29325_v9, %v16204_v37  ;;  %v22677_v51 = vpop.f32.mrb[61].mxu0  ;;  %v16208_v44 = vadd.f32 %v40316_v29, %v39024_v63 }
0x14c5   : > { %v29650_v3 = vadd.f32 %v22677_v51, %v16202_v58  ;;  %v29326_v17 = vpop.f32.mrb[62].mxu0  ;;  %v40329_v58 = vld [vmem:[#allocation143_spill] sm:$0xff] }
0x14c6   : > { %v39118_v50 = vadd.f32 %v29326_v17, %v16205_v19  ;;  %v22680_v1 = vpop.f32.mrb[63].mxu0  ;;  %v16218_v9 = vadd.f32 %v39024_v63, %v40329_v58  ;;  %v40330_v19 = vld [vmem:[#allocation144_spill] sm:$0xff]  ;;  %v40331_v17 = vld [vmem:[#allocation145_spill] sm:$0xff]  ;;  %v40344_v58 = vld [vmem:[#allocation158_spill] sm:$0xff] }
0x14c7   : > { %v29654_v45 = vadd.f32 %v22680_v1, %v16203_v57  ;;  %23218 = vxpose.xlu0.b32.cont [15/16] (narrow) %v39072_v10, 8  ;;  %23242 = vxpose.xlu1.b32.cont [7/16] (narrow) %v29632_v52, 8  ;;  %v16213_v52 = vadd.f32 %v40322_v40, %v39024_v63  ;;  %v16221_v51 = vadd.f32 %v40330_v19, %v39024_v63 }
0x14c8   : > { %v16219_v1 = vadd.f32 %v39024_v63, %v40331_v17 }
0x14cb   : > { %23219 = vxpose.xlu0.b32.end [16/16] (narrow) %v39076_v26, 8  ;;  %23243 = vxpose.xlu1.b32.cont [8/16] (narrow) %v29636_v7, 8  ;;  %v29329_v4 = vpop.f32.mrb[64].mxu0  ;;  %v16212_v26 = vadd.f32 %v40320_v56, %v39024_v63 }
0x14cc   : > { %v29656_v5 = vadd.f32 %v29329_v4, %v16208_v44  ;;  %v22693_v22 = vpop.f32.mrb[65].mxu0 }
0x14cd   : > { %v29658_v10 = vadd.f32 %v22693_v22, %v16206_v54  ;;  %v29330_v39 = vpop.f32.mrb[66].mxu0  ;;  %v40334_v22 = vld [vmem:[#allocation148_spill] sm:$0xff] }
0x14ce   : > { %v29660_v25 = vadd.f32 %v29330_v39, %v16209_v13  ;;  %v22696_v8 = vpop.f32.mrb[67].mxu0  ;;  %v16222_v13 = vadd.f32 %v39024_v63, %v40333_v30  ;;  %v16225_v42 = vadd.f32 %v40334_v22, %v39024_v63  ;;  %v40335_v39 = vld [vmem:[#allocation149_spill] sm:$0xff]  ;;  %v40349_v22 = vld [vmem:[#allocation163_spill] sm:$0xff] }
0x14cf   : > { %v29662_v21 = vadd.f32 %v22696_v8, %v16207_v28  ;;  %23244 = vxpose.xlu1.b32.cont [9/16] (narrow) %v29642_v0, 8  ;;  %23268 = vxpose.xlu0.b32.start [1/16] (narrow) %v29658_v10, 8  ;;  %v40327_v0 = vld [vmem:[#allocation141_spill] sm:$0xff] }
0x14d0   : > { %v16215_v12 = vadd.f32 %v39024_v63, %v40327_v0 }
0x14d3   : > { %23245 = vxpose.xlu1.b32.cont [10/16] (narrow) %v29646_v34, 8  ;;  %23269 = vxpose.xlu0.b32.cont [2/16] (narrow) %v29662_v21, 8  ;;  %v29333_v24 = vpop.f32.mrb[68].mxu0 }
0x14d4   : > { %v29664_v60 = vadd.f32 %v29333_v24, %v16212_v26  ;;  %v22709_v61 = vpop.f32.mrb[69].mxu0 }
0x14d5   : > { %v29666_v36 = vadd.f32 %v22709_v61, %v16210_v20  ;;  %v29334_v7 = vpop.f32.mrb[70].mxu0  ;;  %v40337_v20 = vld [vmem:[#allocation151_spill] sm:$0xff] }
0x14d6   : > { %v29668_v59 = vadd.f32 %v29334_v7, %v16213_v52  ;;  %v22712_v6 = vpop.f32.mrb[71].mxu0  ;;  %v16226_v24 = vadd.f32 %v39024_v63, %v40337_v20  ;;  %v40338_v52 = vld [vmem:[#allocation152_spill] sm:$0xff]  ;;  %v40352_v20 = vld [vmem:[#allocation166_spill] sm:$0xff] }
0x14d7   : > { %v29670_v31 = vadd.f32 %v22712_v6, %v16211_v48  ;;  %23246 = vxpose.xlu1.b32.cont [11/16] (narrow) %v29640_v11, 8  ;;  %23270 = vxpose.xlu0.b32.cont [3/16] (narrow) %v29656_v5, 8  ;;  %v40339_v48 = vld [vmem:[#allocation153_spill] sm:$0xff] }
0x14db   : > { %23247 = vxpose.xlu1.b32.cont [12/16] (narrow) %v29644_v14, 8  ;;  %23271 = vxpose.xlu0.b32.cont [4/16] (narrow) %v29660_v25, 8  ;;  %v29337_v62 = vpop.f32.mrb[72].mxu0  ;;  %v16220_v14 = vadd.f32 %v40328_v27, %v39024_v63  ;;  %v16223_v25 = vadd.f32 %v39024_v63, %v40335_v39 }
0x14dc   : > { %v29672_v16 = vadd.f32 %v29337_v62, %v16216_v49  ;;  %v22725_v15 = vpop.f32.mrb[73].mxu0  ;;  %v40340_v49 = vld [vmem:[#allocation154_spill] sm:$0xff] }
0x14dd   : > { %v29674_v33 = vadd.f32 %v22725_v15, %v16214_v18  ;;  %v29338_v11 = vpop.f32.mrb[74].mxu0  ;;  %v16232_v32 = vadd.f32 %v40340_v49, %v39024_v63  ;;  %v40341_v18 = vld [vmem:[#allocation155_spill] sm:$0xff] }
0x14de   : > { %v29676_v34 = vadd.f32 %v29338_v11, %v16217_v53  ;;  %v22728_v47 = vpop.f32.mrb[75].mxu0  ;;  %v16230_v62 = vadd.f32 %v39024_v63, %v40341_v18  ;;  %v40342_v53 = vld [vmem:[#allocation156_spill] sm:$0xff] }
0x14df   : > { %v29678_v37 = vadd.f32 %v22728_v47, %v16215_v12  ;;  %23248 = vxpose.xlu1.b32.cont [13/16] (narrow) %v29650_v3, 8  ;;  %23272 = vxpose.xlu0.b32.cont [5/16] (narrow) %v29666_v36, 8  ;;  %v16227_v36 = vadd.f32 %v39024_v63, %v40339_v48  ;;  %v16233_v15 = vadd.f32 %v40342_v53, %v39024_v63 }
0x14e3   : > { %23249 = vxpose.xlu1.b32.cont [14/16] (narrow) %v29654_v45, 8  ;;  %23273 = vxpose.xlu0.b32.cont [6/16] (narrow) %v29670_v31, 8  ;;  %v29341_v43 = vpop.f32.mrb[76].mxu0  ;;  %v40332_v45 = vld [vmem:[#allocation146_spill] sm:$0xff] }
0x14e4   : > { %v39152_v41 = vadd.f32 %v29341_v43, %v16220_v14  ;;  %v22741_v57 = vpop.f32.mrb[77].mxu0  ;;  %v16224_v4 = vadd.f32 %v40332_v45, %v39024_v63 }
0x14e5   : > { %v29682_v3 = vadd.f32 %v22741_v57, %v16218_v9  ;;  %v29342_v29 = vpop.f32.mrb[78].mxu0  ;;  %v40345_v9 = vld [vmem:[#allocation159_spill] sm:$0xff] }
0x14e6   : > { %v39156_v44 = vadd.f32 %v29342_v29, %v16221_v51  ;;  %v22744_v55 = vpop.f32.mrb[79].mxu0  ;;  %v16234_v43 = vadd.f32 %v39024_v63, %v40345_v9  ;;  %v40346_v51 = vld [vmem:[#allocation160_spill] sm:$0xff]  ;;  %v40347_v29 = vld [vmem:[#allocation161_spill] sm:$0xff]  ;;  %v40360_v9 = vld [vmem:[#allocation174_spill] sm:$0xff] }
0x14e7   : > { %v29686_v54 = vadd.f32 %v22744_v55, %v16219_v1  ;;  %23250 = vxpose.xlu1.b32.cont [15/16] (narrow) %v39114_v35, 8  ;;  %23274 = vxpose.xlu0.b32.cont [7/16] (narrow) %v29664_v60, 8  ;;  %v16229_v60 = vadd.f32 %v40338_v52, %v39024_v63  ;;  %v16237_v57 = vadd.f32 %v40346_v51, %v39024_v63 }
0x14e8   : > { %v16235_v55 = vadd.f32 %v39024_v63, %v40347_v29 }
0x14eb   : > { %23251 = vxpose.xlu1.b32.end [16/16] (narrow) %v39118_v50, 8  ;;  %23275 = vxpose.xlu0.b32.cont [8/16] (narrow) %v29668_v59, 8  ;;  %v29345_v5 = vpop.f32.mrb[80].mxu0  ;;  %v16228_v50 = vadd.f32 %v40336_v23, %v39024_v63 }
0x14ec   : > { %v29688_v28 = vadd.f32 %v29345_v5, %v16224_v4  ;;  %v22757_v10 = vpop.f32.mrb[81].mxu0 }
0x14ed   : > { %v29690_v35 = vadd.f32 %v22757_v10, %v16222_v13  ;;  %v29346_v8 = vpop.f32.mrb[82].mxu0  ;;  %v40350_v10 = vld [vmem:[#allocation164_spill] sm:$0xff] }
0x14ee   : > { %v29692_v21 = vadd.f32 %v29346_v8, %v16225_v42  ;;  %v22760_v56 = vpop.f32.mrb[83].mxu0  ;;  %v16238_v42 = vadd.f32 %v39024_v63, %v40349_v22  ;;  %v16241_v39 = vadd.f32 %v40350_v10, %v39024_v63  ;;  %v40351_v8 = vld [vmem:[#allocation165_spill] sm:$0xff]  ;;  %v40365_v10 = vld [vmem:[#allocation179_spill] sm:$0xff] }
0x14ef   : > { %v29694_v26 = vadd.f32 %v22760_v56, %v16223_v25  ;;  %23276 = vxpose.xlu0.b32.cont [9/16] (narrow) %v29674_v33, 8  ;;  %23300 = vxpose.xlu1.b32.start [1/16] (narrow) %v29690_v35, 8  ;;  %v40343_v33 = vld [vmem:[#allocation157_spill] sm:$0xff] }
0x14f0   : > { %v16231_v11 = vadd.f32 %v39024_v63, %v40343_v33 }
0x14f3   : > { %23277 = vxpose.xlu0.b32.cont [10/16] (narrow) %v29678_v37, 8  ;;  %23301 = vxpose.xlu1.b32.cont [2/16] (narrow) %v29694_v26, 8  ;;  %v29349_v40 = vpop.f32.mrb[84].mxu0 }
0x14f4   : > { %v29696_v61 = vadd.f32 %v29349_v40, %v16228_v50  ;;  %v22773_v46 = vpop.f32.mrb[85].mxu0 }
0x14f5   : > { %v29698_v7 = vadd.f32 %v22773_v46, %v16226_v24  ;;  %v29350_v59 = vpop.f32.mrb[86].mxu0  ;;  %v40353_v24 = vld [vmem:[#allocation167_spill] sm:$0xff] }
0x14f6   : > { %v29700_v6 = vadd.f32 %v29350_v59, %v16229_v60  ;;  %v22776_v31 = vpop.f32.mrb[87].mxu0  ;;  %v16242_v40 = vadd.f32 %v39024_v63, %v40353_v24  ;;  %v40354_v60 = vld [vmem:[#allocation168_spill] sm:$0xff] }
0x14f7   : > { %v29702_v38 = vadd.f32 %v22776_v31, %v16227_v36  ;;  %23278 = vxpose.xlu0.b32.cont [11/16] (narrow) %v29672_v16, 8  ;;  %23302 = vxpose.xlu1.b32.cont [3/16] (narrow) %v29688_v28, 8  ;;  %v40355_v36 = vld [vmem:[#allocation169_spill] sm:$0xff] }
0x14fb   : > { %23279 = vxpose.xlu0.b32.cont [12/16] (narrow) %v29676_v34, 8  ;;  %23303 = vxpose.xlu1.b32.cont [4/16] (narrow) %v29692_v21, 8  ;;  %v29353_v2 = vpop.f32.mrb[88].mxu0  ;;  %v16236_v34 = vadd.f32 %v40344_v58, %v39024_v63  ;;  %v16239_v21 = vadd.f32 %v39024_v63, %v40351_v8 }
0x14fc   : > { %v29704_v0 = vadd.f32 %v29353_v2, %v16232_v32  ;;  %v22789_v12 = vpop.f32.mrb[89].mxu0  ;;  %v40356_v32 = vld [vmem:[#allocation170_spill] sm:$0xff] }
0x14fd   : > { %v29706_v47 = vadd.f32 %v22789_v12, %v16230_v62  ;;  %v29354_v16 = vpop.f32.mrb[90].mxu0  ;;  %v16248_v18 = vadd.f32 %v40356_v32, %v39024_v63  ;;  %v40357_v62 = vld [vmem:[#allocation171_spill] sm:$0xff] }
0x14fe   : > { %v29708_v37 = vadd.f32 %v29354_v16, %v16233_v15  ;;  %v22792_v27 = vpop.f32.mrb[91].mxu0  ;;  %v16246_v2 = vadd.f32 %v39024_v63, %v40357_v62  ;;  %v40358_v15 = vld [vmem:[#allocation172_spill] sm:$0xff] }
0x14ff   : > { %v29710_v14 = vadd.f32 %v22792_v27, %v16231_v11  ;;  %23280 = vxpose.xlu0.b32.cont [13/16] (narrow) %v29682_v3, 8  ;;  %23304 = vxpose.xlu1.b32.cont [5/16] (narrow) %v29698_v7, 8  ;;  %v16243_v7 = vadd.f32 %v39024_v63, %v40355_v36  ;;  %v16249_v12 = vadd.f32 %v40358_v15, %v39024_v63  ;;  %v40370_v36 = vld [vmem:[#allocation184_spill] sm:$0xff] }
0x1503   : > { %23281 = vxpose.xlu0.b32.cont [14/16] (narrow) %v29686_v54, 8  ;;  %23305 = vxpose.xlu1.b32.cont [6/16] (narrow) %v29702_v38, 8  ;;  %v29357_v19 = vpop.f32.mrb[92].mxu0  ;;  %v40348_v54 = vld [vmem:[#allocation162_spill] sm:$0xff] }
0x1504   : > { %v39190_v17 = vadd.f32 %v29357_v19, %v16236_v34  ;;  %v22805_v1 = vpop.f32.mrb[93].mxu0  ;;  %v16240_v5 = vadd.f32 %v40348_v54, %v39024_v63 }
0x1505   : > { %v29714_v3 = vadd.f32 %v22805_v1, %v16234_v43  ;;  %v29358_v45 = vpop.f32.mrb[94].mxu0  ;;  %v40361_v43 = vld [vmem:[#allocation175_spill] sm:$0xff] }
0x1506   : > { %v39194_v4 = vadd.f32 %v29358_v45, %v16237_v57  ;;  %v22808_v30 = vpop.f32.mrb[95].mxu0  ;;  %v16250_v19 = vadd.f32 %v39024_v63, %v40361_v43  ;;  %v40362_v57 = vld [vmem:[#allocation176_spill] sm:$0xff]  ;;  %v40363_v45 = vld [vmem:[#allocation177_spill] sm:$0xff] }
0x1507   : > { %v29718_v13 = vadd.f32 %v22808_v30, %v16235_v55  ;;  %23282 = vxpose.xlu0.b32.cont [15/16] (narrow) %v39152_v41, 8  ;;  %23306 = vxpose.xlu1.b32.cont [7/16] (narrow) %v29696_v61, 8  ;;  %v16245_v61 = vadd.f32 %v40354_v60, %v39024_v63  ;;  %v16253_v1 = vadd.f32 %v40362_v57, %v39024_v63  ;;  %v40376_v57 = vld [vmem:[#allocation190_spill] sm:$0xff] }
0x1508   : > { %v16251_v30 = vadd.f32 %v39024_v63, %v40363_v45 }
0x150b   : > { %23283 = vxpose.xlu0.b32.end [16/16] (narrow) %v39156_v44, 8  ;;  %23307 = vxpose.xlu1.b32.cont [8/16] (narrow) %v29700_v6, 8  ;;  %v29361_v28 = vpop.f32.mrb[96].mxu0  ;;  %v16244_v44 = vadd.f32 %v40352_v20, %v39024_v63 }
0x150c   : > { %v29720_v25 = vadd.f32 %v29361_v28, %v16240_v5  ;;  %v22821_v35 = vpop.f32.mrb[97].mxu0 }
0x150d   : > { %v29722_v41 = vadd.f32 %v22821_v35, %v16238_v42  ;;  %v29362_v56 = vpop.f32.mrb[98].mxu0  ;;  %v40366_v35 = vld [vmem:[#allocation180_spill] sm:$0xff] }
0x150e   : > { %v29724_v26 = vadd.f32 %v29362_v56, %v16241_v39  ;;  %v22824_v23 = vpop.f32.mrb[99].mxu0  ;;  %v16254_v39 = vadd.f32 %v39024_v63, %v40365_v10  ;;  %v16257_v8 = vadd.f32 %v40366_v35, %v39024_v63  ;;  %v40367_v56 = vld [vmem:[#allocation181_spill] sm:$0xff] }
0x150f   : > { %v29726_v50 = vadd.f32 %v22824_v23, %v16239_v21  ;;  %23308 = vxpose.xlu1.b32.cont [9/16] (narrow) %v29706_v47, 8  ;;  %23332 = vxpose.xlu0.b32.start [1/16] (narrow) %v29722_v41, 8  ;;  %v40359_v47 = vld [vmem:[#allocation173_spill] sm:$0xff] }
0x1510   : > { %v16247_v16 = vadd.f32 %v39024_v63, %v40359_v47 }
0x1513   : > { %23309 = vxpose.xlu1.b32.cont [10/16] (narrow) %v29710_v14, 8  ;;  %23333 = vxpose.xlu0.b32.cont [2/16] (narrow) %v29726_v50, 8  ;;  %v29365_v52 = vpop.f32.mrb[100].mxu0  ;;  %v23220_v50 = vpop.trf.xlu0 }
0x1514   : > { %v29728_v46 = vadd.f32 %v29365_v52, %v16244_v44  ;;  %v22837_v48 = vpop.f32.mrb[101].mxu0  ;;  %v40368_v52 = vld [vmem:[#allocation182_spill] sm:$0xff] }
0x1515   : > { %v29730_v59 = vadd.f32 %v22837_v48, %v16242_v40  ;;  %v29366_v6 = vpop.f32.mrb[102].mxu0  ;;  %v16260_v60 = vadd.f32 %v40368_v52, %v39024_v63 }
0x1516   : > { %v29732_v31 = vadd.f32 %v29366_v6, %v16245_v61  ;;  %v22840_v38 = vpop.f32.mrb[103].mxu0  ;;  %v40369_v61 = vld [vmem:[#allocation183_spill] sm:$0xff] }
0x1517   : > { %v29734_v49 = vadd.f32 %v22840_v38, %v16243_v7  ;;  %23310 = vxpose.xlu1.b32.cont [11/16] (narrow) %v29704_v0, 8  ;;  %23334 = vxpose.xlu0.b32.cont [3/16] (narrow) %v29720_v25, 8  ;;  %v16261_v7 = vadd.f32 %v40370_v36, %v39024_v63 }
0x151b   : > { %23311 = vxpose.xlu1.b32.cont [12/16] (narrow) %v29708_v37, 8  ;;  %23335 = vxpose.xlu0.b32.cont [4/16] (narrow) %v29724_v26, 8  ;;  %v29369_v53 = vpop.f32.mrb[104].mxu0  ;;  %v16252_v37 = vadd.f32 %v40360_v9, %v39024_v63 }
0x151c   : > { %v29736_v33 = vadd.f32 %v29369_v53, %v16248_v18  ;;  %v22853_v11 = vpop.f32.mrb[105].mxu0  ;;  %v40372_v53 = vld [vmem:[#allocation186_spill] sm:$0xff] }
0x151d   : > { %v29738_v27 = vadd.f32 %v22853_v11, %v16246_v2  ;;  %v29370_v0 = vpop.f32.mrb[106].mxu0  ;;  %v16264_v15 = vadd.f32 %v40372_v53, %v39024_v63 }
0x151e   : > { %v29740_v14 = vadd.f32 %v29370_v0, %v16249_v12  ;;  %v22856_v58 = vpop.f32.mrb[107].mxu0  ;;  %v40373_v12 = vld [vmem:[#allocation187_spill] sm:$0xff] }
0x151f   : > { %v29742_v34 = vadd.f32 %v22856_v58, %v16247_v16  ;;  %23312 = vxpose.xlu1.b32.cont [13/16] (narrow) %v29714_v3, 8  ;;  %23336 = vxpose.xlu0.b32.cont [5/16] (narrow) %v29730_v59, 8  ;;  %v16262_v11 = vadd.f32 %v39024_v63, %v40373_v12  ;;  %v40374_v16 = vld [vmem:[#allocation188_spill] sm:$0xff] }
0x1523   : > { %23313 = vxpose.xlu1.b32.cont [14/16] (narrow) %v29718_v13, 8  ;;  %23337 = vxpose.xlu0.b32.cont [6/16] (narrow) %v29734_v49, 8  ;;  %v29373_v51 = vpop.f32.mrb[108].mxu0  ;;  %v40364_v13 = vld [vmem:[#allocation178_spill] sm:$0xff] }
0x1524   : > { %v39228_v29 = vadd.f32 %v29373_v51, %v16252_v37  ;;  %v22869_v55 = vpop.f32.mrb[109].mxu0  ;;  %v16256_v28 = vadd.f32 %v40364_v13, %v39024_v63 }
0x1525   : > { %v29746_v3 = vadd.f32 %v22869_v55, %v16250_v19  ;;  %v29374_v54 = vpop.f32.mrb[110].mxu0 }
0x1526   : > { %v39232_v5 = vadd.f32 %v29374_v54, %v16253_v1  ;;  %v22872_v22 = vpop.f32.mrb[111].mxu0  ;;  %v40377_v1 = vld [vmem:[#allocation191_spill] sm:$0xff] }
0x1527   : > { %v29750_v42 = vadd.f32 %v22872_v22, %v16251_v30  ;;  %23314 = vxpose.xlu1.b32.cont [15/16] (narrow) %v39190_v17, 8  ;;  %23338 = vxpose.xlu0.b32.cont [7/16] (narrow) %v29728_v46, 8  ;;  %v16255_v17 = vadd.f32 %v39024_v63, %v40367_v56  ;;  %v16258_v46 = vadd.f32 %v39024_v63, %v40369_v61  ;;  %v40378_v30 = vld [vmem:[#allocation192_spill] sm:$0xff]  ;;  %v40384_v61 = vld [vmem:[#allocation198_spill] sm:$0xff] }
0x1528   : > { %v16266_v55 = vadd.f32 %v39024_v63, %v40377_v1  ;;  %v16269_v54 = vadd.f32 %v40378_v30, %v39024_v63  ;;  %v40392_v1 = vld [vmem:[#allocation210_spill] sm:$0xff] }
0x152b   : > { %23315 = vxpose.xlu1.b32.end [16/16] (narrow) %v39194_v4, 8  ;;  %23339 = vxpose.xlu0.b32.cont [8/16] (narrow) %v29732_v31, 8  ;;  %v29377_v25 = vpop.f32.mrb[112].mxu0  ;;  %v40371_v31 = vld [vmem:[#allocation185_spill] sm:$0xff] }
0x152c   : > { %v29752_v21 = vadd.f32 %v29377_v25, %v16256_v28  ;;  %v22885_v41 = vpop.f32.mrb[113].mxu0  ;;  %v16259_v38 = vadd.f32 %v39024_v63, %v40371_v31  ;;  %v40379_v28 = vld [vmem:[#allocation193_spill] sm:$0xff] }
0x152d   : > { %v29754_v26 = vadd.f32 %v22885_v41, %v16254_v39  ;;  %v29378_v23 = vpop.f32.mrb[114].mxu0  ;;  %v16267_v10 = vadd.f32 %v39024_v63, %v40379_v28  ;;  %v40381_v41 = vld [vmem:[#allocation195_spill] sm:$0xff] }
0x152e   : > { %v29756_v20 = vadd.f32 %v29378_v23, %v16257_v8  ;;  %v22888_v44 = vpop.f32.mrb[115].mxu0  ;;  %v16270_v56 = vadd.f32 %v39024_v63, %v40381_v41 }
0x152f   : > { %v29758_v24 = vadd.f32 %v22888_v44, %v16255_v17  ;;  %23340 = vxpose.xlu0.b32.cont [9/16] (narrow) %v29738_v27, 8  ;;  %23364 = vxpose.xlu1.b32.start [1/16] (narrow) %v29754_v26, 8  ;;  %v23252_v4 = vpop.trf.xlu1  ;;  %v16265_v27 = vadd.f32 %v40374_v16, %v39024_v63  ;;  %v40382_v26 = vld [vmem:[#allocation196_spill] sm:$0xff]  ;;  %v40383_v44 = vld [vmem:[#allocation197_spill] sm:$0xff] }
0x1530   : > { %v23468_v40 = vcombine.low %v23220_v50, %v23252_v4  ;;  %v16273_v23 = vadd.f32 %v40382_v26, %v39024_v63  ;;  %v40397_v26 = vld [vmem:[#allocation215_spill] sm:$0xff] }
0x1532   : > { %23476 = vst [vmem:[%s39248_s16] sm:$0x77] %v23468_v40 }
0x1533   : > { %23341 = vxpose.xlu0.b32.cont [10/16] (narrow) %v29742_v34, 8  ;;  %23365 = vxpose.xlu1.b32.cont [2/16] (narrow) %v29758_v24, 8  ;;  %v29381_v48 = vpop.f32.mrb[116].mxu0  ;;  %v40375_v34 = vld [vmem:[#allocation189_spill] sm:$0xff]  ;;  %v16271_v24 = vadd.f32 %v39024_v63, %v40383_v44 }
0x1534   : > { %v29760_v59 = vadd.f32 %v29381_v48, %v16260_v60  ;;  %v22901_v6 = vpop.f32.mrb[117].mxu0  ;;  %v16263_v9 = vadd.f32 %v39024_v63, %v40375_v34 }
0x1535   : > { %v29762_v49 = vadd.f32 %v22901_v6, %v16258_v46  ;;  %v29382_v32 = vpop.f32.mrb[118].mxu0  ;;  %v40385_v46 = vld [vmem:[#allocation199_spill] sm:$0xff] }
0x1536   : > { %v29764_v18 = vadd.f32 %v29382_v32, %v16261_v7  ;;  %v22904_v62 = vpop.f32.mrb[119].mxu0  ;;  %v16274_v48 = vadd.f32 %v39024_v63, %v40385_v46  ;;  %v40386_v7 = vld [vmem:[#allocation200_spill] sm:$0xff] }
0x1537   : > { %v29766_v2 = vadd.f32 %v22904_v62, %v16259_v38  ;;  %23342 = vxpose.xlu0.b32.cont [11/16] (narrow) %v29736_v33, 8  ;;  %23366 = vxpose.xlu1.b32.cont [3/16] (narrow) %v29752_v21, 8  ;;  %v40387_v38 = vld [vmem:[#allocation201_spill] sm:$0xff] }
0x153b   : > { %23343 = vxpose.xlu0.b32.cont [12/16] (narrow) %v29740_v14, 8  ;;  %23367 = vxpose.xlu1.b32.cont [4/16] (narrow) %v29756_v20, 8  ;;  %v29385_v47 = vpop.f32.mrb[120].mxu0  ;;  %v16268_v14 = vadd.f32 %v40376_v57, %v39024_v63 }
0x153c   : > { %v29768_v0 = vadd.f32 %v29385_v47, %v16264_v15  ;;  %v22917_v58 = vpop.f32.mrb[121].mxu0  ;;  %v40388_v15 = vld [vmem:[#allocation202_spill] sm:$0xff] }
0x153d   : > { %v29770_v37 = vadd.f32 %v22917_v58, %v16262_v11  ;;  %v29386_v33 = vpop.f32.mrb[122].mxu0  ;;  %v16280_v12 = vadd.f32 %v40388_v15, %v39024_v63  ;;  %v40389_v11 = vld [vmem:[#allocation203_spill] sm:$0xff] }
0x153e   : > { %v29772_v43 = vadd.f32 %v29386_v33, %v16265_v27  ;;  %v22920_v19 = vpop.f32.mrb[123].mxu0  ;;  %v16278_v47 = vadd.f32 %v39024_v63, %v40389_v11  ;;  %v40390_v27 = vld [vmem:[#allocation204_spill] sm:$0xff] }
0x153f   : > { %v29774_v51 = vadd.f32 %v22920_v19, %v16263_v9  ;;  %23344 = vxpose.xlu0.b32.cont [13/16] (narrow) %v29746_v3, 8  ;;  %23368 = vxpose.xlu1.b32.cont [5/16] (narrow) %v29762_v49, 8  ;;  %v16275_v49 = vadd.f32 %v39024_v63, %v40387_v38  ;;  %v16281_v58 = vadd.f32 %v40390_v27, %v39024_v63  ;;  %v40402_v38 = vld [vmem:[#allocation220_spill] sm:$0xff] }
0x1543   : > { %23345 = vxpose.xlu0.b32.cont [14/16] (narrow) %v29750_v42, 8  ;;  %23369 = vxpose.xlu1.b32.cont [6/16] (narrow) %v29766_v2, 8  ;;  %v29389_v45 = vpop.f32.mrb[124].mxu0  ;;  %v40380_v42 = vld [vmem:[#allocation194_spill] sm:$0xff] }
0x1544   : > { %v39273_v22 = vadd.f32 %v29389_v45, %v16268_v14  ;;  %v22933_v13 = vpop.f32.mrb[125].mxu0  ;;  %v16272_v21 = vadd.f32 %v40380_v42, %v39024_v63 }
0x1545   : > { %v29778_v3 = vadd.f32 %v22933_v13, %v16266_v55  ;;  %v29390_v39 = vpop.f32.mrb[126].mxu0  ;;  %v40393_v55 = vld [vmem:[#allocation211_spill] sm:$0xff] }
0x1546   : > { %v39277_v25 = vadd.f32 %v29390_v39, %v16269_v54  ;;  %v22936_v35 = vpop.f32.mrb[127].mxu0  ;;  %v29809_v45 = vadd.f32 %v39024_v63, %v40393_v55  ;;  %v40394_v54 = vld [vmem:[#allocation212_spill] sm:$0xff]  ;;  %v40395_v39 = vld [vmem:[#allocation213_spill] sm:$0xff] }
0x1547   : > { %v29782_v8 = vadd.f32 %v22936_v35, %v16267_v10  ;;  %23346 = vxpose.xlu0.b32.cont [15/16] (narrow) %v39228_v29, 8  ;;  %23370 = vxpose.xlu1.b32.cont [7/16] (narrow) %v29760_v59, 8  ;;  %v16277_v59 = vadd.f32 %v40386_v7, %v39024_v63  ;;  %v29811_v13 = vadd.f32 %v40394_v54, %v39024_v63  ;;  %v40408_v54 = vld [vmem:[#allocation227_spill] sm:$0xff] }
0x1548   : > { %v29813_v35 = vadd.f32 %v39024_v63, %v40395_v39 }
0x154b   : > { %23347 = vxpose.xlu0.b32.end [16/16] (narrow) %v39232_v5, 8  ;;  %23371 = vxpose.xlu1.b32.cont [8/16] (narrow) %v29764_v18, 8  ;;  %v29393_v17 = vpop.f32.mrb[128].mxu0  ;;  %v16276_v5 = vadd.f32 %v40384_v61, %v39024_v63 }
0x154c   : > { %v29784_v50 = vadd.f32 %v29393_v17, %v16272_v21  ;;  %v22949_v20 = vpop.f32.mrb[129].mxu0 }
0x154d   : > { %v29786_v29 = vadd.f32 %v22949_v20, %v16270_v56  ;;  %v29394_v4 = vpop.f32.mrb[130].mxu0  ;;  %v40398_v20 = vld [vmem:[#allocation216_spill] sm:$0xff] }
0x154e   : > { %v29788_v40 = vadd.f32 %v29394_v4, %v16273_v23  ;;  %v22952_v52 = vpop.f32.mrb[131].mxu0  ;;  %v29817_v23 = vadd.f32 %v39024_v63, %v40397_v26  ;;  %v29819_v44 = vadd.f32 %v40398_v20, %v39024_v63  ;;  %v40399_v4 = vld [vmem:[#allocation217_spill] sm:$0xff]  ;;  %v40411_v26 = vld [vmem:[#allocation230_spill] sm:$0xff] }
0x154f   : > { %v29790_v60 = vadd.f32 %v22952_v52, %v16271_v24  ;;  %23372 = vxpose.xlu1.b32.cont [9/16] (narrow) %v29770_v37, 8  ;;  %23396 = vxpose.xlu0.b32.start [1/16] (narrow) %v29786_v29, 8  ;;  %v40391_v37 = vld [vmem:[#allocation205_spill] sm:$0xff] }
0x1550   : > { %v16279_v33 = vadd.f32 %v39024_v63, %v40391_v37 }
0x1553   : > { %23373 = vxpose.xlu1.b32.cont [10/16] (narrow) %v29774_v51, 8  ;;  %23397 = vxpose.xlu0.b32.cont [2/16] (narrow) %v29790_v60, 8  ;;  %v29397_v36 = vpop.f32.mrb[132].mxu0  ;;  %v23284_v60 = vpop.trf.xlu0 }
0x1554   : > { %v29792_v6 = vadd.f32 %v29397_v36, %v16276_v5  ;;  %v22965_v31 = vpop.f32.mrb[133].mxu0  ;;  %v40400_v36 = vld [vmem:[#allocation218_spill] sm:$0xff] }
0x1555   : > { %v29794_v32 = vadd.f32 %v22965_v31, %v16274_v48  ;;  %v29398_v18 = vpop.f32.mrb[134].mxu0  ;;  %v29823_v7 = vadd.f32 %v40400_v36, %v39024_v63 }
0x1556   : > { %v29796_v62 = vadd.f32 %v29398_v18, %v16277_v59  ;;  %v22968_v2 = vpop.f32.mrb[135].mxu0  ;;  %v40401_v59 = vld [vmem:[#allocation219_spill] sm:$0xff] }
0x1557   : > { %v29798_v53 = vadd.f32 %v22968_v2, %v16275_v49  ;;  %23374 = vxpose.xlu1.b32.cont [11/16] (narrow) %v29768_v0, 8  ;;  %23398 = vxpose.xlu0.b32.cont [3/16] (narrow) %v29784_v50, 8  ;;  %v29827_v49 = vadd.f32 %v40402_v38, %v39024_v63 }
0x155b   : > { %23375 = vxpose.xlu1.b32.cont [12/16] (narrow) %v29772_v43, 8  ;;  %23399 = vxpose.xlu0.b32.cont [4/16] (narrow) %v29788_v40, 8  ;;  %v29401_v16 = vpop.f32.mrb[136].mxu0  ;;  %v29807_v43 = vadd.f32 %v40392_v1, %v39024_v63 }
0x155c   : > { %v29800_v34 = vadd.f32 %v29401_v16, %v16280_v12  ;;  %v22981_v9 = vpop.f32.mrb[137].mxu0  ;;  %v40404_v16 = vld [vmem:[#allocation222_spill] sm:$0xff] }
0x155d   : > { %v29802_v19 = vadd.f32 %v22981_v9, %v16278_v47  ;;  %v29402_v0 = vpop.f32.mrb[138].mxu0  ;;  %v29831_v27 = vadd.f32 %v40404_v16, %v39024_v63 }
0x155e   : > { %v29804_v51 = vadd.f32 %v29402_v0, %v16281_v58  ;;  %v22984_v57 = vpop.f32.mrb[139].mxu0  ;;  %v40405_v58 = vld [vmem:[#allocation223_spill] sm:$0xff] }
0x155f   : > { %v29806_v14 = vadd.f32 %v22984_v57, %v16279_v33  ;;  %23376 = vxpose.xlu1.b32.cont [13/16] (narrow) %v29778_v3, 8  ;;  %23400 = vxpose.xlu0.b32.cont [5/16] (narrow) %v29794_v32, 8  ;;  %v29833_v9 = vadd.f32 %v39024_v63, %v40405_v58  ;;  %v40406_v33 = vld [vmem:[#allocation224_spill] sm:$0xff] }
0x1563   : > { %23377 = vxpose.xlu1.b32.cont [14/16] (narrow) %v29782_v8, 8  ;;  %23401 = vxpose.xlu0.b32.cont [6/16] (narrow) %v29798_v53, 8  ;;  %v29405_v30 = vpop.f32.mrb[140].mxu0  ;;  %v40396_v8 = vld [vmem:[#allocation214_spill] sm:$0xff] }
0x1564   : > { %v39311_v28 = vadd.f32 %v29807_v43, %v29405_v30  ;;  %v22997_v10 = vpop.f32.mrb[141].mxu0  ;;  %v29815_v17 = vadd.f32 %v40396_v8, %v39024_v63 }
0x1565   : > { %v29810_v3 = vadd.f32 %v29809_v45, %v22997_v10  ;;  %v29406_v42 = vpop.f32.mrb[142].mxu0 }
0x1566   : > { %v39315_v21 = vadd.f32 %v29811_v13, %v29406_v42  ;;  %v23000_v41 = vpop.f32.mrb[143].mxu0  ;;  %v40409_v13 = vld [vmem:[#allocation228_spill] sm:$0xff]  ;;  %v40410_v42 = vld [vmem:[#allocation229_spill] sm:$0xff] }
0x1567   : > { %v29814_v56 = vadd.f32 %v29813_v35, %v23000_v41  ;;  %23378 = vxpose.xlu1.b32.cont [15/16] (narrow) %v39273_v22, 8  ;;  %23402 = vxpose.xlu0.b32.cont [7/16] (narrow) %v29792_v6, 8  ;;  %v29821_v22 = vadd.f32 %v39024_v63, %v40399_v4  ;;  %v29825_v6 = vadd.f32 %v39024_v63, %v40401_v59  ;;  %v32180_v35 = vld [vmem:[%s39366_s6] ss:$0 sm:$0xff] }
0x1568   : > { %v29841_v10 = vadd.f32 %v39024_v63, %v40409_v13  ;;  %v29843_v41 = vadd.f32 %v32180_v35, %v40410_v42 }
0x156b   : > { %23379 = vxpose.xlu1.b32.end [16/16] (narrow) %v39277_v25, 8  ;;  %23403 = vxpose.xlu0.b32.cont [8/16] (narrow) %v29796_v62, 8  ;;  %v29409_v50 = vpop.f32.mrb[144].mxu0  ;;  %v40403_v62 = vld [vmem:[#allocation221_spill] sm:$0xff] }
0x156c   : > { %v29816_v24 = vadd.f32 %v29815_v17, %v29409_v50  ;;  %v23013_v29 = vpop.f32.mrb[145].mxu0  ;;  %v29829_v2 = vadd.f32 %v39024_v63, %v40403_v62 }
0x156d   : > { %v29818_v40 = vadd.f32 %v29817_v23, %v23013_v29  ;;  %v29410_v52 = vpop.f32.mrb[146].mxu0 }
0x156e   : > { %v29820_v61 = vadd.f32 %v29819_v44, %v29410_v52  ;;  %v23016_v5 = vpop.f32.mrb[147].mxu0 }
0x156f   : > { %v29822_v46 = vadd.f32 %v29821_v22, %v23016_v5  ;;  %23404 = vxpose.xlu0.b32.cont [9/16] (narrow) %v29802_v19, 8  ;;  %23428 = vxpose.xlu1.b32.start [1/16] (narrow) %v29818_v40, 8  ;;  %v23316_v25 = vpop.trf.xlu1  ;;  %v29835_v19 = vadd.f32 %v40406_v33, %v39024_v63 }
0x1570   : > { %v23469_v48 = vcombine.low %v23284_v60, %v23316_v25 }
0x1572   : > { %23477 = vst [vmem:[%s39248_s16 + $0x8] sm:$0x77] %v23469_v48 }
0x1573   : > { %23405 = vxpose.xlu0.b32.cont [10/16] (narrow) %v29806_v14, 8  ;;  %23429 = vxpose.xlu1.b32.cont [2/16] (narrow) %v29822_v46, 8  ;;  %v29413_v31 = vpop.f32.mrb[148].mxu0  ;;  %v40407_v14 = vld [vmem:[#allocation225_spill] sm:$0xff] }
0x1574   : > { %v29824_v32 = vadd.f32 %v29823_v7, %v29413_v31  ;;  %v23029_v18 = vpop.f32.mrb[149].mxu0  ;;  %v29837_v1 = vadd.f32 %v39024_v63, %v40407_v14 }
0x1575   : > { %v29826_v53 = vadd.f32 %v29825_v6, %v23029_v18  ;;  %v29414_v15 = vpop.f32.mrb[150].mxu0 }
0x1576   : > { %v29828_v12 = vadd.f32 %v29827_v49, %v29414_v15  ;;  %v23032_v11 = vpop.f32.mrb[151].mxu0 }
0x1577   : > { %v29830_v47 = vadd.f32 %v29829_v2, %v23032_v11  ;;  %23406 = vxpose.xlu0.b32.cont [11/16] (narrow) %v29800_v34, 8  ;;  %23430 = vxpose.xlu1.b32.cont [3/16] (narrow) %v29816_v24, 8 }
0x157b   : > { %23407 = vxpose.xlu0.b32.cont [12/16] (narrow) %v29804_v51, 8  ;;  %23431 = vxpose.xlu1.b32.cont [4/16] (narrow) %v29820_v61, 8  ;;  %v29417_v37 = vpop.f32.mrb[152].mxu0  ;;  %v29839_v51 = vadd.f32 %v40408_v54, %v39024_v63 }
0x157c   : > { %v29832_v0 = vadd.f32 %v29831_v27, %v29417_v37  ;;  %v23045_v57 = vpop.f32.mrb[153].mxu0 }
0x157d   : > { %v29834_v43 = vadd.f32 %v29833_v9, %v23045_v57  ;;  %v29418_v34 = vpop.f32.mrb[154].mxu0 }
0x157e   : > { %v29836_v55 = vadd.f32 %v29835_v19, %v29418_v34  ;;  %v23048_v45 = vpop.f32.mrb[155].mxu0 }
0x157f   : > { %v29838_v30 = vadd.f32 %v29837_v1, %v23048_v45  ;;  %23408 = vxpose.xlu0.b32.cont [13/16] (narrow) %v29810_v3, 8  ;;  %23432 = vxpose.xlu1.b32.cont [5/16] (narrow) %v29826_v53, 8  ;;  %v29845_v3 = vadd.f32 %v32180_v35, %v40411_v26 }
0x1583   : > { %23409 = vxpose.xlu0.b32.cont [14/16] (narrow) %v29814_v56, 8  ;;  %23433 = vxpose.xlu1.b32.cont [6/16] (narrow) %v29830_v47, 8  ;;  %v29421_v39 = vpop.f32.mrb[156].mxu0 }
0x1584   : > { %v29840_v8 = vadd.f32 %v29839_v51, %v29421_v39  ;;  %v23061_v17 = vpop.f32.mrb[157].mxu0 }
0x1585   : > { %v29842_v23 = vadd.f32 %v29841_v10, %v23061_v17  ;;  %v29422_v50 = vpop.f32.mrb[158].mxu0 }
0x1586   : > { %v29844_v20 = vadd.f32 %v29843_v41, %v29422_v50  ;;  %v23064_v44 = vpop.f32.mrb[159].mxu0 }
0x1587   : > { %v29846_v24 = vadd.f32 %v29845_v3, %v23064_v44  ;;  %23410 = vxpose.xlu0.b32.cont [15/16] (narrow) %v39311_v28, 8  ;;  %23434 = vxpose.xlu1.b32.cont [7/16] (narrow) %v29824_v32, 8 }
0x158b   : > { %23411 = vxpose.xlu0.b32.end [16/16] (narrow) %v39315_v21, 8  ;;  %23435 = vxpose.xlu1.b32.cont [8/16] (narrow) %v29828_v12, 8 }
0x158f   : > { %23436 = vxpose.xlu1.b32.cont [9/16] (narrow) %v29834_v43, 8  ;;  %v23348_v63 = vpop.trf.xlu0 }
0x1593   : > { %23437 = vxpose.xlu1.b32.cont [10/16] (narrow) %v29838_v30, 8 }
0x1597   : > { %23438 = vxpose.xlu1.b32.cont [11/16] (narrow) %v29832_v0, 8 }
0x159b   : > { %23439 = vxpose.xlu1.b32.cont [12/16] (narrow) %v29836_v55, 8 }
0x159f   : > { %23440 = vxpose.xlu1.b32.cont [13/16] (narrow) %v29842_v23, 8 }
0x15a3   : > { %23441 = vxpose.xlu1.b32.cont [14/16] (narrow) %v29846_v24, 8 }
0x15a7   : > { %23442 = vxpose.xlu1.b32.cont [15/16] (narrow) %v29840_v8, 8 }
0x15ab   : > { %23443 = vxpose.xlu1.b32.end [16/16] (narrow) %v29844_v20, 8 }
0x15af   : > { %v23380_v56 = vpop.trf.xlu1 }
0x15b0   : > { %v23470_v29 = vcombine.low %v23348_v63, %v23380_v56 }
0x15b2   : > { %23478 = vst [vmem:[%s39248_s16 + $0x10] sm:$0x77] %v23470_v29 }
0x15cf   : > { %v23412_v4 = vpop.trf.xlu0 }
0x15ef   : > { %v23444_v22 = vpop.trf.xlu1 }
0x15f0   : > { %v23471_v28 = vcombine.low %v23412_v4, %v23444_v22 }
0x15f2   : > { %23479 = vst [vmem:[%s39248_s16 + $0x18] sm:$0x77] %v23471_v28 }
0x15f3 PF: > { %s17_s24 = sadd.s32 1, %s32187_s24  }
0x15f4   : > { %p14_p4 = scmp.ge.s32.totalorder %s17_s24, 4  }
0x15f6   :  { %16 = sbr.rel (!%p14_p4) target bundleno = 1 (0x1), region = 102 }

</bundles_post_ra>
